<compile_context>
chip_gen: v7x
topology: tpu7x:2x2x1
jax: 0.10.0
libtpu: 0.0.40
codegen_flags: <defaults>
</compile_context>

<pallas_src>
import functools

import jax
import jax.numpy as jnp
from jax import lax
from jax.experimental import pallas as pl
from jax.experimental.pallas import tpu as pltpu

HIDDEN = 31
INPUT_SIZE = 36
NUM_CLASSES = 7
NUM_LAYERS = 2

LANES = 128               # one gate slot == one 128-lane vreg row
GATES = 3 * LANES         # r / z / n, each in its own lane slot

# Plane indices inside the packed (NUM_W, 128, 384) weight slab.
(W0F_IH, W0B_IH, W0F_HH, W0B_HH,
 W1F_IHF, W1F_IHB, W1F_HH,
 W1B_IHF, W1B_IHB,
 FCW_F, FCW_B) = range(11)
NUM_W = 11

# Rows of the (16, 384) bias slab.
B0F_I, B0B_I, B1F_I, B1B_I = 0, 1, 2, 3
B0F_HN, B0B_HN, B1F_HN, B1B_HN = 4, 5, 6, 7
B_FC = 8
NUM_B_ROWS = 16


# ----------------------------------------------------------------------------
# GRU cell (values, not refs). Gates are lane-aligned: gi/gh are (BP, 3*128).
#   gi = x_t @ W_ih + (b_ih + [b_hh_r, b_hh_z, 0]);  gh = h @ W_hh (no bias);
#   n-gate uses r * (gh_n + b_hn)  (PyTorch semantics).
# ----------------------------------------------------------------------------
def _gru_cell(gi, gh, h_prev, b_hn):
    r = jax.nn.sigmoid(gi[:, 0:LANES] + gh[:, 0:LANES])
    z = jax.nn.sigmoid(gi[:, LANES:2 * LANES] + gh[:, LANES:2 * LANES])
    n = jnp.tanh(gi[:, 2 * LANES:] + r * (gh[:, 2 * LANES:] + b_hn))
    return n + z * (h_prev - n)           # == (1 - z) * n + z * h_prev


# ----------------------------------------------------------------------------
# Fully fused kernel: layer0 (fwd+bwd, with layer-1 projection folded in)
#                     -> layer1 (fwd full, bwd 1 step) -> FC
# ----------------------------------------------------------------------------
def _rnn_fused_kernel(x_ref, w_ref, b_ref, out_ref,
                      gi0f_ref, gi0b_ref, gi1f_ref, *, T, BP):
    f32 = jnp.float32

    # ---------------- Layer 0: hoisted input projections -> scratch --------
    x = x_ref[...]                                            # (T*BP, 128)
    gi0f_ref[...] = (jnp.dot(x, w_ref[W0F_IH], preferred_element_type=f32)
                     + b_ref[B0F_I:B0F_I + 1, :])
    gi0b_ref[...] = (jnp.dot(x, w_ref[W0B_IH], preferred_element_type=f32)
                     + b_ref[B0B_I:B0B_I + 1, :])
    # Layer-1 fwd gate inputs start as the bias; the projection of the
    # layer-0 outputs is accumulated inside the layer-0 loop below.
    gi1f_ref[...] = jnp.broadcast_to(b_ref[B1F_I:B1F_I + 1, :], (T * BP, GATES))

    b0f_hn = jnp.broadcast_to(b_ref[B0F_HN:B0F_HN + 1, 0:LANES], (BP, LANES))
    b0b_hn = jnp.broadcast_to(b_ref[B0B_HN:B0B_HN + 1, 0:LANES], (BP, LANES))

    hf = jnp.zeros((BP, LANES), f32)
    hb = jnp.zeros((BP, LANES), f32)
    gi1b = None
    # Fully unrolled (T is a small static constant); the fwd and reversed-time
    # bwd chains are interleaved so the two independent serial chains overlap.
    for t in range(T):
        tb = T - 1 - t                                        # reversed time index
        rf = slice(t * BP, (t + 1) * BP)                      # aligned (8, 384) tiles
        rb = slice(tb * BP, (tb + 1) * BP)
        ghf = jnp.dot(hf, w_ref[W0F_HH], preferred_element_type=f32)
        ghb = jnp.dot(hb, w_ref[W0B_HH], preferred_element_type=f32)
        hf = _gru_cell(gi0f_ref[rf, :], ghf, hf, b0f_hn)
        hb = _gru_cell(gi0b_ref[rb, :], ghb, hb, b0b_hn)
        # Fold the layer-1 fwd input projection under the layer-0 chain
        # (MXU is idle between the tiny recurrent dots).
        gi1f_ref[rf, :] = gi1f_ref[rf, :] + jnp.dot(
            hf, w_ref[W1F_IHF], preferred_element_type=f32)
        gi1f_ref[rb, :] = gi1f_ref[rb, :] + jnp.dot(
            hb, w_ref[W1F_IHB], preferred_element_type=f32)
        if t == 0:
            # Layer-0 bwd output at time T-1 (its first step) feeds layer-1 bwd.
            gi1b = (jnp.dot(hb, w_ref[W1B_IHB], preferred_element_type=f32)
                    + b_ref[B1B_I:B1B_I + 1, :])
    # Layer-0 fwd output at time T-1 is the final hf.
    gi1b = gi1b + jnp.dot(hf, w_ref[W1B_IHF], preferred_element_type=f32)

    # ---------------- Layer 1 backward: single step from h0 = 0 ------------
    # Only its hidden state at t = T-1 feeds out[:, -1, :]; with h0 = 0 the
    # recurrent term vanishes (W1B_HH never needed).
    # NOTE: valid only because downstream uses the last timestep exclusively.
    b1b_hn = jnp.broadcast_to(b_ref[B1B_HN:B1B_HN + 1, 0:LANES], (BP, LANES))
    r1b = jax.nn.sigmoid(gi1b[:, 0:LANES])
    z1b = jax.nn.sigmoid(gi1b[:, LANES:2 * LANES])
    n1b = jnp.tanh(gi1b[:, 2 * LANES:] + r1b * b1b_hn)
    h1b = n1b - z1b * n1b                                     # (1 - z) * n

    # ---------------- Layer 1 forward recurrence ----------------------------
    b1f_hn = jnp.broadcast_to(b_ref[B1F_HN:B1F_HN + 1, 0:LANES], (BP, LANES))
    h1f = jnp.zeros((BP, LANES), f32)
    for t in range(T):
        rf = slice(t * BP, (t + 1) * BP)
        gh = jnp.dot(h1f, w_ref[W1F_HH], preferred_element_type=f32)
        h1f = _gru_cell(gi1f_ref[rf, :], gh, h1f, b1f_hn)

    # ---------------- FC epilogue (fused, lane-aligned) ---------------------
    res = (jnp.dot(h1f, w_ref[FCW_F], preferred_element_type=f32)
           + jnp.dot(h1b, w_ref[FCW_B], preferred_element_type=f32)
           + b_ref[B_FC:B_FC + 1, :])
    out_ref[...] = res[:, 0:LANES]     # classes live in lanes [0, NUM_CLASSES)


# ----------------------------------------------------------------------------
# Weight prepacking (done once, outside the per-call forward): two slabs.
# ----------------------------------------------------------------------------
def prepack_params(params):
    H = HIDDEN
    f32 = jnp.float32

    def pad_w(w_t):
        """(K, 3H), gate order [r,z,n] -> (128, 384): each gate in its own
        128-lane slot, K zero-padded to 128 rows."""
        K = w_t.shape[0]
        out = jnp.zeros((LANES, GATES), f32)
        for g in range(3):
            out = out.at[:K, g * LANES:g * LANES + H].set(w_t[:, g * H:(g + 1) * H])
        return out

    def pad_b(b):
        out = jnp.zeros((GATES,), f32)
        for g in range(3):
            out = out.at[g * LANES:g * LANES + H].set(b[g * H:(g + 1) * H])
        return out

    def dir_parts(w_ih, w_hh, b_ih, b_hh):
        # Fold b_hh_{r,z} into the input-side bias; keep b_hh_n separate
        # (it sits inside r * (h @ W_hn + b_hn), PyTorch semantics).
        b_i = pad_b(jnp.concatenate([b_ih[:2 * H] + b_hh[:2 * H], b_ih[2 * H:]]))
        b_hn = jnp.zeros((LANES,), f32).at[:H].set(b_hh[2 * H:])
        return w_ih.T, w_hh.T, b_i, b_hn

    w0f_ih_t, w0f_hh_t, b0f_i, b0f_hn = dir_parts(*params["l0_fwd"])
    w0b_ih_t, w0b_hh_t, b0b_i, b0b_hn = dir_parts(*params["l0_bwd"])
    w1f_ih_t, w1f_hh_t, b1f_i, b1f_hn = dir_parts(*params["l1_fwd"])
    w1b_ih_t, _unused_w1b_hh, b1b_i, b1b_hn = dir_parts(*params["l1_bwd"])
    fc_w, fc_b = params["fc"]
    fcw_t = fc_w.T                                            # (2H, C)

    def pad_fc(w_half):                                       # (H, C) -> (128, 384)
        return jnp.zeros((LANES, GATES), f32).at[:H, :NUM_CLASSES].set(w_half)

    planes = [None] * NUM_W
    planes[W0F_IH] = pad_w(w0f_ih_t)
    planes[W0B_IH] = pad_w(w0b_ih_t)
    planes[W0F_HH] = pad_w(w0f_hh_t)
    planes[W0B_HH] = pad_w(w0b_hh_t)
    planes[W1F_IHF] = pad_w(w1f_ih_t[:H])      # fwd-half rows of layer-1 W_ih
    planes[W1F_IHB] = pad_w(w1f_ih_t[H:])      # bwd-half rows
    planes[W1F_HH] = pad_w(w1f_hh_t)
    planes[W1B_IHF] = pad_w(w1b_ih_t[:H])
    planes[W1B_IHB] = pad_w(w1b_ih_t[H:])
    planes[FCW_F] = pad_fc(fcw_t[:H])
    planes[FCW_B] = pad_fc(fcw_t[H:])
    wslab = jnp.stack(planes, axis=0)                         # (11, 128, 384)

    bslab = jnp.zeros((NUM_B_ROWS, GATES), f32)
    bslab = bslab.at[B0F_I].set(b0f_i).at[B0B_I].set(b0b_i)
    bslab = bslab.at[B1F_I].set(b1f_i).at[B1B_I].set(b1b_i)
    bslab = bslab.at[B0F_HN, :LANES].set(b0f_hn).at[B0B_HN, :LANES].set(b0b_hn)
    bslab = bslab.at[B1F_HN, :LANES].set(b1f_hn).at[B1B_HN, :LANES].set(b1b_hn)
    bslab = bslab.at[B_FC, :NUM_CLASSES].set(fc_b)
    return wslab, bslab


# ----------------------------------------------------------------------------
# Public forward (x is batch_first (B, T, D_in), like the PyTorch module)
# ----------------------------------------------------------------------------
def rnn_forward(x, wslab, bslab):
    B, T, d_in = x.shape
    assert d_in == INPUT_SIZE
    BP = max(8, -(-B // 8) * 8)            # batch rows padded to sublane multiple

    # Time-major layout, batch padded to BP sublane rows, features zero-padded
    # to 128 lanes.  Tiny (<= 32 KiB) and fused into the same jit region.
    x_t = jnp.transpose(x, (1, 0, 2))
    x_p = jnp.zeros((T, BP, LANES), jnp.float32).at[:, :B, :d_in].set(x_t)
    x_p = x_p.reshape(T * BP, LANES)

    kernel = functools.partial(_rnn_fused_kernel, T=T, BP=BP)
    vmem = pl.BlockSpec(memory_space=pltpu.MemorySpace.VMEM)

    out = pl.pallas_call(
        kernel,
        out_shape=jax.ShapeDtypeStruct((BP, LANES), jnp.float32),
        in_specs=[vmem, vmem, vmem],
        out_specs=vmem,
        scratch_shapes=[
            pltpu.VMEM((T * BP, GATES), jnp.float32),   # layer-0 fwd gate inputs
            pltpu.VMEM((T * BP, GATES), jnp.float32),   # layer-0 bwd gate inputs
            pltpu.VMEM((T * BP, GATES), jnp.float32),   # layer-1 fwd gate inputs
        ],
        compiler_params=pltpu.CompilerParams(vmem_limit_bytes=16 * 1024 * 1024),
    )(x_p, wslab, bslab)
    # TODO(synk): dropout(p=0.05) between GRU layers applies only in training
    # mode; this implements the eval-mode forward (no-op), matching the spec.
    return out[:B, :NUM_CLASSES]


# ----------------------------------------------------------------------------
# Deterministic parameter init (matches PyTorch shapes; uniform(-k, k))
# ----------------------------------------------------------------------------
def init_params(key):
    params = {}
    k_gru = 1.0 / jnp.sqrt(HIDDEN)
    keys = jax.random.split(key, NUM_LAYERS * 2 * 4 + 2)
    idx = 0
    for layer in range(NUM_LAYERS):
        d_in = INPUT_SIZE if layer == 0 else 2 * HIDDEN
        for direction in ("fwd", "bwd"):
            w_ih = jax.random.uniform(keys[idx], (3 * HIDDEN, d_in),
                                      minval=-k_gru, maxval=k_gru); idx += 1
            w_hh = jax.random.uniform(keys[idx], (3 * HIDDEN, HIDDEN),
                                      minval=-k_gru, maxval=k_gru); idx += 1
            b_ih = jax.random.uniform(keys[idx], (3 * HIDDEN,),
                                      minval=-k_gru, maxval=k_gru); idx += 1
            b_hh = jax.random.uniform(keys[idx], (3 * HIDDEN,),
                                      minval=-k_gru, maxval=k_gru); idx += 1
            params[f"l{layer}_{direction}"] = (w_ih, w_hh, b_ih, b_hh)
    k_fc = 1.0 / jnp.sqrt(2 * HIDDEN)
    fc_w = jax.random.uniform(keys[idx], (NUM_CLASSES, 2 * HIDDEN),
                              minval=-k_fc, maxval=k_fc); idx += 1
    fc_b = jax.random.uniform(keys[idx], (NUM_CLASSES,),
                              minval=-k_fc, maxval=k_fc)
    params["fc"] = (fc_w, fc_b)
    return params


# ----------------------------------------------------------------------------
# Pure-JAX reference (same semantics as torch.nn.GRU, eval mode)
# ----------------------------------------------------------------------------
def _ref_gru_dir(x_tbd, w_ih, w_hh, b_ih, b_hh):
    T, B, _ = x_tbd.shape
    H = w_hh.shape[1]

    def cell(h, x_t):
        gi = x_t @ w_ih.T + b_ih
        gh = h @ w_hh.T + b_hh
        r = jax.nn.sigmoid(gi[:, :H] + gh[:, :H])
        z = jax.nn.sigmoid(gi[:, H:2 * H] + gh[:, H:2 * H])
        n = jnp.tanh(gi[:, 2 * H:] + r * gh[:, 2 * H:])
        h_new = (1.0 - z) * n + z * h
        return h_new, h_new

    h0 = jnp.zeros((B, H), jnp.float32)
    _, outs = lax.scan(cell, h0, x_tbd)
    return outs


def rnn_forward_ref(x, params):
    h = jnp.transpose(x, (1, 0, 2))
    for layer in range(NUM_LAYERS):
        f = _ref_gru_dir(h, *params[f"l{layer}_fwd"])
        b = jnp.flip(_ref_gru_dir(jnp.flip(h, axis=0), *params[f"l{layer}_bwd"]), axis=0)
        h = jnp.concatenate([f, b], axis=-1)
    last = h[-1]
    fc_w, fc_b = params["fc"]
    return last @ fc_w.T + fc_b


# ----------------------------------------------------------------------------
if __name__ == "__main__":
    key = jax.random.PRNGKey(0)
    k_param, k_x = jax.random.split(key)

    params = init_params(k_param)
    wslab, bslab = prepack_params(params)

    B, T = 2, 8
    x = jax.random.normal(k_x, (B, T, INPUT_SIZE), dtype=jnp.float32)

    fwd = jax.jit(rnn_forward)
    out = jax.block_until_ready(fwd(x, wslab, bslab))
    assert out.shape == (B, NUM_CLASSES), out.shape

    ref = jax.block_until_ready(rnn_forward_ref(x, params))
    assert jnp.allclose(out, ref, atol=2e-3, rtol=2e-3), (
        f"mismatch: max abs err {jnp.max(jnp.abs(out - ref))}")

    print("KERNEL_OK")
</pallas_src>

<mosaic_0001>
module attributes {stable_mosaic.version = 11 : i64} {
  func.func @_rnn_fused_kernel(%arg0: memref<64x128xf32, #tpu.memory_space<vmem>>, %arg1: memref<11x128x384xf32, #tpu.memory_space<vmem>>, %arg2: memref<16x384xf32, #tpu.memory_space<vmem>>, %arg3: memref<8x128xf32, #tpu.memory_space<vmem>>, %arg4: memref<64x384xf32, #tpu.memory_space<vmem>>, %arg5: memref<64x384xf32, #tpu.memory_space<vmem>>, %arg6: memref<64x384xf32, #tpu.memory_space<vmem>>) attributes {dimension_semantics = [], scalar_prefetch = 0 : i64, scratch_operands = 3 : i64, tpu.core_type = #tpu.core_type<tc>} {
    %c0 = arith.constant 0 : index
    %c0_0 = arith.constant 0 : index
    %0 = vector.load %arg0[%c0, %c0_0] : memref<64x128xf32, #tpu.memory_space<vmem>>, vector<64x128xf32>
    %c0_1 = arith.constant 0 : index
    %c0_2 = arith.constant 0 : index
    %c0_3 = arith.constant 0 : index
    %1 = vector.load %arg1[%c0_1, %c0_2, %c0_3] : memref<11x128x384xf32, #tpu.memory_space<vmem>>, vector<1x128x384xf32>
    %2 = vector.shape_cast %1 : vector<1x128x384xf32> to vector<128x384xf32>
    %cst = arith.constant dense<0.000000e+00> : vector<64x384xf32>
    %3 = tpu.matmul %0, %2, %cst {dimension_numbers = #tpu.dot_dimension_numbers<[1], [0], [0], [1], [0, 0, 1, 1], [], []>} : vector<64x128xf32>, vector<128x384xf32>, vector<64x384xf32> -> vector<64x384xf32>
    %c0_4 = arith.constant 0 : index
    %c0_5 = arith.constant 0 : index
    %4 = vector.load %arg2[%c0_4, %c0_5] : memref<16x384xf32, #tpu.memory_space<vmem>>, vector<1x384xf32>
    %5 = vector.broadcast %4 : vector<1x384xf32> to vector<64x384xf32>
    %6 = arith.addf %3, %5 : vector<64x384xf32>
    %c0_6 = arith.constant 0 : index
    %c0_7 = arith.constant 0 : index
    %7 = vector.load %arg4[%c0_6, %c0_7] : memref<64x384xf32, #tpu.memory_space<vmem>>, vector<64x384xf32>
    tpu.vector_store %arg4[%c0_6, %c0_7], %6 {strides = array<i32>} : memref<64x384xf32, #tpu.memory_space<vmem>>, vector<64x384xf32>,
    %c1 = arith.constant 1 : index
    %c0_8 = arith.constant 0 : index
    %c0_9 = arith.constant 0 : index
    %8 = vector.load %arg1[%c1, %c0_8, %c0_9] : memref<11x128x384xf32, #tpu.memory_space<vmem>>, vector<1x128x384xf32>
    %9 = vector.shape_cast %8 : vector<1x128x384xf32> to vector<128x384xf32>
    %cst_10 = arith.constant dense<0.000000e+00> : vector<64x384xf32>
    %10 = tpu.matmul %0, %9, %cst_10 {dimension_numbers = #tpu.dot_dimension_numbers<[1], [0], [0], [1], [0, 0, 1, 1], [], []>} : vector<64x128xf32>, vector<128x384xf32>, vector<64x384xf32> -> vector<64x384xf32>
    %c1_11 = arith.constant 1 : index
    %c0_12 = arith.constant 0 : index
    %11 = vector.load %arg2[%c1_11, %c0_12] : memref<16x384xf32, #tpu.memory_space<vmem>>, vector<1x384xf32>
    %12 = vector.broadcast %11 : vector<1x384xf32> to vector<64x384xf32>
    %13 = arith.addf %10, %12 : vector<64x384xf32>
    %c0_13 = arith.constant 0 : index
    %c0_14 = arith.constant 0 : index
    %14 = vector.load %arg5[%c0_13, %c0_14] : memref<64x384xf32, #tpu.memory_space<vmem>>, vector<64x384xf32>
    tpu.vector_store %arg5[%c0_13, %c0_14], %13 {strides = array<i32>} : memref<64x384xf32, #tpu.memory_space<vmem>>, vector<64x384xf32>,
    %c2 = arith.constant 2 : index
    %c0_15 = arith.constant 0 : index
    %15 = vector.load %arg2[%c2, %c0_15] : memref<16x384xf32, #tpu.memory_space<vmem>>, vector<1x384xf32>
    %16 = vector.shape_cast %15 : vector<1x384xf32> to vector<1x384xf32>
    %17 = vector.broadcast %16 : vector<1x384xf32> to vector<64x384xf32>
    %c0_16 = arith.constant 0 : index
    %c0_17 = arith.constant 0 : index
    %18 = vector.load %arg6[%c0_16, %c0_17] : memref<64x384xf32, #tpu.memory_space<vmem>>, vector<64x384xf32>
    tpu.vector_store %arg6[%c0_16, %c0_17], %17 {strides = array<i32>} : memref<64x384xf32, #tpu.memory_space<vmem>>, vector<64x384xf32>,
    %c4 = arith.constant 4 : index
    %c0_18 = arith.constant 0 : index
    %19 = vector.load %arg2[%c4, %c0_18] : memref<16x384xf32, #tpu.memory_space<vmem>>, vector<1x128xf32>
    %20 = vector.shape_cast %19 : vector<1x128xf32> to vector<1x128xf32>
    %21 = vector.broadcast %20 : vector<1x128xf32> to vector<8x128xf32>
    %c5 = arith.constant 5 : index
    %c0_19 = arith.constant 0 : index
    %22 = vector.load %arg2[%c5, %c0_19] : memref<16x384xf32, #tpu.memory_space<vmem>>, vector<1x128xf32>
    %23 = vector.shape_cast %22 : vector<1x128xf32> to vector<1x128xf32>
    %24 = vector.broadcast %23 : vector<1x128xf32> to vector<8x128xf32>
    %cst_20 = arith.constant 0.000000e+00 : f32
    %25 = vector.broadcast %cst_20 : f32 to vector<8x128xf32>
    %cst_21 = arith.constant 0.000000e+00 : f32
    %26 = vector.broadcast %cst_21 : f32 to vector<8x128xf32>
    %c2_22 = arith.constant 2 : index
    %c0_23 = arith.constant 0 : index
    %c0_24 = arith.constant 0 : index
    %27 = vector.load %arg1[%c2_22, %c0_23, %c0_24] : memref<11x128x384xf32, #tpu.memory_space<vmem>>, vector<1x128x384xf32>
    %28 = vector.shape_cast %27 : vector<1x128x384xf32> to vector<128x384xf32>
    %cst_25 = arith.constant dense<0.000000e+00> : vector<8x384xf32>
    %29 = tpu.matmul %25, %28, %cst_25 {dimension_numbers = #tpu.dot_dimension_numbers<[1], [0], [0], [1], [0, 0, 1, 1], [], []>} : vector<8x128xf32>, vector<128x384xf32>, vector<8x384xf32> -> vector<8x384xf32>
    %c3 = arith.constant 3 : index
    %c0_26 = arith.constant 0 : index
    %c0_27 = arith.constant 0 : index
    %30 = vector.load %arg1[%c3, %c0_26, %c0_27] : memref<11x128x384xf32, #tpu.memory_space<vmem>>, vector<1x128x384xf32>
    %31 = vector.shape_cast %30 : vector<1x128x384xf32> to vector<128x384xf32>
    %cst_28 = arith.constant dense<0.000000e+00> : vector<8x384xf32>
    %32 = tpu.matmul %26, %31, %cst_28 {dimension_numbers = #tpu.dot_dimension_numbers<[1], [0], [0], [1], [0, 0, 1, 1], [], []>} : vector<8x128xf32>, vector<128x384xf32>, vector<8x384xf32> -> vector<8x384xf32>
    %c0_29 = arith.constant 0 : index
    %c0_30 = arith.constant 0 : index
    %33 = vector.load %arg4[%c0_29, %c0_30] : memref<64x384xf32, #tpu.memory_space<vmem>>, vector<8x384xf32>
    %34 = vector.extract_strided_slice %33 {offsets = [0, 0], sizes = [8, 128], strides = [1, 1]} : vector<8x384xf32> to vector<8x128xf32>
    %35 = vector.extract_strided_slice %29 {offsets = [0, 0], sizes = [8, 128], strides = [1, 1]} : vector<8x384xf32> to vector<8x128xf32>
    %36 = arith.addf %34, %35 : vector<8x128xf32>
    %37 = arith.negf %36 : vector<8x128xf32>
    %38 = math.exp %37 : vector<8x128xf32>
    %cst_31 = arith.constant 1.000000e+00 : f32
    %39 = vector.broadcast %cst_31 : f32 to vector<8x128xf32>
    %40 = arith.addf %39, %38 : vector<8x128xf32>
    %41 = arith.divf %39, %40 : vector<8x128xf32>
    %42 = vector.extract_strided_slice %33 {offsets = [0, 128], sizes = [8, 128], strides = [1, 1]} : vector<8x384xf32> to vector<8x128xf32>
    %43 = vector.extract_strided_slice %29 {offsets = [0, 128], sizes = [8, 128], strides = [1, 1]} : vector<8x384xf32> to vector<8x128xf32>
    %44 = arith.addf %42, %43 : vector<8x128xf32>
    %45 = arith.negf %44 : vector<8x128xf32>
    %46 = math.exp %45 : vector<8x128xf32>
    %cst_32 = arith.constant 1.000000e+00 : f32
    %47 = vector.broadcast %cst_32 : f32 to vector<8x128xf32>
    %48 = arith.addf %47, %46 : vector<8x128xf32>
    %49 = arith.divf %47, %48 : vector<8x128xf32>
    %50 = vector.extract_strided_slice %33 {offsets = [0, 256], sizes = [8, 128], strides = [1, 1]} : vector<8x384xf32> to vector<8x128xf32>
    %51 = vector.extract_strided_slice %29 {offsets = [0, 256], sizes = [8, 128], strides = [1, 1]} : vector<8x384xf32> to vector<8x128xf32>
    %52 = arith.addf %51, %21 : vector<8x128xf32>
    %53 = arith.mulf %41, %52 : vector<8x128xf32>
    %54 = arith.addf %50, %53 : vector<8x128xf32>
    %55 = math.tanh %54 : vector<8x128xf32>
    %56 = arith.subf %25, %55 : vector<8x128xf32>
    %57 = arith.mulf %49, %56 : vector<8x128xf32>
    %58 = arith.addf %55, %57 : vector<8x128xf32>
    %c56 = arith.constant 56 : index
    %c0_33 = arith.constant 0 : index
    %59 = vector.load %arg5[%c56, %c0_33] : memref<64x384xf32, #tpu.memory_space<vmem>>, vector<8x384xf32>
    %60 = vector.extract_strided_slice %59 {offsets = [0, 0], sizes = [8, 128], strides = [1, 1]} : vector<8x384xf32> to vector<8x128xf32>
    %61 = vector.extract_strided_slice %32 {offsets = [0, 0], sizes = [8, 128], strides = [1, 1]} : vector<8x384xf32> to vector<8x128xf32>
    %62 = arith.addf %60, %61 : vector<8x128xf32>
    %63 = arith.negf %62 : vector<8x128xf32>
    %64 = math.exp %63 : vector<8x128xf32>
    %cst_34 = arith.constant 1.000000e+00 : f32
    %65 = vector.broadcast %cst_34 : f32 to vector<8x128xf32>
    %66 = arith.addf %65, %64 : vector<8x128xf32>
    %67 = arith.divf %65, %66 : vector<8x128xf32>
    %68 = vector.extract_strided_slice %59 {offsets = [0, 128], sizes = [8, 128], strides = [1, 1]} : vector<8x384xf32> to vector<8x128xf32>
    %69 = vector.extract_strided_slice %32 {offsets = [0, 128], sizes = [8, 128], strides = [1, 1]} : vector<8x384xf32> to vector<8x128xf32>
    %70 = arith.addf %68, %69 : vector<8x128xf32>
    %71 = arith.negf %70 : vector<8x128xf32>
    %72 = math.exp %71 : vector<8x128xf32>
    %cst_35 = arith.constant 1.000000e+00 : f32
    %73 = vector.broadcast %cst_35 : f32 to vector<8x128xf32>
    %74 = arith.addf %73, %72 : vector<8x128xf32>
    %75 = arith.divf %73, %74 : vector<8x128xf32>
    %76 = vector.extract_strided_slice %59 {offsets = [0, 256], sizes = [8, 128], strides = [1, 1]} : vector<8x384xf32> to vector<8x128xf32>
    %77 = vector.extract_strided_slice %32 {offsets = [0, 256], sizes = [8, 128], strides = [1, 1]} : vector<8x384xf32> to vector<8x128xf32>
    %78 = arith.addf %77, %24 : vector<8x128xf32>
    %79 = arith.mulf %67, %78 : vector<8x128xf32>
    %80 = arith.addf %76, %79 : vector<8x128xf32>
    %81 = math.tanh %80 : vector<8x128xf32>
    %82 = arith.subf %26, %81 : vector<8x128xf32>
    %83 = arith.mulf %75, %82 : vector<8x128xf32>
    %84 = arith.addf %81, %83 : vector<8x128xf32>
    %c0_36 = arith.constant 0 : index
    %c0_37 = arith.constant 0 : index
    %85 = vector.load %arg6[%c0_36, %c0_37] : memref<64x384xf32, #tpu.memory_space<vmem>>, vector<8x384xf32>
    %c4_38 = arith.constant 4 : index
    %c0_39 = arith.constant 0 : index
    %c0_40 = arith.constant 0 : index
    %86 = vector.load %arg1[%c4_38, %c0_39, %c0_40] : memref<11x128x384xf32, #tpu.memory_space<vmem>>, vector<1x128x384xf32>
    %87 = vector.shape_cast %86 : vector<1x128x384xf32> to vector<128x384xf32>
    %cst_41 = arith.constant dense<0.000000e+00> : vector<8x384xf32>
    %88 = tpu.matmul %58, %87, %cst_41 {dimension_numbers = #tpu.dot_dimension_numbers<[1], [0], [0], [1], [0, 0, 1, 1], [], []>} : vector<8x128xf32>, vector<128x384xf32>, vector<8x384xf32> -> vector<8x384xf32>
    %89 = arith.addf %85, %88 : vector<8x384xf32>
    %c0_42 = arith.constant 0 : index
    %c0_43 = arith.constant 0 : index
    %90 = vector.load %arg6[%c0_42, %c0_43] : memref<64x384xf32, #tpu.memory_space<vmem>>, vector<8x384xf32>
    tpu.vector_store %arg6[%c0_42, %c0_43], %89 {strides = array<i32>} : memref<64x384xf32, #tpu.memory_space<vmem>>, vector<8x384xf32>,
    %c56_44 = arith.constant 56 : index
    %c0_45 = arith.constant 0 : index
    %91 = vector.load %arg6[%c56_44, %c0_45] : memref<64x384xf32, #tpu.memory_space<vmem>>, vector<8x384xf32>
    %c5_46 = arith.constant 5 : index
    %c0_47 = arith.constant 0 : index
    %c0_48 = arith.constant 0 : index
    %92 = vector.load %arg1[%c5_46, %c0_47, %c0_48] : memref<11x128x384xf32, #tpu.memory_space<vmem>>, vector<1x128x384xf32>
    %93 = vector.shape_cast %92 : vector<1x128x384xf32> to vector<128x384xf32>
    %cst_49 = arith.constant dense<0.000000e+00> : vector<8x384xf32>
    %94 = tpu.matmul %84, %93, %cst_49 {dimension_numbers = #tpu.dot_dimension_numbers<[1], [0], [0], [1], [0, 0, 1, 1], [], []>} : vector<8x128xf32>, vector<128x384xf32>, vector<8x384xf32> -> vector<8x384xf32>
    %95 = arith.addf %91, %94 : vector<8x384xf32>
    %c56_50 = arith.constant 56 : index
    %c0_51 = arith.constant 0 : index
    %96 = vector.load %arg6[%c56_50, %c0_51] : memref<64x384xf32, #tpu.memory_space<vmem>>, vector<8x384xf32>
    tpu.vector_store %arg6[%c56_50, %c0_51], %95 {strides = array<i32>} : memref<64x384xf32, #tpu.memory_space<vmem>>, vector<8x384xf32>,
    %c8 = arith.constant 8 : index
    %c0_52 = arith.constant 0 : index
    %c0_53 = arith.constant 0 : index
    %97 = vector.load %arg1[%c8, %c0_52, %c0_53] : memref<11x128x384xf32, #tpu.memory_space<vmem>>, vector<1x128x384xf32>
    %98 = vector.shape_cast %97 : vector<1x128x384xf32> to vector<128x384xf32>
    %cst_54 = arith.constant dense<0.000000e+00> : vector<8x384xf32>
    %99 = tpu.matmul %84, %98, %cst_54 {dimension_numbers = #tpu.dot_dimension_numbers<[1], [0], [0], [1], [0, 0, 1, 1], [], []>} : vector<8x128xf32>, vector<128x384xf32>, vector<8x384xf32> -> vector<8x384xf32>
    %c3_55 = arith.constant 3 : index
    %c0_56 = arith.constant 0 : index
    %100 = vector.load %arg2[%c3_55, %c0_56] : memref<16x384xf32, #tpu.memory_space<vmem>>, vector<1x384xf32>
    %101 = vector.broadcast %100 : vector<1x384xf32> to vector<8x384xf32>
    %102 = arith.addf %99, %101 : vector<8x384xf32>
    %c2_57 = arith.constant 2 : index
    %c0_58 = arith.constant 0 : index
    %c0_59 = arith.constant 0 : index
    %103 = vector.load %arg1[%c2_57, %c0_58, %c0_59] : memref<11x128x384xf32, #tpu.memory_space<vmem>>, vector<1x128x384xf32>
    %104 = vector.shape_cast %103 : vector<1x128x384xf32> to vector<128x384xf32>
    %cst_60 = arith.constant dense<0.000000e+00> : vector<8x384xf32>
    %105 = tpu.matmul %58, %104, %cst_60 {dimension_numbers = #tpu.dot_dimension_numbers<[1], [0], [0], [1], [0, 0, 1, 1], [], []>} : vector<8x128xf32>, vector<128x384xf32>, vector<8x384xf32> -> vector<8x384xf32>
    %c3_61 = arith.constant 3 : index
    %c0_62 = arith.constant 0 : index
    %c0_63 = arith.constant 0 : index
    %106 = vector.load %arg1[%c3_61, %c0_62, %c0_63] : memref<11x128x384xf32, #tpu.memory_space<vmem>>, vector<1x128x384xf32>
    %107 = vector.shape_cast %106 : vector<1x128x384xf32> to vector<128x384xf32>
    %cst_64 = arith.constant dense<0.000000e+00> : vector<8x384xf32>
    %108 = tpu.matmul %84, %107, %cst_64 {dimension_numbers = #tpu.dot_dimension_numbers<[1], [0], [0], [1], [0, 0, 1, 1], [], []>} : vector<8x128xf32>, vector<128x384xf32>, vector<8x384xf32> -> vector<8x384xf32>
    %c8_65 = arith.constant 8 : index
    %c0_66 = arith.constant 0 : index
    %109 = vector.load %arg4[%c8_65, %c0_66] : memref<64x384xf32, #tpu.memory_space<vmem>>, vector<8x384xf32>
    %110 = vector.extract_strided_slice %109 {offsets = [0, 0], sizes = [8, 128], strides = [1, 1]} : vector<8x384xf32> to vector<8x128xf32>
    %111 = vector.extract_strided_slice %105 {offsets = [0, 0], sizes = [8, 128], strides = [1, 1]} : vector<8x384xf32> to vector<8x128xf32>
    %112 = arith.addf %110, %111 : vector<8x128xf32>
    %113 = arith.negf %112 : vector<8x128xf32>
    %114 = math.exp %113 : vector<8x128xf32>
    %cst_67 = arith.constant 1.000000e+00 : f32
    %115 = vector.broadcast %cst_67 : f32 to vector<8x128xf32>
    %116 = arith.addf %115, %114 : vector<8x128xf32>
    %117 = arith.divf %115, %116 : vector<8x128xf32>
    %118 = vector.extract_strided_slice %109 {offsets = [0, 128], sizes = [8, 128], strides = [1, 1]} : vector<8x384xf32> to vector<8x128xf32>
    %119 = vector.extract_strided_slice %105 {offsets = [0, 128], sizes = [8, 128], strides = [1, 1]} : vector<8x384xf32> to vector<8x128xf32>
    %120 = arith.addf %118, %119 : vector<8x128xf32>
    %121 = arith.negf %120 : vector<8x128xf32>
    %122 = math.exp %121 : vector<8x128xf32>
    %cst_68 = arith.constant 1.000000e+00 : f32
    %123 = vector.broadcast %cst_68 : f32 to vector<8x128xf32>
    %124 = arith.addf %123, %122 : vector<8x128xf32>
    %125 = arith.divf %123, %124 : vector<8x128xf32>
    %126 = vector.extract_strided_slice %109 {offsets = [0, 256], sizes = [8, 128], strides = [1, 1]} : vector<8x384xf32> to vector<8x128xf32>
    %127 = vector.extract_strided_slice %105 {offsets = [0, 256], sizes = [8, 128], strides = [1, 1]} : vector<8x384xf32> to vector<8x128xf32>
    %128 = arith.addf %127, %21 : vector<8x128xf32>
    %129 = arith.mulf %117, %128 : vector<8x128xf32>
    %130 = arith.addf %126, %129 : vector<8x128xf32>
    %131 = math.tanh %130 : vector<8x128xf32>
    %132 = arith.subf %58, %131 : vector<8x128xf32>
    %133 = arith.mulf %125, %132 : vector<8x128xf32>
    %134 = arith.addf %131, %133 : vector<8x128xf32>
    %c48 = arith.constant 48 : index
    %c0_69 = arith.constant 0 : index
    %135 = vector.load %arg5[%c48, %c0_69] : memref<64x384xf32, #tpu.memory_space<vmem>>, vector<8x384xf32>
    %136 = vector.extract_strided_slice %135 {offsets = [0, 0], sizes = [8, 128], strides = [1, 1]} : vector<8x384xf32> to vector<8x128xf32>
    %137 = vector.extract_strided_slice %108 {offsets = [0, 0], sizes = [8, 128], strides = [1, 1]} : vector<8x384xf32> to vector<8x128xf32>
    %138 = arith.addf %136, %137 : vector<8x128xf32>
    %139 = arith.negf %138 : vector<8x128xf32>
    %140 = math.exp %139 : vector<8x128xf32>
    %cst_70 = arith.constant 1.000000e+00 : f32
    %141 = vector.broadcast %cst_70 : f32 to vector<8x128xf32>
    %142 = arith.addf %141, %140 : vector<8x128xf32>
    %143 = arith.divf %141, %142 : vector<8x128xf32>
    %144 = vector.extract_strided_slice %135 {offsets = [0, 128], sizes = [8, 128], strides = [1, 1]} : vector<8x384xf32> to vector<8x128xf32>
    %145 = vector.extract_strided_slice %108 {offsets = [0, 128], sizes = [8, 128], strides = [1, 1]} : vector<8x384xf32> to vector<8x128xf32>
    %146 = arith.addf %144, %145 : vector<8x128xf32>
    %147 = arith.negf %146 : vector<8x128xf32>
    %148 = math.exp %147 : vector<8x128xf32>
    %cst_71 = arith.constant 1.000000e+00 : f32
    %149 = vector.broadcast %cst_71 : f32 to vector<8x128xf32>
    %150 = arith.addf %149, %148 : vector<8x128xf32>
    %151 = arith.divf %149, %150 : vector<8x128xf32>
    %152 = vector.extract_strided_slice %135 {offsets = [0, 256], sizes = [8, 128], strides = [1, 1]} : vector<8x384xf32> to vector<8x128xf32>
    %153 = vector.extract_strided_slice %108 {offsets = [0, 256], sizes = [8, 128], strides = [1, 1]} : vector<8x384xf32> to vector<8x128xf32>
    %154 = arith.addf %153, %24 : vector<8x128xf32>
    %155 = arith.mulf %143, %154 : vector<8x128xf32>
    %156 = arith.addf %152, %155 : vector<8x128xf32>
    %157 = math.tanh %156 : vector<8x128xf32>
    %158 = arith.subf %84, %157 : vector<8x128xf32>
    %159 = arith.mulf %151, %158 : vector<8x128xf32>
    %160 = arith.addf %157, %159 : vector<8x128xf32>
    %c8_72 = arith.constant 8 : index
    %c0_73 = arith.constant 0 : index
    %161 = vector.load %arg6[%c8_72, %c0_73] : memref<64x384xf32, #tpu.memory_space<vmem>>, vector<8x384xf32>
    %c4_74 = arith.constant 4 : index
    %c0_75 = arith.constant 0 : index
    %c0_76 = arith.constant 0 : index
    %162 = vector.load %arg1[%c4_74, %c0_75, %c0_76] : memref<11x128x384xf32, #tpu.memory_space<vmem>>, vector<1x128x384xf32>
    %163 = vector.shape_cast %162 : vector<1x128x384xf32> to vector<128x384xf32>
    %cst_77 = arith.constant dense<0.000000e+00> : vector<8x384xf32>
    %164 = tpu.matmul %134, %163, %cst_77 {dimension_numbers = #tpu.dot_dimension_numbers<[1], [0], [0], [1], [0, 0, 1, 1], [], []>} : vector<8x128xf32>, vector<128x384xf32>, vector<8x384xf32> -> vector<8x384xf32>
    %165 = arith.addf %161, %164 : vector<8x384xf32>
    %c8_78 = arith.constant 8 : index
    %c0_79 = arith.constant 0 : index
    %166 = vector.load %arg6[%c8_78, %c0_79] : memref<64x384xf32, #tpu.memory_space<vmem>>, vector<8x384xf32>
    tpu.vector_store %arg6[%c8_78, %c0_79], %165 {strides = array<i32>} : memref<64x384xf32, #tpu.memory_space<vmem>>, vector<8x384xf32>,
    %c48_80 = arith.constant 48 : index
    %c0_81 = arith.constant 0 : index
    %167 = vector.load %arg6[%c48_80, %c0_81] : memref<64x384xf32, #tpu.memory_space<vmem>>, vector<8x384xf32>
    %c5_82 = arith.constant 5 : index
    %c0_83 = arith.constant 0 : index
    %c0_84 = arith.constant 0 : index
    %168 = vector.load %arg1[%c5_82, %c0_83, %c0_84] : memref<11x128x384xf32, #tpu.memory_space<vmem>>, vector<1x128x384xf32>
    %169 = vector.shape_cast %168 : vector<1x128x384xf32> to vector<128x384xf32>
    %cst_85 = arith.constant dense<0.000000e+00> : vector<8x384xf32>
    %170 = tpu.matmul %160, %169, %cst_85 {dimension_numbers = #tpu.dot_dimension_numbers<[1], [0], [0], [1], [0, 0, 1, 1], [], []>} : vector<8x128xf32>, vector<128x384xf32>, vector<8x384xf32> -> vector<8x384xf32>
    %171 = arith.addf %167, %170 : vector<8x384xf32>
    %c48_86 = arith.constant 48 : index
    %c0_87 = arith.constant 0 : index
    %172 = vector.load %arg6[%c48_86, %c0_87] : memref<64x384xf32, #tpu.memory_space<vmem>>, vector<8x384xf32>
    tpu.vector_store %arg6[%c48_86, %c0_87], %171 {strides = array<i32>} : memref<64x384xf32, #tpu.memory_space<vmem>>, vector<8x384xf32>,
    %c2_88 = arith.constant 2 : index
    %c0_89 = arith.constant 0 : index
    %c0_90 = arith.constant 0 : index
    %173 = vector.load %arg1[%c2_88, %c0_89, %c0_90] : memref<11x128x384xf32, #tpu.memory_space<vmem>>, vector<1x128x384xf32>
    %174 = vector.shape_cast %173 : vector<1x128x384xf32> to vector<128x384xf32>
    %cst_91 = arith.constant dense<0.000000e+00> : vector<8x384xf32>
    %175 = tpu.matmul %134, %174, %cst_91 {dimension_numbers = #tpu.dot_dimension_numbers<[1], [0], [0], [1], [0, 0, 1, 1], [], []>} : vector<8x128xf32>, vector<128x384xf32>, vector<8x384xf32> -> vector<8x384xf32>
    %c3_92 = arith.constant 3 : index
    %c0_93 = arith.constant 0 : index
    %c0_94 = arith.constant 0 : index
    %176 = vector.load %arg1[%c3_92, %c0_93, %c0_94] : memref<11x128x384xf32, #tpu.memory_space<vmem>>, vector<1x128x384xf32>
    %177 = vector.shape_cast %176 : vector<1x128x384xf32> to vector<128x384xf32>
    %cst_95 = arith.constant dense<0.000000e+00> : vector<8x384xf32>
    %178 = tpu.matmul %160, %177, %cst_95 {dimension_numbers = #tpu.dot_dimension_numbers<[1], [0], [0], [1], [0, 0, 1, 1], [], []>} : vector<8x128xf32>, vector<128x384xf32>, vector<8x384xf32> -> vector<8x384xf32>
    %c16 = arith.constant 16 : index
    %c0_96 = arith.constant 0 : index
    %179 = vector.load %arg4[%c16, %c0_96] : memref<64x384xf32, #tpu.memory_space<vmem>>, vector<8x384xf32>
    %180 = vector.extract_strided_slice %179 {offsets = [0, 0], sizes = [8, 128], strides = [1, 1]} : vector<8x384xf32> to vector<8x128xf32>
    %181 = vector.extract_strided_slice %175 {offsets = [0, 0], sizes = [8, 128], strides = [1, 1]} : vector<8x384xf32> to vector<8x128xf32>
    %182 = arith.addf %180, %181 : vector<8x128xf32>
    %183 = arith.negf %182 : vector<8x128xf32>
    %184 = math.exp %183 : vector<8x128xf32>
    %cst_97 = arith.constant 1.000000e+00 : f32
    %185 = vector.broadcast %cst_97 : f32 to vector<8x128xf32>
    %186 = arith.addf %185, %184 : vector<8x128xf32>
    %187 = arith.divf %185, %186 : vector<8x128xf32>
    %188 = vector.extract_strided_slice %179 {offsets = [0, 128], sizes = [8, 128], strides = [1, 1]} : vector<8x384xf32> to vector<8x128xf32>
    %189 = vector.extract_strided_slice %175 {offsets = [0, 128], sizes = [8, 128], strides = [1, 1]} : vector<8x384xf32> to vector<8x128xf32>
    %190 = arith.addf %188, %189 : vector<8x128xf32>
    %191 = arith.negf %190 : vector<8x128xf32>
    %192 = math.exp %191 : vector<8x128xf32>
    %cst_98 = arith.constant 1.000000e+00 : f32
    %193 = vector.broadcast %cst_98 : f32 to vector<8x128xf32>
    %194 = arith.addf %193, %192 : vector<8x128xf32>
    %195 = arith.divf %193, %194 : vector<8x128xf32>
    %196 = vector.extract_strided_slice %179 {offsets = [0, 256], sizes = [8, 128], strides = [1, 1]} : vector<8x384xf32> to vector<8x128xf32>
    %197 = vector.extract_strided_slice %175 {offsets = [0, 256], sizes = [8, 128], strides = [1, 1]} : vector<8x384xf32> to vector<8x128xf32>
    %198 = arith.addf %197, %21 : vector<8x128xf32>
    %199 = arith.mulf %187, %198 : vector<8x128xf32>
    %200 = arith.addf %196, %199 : vector<8x128xf32>
    %201 = math.tanh %200 : vector<8x128xf32>
    %202 = arith.subf %134, %201 : vector<8x128xf32>
    %203 = arith.mulf %195, %202 : vector<8x128xf32>
    %204 = arith.addf %201, %203 : vector<8x128xf32>
    %c40 = arith.constant 40 : index
    %c0_99 = arith.constant 0 : index
    %205 = vector.load %arg5[%c40, %c0_99] : memref<64x384xf32, #tpu.memory_space<vmem>>, vector<8x384xf32>
    %206 = vector.extract_strided_slice %205 {offsets = [0, 0], sizes = [8, 128], strides = [1, 1]} : vector<8x384xf32> to vector<8x128xf32>
    %207 = vector.extract_strided_slice %178 {offsets = [0, 0], sizes = [8, 128], strides = [1, 1]} : vector<8x384xf32> to vector<8x128xf32>
    %208 = arith.addf %206, %207 : vector<8x128xf32>
    %209 = arith.negf %208 : vector<8x128xf32>
    %210 = math.exp %209 : vector<8x128xf32>
    %cst_100 = arith.constant 1.000000e+00 : f32
    %211 = vector.broadcast %cst_100 : f32 to vector<8x128xf32>
    %212 = arith.addf %211, %210 : vector<8x128xf32>
    %213 = arith.divf %211, %212 : vector<8x128xf32>
    %214 = vector.extract_strided_slice %205 {offsets = [0, 128], sizes = [8, 128], strides = [1, 1]} : vector<8x384xf32> to vector<8x128xf32>
    %215 = vector.extract_strided_slice %178 {offsets = [0, 128], sizes = [8, 128], strides = [1, 1]} : vector<8x384xf32> to vector<8x128xf32>
    %216 = arith.addf %214, %215 : vector<8x128xf32>
    %217 = arith.negf %216 : vector<8x128xf32>
    %218 = math.exp %217 : vector<8x128xf32>
    %cst_101 = arith.constant 1.000000e+00 : f32
    %219 = vector.broadcast %cst_101 : f32 to vector<8x128xf32>
    %220 = arith.addf %219, %218 : vector<8x128xf32>
    %221 = arith.divf %219, %220 : vector<8x128xf32>
    %222 = vector.extract_strided_slice %205 {offsets = [0, 256], sizes = [8, 128], strides = [1, 1]} : vector<8x384xf32> to vector<8x128xf32>
    %223 = vector.extract_strided_slice %178 {offsets = [0, 256], sizes = [8, 128], strides = [1, 1]} : vector<8x384xf32> to vector<8x128xf32>
    %224 = arith.addf %223, %24 : vector<8x128xf32>
    %225 = arith.mulf %213, %224 : vector<8x128xf32>
    %226 = arith.addf %222, %225 : vector<8x128xf32>
    %227 = math.tanh %226 : vector<8x128xf32>
    %228 = arith.subf %160, %227 : vector<8x128xf32>
    %229 = arith.mulf %221, %228 : vector<8x128xf32>
    %230 = arith.addf %227, %229 : vector<8x128xf32>
    %c16_102 = arith.constant 16 : index
    %c0_103 = arith.constant 0 : index
    %231 = vector.load %arg6[%c16_102, %c0_103] : memref<64x384xf32, #tpu.memory_space<vmem>>, vector<8x384xf32>
    %c4_104 = arith.constant 4 : index
    %c0_105 = arith.constant 0 : index
    %c0_106 = arith.constant 0 : index
    %232 = vector.load %arg1[%c4_104, %c0_105, %c0_106] : memref<11x128x384xf32, #tpu.memory_space<vmem>>, vector<1x128x384xf32>
    %233 = vector.shape_cast %232 : vector<1x128x384xf32> to vector<128x384xf32>
    %cst_107 = arith.constant dense<0.000000e+00> : vector<8x384xf32>
    %234 = tpu.matmul %204, %233, %cst_107 {dimension_numbers = #tpu.dot_dimension_numbers<[1], [0], [0], [1], [0, 0, 1, 1], [], []>} : vector<8x128xf32>, vector<128x384xf32>, vector<8x384xf32> -> vector<8x384xf32>
    %235 = arith.addf %231, %234 : vector<8x384xf32>
    %c16_108 = arith.constant 16 : index
    %c0_109 = arith.constant 0 : index
    %236 = vector.load %arg6[%c16_108, %c0_109] : memref<64x384xf32, #tpu.memory_space<vmem>>, vector<8x384xf32>
    tpu.vector_store %arg6[%c16_108, %c0_109], %235 {strides = array<i32>} : memref<64x384xf32, #tpu.memory_space<vmem>>, vector<8x384xf32>,
    %c40_110 = arith.constant 40 : index
    %c0_111 = arith.constant 0 : index
    %237 = vector.load %arg6[%c40_110, %c0_111] : memref<64x384xf32, #tpu.memory_space<vmem>>, vector<8x384xf32>
    %c5_112 = arith.constant 5 : index
    %c0_113 = arith.constant 0 : index
    %c0_114 = arith.constant 0 : index
    %238 = vector.load %arg1[%c5_112, %c0_113, %c0_114] : memref<11x128x384xf32, #tpu.memory_space<vmem>>, vector<1x128x384xf32>
    %239 = vector.shape_cast %238 : vector<1x128x384xf32> to vector<128x384xf32>
    %cst_115 = arith.constant dense<0.000000e+00> : vector<8x384xf32>
    %240 = tpu.matmul %230, %239, %cst_115 {dimension_numbers = #tpu.dot_dimension_numbers<[1], [0], [0], [1], [0, 0, 1, 1], [], []>} : vector<8x128xf32>, vector<128x384xf32>, vector<8x384xf32> -> vector<8x384xf32>
    %241 = arith.addf %237, %240 : vector<8x384xf32>
    %c40_116 = arith.constant 40 : index
    %c0_117 = arith.constant 0 : index
    %242 = vector.load %arg6[%c40_116, %c0_117] : memref<64x384xf32, #tpu.memory_space<vmem>>, vector<8x384xf32>
    tpu.vector_store %arg6[%c40_116, %c0_117], %241 {strides = array<i32>} : memref<64x384xf32, #tpu.memory_space<vmem>>, vector<8x384xf32>,
    %c2_118 = arith.constant 2 : index
    %c0_119 = arith.constant 0 : index
    %c0_120 = arith.constant 0 : index
    %243 = vector.load %arg1[%c2_118, %c0_119, %c0_120] : memref<11x128x384xf32, #tpu.memory_space<vmem>>, vector<1x128x384xf32>
    %244 = vector.shape_cast %243 : vector<1x128x384xf32> to vector<128x384xf32>
    %cst_121 = arith.constant dense<0.000000e+00> : vector<8x384xf32>
    %245 = tpu.matmul %204, %244, %cst_121 {dimension_numbers = #tpu.dot_dimension_numbers<[1], [0], [0], [1], [0, 0, 1, 1], [], []>} : vector<8x128xf32>, vector<128x384xf32>, vector<8x384xf32> -> vector<8x384xf32>
    %c3_122 = arith.constant 3 : index
    %c0_123 = arith.constant 0 : index
    %c0_124 = arith.constant 0 : index
    %246 = vector.load %arg1[%c3_122, %c0_123, %c0_124] : memref<11x128x384xf32, #tpu.memory_space<vmem>>, vector<1x128x384xf32>
    %247 = vector.shape_cast %246 : vector<1x128x384xf32> to vector<128x384xf32>
    %cst_125 = arith.constant dense<0.000000e+00> : vector<8x384xf32>
    %248 = tpu.matmul %230, %247, %cst_125 {dimension_numbers = #tpu.dot_dimension_numbers<[1], [0], [0], [1], [0, 0, 1, 1], [], []>} : vector<8x128xf32>, vector<128x384xf32>, vector<8x384xf32> -> vector<8x384xf32>
    %c24 = arith.constant 24 : index
    %c0_126 = arith.constant 0 : index
    %249 = vector.load %arg4[%c24, %c0_126] : memref<64x384xf32, #tpu.memory_space<vmem>>, vector<8x384xf32>
    %250 = vector.extract_strided_slice %249 {offsets = [0, 0], sizes = [8, 128], strides = [1, 1]} : vector<8x384xf32> to vector<8x128xf32>
    %251 = vector.extract_strided_slice %245 {offsets = [0, 0], sizes = [8, 128], strides = [1, 1]} : vector<8x384xf32> to vector<8x128xf32>
    %252 = arith.addf %250, %251 : vector<8x128xf32>
    %253 = arith.negf %252 : vector<8x128xf32>
    %254 = math.exp %253 : vector<8x128xf32>
    %cst_127 = arith.constant 1.000000e+00 : f32
    %255 = vector.broadcast %cst_127 : f32 to vector<8x128xf32>
    %256 = arith.addf %255, %254 : vector<8x128xf32>
    %257 = arith.divf %255, %256 : vector<8x128xf32>
    %258 = vector.extract_strided_slice %249 {offsets = [0, 128], sizes = [8, 128], strides = [1, 1]} : vector<8x384xf32> to vector<8x128xf32>
    %259 = vector.extract_strided_slice %245 {offsets = [0, 128], sizes = [8, 128], strides = [1, 1]} : vector<8x384xf32> to vector<8x128xf32>
    %260 = arith.addf %258, %259 : vector<8x128xf32>
    %261 = arith.negf %260 : vector<8x128xf32>
    %262 = math.exp %261 : vector<8x128xf32>
    %cst_128 = arith.constant 1.000000e+00 : f32
    %263 = vector.broadcast %cst_128 : f32 to vector<8x128xf32>
    %264 = arith.addf %263, %262 : vector<8x128xf32>
    %265 = arith.divf %263, %264 : vector<8x128xf32>
    %266 = vector.extract_strided_slice %249 {offsets = [0, 256], sizes = [8, 128], strides = [1, 1]} : vector<8x384xf32> to vector<8x128xf32>
    %267 = vector.extract_strided_slice %245 {offsets = [0, 256], sizes = [8, 128], strides = [1, 1]} : vector<8x384xf32> to vector<8x128xf32>
    %268 = arith.addf %267, %21 : vector<8x128xf32>
    %269 = arith.mulf %257, %268 : vector<8x128xf32>
    %270 = arith.addf %266, %269 : vector<8x128xf32>
    %271 = math.tanh %270 : vector<8x128xf32>
    %272 = arith.subf %204, %271 : vector<8x128xf32>
    %273 = arith.mulf %265, %272 : vector<8x128xf32>
    %274 = arith.addf %271, %273 : vector<8x128xf32>
    %c32 = arith.constant 32 : index
    %c0_129 = arith.constant 0 : index
    %275 = vector.load %arg5[%c32, %c0_129] : memref<64x384xf32, #tpu.memory_space<vmem>>, vector<8x384xf32>
    %276 = vector.extract_strided_slice %275 {offsets = [0, 0], sizes = [8, 128], strides = [1, 1]} : vector<8x384xf32> to vector<8x128xf32>
    %277 = vector.extract_strided_slice %248 {offsets = [0, 0], sizes = [8, 128], strides = [1, 1]} : vector<8x384xf32> to vector<8x128xf32>
    %278 = arith.addf %276, %277 : vector<8x128xf32>
    %279 = arith.negf %278 : vector<8x128xf32>
    %280 = math.exp %279 : vector<8x128xf32>
    %cst_130 = arith.constant 1.000000e+00 : f32
    %281 = vector.broadcast %cst_130 : f32 to vector<8x128xf32>
    %282 = arith.addf %281, %280 : vector<8x128xf32>
    %283 = arith.divf %281, %282 : vector<8x128xf32>
    %284 = vector.extract_strided_slice %275 {offsets = [0, 128], sizes = [8, 128], strides = [1, 1]} : vector<8x384xf32> to vector<8x128xf32>
    %285 = vector.extract_strided_slice %248 {offsets = [0, 128], sizes = [8, 128], strides = [1, 1]} : vector<8x384xf32> to vector<8x128xf32>
    %286 = arith.addf %284, %285 : vector<8x128xf32>
    %287 = arith.negf %286 : vector<8x128xf32>
    %288 = math.exp %287 : vector<8x128xf32>
    %cst_131 = arith.constant 1.000000e+00 : f32
    %289 = vector.broadcast %cst_131 : f32 to vector<8x128xf32>
    %290 = arith.addf %289, %288 : vector<8x128xf32>
    %291 = arith.divf %289, %290 : vector<8x128xf32>
    %292 = vector.extract_strided_slice %275 {offsets = [0, 256], sizes = [8, 128], strides = [1, 1]} : vector<8x384xf32> to vector<8x128xf32>
    %293 = vector.extract_strided_slice %248 {offsets = [0, 256], sizes = [8, 128], strides = [1, 1]} : vector<8x384xf32> to vector<8x128xf32>
    %294 = arith.addf %293, %24 : vector<8x128xf32>
    %295 = arith.mulf %283, %294 : vector<8x128xf32>
    %296 = arith.addf %292, %295 : vector<8x128xf32>
    %297 = math.tanh %296 : vector<8x128xf32>
    %298 = arith.subf %230, %297 : vector<8x128xf32>
    %299 = arith.mulf %291, %298 : vector<8x128xf32>
    %300 = arith.addf %297, %299 : vector<8x128xf32>
    %c24_132 = arith.constant 24 : index
    %c0_133 = arith.constant 0 : index
    %301 = vector.load %arg6[%c24_132, %c0_133] : memref<64x384xf32, #tpu.memory_space<vmem>>, vector<8x384xf32>
    %c4_134 = arith.constant 4 : index
    %c0_135 = arith.constant 0 : index
    %c0_136 = arith.constant 0 : index
    %302 = vector.load %arg1[%c4_134, %c0_135, %c0_136] : memref<11x128x384xf32, #tpu.memory_space<vmem>>, vector<1x128x384xf32>
    %303 = vector.shape_cast %302 : vector<1x128x384xf32> to vector<128x384xf32>
    %cst_137 = arith.constant dense<0.000000e+00> : vector<8x384xf32>
    %304 = tpu.matmul %274, %303, %cst_137 {dimension_numbers = #tpu.dot_dimension_numbers<[1], [0], [0], [1], [0, 0, 1, 1], [], []>} : vector<8x128xf32>, vector<128x384xf32>, vector<8x384xf32> -> vector<8x384xf32>
    %305 = arith.addf %301, %304 : vector<8x384xf32>
    %c24_138 = arith.constant 24 : index
    %c0_139 = arith.constant 0 : index
    %306 = vector.load %arg6[%c24_138, %c0_139] : memref<64x384xf32, #tpu.memory_space<vmem>>, vector<8x384xf32>
    tpu.vector_store %arg6[%c24_138, %c0_139], %305 {strides = array<i32>} : memref<64x384xf32, #tpu.memory_space<vmem>>, vector<8x384xf32>,
    %c32_140 = arith.constant 32 : index
    %c0_141 = arith.constant 0 : index
    %307 = vector.load %arg6[%c32_140, %c0_141] : memref<64x384xf32, #tpu.memory_space<vmem>>, vector<8x384xf32>
    %c5_142 = arith.constant 5 : index
    %c0_143 = arith.constant 0 : index
    %c0_144 = arith.constant 0 : index
    %308 = vector.load %arg1[%c5_142, %c0_143, %c0_144] : memref<11x128x384xf32, #tpu.memory_space<vmem>>, vector<1x128x384xf32>
    %309 = vector.shape_cast %308 : vector<1x128x384xf32> to vector<128x384xf32>
    %cst_145 = arith.constant dense<0.000000e+00> : vector<8x384xf32>
    %310 = tpu.matmul %300, %309, %cst_145 {dimension_numbers = #tpu.dot_dimension_numbers<[1], [0], [0], [1], [0, 0, 1, 1], [], []>} : vector<8x128xf32>, vector<128x384xf32>, vector<8x384xf32> -> vector<8x384xf32>
    %311 = arith.addf %307, %310 : vector<8x384xf32>
    %c32_146 = arith.constant 32 : index
    %c0_147 = arith.constant 0 : index
    %312 = vector.load %arg6[%c32_146, %c0_147] : memref<64x384xf32, #tpu.memory_space<vmem>>, vector<8x384xf32>
    tpu.vector_store %arg6[%c32_146, %c0_147], %311 {strides = array<i32>} : memref<64x384xf32, #tpu.memory_space<vmem>>, vector<8x384xf32>,
    %c2_148 = arith.constant 2 : index
    %c0_149 = arith.constant 0 : index
    %c0_150 = arith.constant 0 : index
    %313 = vector.load %arg1[%c2_148, %c0_149, %c0_150] : memref<11x128x384xf32, #tpu.memory_space<vmem>>, vector<1x128x384xf32>
    %314 = vector.shape_cast %313 : vector<1x128x384xf32> to vector<128x384xf32>
    %cst_151 = arith.constant dense<0.000000e+00> : vector<8x384xf32>
    %315 = tpu.matmul %274, %314, %cst_151 {dimension_numbers = #tpu.dot_dimension_numbers<[1], [0], [0], [1], [0, 0, 1, 1], [], []>} : vector<8x128xf32>, vector<128x384xf32>, vector<8x384xf32> -> vector<8x384xf32>
    %c3_152 = arith.constant 3 : index
    %c0_153 = arith.constant 0 : index
    %c0_154 = arith.constant 0 : index
    %316 = vector.load %arg1[%c3_152, %c0_153, %c0_154] : memref<11x128x384xf32, #tpu.memory_space<vmem>>, vector<1x128x384xf32>
    %317 = vector.shape_cast %316 : vector<1x128x384xf32> to vector<128x384xf32>
    %cst_155 = arith.constant dense<0.000000e+00> : vector<8x384xf32>
    %318 = tpu.matmul %300, %317, %cst_155 {dimension_numbers = #tpu.dot_dimension_numbers<[1], [0], [0], [1], [0, 0, 1, 1], [], []>} : vector<8x128xf32>, vector<128x384xf32>, vector<8x384xf32> -> vector<8x384xf32>
    %c32_156 = arith.constant 32 : index
    %c0_157 = arith.constant 0 : index
    %319 = vector.load %arg4[%c32_156, %c0_157] : memref<64x384xf32, #tpu.memory_space<vmem>>, vector<8x384xf32>
    %320 = vector.extract_strided_slice %319 {offsets = [0, 0], sizes = [8, 128], strides = [1, 1]} : vector<8x384xf32> to vector<8x128xf32>
    %321 = vector.extract_strided_slice %315 {offsets = [0, 0], sizes = [8, 128], strides = [1, 1]} : vector<8x384xf32> to vector<8x128xf32>
    %322 = arith.addf %320, %321 : vector<8x128xf32>
    %323 = arith.negf %322 : vector<8x128xf32>
    %324 = math.exp %323 : vector<8x128xf32>
    %cst_158 = arith.constant 1.000000e+00 : f32
    %325 = vector.broadcast %cst_158 : f32 to vector<8x128xf32>
    %326 = arith.addf %325, %324 : vector<8x128xf32>
    %327 = arith.divf %325, %326 : vector<8x128xf32>
    %328 = vector.extract_strided_slice %319 {offsets = [0, 128], sizes = [8, 128], strides = [1, 1]} : vector<8x384xf32> to vector<8x128xf32>
    %329 = vector.extract_strided_slice %315 {offsets = [0, 128], sizes = [8, 128], strides = [1, 1]} : vector<8x384xf32> to vector<8x128xf32>
    %330 = arith.addf %328, %329 : vector<8x128xf32>
    %331 = arith.negf %330 : vector<8x128xf32>
    %332 = math.exp %331 : vector<8x128xf32>
    %cst_159 = arith.constant 1.000000e+00 : f32
    %333 = vector.broadcast %cst_159 : f32 to vector<8x128xf32>
    %334 = arith.addf %333, %332 : vector<8x128xf32>
    %335 = arith.divf %333, %334 : vector<8x128xf32>
    %336 = vector.extract_strided_slice %319 {offsets = [0, 256], sizes = [8, 128], strides = [1, 1]} : vector<8x384xf32> to vector<8x128xf32>
    %337 = vector.extract_strided_slice %315 {offsets = [0, 256], sizes = [8, 128], strides = [1, 1]} : vector<8x384xf32> to vector<8x128xf32>
    %338 = arith.addf %337, %21 : vector<8x128xf32>
    %339 = arith.mulf %327, %338 : vector<8x128xf32>
    %340 = arith.addf %336, %339 : vector<8x128xf32>
    %341 = math.tanh %340 : vector<8x128xf32>
    %342 = arith.subf %274, %341 : vector<8x128xf32>
    %343 = arith.mulf %335, %342 : vector<8x128xf32>
    %344 = arith.addf %341, %343 : vector<8x128xf32>
    %c24_160 = arith.constant 24 : index
    %c0_161 = arith.constant 0 : index
    %345 = vector.load %arg5[%c24_160, %c0_161] : memref<64x384xf32, #tpu.memory_space<vmem>>, vector<8x384xf32>
    %346 = vector.extract_strided_slice %345 {offsets = [0, 0], sizes = [8, 128], strides = [1, 1]} : vector<8x384xf32> to vector<8x128xf32>
    %347 = vector.extract_strided_slice %318 {offsets = [0, 0], sizes = [8, 128], strides = [1, 1]} : vector<8x384xf32> to vector<8x128xf32>
    %348 = arith.addf %346, %347 : vector<8x128xf32>
    %349 = arith.negf %348 : vector<8x128xf32>
    %350 = math.exp %349 : vector<8x128xf32>
    %cst_162 = arith.constant 1.000000e+00 : f32
    %351 = vector.broadcast %cst_162 : f32 to vector<8x128xf32>
    %352 = arith.addf %351, %350 : vector<8x128xf32>
    %353 = arith.divf %351, %352 : vector<8x128xf32>
    %354 = vector.extract_strided_slice %345 {offsets = [0, 128], sizes = [8, 128], strides = [1, 1]} : vector<8x384xf32> to vector<8x128xf32>
    %355 = vector.extract_strided_slice %318 {offsets = [0, 128], sizes = [8, 128], strides = [1, 1]} : vector<8x384xf32> to vector<8x128xf32>
    %356 = arith.addf %354, %355 : vector<8x128xf32>
    %357 = arith.negf %356 : vector<8x128xf32>
    %358 = math.exp %357 : vector<8x128xf32>
    %cst_163 = arith.constant 1.000000e+00 : f32
    %359 = vector.broadcast %cst_163 : f32 to vector<8x128xf32>
    %360 = arith.addf %359, %358 : vector<8x128xf32>
    %361 = arith.divf %359, %360 : vector<8x128xf32>
    %362 = vector.extract_strided_slice %345 {offsets = [0, 256], sizes = [8, 128], strides = [1, 1]} : vector<8x384xf32> to vector<8x128xf32>
    %363 = vector.extract_strided_slice %318 {offsets = [0, 256], sizes = [8, 128], strides = [1, 1]} : vector<8x384xf32> to vector<8x128xf32>
    %364 = arith.addf %363, %24 : vector<8x128xf32>
    %365 = arith.mulf %353, %364 : vector<8x128xf32>
    %366 = arith.addf %362, %365 : vector<8x128xf32>
    %367 = math.tanh %366 : vector<8x128xf32>
    %368 = arith.subf %300, %367 : vector<8x128xf32>
    %369 = arith.mulf %361, %368 : vector<8x128xf32>
    %370 = arith.addf %367, %369 : vector<8x128xf32>
    %c32_164 = arith.constant 32 : index
    %c0_165 = arith.constant 0 : index
    %371 = vector.load %arg6[%c32_164, %c0_165] : memref<64x384xf32, #tpu.memory_space<vmem>>, vector<8x384xf32>
    %c4_166 = arith.constant 4 : index
    %c0_167 = arith.constant 0 : index
    %c0_168 = arith.constant 0 : index
    %372 = vector.load %arg1[%c4_166, %c0_167, %c0_168] : memref<11x128x384xf32, #tpu.memory_space<vmem>>, vector<1x128x384xf32>
    %373 = vector.shape_cast %372 : vector<1x128x384xf32> to vector<128x384xf32>
    %cst_169 = arith.constant dense<0.000000e+00> : vector<8x384xf32>
    %374 = tpu.matmul %344, %373, %cst_169 {dimension_numbers = #tpu.dot_dimension_numbers<[1], [0], [0], [1], [0, 0, 1, 1], [], []>} : vector<8x128xf32>, vector<128x384xf32>, vector<8x384xf32> -> vector<8x384xf32>
    %375 = arith.addf %371, %374 : vector<8x384xf32>
    %c32_170 = arith.constant 32 : index
    %c0_171 = arith.constant 0 : index
    %376 = vector.load %arg6[%c32_170, %c0_171] : memref<64x384xf32, #tpu.memory_space<vmem>>, vector<8x384xf32>
    tpu.vector_store %arg6[%c32_170, %c0_171], %375 {strides = array<i32>} : memref<64x384xf32, #tpu.memory_space<vmem>>, vector<8x384xf32>,
    %c24_172 = arith.constant 24 : index
    %c0_173 = arith.constant 0 : index
    %377 = vector.load %arg6[%c24_172, %c0_173] : memref<64x384xf32, #tpu.memory_space<vmem>>, vector<8x384xf32>
    %c5_174 = arith.constant 5 : index
    %c0_175 = arith.constant 0 : index
    %c0_176 = arith.constant 0 : index
    %378 = vector.load %arg1[%c5_174, %c0_175, %c0_176] : memref<11x128x384xf32, #tpu.memory_space<vmem>>, vector<1x128x384xf32>
    %379 = vector.shape_cast %378 : vector<1x128x384xf32> to vector<128x384xf32>
    %cst_177 = arith.constant dense<0.000000e+00> : vector<8x384xf32>
    %380 = tpu.matmul %370, %379, %cst_177 {dimension_numbers = #tpu.dot_dimension_numbers<[1], [0], [0], [1], [0, 0, 1, 1], [], []>} : vector<8x128xf32>, vector<128x384xf32>, vector<8x384xf32> -> vector<8x384xf32>
    %381 = arith.addf %377, %380 : vector<8x384xf32>
    %c24_178 = arith.constant 24 : index
    %c0_179 = arith.constant 0 : index
    %382 = vector.load %arg6[%c24_178, %c0_179] : memref<64x384xf32, #tpu.memory_space<vmem>>, vector<8x384xf32>
    tpu.vector_store %arg6[%c24_178, %c0_179], %381 {strides = array<i32>} : memref<64x384xf32, #tpu.memory_space<vmem>>, vector<8x384xf32>,
    %c2_180 = arith.constant 2 : index
    %c0_181 = arith.constant 0 : index
    %c0_182 = arith.constant 0 : index
    %383 = vector.load %arg1[%c2_180, %c0_181, %c0_182] : memref<11x128x384xf32, #tpu.memory_space<vmem>>, vector<1x128x384xf32>
    %384 = vector.shape_cast %383 : vector<1x128x384xf32> to vector<128x384xf32>
    %cst_183 = arith.constant dense<0.000000e+00> : vector<8x384xf32>
    %385 = tpu.matmul %344, %384, %cst_183 {dimension_numbers = #tpu.dot_dimension_numbers<[1], [0], [0], [1], [0, 0, 1, 1], [], []>} : vector<8x128xf32>, vector<128x384xf32>, vector<8x384xf32> -> vector<8x384xf32>
    %c3_184 = arith.constant 3 : index
    %c0_185 = arith.constant 0 : index
    %c0_186 = arith.constant 0 : index
    %386 = vector.load %arg1[%c3_184, %c0_185, %c0_186] : memref<11x128x384xf32, #tpu.memory_space<vmem>>, vector<1x128x384xf32>
    %387 = vector.shape_cast %386 : vector<1x128x384xf32> to vector<128x384xf32>
    %cst_187 = arith.constant dense<0.000000e+00> : vector<8x384xf32>
    %388 = tpu.matmul %370, %387, %cst_187 {dimension_numbers = #tpu.dot_dimension_numbers<[1], [0], [0], [1], [0, 0, 1, 1], [], []>} : vector<8x128xf32>, vector<128x384xf32>, vector<8x384xf32> -> vector<8x384xf32>
    %c40_188 = arith.constant 40 : index
    %c0_189 = arith.constant 0 : index
    %389 = vector.load %arg4[%c40_188, %c0_189] : memref<64x384xf32, #tpu.memory_space<vmem>>, vector<8x384xf32>
    %390 = vector.extract_strided_slice %389 {offsets = [0, 0], sizes = [8, 128], strides = [1, 1]} : vector<8x384xf32> to vector<8x128xf32>
    %391 = vector.extract_strided_slice %385 {offsets = [0, 0], sizes = [8, 128], strides = [1, 1]} : vector<8x384xf32> to vector<8x128xf32>
    %392 = arith.addf %390, %391 : vector<8x128xf32>
    %393 = arith.negf %392 : vector<8x128xf32>
    %394 = math.exp %393 : vector<8x128xf32>
    %cst_190 = arith.constant 1.000000e+00 : f32
    %395 = vector.broadcast %cst_190 : f32 to vector<8x128xf32>
    %396 = arith.addf %395, %394 : vector<8x128xf32>
    %397 = arith.divf %395, %396 : vector<8x128xf32>
    %398 = vector.extract_strided_slice %389 {offsets = [0, 128], sizes = [8, 128], strides = [1, 1]} : vector<8x384xf32> to vector<8x128xf32>
    %399 = vector.extract_strided_slice %385 {offsets = [0, 128], sizes = [8, 128], strides = [1, 1]} : vector<8x384xf32> to vector<8x128xf32>
    %400 = arith.addf %398, %399 : vector<8x128xf32>
    %401 = arith.negf %400 : vector<8x128xf32>
    %402 = math.exp %401 : vector<8x128xf32>
    %cst_191 = arith.constant 1.000000e+00 : f32
    %403 = vector.broadcast %cst_191 : f32 to vector<8x128xf32>
    %404 = arith.addf %403, %402 : vector<8x128xf32>
    %405 = arith.divf %403, %404 : vector<8x128xf32>
    %406 = vector.extract_strided_slice %389 {offsets = [0, 256], sizes = [8, 128], strides = [1, 1]} : vector<8x384xf32> to vector<8x128xf32>
    %407 = vector.extract_strided_slice %385 {offsets = [0, 256], sizes = [8, 128], strides = [1, 1]} : vector<8x384xf32> to vector<8x128xf32>
    %408 = arith.addf %407, %21 : vector<8x128xf32>
    %409 = arith.mulf %397, %408 : vector<8x128xf32>
    %410 = arith.addf %406, %409 : vector<8x128xf32>
    %411 = math.tanh %410 : vector<8x128xf32>
    %412 = arith.subf %344, %411 : vector<8x128xf32>
    %413 = arith.mulf %405, %412 : vector<8x128xf32>
    %414 = arith.addf %411, %413 : vector<8x128xf32>
    %c16_192 = arith.constant 16 : index
    %c0_193 = arith.constant 0 : index
    %415 = vector.load %arg5[%c16_192, %c0_193] : memref<64x384xf32, #tpu.memory_space<vmem>>, vector<8x384xf32>
    %416 = vector.extract_strided_slice %415 {offsets = [0, 0], sizes = [8, 128], strides = [1, 1]} : vector<8x384xf32> to vector<8x128xf32>
    %417 = vector.extract_strided_slice %388 {offsets = [0, 0], sizes = [8, 128], strides = [1, 1]} : vector<8x384xf32> to vector<8x128xf32>
    %418 = arith.addf %416, %417 : vector<8x128xf32>
    %419 = arith.negf %418 : vector<8x128xf32>
    %420 = math.exp %419 : vector<8x128xf32>
    %cst_194 = arith.constant 1.000000e+00 : f32
    %421 = vector.broadcast %cst_194 : f32 to vector<8x128xf32>
    %422 = arith.addf %421, %420 : vector<8x128xf32>
    %423 = arith.divf %421, %422 : vector<8x128xf32>
    %424 = vector.extract_strided_slice %415 {offsets = [0, 128], sizes = [8, 128], strides = [1, 1]} : vector<8x384xf32> to vector<8x128xf32>
    %425 = vector.extract_strided_slice %388 {offsets = [0, 128], sizes = [8, 128], strides = [1, 1]} : vector<8x384xf32> to vector<8x128xf32>
    %426 = arith.addf %424, %425 : vector<8x128xf32>
    %427 = arith.negf %426 : vector<8x128xf32>
    %428 = math.exp %427 : vector<8x128xf32>
    %cst_195 = arith.constant 1.000000e+00 : f32
    %429 = vector.broadcast %cst_195 : f32 to vector<8x128xf32>
    %430 = arith.addf %429, %428 : vector<8x128xf32>
    %431 = arith.divf %429, %430 : vector<8x128xf32>
    %432 = vector.extract_strided_slice %415 {offsets = [0, 256], sizes = [8, 128], strides = [1, 1]} : vector<8x384xf32> to vector<8x128xf32>
    %433 = vector.extract_strided_slice %388 {offsets = [0, 256], sizes = [8, 128], strides = [1, 1]} : vector<8x384xf32> to vector<8x128xf32>
    %434 = arith.addf %433, %24 : vector<8x128xf32>
    %435 = arith.mulf %423, %434 : vector<8x128xf32>
    %436 = arith.addf %432, %435 : vector<8x128xf32>
    %437 = math.tanh %436 : vector<8x128xf32>
    %438 = arith.subf %370, %437 : vector<8x128xf32>
    %439 = arith.mulf %431, %438 : vector<8x128xf32>
    %440 = arith.addf %437, %439 : vector<8x128xf32>
    %c40_196 = arith.constant 40 : index
    %c0_197 = arith.constant 0 : index
    %441 = vector.load %arg6[%c40_196, %c0_197] : memref<64x384xf32, #tpu.memory_space<vmem>>, vector<8x384xf32>
    %c4_198 = arith.constant 4 : index
    %c0_199 = arith.constant 0 : index
    %c0_200 = arith.constant 0 : index
    %442 = vector.load %arg1[%c4_198, %c0_199, %c0_200] : memref<11x128x384xf32, #tpu.memory_space<vmem>>, vector<1x128x384xf32>
    %443 = vector.shape_cast %442 : vector<1x128x384xf32> to vector<128x384xf32>
    %cst_201 = arith.constant dense<0.000000e+00> : vector<8x384xf32>
    %444 = tpu.matmul %414, %443, %cst_201 {dimension_numbers = #tpu.dot_dimension_numbers<[1], [0], [0], [1], [0, 0, 1, 1], [], []>} : vector<8x128xf32>, vector<128x384xf32>, vector<8x384xf32> -> vector<8x384xf32>
    %445 = arith.addf %441, %444 : vector<8x384xf32>
    %c40_202 = arith.constant 40 : index
    %c0_203 = arith.constant 0 : index
    %446 = vector.load %arg6[%c40_202, %c0_203] : memref<64x384xf32, #tpu.memory_space<vmem>>, vector<8x384xf32>
    tpu.vector_store %arg6[%c40_202, %c0_203], %445 {strides = array<i32>} : memref<64x384xf32, #tpu.memory_space<vmem>>, vector<8x384xf32>,
    %c16_204 = arith.constant 16 : index
    %c0_205 = arith.constant 0 : index
    %447 = vector.load %arg6[%c16_204, %c0_205] : memref<64x384xf32, #tpu.memory_space<vmem>>, vector<8x384xf32>
    %c5_206 = arith.constant 5 : index
    %c0_207 = arith.constant 0 : index
    %c0_208 = arith.constant 0 : index
    %448 = vector.load %arg1[%c5_206, %c0_207, %c0_208] : memref<11x128x384xf32, #tpu.memory_space<vmem>>, vector<1x128x384xf32>
    %449 = vector.shape_cast %448 : vector<1x128x384xf32> to vector<128x384xf32>
    %cst_209 = arith.constant dense<0.000000e+00> : vector<8x384xf32>
    %450 = tpu.matmul %440, %449, %cst_209 {dimension_numbers = #tpu.dot_dimension_numbers<[1], [0], [0], [1], [0, 0, 1, 1], [], []>} : vector<8x128xf32>, vector<128x384xf32>, vector<8x384xf32> -> vector<8x384xf32>
    %451 = arith.addf %447, %450 : vector<8x384xf32>
    %c16_210 = arith.constant 16 : index
    %c0_211 = arith.constant 0 : index
    %452 = vector.load %arg6[%c16_210, %c0_211] : memref<64x384xf32, #tpu.memory_space<vmem>>, vector<8x384xf32>
    tpu.vector_store %arg6[%c16_210, %c0_211], %451 {strides = array<i32>} : memref<64x384xf32, #tpu.memory_space<vmem>>, vector<8x384xf32>,
    %c2_212 = arith.constant 2 : index
    %c0_213 = arith.constant 0 : index
    %c0_214 = arith.constant 0 : index
    %453 = vector.load %arg1[%c2_212, %c0_213, %c0_214] : memref<11x128x384xf32, #tpu.memory_space<vmem>>, vector<1x128x384xf32>
    %454 = vector.shape_cast %453 : vector<1x128x384xf32> to vector<128x384xf32>
    %cst_215 = arith.constant dense<0.000000e+00> : vector<8x384xf32>
    %455 = tpu.matmul %414, %454, %cst_215 {dimension_numbers = #tpu.dot_dimension_numbers<[1], [0], [0], [1], [0, 0, 1, 1], [], []>} : vector<8x128xf32>, vector<128x384xf32>, vector<8x384xf32> -> vector<8x384xf32>
    %c3_216 = arith.constant 3 : index
    %c0_217 = arith.constant 0 : index
    %c0_218 = arith.constant 0 : index
    %456 = vector.load %arg1[%c3_216, %c0_217, %c0_218] : memref<11x128x384xf32, #tpu.memory_space<vmem>>, vector<1x128x384xf32>
    %457 = vector.shape_cast %456 : vector<1x128x384xf32> to vector<128x384xf32>
    %cst_219 = arith.constant dense<0.000000e+00> : vector<8x384xf32>
    %458 = tpu.matmul %440, %457, %cst_219 {dimension_numbers = #tpu.dot_dimension_numbers<[1], [0], [0], [1], [0, 0, 1, 1], [], []>} : vector<8x128xf32>, vector<128x384xf32>, vector<8x384xf32> -> vector<8x384xf32>
    %c48_220 = arith.constant 48 : index
    %c0_221 = arith.constant 0 : index
    %459 = vector.load %arg4[%c48_220, %c0_221] : memref<64x384xf32, #tpu.memory_space<vmem>>, vector<8x384xf32>
    %460 = vector.extract_strided_slice %459 {offsets = [0, 0], sizes = [8, 128], strides = [1, 1]} : vector<8x384xf32> to vector<8x128xf32>
    %461 = vector.extract_strided_slice %455 {offsets = [0, 0], sizes = [8, 128], strides = [1, 1]} : vector<8x384xf32> to vector<8x128xf32>
    %462 = arith.addf %460, %461 : vector<8x128xf32>
    %463 = arith.negf %462 : vector<8x128xf32>
    %464 = math.exp %463 : vector<8x128xf32>
    %cst_222 = arith.constant 1.000000e+00 : f32
    %465 = vector.broadcast %cst_222 : f32 to vector<8x128xf32>
    %466 = arith.addf %465, %464 : vector<8x128xf32>
    %467 = arith.divf %465, %466 : vector<8x128xf32>
    %468 = vector.extract_strided_slice %459 {offsets = [0, 128], sizes = [8, 128], strides = [1, 1]} : vector<8x384xf32> to vector<8x128xf32>
    %469 = vector.extract_strided_slice %455 {offsets = [0, 128], sizes = [8, 128], strides = [1, 1]} : vector<8x384xf32> to vector<8x128xf32>
    %470 = arith.addf %468, %469 : vector<8x128xf32>
    %471 = arith.negf %470 : vector<8x128xf32>
    %472 = math.exp %471 : vector<8x128xf32>
    %cst_223 = arith.constant 1.000000e+00 : f32
    %473 = vector.broadcast %cst_223 : f32 to vector<8x128xf32>
    %474 = arith.addf %473, %472 : vector<8x128xf32>
    %475 = arith.divf %473, %474 : vector<8x128xf32>
    %476 = vector.extract_strided_slice %459 {offsets = [0, 256], sizes = [8, 128], strides = [1, 1]} : vector<8x384xf32> to vector<8x128xf32>
    %477 = vector.extract_strided_slice %455 {offsets = [0, 256], sizes = [8, 128], strides = [1, 1]} : vector<8x384xf32> to vector<8x128xf32>
    %478 = arith.addf %477, %21 : vector<8x128xf32>
    %479 = arith.mulf %467, %478 : vector<8x128xf32>
    %480 = arith.addf %476, %479 : vector<8x128xf32>
    %481 = math.tanh %480 : vector<8x128xf32>
    %482 = arith.subf %414, %481 : vector<8x128xf32>
    %483 = arith.mulf %475, %482 : vector<8x128xf32>
    %484 = arith.addf %481, %483 : vector<8x128xf32>
    %c8_224 = arith.constant 8 : index
    %c0_225 = arith.constant 0 : index
    %485 = vector.load %arg5[%c8_224, %c0_225] : memref<64x384xf32, #tpu.memory_space<vmem>>, vector<8x384xf32>
    %486 = vector.extract_strided_slice %485 {offsets = [0, 0], sizes = [8, 128], strides = [1, 1]} : vector<8x384xf32> to vector<8x128xf32>
    %487 = vector.extract_strided_slice %458 {offsets = [0, 0], sizes = [8, 128], strides = [1, 1]} : vector<8x384xf32> to vector<8x128xf32>
    %488 = arith.addf %486, %487 : vector<8x128xf32>
    %489 = arith.negf %488 : vector<8x128xf32>
    %490 = math.exp %489 : vector<8x128xf32>
    %cst_226 = arith.constant 1.000000e+00 : f32
    %491 = vector.broadcast %cst_226 : f32 to vector<8x128xf32>
    %492 = arith.addf %491, %490 : vector<8x128xf32>
    %493 = arith.divf %491, %492 : vector<8x128xf32>
    %494 = vector.extract_strided_slice %485 {offsets = [0, 128], sizes = [8, 128], strides = [1, 1]} : vector<8x384xf32> to vector<8x128xf32>
    %495 = vector.extract_strided_slice %458 {offsets = [0, 128], sizes = [8, 128], strides = [1, 1]} : vector<8x384xf32> to vector<8x128xf32>
    %496 = arith.addf %494, %495 : vector<8x128xf32>
    %497 = arith.negf %496 : vector<8x128xf32>
    %498 = math.exp %497 : vector<8x128xf32>
    %cst_227 = arith.constant 1.000000e+00 : f32
    %499 = vector.broadcast %cst_227 : f32 to vector<8x128xf32>
    %500 = arith.addf %499, %498 : vector<8x128xf32>
    %501 = arith.divf %499, %500 : vector<8x128xf32>
    %502 = vector.extract_strided_slice %485 {offsets = [0, 256], sizes = [8, 128], strides = [1, 1]} : vector<8x384xf32> to vector<8x128xf32>
    %503 = vector.extract_strided_slice %458 {offsets = [0, 256], sizes = [8, 128], strides = [1, 1]} : vector<8x384xf32> to vector<8x128xf32>
    %504 = arith.addf %503, %24 : vector<8x128xf32>
    %505 = arith.mulf %493, %504 : vector<8x128xf32>
    %506 = arith.addf %502, %505 : vector<8x128xf32>
    %507 = math.tanh %506 : vector<8x128xf32>
    %508 = arith.subf %440, %507 : vector<8x128xf32>
    %509 = arith.mulf %501, %508 : vector<8x128xf32>
    %510 = arith.addf %507, %509 : vector<8x128xf32>
    %c48_228 = arith.constant 48 : index
    %c0_229 = arith.constant 0 : index
    %511 = vector.load %arg6[%c48_228, %c0_229] : memref<64x384xf32, #tpu.memory_space<vmem>>, vector<8x384xf32>
    %c4_230 = arith.constant 4 : index
    %c0_231 = arith.constant 0 : index
    %c0_232 = arith.constant 0 : index
    %512 = vector.load %arg1[%c4_230, %c0_231, %c0_232] : memref<11x128x384xf32, #tpu.memory_space<vmem>>, vector<1x128x384xf32>
    %513 = vector.shape_cast %512 : vector<1x128x384xf32> to vector<128x384xf32>
    %cst_233 = arith.constant dense<0.000000e+00> : vector<8x384xf32>
    %514 = tpu.matmul %484, %513, %cst_233 {dimension_numbers = #tpu.dot_dimension_numbers<[1], [0], [0], [1], [0, 0, 1, 1], [], []>} : vector<8x128xf32>, vector<128x384xf32>, vector<8x384xf32> -> vector<8x384xf32>
    %515 = arith.addf %511, %514 : vector<8x384xf32>
    %c48_234 = arith.constant 48 : index
    %c0_235 = arith.constant 0 : index
    %516 = vector.load %arg6[%c48_234, %c0_235] : memref<64x384xf32, #tpu.memory_space<vmem>>, vector<8x384xf32>
    tpu.vector_store %arg6[%c48_234, %c0_235], %515 {strides = array<i32>} : memref<64x384xf32, #tpu.memory_space<vmem>>, vector<8x384xf32>,
    %c8_236 = arith.constant 8 : index
    %c0_237 = arith.constant 0 : index
    %517 = vector.load %arg6[%c8_236, %c0_237] : memref<64x384xf32, #tpu.memory_space<vmem>>, vector<8x384xf32>
    %c5_238 = arith.constant 5 : index
    %c0_239 = arith.constant 0 : index
    %c0_240 = arith.constant 0 : index
    %518 = vector.load %arg1[%c5_238, %c0_239, %c0_240] : memref<11x128x384xf32, #tpu.memory_space<vmem>>, vector<1x128x384xf32>
    %519 = vector.shape_cast %518 : vector<1x128x384xf32> to vector<128x384xf32>
    %cst_241 = arith.constant dense<0.000000e+00> : vector<8x384xf32>
    %520 = tpu.matmul %510, %519, %cst_241 {dimension_numbers = #tpu.dot_dimension_numbers<[1], [0], [0], [1], [0, 0, 1, 1], [], []>} : vector<8x128xf32>, vector<128x384xf32>, vector<8x384xf32> -> vector<8x384xf32>
    %521 = arith.addf %517, %520 : vector<8x384xf32>
    %c8_242 = arith.constant 8 : index
    %c0_243 = arith.constant 0 : index
    %522 = vector.load %arg6[%c8_242, %c0_243] : memref<64x384xf32, #tpu.memory_space<vmem>>, vector<8x384xf32>
    tpu.vector_store %arg6[%c8_242, %c0_243], %521 {strides = array<i32>} : memref<64x384xf32, #tpu.memory_space<vmem>>, vector<8x384xf32>,
    %c2_244 = arith.constant 2 : index
    %c0_245 = arith.constant 0 : index
    %c0_246 = arith.constant 0 : index
    %523 = vector.load %arg1[%c2_244, %c0_245, %c0_246] : memref<11x128x384xf32, #tpu.memory_space<vmem>>, vector<1x128x384xf32>
    %524 = vector.shape_cast %523 : vector<1x128x384xf32> to vector<128x384xf32>
    %cst_247 = arith.constant dense<0.000000e+00> : vector<8x384xf32>
    %525 = tpu.matmul %484, %524, %cst_247 {dimension_numbers = #tpu.dot_dimension_numbers<[1], [0], [0], [1], [0, 0, 1, 1], [], []>} : vector<8x128xf32>, vector<128x384xf32>, vector<8x384xf32> -> vector<8x384xf32>
    %c3_248 = arith.constant 3 : index
    %c0_249 = arith.constant 0 : index
    %c0_250 = arith.constant 0 : index
    %526 = vector.load %arg1[%c3_248, %c0_249, %c0_250] : memref<11x128x384xf32, #tpu.memory_space<vmem>>, vector<1x128x384xf32>
    %527 = vector.shape_cast %526 : vector<1x128x384xf32> to vector<128x384xf32>
    %cst_251 = arith.constant dense<0.000000e+00> : vector<8x384xf32>
    %528 = tpu.matmul %510, %527, %cst_251 {dimension_numbers = #tpu.dot_dimension_numbers<[1], [0], [0], [1], [0, 0, 1, 1], [], []>} : vector<8x128xf32>, vector<128x384xf32>, vector<8x384xf32> -> vector<8x384xf32>
    %c56_252 = arith.constant 56 : index
    %c0_253 = arith.constant 0 : index
    %529 = vector.load %arg4[%c56_252, %c0_253] : memref<64x384xf32, #tpu.memory_space<vmem>>, vector<8x384xf32>
    %530 = vector.extract_strided_slice %529 {offsets = [0, 0], sizes = [8, 128], strides = [1, 1]} : vector<8x384xf32> to vector<8x128xf32>
    %531 = vector.extract_strided_slice %525 {offsets = [0, 0], sizes = [8, 128], strides = [1, 1]} : vector<8x384xf32> to vector<8x128xf32>
    %532 = arith.addf %530, %531 : vector<8x128xf32>
    %533 = arith.negf %532 : vector<8x128xf32>
    %534 = math.exp %533 : vector<8x128xf32>
    %cst_254 = arith.constant 1.000000e+00 : f32
    %535 = vector.broadcast %cst_254 : f32 to vector<8x128xf32>
    %536 = arith.addf %535, %534 : vector<8x128xf32>
    %537 = arith.divf %535, %536 : vector<8x128xf32>
    %538 = vector.extract_strided_slice %529 {offsets = [0, 128], sizes = [8, 128], strides = [1, 1]} : vector<8x384xf32> to vector<8x128xf32>
    %539 = vector.extract_strided_slice %525 {offsets = [0, 128], sizes = [8, 128], strides = [1, 1]} : vector<8x384xf32> to vector<8x128xf32>
    %540 = arith.addf %538, %539 : vector<8x128xf32>
    %541 = arith.negf %540 : vector<8x128xf32>
    %542 = math.exp %541 : vector<8x128xf32>
    %cst_255 = arith.constant 1.000000e+00 : f32
    %543 = vector.broadcast %cst_255 : f32 to vector<8x128xf32>
    %544 = arith.addf %543, %542 : vector<8x128xf32>
    %545 = arith.divf %543, %544 : vector<8x128xf32>
    %546 = vector.extract_strided_slice %529 {offsets = [0, 256], sizes = [8, 128], strides = [1, 1]} : vector<8x384xf32> to vector<8x128xf32>
    %547 = vector.extract_strided_slice %525 {offsets = [0, 256], sizes = [8, 128], strides = [1, 1]} : vector<8x384xf32> to vector<8x128xf32>
    %548 = arith.addf %547, %21 : vector<8x128xf32>
    %549 = arith.mulf %537, %548 : vector<8x128xf32>
    %550 = arith.addf %546, %549 : vector<8x128xf32>
    %551 = math.tanh %550 : vector<8x128xf32>
    %552 = arith.subf %484, %551 : vector<8x128xf32>
    %553 = arith.mulf %545, %552 : vector<8x128xf32>
    %554 = arith.addf %551, %553 : vector<8x128xf32>
    %c0_256 = arith.constant 0 : index
    %c0_257 = arith.constant 0 : index
    %555 = vector.load %arg5[%c0_256, %c0_257] : memref<64x384xf32, #tpu.memory_space<vmem>>, vector<8x384xf32>
    %556 = vector.extract_strided_slice %555 {offsets = [0, 0], sizes = [8, 128], strides = [1, 1]} : vector<8x384xf32> to vector<8x128xf32>
    %557 = vector.extract_strided_slice %528 {offsets = [0, 0], sizes = [8, 128], strides = [1, 1]} : vector<8x384xf32> to vector<8x128xf32>
    %558 = arith.addf %556, %557 : vector<8x128xf32>
    %559 = arith.negf %558 : vector<8x128xf32>
    %560 = math.exp %559 : vector<8x128xf32>
    %cst_258 = arith.constant 1.000000e+00 : f32
    %561 = vector.broadcast %cst_258 : f32 to vector<8x128xf32>
    %562 = arith.addf %561, %560 : vector<8x128xf32>
    %563 = arith.divf %561, %562 : vector<8x128xf32>
    %564 = vector.extract_strided_slice %555 {offsets = [0, 128], sizes = [8, 128], strides = [1, 1]} : vector<8x384xf32> to vector<8x128xf32>
    %565 = vector.extract_strided_slice %528 {offsets = [0, 128], sizes = [8, 128], strides = [1, 1]} : vector<8x384xf32> to vector<8x128xf32>
    %566 = arith.addf %564, %565 : vector<8x128xf32>
    %567 = arith.negf %566 : vector<8x128xf32>
    %568 = math.exp %567 : vector<8x128xf32>
    %cst_259 = arith.constant 1.000000e+00 : f32
    %569 = vector.broadcast %cst_259 : f32 to vector<8x128xf32>
    %570 = arith.addf %569, %568 : vector<8x128xf32>
    %571 = arith.divf %569, %570 : vector<8x128xf32>
    %572 = vector.extract_strided_slice %555 {offsets = [0, 256], sizes = [8, 128], strides = [1, 1]} : vector<8x384xf32> to vector<8x128xf32>
    %573 = vector.extract_strided_slice %528 {offsets = [0, 256], sizes = [8, 128], strides = [1, 1]} : vector<8x384xf32> to vector<8x128xf32>
    %574 = arith.addf %573, %24 : vector<8x128xf32>
    %575 = arith.mulf %563, %574 : vector<8x128xf32>
    %576 = arith.addf %572, %575 : vector<8x128xf32>
    %577 = math.tanh %576 : vector<8x128xf32>
    %578 = arith.subf %510, %577 : vector<8x128xf32>
    %579 = arith.mulf %571, %578 : vector<8x128xf32>
    %580 = arith.addf %577, %579 : vector<8x128xf32>
    %c56_260 = arith.constant 56 : index
    %c0_261 = arith.constant 0 : index
    %581 = vector.load %arg6[%c56_260, %c0_261] : memref<64x384xf32, #tpu.memory_space<vmem>>, vector<8x384xf32>
    %c4_262 = arith.constant 4 : index
    %c0_263 = arith.constant 0 : index
    %c0_264 = arith.constant 0 : index
    %582 = vector.load %arg1[%c4_262, %c0_263, %c0_264] : memref<11x128x384xf32, #tpu.memory_space<vmem>>, vector<1x128x384xf32>
    %583 = vector.shape_cast %582 : vector<1x128x384xf32> to vector<128x384xf32>
    %cst_265 = arith.constant dense<0.000000e+00> : vector<8x384xf32>
    %584 = tpu.matmul %554, %583, %cst_265 {dimension_numbers = #tpu.dot_dimension_numbers<[1], [0], [0], [1], [0, 0, 1, 1], [], []>} : vector<8x128xf32>, vector<128x384xf32>, vector<8x384xf32> -> vector<8x384xf32>
    %585 = arith.addf %581, %584 : vector<8x384xf32>
    %c56_266 = arith.constant 56 : index
    %c0_267 = arith.constant 0 : index
    %586 = vector.load %arg6[%c56_266, %c0_267] : memref<64x384xf32, #tpu.memory_space<vmem>>, vector<8x384xf32>
    tpu.vector_store %arg6[%c56_266, %c0_267], %585 {strides = array<i32>} : memref<64x384xf32, #tpu.memory_space<vmem>>, vector<8x384xf32>,
    %c0_268 = arith.constant 0 : index
    %c0_269 = arith.constant 0 : index
    %587 = vector.load %arg6[%c0_268, %c0_269] : memref<64x384xf32, #tpu.memory_space<vmem>>, vector<8x384xf32>
    %c5_270 = arith.constant 5 : index
    %c0_271 = arith.constant 0 : index
    %c0_272 = arith.constant 0 : index
    %588 = vector.load %arg1[%c5_270, %c0_271, %c0_272] : memref<11x128x384xf32, #tpu.memory_space<vmem>>, vector<1x128x384xf32>
    %589 = vector.shape_cast %588 : vector<1x128x384xf32> to vector<128x384xf32>
    %cst_273 = arith.constant dense<0.000000e+00> : vector<8x384xf32>
    %590 = tpu.matmul %580, %589, %cst_273 {dimension_numbers = #tpu.dot_dimension_numbers<[1], [0], [0], [1], [0, 0, 1, 1], [], []>} : vector<8x128xf32>, vector<128x384xf32>, vector<8x384xf32> -> vector<8x384xf32>
    %591 = arith.addf %587, %590 : vector<8x384xf32>
    %c0_274 = arith.constant 0 : index
    %c0_275 = arith.constant 0 : index
    %592 = vector.load %arg6[%c0_274, %c0_275] : memref<64x384xf32, #tpu.memory_space<vmem>>, vector<8x384xf32>
    tpu.vector_store %arg6[%c0_274, %c0_275], %591 {strides = array<i32>} : memref<64x384xf32, #tpu.memory_space<vmem>>, vector<8x384xf32>,
    %c7 = arith.constant 7 : index
    %c0_276 = arith.constant 0 : index
    %c0_277 = arith.constant 0 : index
    %593 = vector.load %arg1[%c7, %c0_276, %c0_277] : memref<11x128x384xf32, #tpu.memory_space<vmem>>, vector<1x128x384xf32>
    %594 = vector.shape_cast %593 : vector<1x128x384xf32> to vector<128x384xf32>
    %cst_278 = arith.constant dense<0.000000e+00> : vector<8x384xf32>
    %595 = tpu.matmul %554, %594, %cst_278 {dimension_numbers = #tpu.dot_dimension_numbers<[1], [0], [0], [1], [0, 0, 1, 1], [], []>} : vector<8x128xf32>, vector<128x384xf32>, vector<8x384xf32> -> vector<8x384xf32>
    %596 = arith.addf %102, %595 : vector<8x384xf32>
    %c7_279 = arith.constant 7 : index
    %c0_280 = arith.constant 0 : index
    %597 = vector.load %arg2[%c7_279, %c0_280] : memref<16x384xf32, #tpu.memory_space<vmem>>, vector<1x128xf32>
    %598 = vector.shape_cast %597 : vector<1x128xf32> to vector<1x128xf32>
    %599 = vector.broadcast %598 : vector<1x128xf32> to vector<8x128xf32>
    %600 = vector.extract_strided_slice %596 {offsets = [0, 0], sizes = [8, 128], strides = [1, 1]} : vector<8x384xf32> to vector<8x128xf32>
    %601 = arith.negf %600 : vector<8x128xf32>
    %602 = math.exp %601 : vector<8x128xf32>
    %cst_281 = arith.constant 1.000000e+00 : f32
    %603 = vector.broadcast %cst_281 : f32 to vector<8x128xf32>
    %604 = arith.addf %603, %602 : vector<8x128xf32>
    %605 = arith.divf %603, %604 : vector<8x128xf32>
    %606 = vector.extract_strided_slice %596 {offsets = [0, 128], sizes = [8, 128], strides = [1, 1]} : vector<8x384xf32> to vector<8x128xf32>
    %607 = arith.negf %606 : vector<8x128xf32>
    %608 = math.exp %607 : vector<8x128xf32>
    %cst_282 = arith.constant 1.000000e+00 : f32
    %609 = vector.broadcast %cst_282 : f32 to vector<8x128xf32>
    %610 = arith.addf %609, %608 : vector<8x128xf32>
    %611 = arith.divf %609, %610 : vector<8x128xf32>
    %612 = vector.extract_strided_slice %596 {offsets = [0, 256], sizes = [8, 128], strides = [1, 1]} : vector<8x384xf32> to vector<8x128xf32>
    %613 = arith.mulf %605, %599 : vector<8x128xf32>
    %614 = arith.addf %612, %613 : vector<8x128xf32>
    %615 = math.tanh %614 : vector<8x128xf32>
    %616 = arith.mulf %611, %615 : vector<8x128xf32>
    %617 = arith.subf %615, %616 : vector<8x128xf32>
    %c6 = arith.constant 6 : index
    %c0_283 = arith.constant 0 : index
    %618 = vector.load %arg2[%c6, %c0_283] : memref<16x384xf32, #tpu.memory_space<vmem>>, vector<1x128xf32>
    %619 = vector.shape_cast %618 : vector<1x128xf32> to vector<1x128xf32>
    %620 = vector.broadcast %619 : vector<1x128xf32> to vector<8x128xf32>
    %cst_284 = arith.constant 0.000000e+00 : f32
    %621 = vector.broadcast %cst_284 : f32 to vector<8x128xf32>
    %c6_285 = arith.constant 6 : index
    %c0_286 = arith.constant 0 : index
    %c0_287 = arith.constant 0 : index
    %622 = vector.load %arg1[%c6_285, %c0_286, %c0_287] : memref<11x128x384xf32, #tpu.memory_space<vmem>>, vector<1x128x384xf32>
    %623 = vector.shape_cast %622 : vector<1x128x384xf32> to vector<128x384xf32>
    %cst_288 = arith.constant dense<0.000000e+00> : vector<8x384xf32>
    %624 = tpu.matmul %621, %623, %cst_288 {dimension_numbers = #tpu.dot_dimension_numbers<[1], [0], [0], [1], [0, 0, 1, 1], [], []>} : vector<8x128xf32>, vector<128x384xf32>, vector<8x384xf32> -> vector<8x384xf32>
    %c0_289 = arith.constant 0 : index
    %c0_290 = arith.constant 0 : index
    %625 = vector.load %arg6[%c0_289, %c0_290] : memref<64x384xf32, #tpu.memory_space<vmem>>, vector<8x384xf32>
    %626 = vector.extract_strided_slice %625 {offsets = [0, 0], sizes = [8, 128], strides = [1, 1]} : vector<8x384xf32> to vector<8x128xf32>
    %627 = vector.extract_strided_slice %624 {offsets = [0, 0], sizes = [8, 128], strides = [1, 1]} : vector<8x384xf32> to vector<8x128xf32>
    %628 = arith.addf %626, %627 : vector<8x128xf32>
    %629 = arith.negf %628 : vector<8x128xf32>
    %630 = math.exp %629 : vector<8x128xf32>
    %cst_291 = arith.constant 1.000000e+00 : f32
    %631 = vector.broadcast %cst_291 : f32 to vector<8x128xf32>
    %632 = arith.addf %631, %630 : vector<8x128xf32>
    %633 = arith.divf %631, %632 : vector<8x128xf32>
    %634 = vector.extract_strided_slice %625 {offsets = [0, 128], sizes = [8, 128], strides = [1, 1]} : vector<8x384xf32> to vector<8x128xf32>
    %635 = vector.extract_strided_slice %624 {offsets = [0, 128], sizes = [8, 128], strides = [1, 1]} : vector<8x384xf32> to vector<8x128xf32>
    %636 = arith.addf %634, %635 : vector<8x128xf32>
    %637 = arith.negf %636 : vector<8x128xf32>
    %638 = math.exp %637 : vector<8x128xf32>
    %cst_292 = arith.constant 1.000000e+00 : f32
    %639 = vector.broadcast %cst_292 : f32 to vector<8x128xf32>
    %640 = arith.addf %639, %638 : vector<8x128xf32>
    %641 = arith.divf %639, %640 : vector<8x128xf32>
    %642 = vector.extract_strided_slice %625 {offsets = [0, 256], sizes = [8, 128], strides = [1, 1]} : vector<8x384xf32> to vector<8x128xf32>
    %643 = vector.extract_strided_slice %624 {offsets = [0, 256], sizes = [8, 128], strides = [1, 1]} : vector<8x384xf32> to vector<8x128xf32>
    %644 = arith.addf %643, %620 : vector<8x128xf32>
    %645 = arith.mulf %633, %644 : vector<8x128xf32>
    %646 = arith.addf %642, %645 : vector<8x128xf32>
    %647 = math.tanh %646 : vector<8x128xf32>
    %648 = arith.subf %621, %647 : vector<8x128xf32>
    %649 = arith.mulf %641, %648 : vector<8x128xf32>
    %650 = arith.addf %647, %649 : vector<8x128xf32>
    %c6_293 = arith.constant 6 : index
    %c0_294 = arith.constant 0 : index
    %c0_295 = arith.constant 0 : index
    %651 = vector.load %arg1[%c6_293, %c0_294, %c0_295] : memref<11x128x384xf32, #tpu.memory_space<vmem>>, vector<1x128x384xf32>
    %652 = vector.shape_cast %651 : vector<1x128x384xf32> to vector<128x384xf32>
    %cst_296 = arith.constant dense<0.000000e+00> : vector<8x384xf32>
    %653 = tpu.matmul %650, %652, %cst_296 {dimension_numbers = #tpu.dot_dimension_numbers<[1], [0], [0], [1], [0, 0, 1, 1], [], []>} : vector<8x128xf32>, vector<128x384xf32>, vector<8x384xf32> -> vector<8x384xf32>
    %c8_297 = arith.constant 8 : index
    %c0_298 = arith.constant 0 : index
    %654 = vector.load %arg6[%c8_297, %c0_298] : memref<64x384xf32, #tpu.memory_space<vmem>>, vector<8x384xf32>
    %655 = vector.extract_strided_slice %654 {offsets = [0, 0], sizes = [8, 128], strides = [1, 1]} : vector<8x384xf32> to vector<8x128xf32>
    %656 = vector.extract_strided_slice %653 {offsets = [0, 0], sizes = [8, 128], strides = [1, 1]} : vector<8x384xf32> to vector<8x128xf32>
    %657 = arith.addf %655, %656 : vector<8x128xf32>
    %658 = arith.negf %657 : vector<8x128xf32>
    %659 = math.exp %658 : vector<8x128xf32>
    %cst_299 = arith.constant 1.000000e+00 : f32
    %660 = vector.broadcast %cst_299 : f32 to vector<8x128xf32>
    %661 = arith.addf %660, %659 : vector<8x128xf32>
    %662 = arith.divf %660, %661 : vector<8x128xf32>
    %663 = vector.extract_strided_slice %654 {offsets = [0, 128], sizes = [8, 128], strides = [1, 1]} : vector<8x384xf32> to vector<8x128xf32>
    %664 = vector.extract_strided_slice %653 {offsets = [0, 128], sizes = [8, 128], strides = [1, 1]} : vector<8x384xf32> to vector<8x128xf32>
    %665 = arith.addf %663, %664 : vector<8x128xf32>
    %666 = arith.negf %665 : vector<8x128xf32>
    %667 = math.exp %666 : vector<8x128xf32>
    %cst_300 = arith.constant 1.000000e+00 : f32
    %668 = vector.broadcast %cst_300 : f32 to vector<8x128xf32>
    %669 = arith.addf %668, %667 : vector<8x128xf32>
    %670 = arith.divf %668, %669 : vector<8x128xf32>
    %671 = vector.extract_strided_slice %654 {offsets = [0, 256], sizes = [8, 128], strides = [1, 1]} : vector<8x384xf32> to vector<8x128xf32>
    %672 = vector.extract_strided_slice %653 {offsets = [0, 256], sizes = [8, 128], strides = [1, 1]} : vector<8x384xf32> to vector<8x128xf32>
    %673 = arith.addf %672, %620 : vector<8x128xf32>
    %674 = arith.mulf %662, %673 : vector<8x128xf32>
    %675 = arith.addf %671, %674 : vector<8x128xf32>
    %676 = math.tanh %675 : vector<8x128xf32>
    %677 = arith.subf %650, %676 : vector<8x128xf32>
    %678 = arith.mulf %670, %677 : vector<8x128xf32>
    %679 = arith.addf %676, %678 : vector<8x128xf32>
    %c6_301 = arith.constant 6 : index
    %c0_302 = arith.constant 0 : index
    %c0_303 = arith.constant 0 : index
    %680 = vector.load %arg1[%c6_301, %c0_302, %c0_303] : memref<11x128x384xf32, #tpu.memory_space<vmem>>, vector<1x128x384xf32>
    %681 = vector.shape_cast %680 : vector<1x128x384xf32> to vector<128x384xf32>
    %cst_304 = arith.constant dense<0.000000e+00> : vector<8x384xf32>
    %682 = tpu.matmul %679, %681, %cst_304 {dimension_numbers = #tpu.dot_dimension_numbers<[1], [0], [0], [1], [0, 0, 1, 1], [], []>} : vector<8x128xf32>, vector<128x384xf32>, vector<8x384xf32> -> vector<8x384xf32>
    %c16_305 = arith.constant 16 : index
    %c0_306 = arith.constant 0 : index
    %683 = vector.load %arg6[%c16_305, %c0_306] : memref<64x384xf32, #tpu.memory_space<vmem>>, vector<8x384xf32>
    %684 = vector.extract_strided_slice %683 {offsets = [0, 0], sizes = [8, 128], strides = [1, 1]} : vector<8x384xf32> to vector<8x128xf32>
    %685 = vector.extract_strided_slice %682 {offsets = [0, 0], sizes = [8, 128], strides = [1, 1]} : vector<8x384xf32> to vector<8x128xf32>
    %686 = arith.addf %684, %685 : vector<8x128xf32>
    %687 = arith.negf %686 : vector<8x128xf32>
    %688 = math.exp %687 : vector<8x128xf32>
    %cst_307 = arith.constant 1.000000e+00 : f32
    %689 = vector.broadcast %cst_307 : f32 to vector<8x128xf32>
    %690 = arith.addf %689, %688 : vector<8x128xf32>
    %691 = arith.divf %689, %690 : vector<8x128xf32>
    %692 = vector.extract_strided_slice %683 {offsets = [0, 128], sizes = [8, 128], strides = [1, 1]} : vector<8x384xf32> to vector<8x128xf32>
    %693 = vector.extract_strided_slice %682 {offsets = [0, 128], sizes = [8, 128], strides = [1, 1]} : vector<8x384xf32> to vector<8x128xf32>
    %694 = arith.addf %692, %693 : vector<8x128xf32>
    %695 = arith.negf %694 : vector<8x128xf32>
    %696 = math.exp %695 : vector<8x128xf32>
    %cst_308 = arith.constant 1.000000e+00 : f32
    %697 = vector.broadcast %cst_308 : f32 to vector<8x128xf32>
    %698 = arith.addf %697, %696 : vector<8x128xf32>
    %699 = arith.divf %697, %698 : vector<8x128xf32>
    %700 = vector.extract_strided_slice %683 {offsets = [0, 256], sizes = [8, 128], strides = [1, 1]} : vector<8x384xf32> to vector<8x128xf32>
    %701 = vector.extract_strided_slice %682 {offsets = [0, 256], sizes = [8, 128], strides = [1, 1]} : vector<8x384xf32> to vector<8x128xf32>
    %702 = arith.addf %701, %620 : vector<8x128xf32>
    %703 = arith.mulf %691, %702 : vector<8x128xf32>
    %704 = arith.addf %700, %703 : vector<8x128xf32>
    %705 = math.tanh %704 : vector<8x128xf32>
    %706 = arith.subf %679, %705 : vector<8x128xf32>
    %707 = arith.mulf %699, %706 : vector<8x128xf32>
    %708 = arith.addf %705, %707 : vector<8x128xf32>
    %c6_309 = arith.constant 6 : index
    %c0_310 = arith.constant 0 : index
    %c0_311 = arith.constant 0 : index
    %709 = vector.load %arg1[%c6_309, %c0_310, %c0_311] : memref<11x128x384xf32, #tpu.memory_space<vmem>>, vector<1x128x384xf32>
    %710 = vector.shape_cast %709 : vector<1x128x384xf32> to vector<128x384xf32>
    %cst_312 = arith.constant dense<0.000000e+00> : vector<8x384xf32>
    %711 = tpu.matmul %708, %710, %cst_312 {dimension_numbers = #tpu.dot_dimension_numbers<[1], [0], [0], [1], [0, 0, 1, 1], [], []>} : vector<8x128xf32>, vector<128x384xf32>, vector<8x384xf32> -> vector<8x384xf32>
    %c24_313 = arith.constant 24 : index
    %c0_314 = arith.constant 0 : index
    %712 = vector.load %arg6[%c24_313, %c0_314] : memref<64x384xf32, #tpu.memory_space<vmem>>, vector<8x384xf32>
    %713 = vector.extract_strided_slice %712 {offsets = [0, 0], sizes = [8, 128], strides = [1, 1]} : vector<8x384xf32> to vector<8x128xf32>
    %714 = vector.extract_strided_slice %711 {offsets = [0, 0], sizes = [8, 128], strides = [1, 1]} : vector<8x384xf32> to vector<8x128xf32>
    %715 = arith.addf %713, %714 : vector<8x128xf32>
    %716 = arith.negf %715 : vector<8x128xf32>
    %717 = math.exp %716 : vector<8x128xf32>
    %cst_315 = arith.constant 1.000000e+00 : f32
    %718 = vector.broadcast %cst_315 : f32 to vector<8x128xf32>
    %719 = arith.addf %718, %717 : vector<8x128xf32>
    %720 = arith.divf %718, %719 : vector<8x128xf32>
    %721 = vector.extract_strided_slice %712 {offsets = [0, 128], sizes = [8, 128], strides = [1, 1]} : vector<8x384xf32> to vector<8x128xf32>
    %722 = vector.extract_strided_slice %711 {offsets = [0, 128], sizes = [8, 128], strides = [1, 1]} : vector<8x384xf32> to vector<8x128xf32>
    %723 = arith.addf %721, %722 : vector<8x128xf32>
    %724 = arith.negf %723 : vector<8x128xf32>
    %725 = math.exp %724 : vector<8x128xf32>
    %cst_316 = arith.constant 1.000000e+00 : f32
    %726 = vector.broadcast %cst_316 : f32 to vector<8x128xf32>
    %727 = arith.addf %726, %725 : vector<8x128xf32>
    %728 = arith.divf %726, %727 : vector<8x128xf32>
    %729 = vector.extract_strided_slice %712 {offsets = [0, 256], sizes = [8, 128], strides = [1, 1]} : vector<8x384xf32> to vector<8x128xf32>
    %730 = vector.extract_strided_slice %711 {offsets = [0, 256], sizes = [8, 128], strides = [1, 1]} : vector<8x384xf32> to vector<8x128xf32>
    %731 = arith.addf %730, %620 : vector<8x128xf32>
    %732 = arith.mulf %720, %731 : vector<8x128xf32>
    %733 = arith.addf %729, %732 : vector<8x128xf32>
    %734 = math.tanh %733 : vector<8x128xf32>
    %735 = arith.subf %708, %734 : vector<8x128xf32>
    %736 = arith.mulf %728, %735 : vector<8x128xf32>
    %737 = arith.addf %734, %736 : vector<8x128xf32>
    %c6_317 = arith.constant 6 : index
    %c0_318 = arith.constant 0 : index
    %c0_319 = arith.constant 0 : index
    %738 = vector.load %arg1[%c6_317, %c0_318, %c0_319] : memref<11x128x384xf32, #tpu.memory_space<vmem>>, vector<1x128x384xf32>
    %739 = vector.shape_cast %738 : vector<1x128x384xf32> to vector<128x384xf32>
    %cst_320 = arith.constant dense<0.000000e+00> : vector<8x384xf32>
    %740 = tpu.matmul %737, %739, %cst_320 {dimension_numbers = #tpu.dot_dimension_numbers<[1], [0], [0], [1], [0, 0, 1, 1], [], []>} : vector<8x128xf32>, vector<128x384xf32>, vector<8x384xf32> -> vector<8x384xf32>
    %c32_321 = arith.constant 32 : index
    %c0_322 = arith.constant 0 : index
    %741 = vector.load %arg6[%c32_321, %c0_322] : memref<64x384xf32, #tpu.memory_space<vmem>>, vector<8x384xf32>
    %742 = vector.extract_strided_slice %741 {offsets = [0, 0], sizes = [8, 128], strides = [1, 1]} : vector<8x384xf32> to vector<8x128xf32>
    %743 = vector.extract_strided_slice %740 {offsets = [0, 0], sizes = [8, 128], strides = [1, 1]} : vector<8x384xf32> to vector<8x128xf32>
    %744 = arith.addf %742, %743 : vector<8x128xf32>
    %745 = arith.negf %744 : vector<8x128xf32>
    %746 = math.exp %745 : vector<8x128xf32>
    %cst_323 = arith.constant 1.000000e+00 : f32
    %747 = vector.broadcast %cst_323 : f32 to vector<8x128xf32>
    %748 = arith.addf %747, %746 : vector<8x128xf32>
    %749 = arith.divf %747, %748 : vector<8x128xf32>
    %750 = vector.extract_strided_slice %741 {offsets = [0, 128], sizes = [8, 128], strides = [1, 1]} : vector<8x384xf32> to vector<8x128xf32>
    %751 = vector.extract_strided_slice %740 {offsets = [0, 128], sizes = [8, 128], strides = [1, 1]} : vector<8x384xf32> to vector<8x128xf32>
    %752 = arith.addf %750, %751 : vector<8x128xf32>
    %753 = arith.negf %752 : vector<8x128xf32>
    %754 = math.exp %753 : vector<8x128xf32>
    %cst_324 = arith.constant 1.000000e+00 : f32
    %755 = vector.broadcast %cst_324 : f32 to vector<8x128xf32>
    %756 = arith.addf %755, %754 : vector<8x128xf32>
    %757 = arith.divf %755, %756 : vector<8x128xf32>
    %758 = vector.extract_strided_slice %741 {offsets = [0, 256], sizes = [8, 128], strides = [1, 1]} : vector<8x384xf32> to vector<8x128xf32>
    %759 = vector.extract_strided_slice %740 {offsets = [0, 256], sizes = [8, 128], strides = [1, 1]} : vector<8x384xf32> to vector<8x128xf32>
    %760 = arith.addf %759, %620 : vector<8x128xf32>
    %761 = arith.mulf %749, %760 : vector<8x128xf32>
    %762 = arith.addf %758, %761 : vector<8x128xf32>
    %763 = math.tanh %762 : vector<8x128xf32>
    %764 = arith.subf %737, %763 : vector<8x128xf32>
    %765 = arith.mulf %757, %764 : vector<8x128xf32>
    %766 = arith.addf %763, %765 : vector<8x128xf32>
    %c6_325 = arith.constant 6 : index
    %c0_326 = arith.constant 0 : index
    %c0_327 = arith.constant 0 : index
    %767 = vector.load %arg1[%c6_325, %c0_326, %c0_327] : memref<11x128x384xf32, #tpu.memory_space<vmem>>, vector<1x128x384xf32>
    %768 = vector.shape_cast %767 : vector<1x128x384xf32> to vector<128x384xf32>
    %cst_328 = arith.constant dense<0.000000e+00> : vector<8x384xf32>
    %769 = tpu.matmul %766, %768, %cst_328 {dimension_numbers = #tpu.dot_dimension_numbers<[1], [0], [0], [1], [0, 0, 1, 1], [], []>} : vector<8x128xf32>, vector<128x384xf32>, vector<8x384xf32> -> vector<8x384xf32>
    %c40_329 = arith.constant 40 : index
    %c0_330 = arith.constant 0 : index
    %770 = vector.load %arg6[%c40_329, %c0_330] : memref<64x384xf32, #tpu.memory_space<vmem>>, vector<8x384xf32>
    %771 = vector.extract_strided_slice %770 {offsets = [0, 0], sizes = [8, 128], strides = [1, 1]} : vector<8x384xf32> to vector<8x128xf32>
    %772 = vector.extract_strided_slice %769 {offsets = [0, 0], sizes = [8, 128], strides = [1, 1]} : vector<8x384xf32> to vector<8x128xf32>
    %773 = arith.addf %771, %772 : vector<8x128xf32>
    %774 = arith.negf %773 : vector<8x128xf32>
    %775 = math.exp %774 : vector<8x128xf32>
    %cst_331 = arith.constant 1.000000e+00 : f32
    %776 = vector.broadcast %cst_331 : f32 to vector<8x128xf32>
    %777 = arith.addf %776, %775 : vector<8x128xf32>
    %778 = arith.divf %776, %777 : vector<8x128xf32>
    %779 = vector.extract_strided_slice %770 {offsets = [0, 128], sizes = [8, 128], strides = [1, 1]} : vector<8x384xf32> to vector<8x128xf32>
    %780 = vector.extract_strided_slice %769 {offsets = [0, 128], sizes = [8, 128], strides = [1, 1]} : vector<8x384xf32> to vector<8x128xf32>
    %781 = arith.addf %779, %780 : vector<8x128xf32>
    %782 = arith.negf %781 : vector<8x128xf32>
    %783 = math.exp %782 : vector<8x128xf32>
    %cst_332 = arith.constant 1.000000e+00 : f32
    %784 = vector.broadcast %cst_332 : f32 to vector<8x128xf32>
    %785 = arith.addf %784, %783 : vector<8x128xf32>
    %786 = arith.divf %784, %785 : vector<8x128xf32>
    %787 = vector.extract_strided_slice %770 {offsets = [0, 256], sizes = [8, 128], strides = [1, 1]} : vector<8x384xf32> to vector<8x128xf32>
    %788 = vector.extract_strided_slice %769 {offsets = [0, 256], sizes = [8, 128], strides = [1, 1]} : vector<8x384xf32> to vector<8x128xf32>
    %789 = arith.addf %788, %620 : vector<8x128xf32>
    %790 = arith.mulf %778, %789 : vector<8x128xf32>
    %791 = arith.addf %787, %790 : vector<8x128xf32>
    %792 = math.tanh %791 : vector<8x128xf32>
    %793 = arith.subf %766, %792 : vector<8x128xf32>
    %794 = arith.mulf %786, %793 : vector<8x128xf32>
    %795 = arith.addf %792, %794 : vector<8x128xf32>
    %c6_333 = arith.constant 6 : index
    %c0_334 = arith.constant 0 : index
    %c0_335 = arith.constant 0 : index
    %796 = vector.load %arg1[%c6_333, %c0_334, %c0_335] : memref<11x128x384xf32, #tpu.memory_space<vmem>>, vector<1x128x384xf32>
    %797 = vector.shape_cast %796 : vector<1x128x384xf32> to vector<128x384xf32>
    %cst_336 = arith.constant dense<0.000000e+00> : vector<8x384xf32>
    %798 = tpu.matmul %795, %797, %cst_336 {dimension_numbers = #tpu.dot_dimension_numbers<[1], [0], [0], [1], [0, 0, 1, 1], [], []>} : vector<8x128xf32>, vector<128x384xf32>, vector<8x384xf32> -> vector<8x384xf32>
    %c48_337 = arith.constant 48 : index
    %c0_338 = arith.constant 0 : index
    %799 = vector.load %arg6[%c48_337, %c0_338] : memref<64x384xf32, #tpu.memory_space<vmem>>, vector<8x384xf32>
    %800 = vector.extract_strided_slice %799 {offsets = [0, 0], sizes = [8, 128], strides = [1, 1]} : vector<8x384xf32> to vector<8x128xf32>
    %801 = vector.extract_strided_slice %798 {offsets = [0, 0], sizes = [8, 128], strides = [1, 1]} : vector<8x384xf32> to vector<8x128xf32>
    %802 = arith.addf %800, %801 : vector<8x128xf32>
    %803 = arith.negf %802 : vector<8x128xf32>
    %804 = math.exp %803 : vector<8x128xf32>
    %cst_339 = arith.constant 1.000000e+00 : f32
    %805 = vector.broadcast %cst_339 : f32 to vector<8x128xf32>
    %806 = arith.addf %805, %804 : vector<8x128xf32>
    %807 = arith.divf %805, %806 : vector<8x128xf32>
    %808 = vector.extract_strided_slice %799 {offsets = [0, 128], sizes = [8, 128], strides = [1, 1]} : vector<8x384xf32> to vector<8x128xf32>
    %809 = vector.extract_strided_slice %798 {offsets = [0, 128], sizes = [8, 128], strides = [1, 1]} : vector<8x384xf32> to vector<8x128xf32>
    %810 = arith.addf %808, %809 : vector<8x128xf32>
    %811 = arith.negf %810 : vector<8x128xf32>
    %812 = math.exp %811 : vector<8x128xf32>
    %cst_340 = arith.constant 1.000000e+00 : f32
    %813 = vector.broadcast %cst_340 : f32 to vector<8x128xf32>
    %814 = arith.addf %813, %812 : vector<8x128xf32>
    %815 = arith.divf %813, %814 : vector<8x128xf32>
    %816 = vector.extract_strided_slice %799 {offsets = [0, 256], sizes = [8, 128], strides = [1, 1]} : vector<8x384xf32> to vector<8x128xf32>
    %817 = vector.extract_strided_slice %798 {offsets = [0, 256], sizes = [8, 128], strides = [1, 1]} : vector<8x384xf32> to vector<8x128xf32>
    %818 = arith.addf %817, %620 : vector<8x128xf32>
    %819 = arith.mulf %807, %818 : vector<8x128xf32>
    %820 = arith.addf %816, %819 : vector<8x128xf32>
    %821 = math.tanh %820 : vector<8x128xf32>
    %822 = arith.subf %795, %821 : vector<8x128xf32>
    %823 = arith.mulf %815, %822 : vector<8x128xf32>
    %824 = arith.addf %821, %823 : vector<8x128xf32>
    %c6_341 = arith.constant 6 : index
    %c0_342 = arith.constant 0 : index
    %c0_343 = arith.constant 0 : index
    %825 = vector.load %arg1[%c6_341, %c0_342, %c0_343] : memref<11x128x384xf32, #tpu.memory_space<vmem>>, vector<1x128x384xf32>
    %826 = vector.shape_cast %825 : vector<1x128x384xf32> to vector<128x384xf32>
    %cst_344 = arith.constant dense<0.000000e+00> : vector<8x384xf32>
    %827 = tpu.matmul %824, %826, %cst_344 {dimension_numbers = #tpu.dot_dimension_numbers<[1], [0], [0], [1], [0, 0, 1, 1], [], []>} : vector<8x128xf32>, vector<128x384xf32>, vector<8x384xf32> -> vector<8x384xf32>
    %c56_345 = arith.constant 56 : index
    %c0_346 = arith.constant 0 : index
    %828 = vector.load %arg6[%c56_345, %c0_346] : memref<64x384xf32, #tpu.memory_space<vmem>>, vector<8x384xf32>
    %829 = vector.extract_strided_slice %828 {offsets = [0, 0], sizes = [8, 128], strides = [1, 1]} : vector<8x384xf32> to vector<8x128xf32>
    %830 = vector.extract_strided_slice %827 {offsets = [0, 0], sizes = [8, 128], strides = [1, 1]} : vector<8x384xf32> to vector<8x128xf32>
    %831 = arith.addf %829, %830 : vector<8x128xf32>
    %832 = arith.negf %831 : vector<8x128xf32>
    %833 = math.exp %832 : vector<8x128xf32>
    %cst_347 = arith.constant 1.000000e+00 : f32
    %834 = vector.broadcast %cst_347 : f32 to vector<8x128xf32>
    %835 = arith.addf %834, %833 : vector<8x128xf32>
    %836 = arith.divf %834, %835 : vector<8x128xf32>
    %837 = vector.extract_strided_slice %828 {offsets = [0, 128], sizes = [8, 128], strides = [1, 1]} : vector<8x384xf32> to vector<8x128xf32>
    %838 = vector.extract_strided_slice %827 {offsets = [0, 128], sizes = [8, 128], strides = [1, 1]} : vector<8x384xf32> to vector<8x128xf32>
    %839 = arith.addf %837, %838 : vector<8x128xf32>
    %840 = arith.negf %839 : vector<8x128xf32>
    %841 = math.exp %840 : vector<8x128xf32>
    %cst_348 = arith.constant 1.000000e+00 : f32
    %842 = vector.broadcast %cst_348 : f32 to vector<8x128xf32>
    %843 = arith.addf %842, %841 : vector<8x128xf32>
    %844 = arith.divf %842, %843 : vector<8x128xf32>
    %845 = vector.extract_strided_slice %828 {offsets = [0, 256], sizes = [8, 128], strides = [1, 1]} : vector<8x384xf32> to vector<8x128xf32>
    %846 = vector.extract_strided_slice %827 {offsets = [0, 256], sizes = [8, 128], strides = [1, 1]} : vector<8x384xf32> to vector<8x128xf32>
    %847 = arith.addf %846, %620 : vector<8x128xf32>
    %848 = arith.mulf %836, %847 : vector<8x128xf32>
    %849 = arith.addf %845, %848 : vector<8x128xf32>
    %850 = math.tanh %849 : vector<8x128xf32>
    %851 = arith.subf %824, %850 : vector<8x128xf32>
    %852 = arith.mulf %844, %851 : vector<8x128xf32>
    %853 = arith.addf %850, %852 : vector<8x128xf32>
    %c9 = arith.constant 9 : index
    %c0_349 = arith.constant 0 : index
    %c0_350 = arith.constant 0 : index
    %854 = vector.load %arg1[%c9, %c0_349, %c0_350] : memref<11x128x384xf32, #tpu.memory_space<vmem>>, vector<1x128x384xf32>
    %855 = vector.shape_cast %854 : vector<1x128x384xf32> to vector<128x384xf32>
    %cst_351 = arith.constant dense<0.000000e+00> : vector<8x384xf32>
    %856 = tpu.matmul %853, %855, %cst_351 {dimension_numbers = #tpu.dot_dimension_numbers<[1], [0], [0], [1], [0, 0, 1, 1], [], []>} : vector<8x128xf32>, vector<128x384xf32>, vector<8x384xf32> -> vector<8x384xf32>
    %c10 = arith.constant 10 : index
    %c0_352 = arith.constant 0 : index
    %c0_353 = arith.constant 0 : index
    %857 = vector.load %arg1[%c10, %c0_352, %c0_353] : memref<11x128x384xf32, #tpu.memory_space<vmem>>, vector<1x128x384xf32>
    %858 = vector.shape_cast %857 : vector<1x128x384xf32> to vector<128x384xf32>
    %cst_354 = arith.constant dense<0.000000e+00> : vector<8x384xf32>
    %859 = tpu.matmul %617, %858, %cst_354 {dimension_numbers = #tpu.dot_dimension_numbers<[1], [0], [0], [1], [0, 0, 1, 1], [], []>} : vector<8x128xf32>, vector<128x384xf32>, vector<8x384xf32> -> vector<8x384xf32>
    %860 = arith.addf %856, %859 : vector<8x384xf32>
    %c8_355 = arith.constant 8 : index
    %c0_356 = arith.constant 0 : index
    %861 = vector.load %arg2[%c8_355, %c0_356] : memref<16x384xf32, #tpu.memory_space<vmem>>, vector<1x384xf32>
    %862 = vector.broadcast %861 : vector<1x384xf32> to vector<8x384xf32>
    %863 = arith.addf %860, %862 : vector<8x384xf32>
    %864 = vector.extract_strided_slice %863 {offsets = [0, 0], sizes = [8, 128], strides = [1, 1]} : vector<8x384xf32> to vector<8x128xf32>
    %c0_357 = arith.constant 0 : index
    %c0_358 = arith.constant 0 : index
    %865 = vector.load %arg3[%c0_357, %c0_358] : memref<8x128xf32, #tpu.memory_space<vmem>>, vector<8x128xf32>
    tpu.vector_store %arg3[%c0_357, %c0_358], %864 {strides = array<i32>} : memref<8x128xf32, #tpu.memory_space<vmem>>, vector<8x128xf32>,
    return
  }
}

</mosaic_0001>

<bundles_post_ra>
// kernel: rnn_forward.1
= control target key start
LH: loop header
LB: loop body
LE: loop exit
PB: predicated region body
PF: predicated region fallthrough
CT: control target
= control target key end

     0   :  { %8 = vsyncpa [#allocation6], 0  ;;  %s17013_s0 = inlined_call_operand.vmem [shape: f32[64,128], index: 0, kind: input, shape index: {}]   ;;  %s17014_s1 = inlined_call_operand.hbm [shape: f32[11,128,384], index: 1, kind: input, shape index: {}]   ;;  %s17015_s2 = inlined_call_operand.hbm [shape: f32[16,384], index: 2, kind: input, shape index: {}]   ;;  %s17016_s3 = inlined_call_operand.vmem [shape: f32[8,128], index: 3, kind: output, shape index: {}]  }
   0x1   :  { %9 = vsyncpa [#allocation8], 0  ;;  %s14646_s12 = smov [#allocation5]   ;;  %s14598_s16 = scalar_lea.hbm %s17014_s1, 67584 }
   0x2   :  { %s17_s13 = sshll.u32 %s14646_s12, 4  ;;  %p14599_p0 = scmp.ne.s32.totalorder %s17014_s1, %s14598_s16  ;;  %s18_s13 = int_to_ptr.vmem [resolvable:$true] %s17_s13 }
   0x3   :  { %p14602_p1 = scmp.lt.u32.totalorder %s14598_s16, %s17014_s1 }
   0x5   :  { %p14604_p2 = pnand %p14602_p1, %p14599_p0 }
   0x7   :  { %14607 = shalt.err (!%p14604_p2)
}
   0x8   :  { %s14608_s21 = scalar_lea.vmem %s18_s13, 67584  ;;  %p14613_p4 = scmp.lt.s32.totalorder %s18_s13, %s18_s13 }
   0x9   :  { %p14609_p3 = scmp.ne.s32.totalorder %s18_s13, %s14608_s21  ;;  %p14614_p5 = scmp.lt.s32.totalorder %s14608_s21, %s14608_s21 }
   0xb   :  { %p14615_p6 = por %p14614_p5, %p14613_p4 }
   0xd   :  { %p14616_p7 = pnand %p14615_p6, %p14609_p3 }
   0xf   :  { %14619 = shalt.err (!%p14616_p7)
}
  0x10   :  { %s14647_s22 = smov 384   ;;  %s14648_s23 = smov 24  }
  0x11   :  { %23 = dma.hbm_to_vmem [thread:$0]  %s17014_s1, 67584, %s18_s13, [#allocation6], %s14647_s22, %s14647_s22, %s14648_s23  }
  0x12   :  { %s14649_s26 = smov [#allocation7]   ;;  %s14620_s30 = scalar_lea.hbm %s17015_s2, 768 }
  0x13   :  { %s29_s27 = sshll.u32 %s14649_s26, 4  ;;  %p14621_p8 = scmp.ne.s32.totalorder %s17015_s2, %s14620_s30  ;;  %s30_s27 = int_to_ptr.vmem [resolvable:$true] %s29_s27 }
  0x14   :  { %p14624_p9 = scmp.lt.u32.totalorder %s14620_s30, %s17015_s2 }
  0x16   :  { %p14626_p10 = pnand %p14624_p9, %p14621_p8 }
  0x18   :  { %14629 = shalt.err (!%p14626_p10)
}
  0x19   :  { %s14630_s8 = scalar_lea.vmem %s30_s27, 768  ;;  %p14635_p12 = scmp.lt.s32.totalorder %s30_s27, %s30_s27 }
  0x1a   :  { %p14631_p11 = scmp.ne.s32.totalorder %s30_s27, %s14630_s8  ;;  %p14636_p13 = scmp.lt.s32.totalorder %s14630_s8, %s14630_s8 }
  0x1c   :  { %p14637_p0 = por %p14636_p13, %p14635_p12 }
  0x1e   :  { %p14638_p1 = pnand %p14637_p0, %p14631_p11 }
  0x20   :  { %14641 = shalt.err (!%p14638_p1)
}
  0x21   :  { %35 = dma.hbm_to_vmem [thread:$0]  %s17015_s2, 768, %s30_s27, [#allocation8], %s14647_s22, %s14647_s22, %s14648_s23  }
  0x22   :  { %14642 = dma.done.wait [#allocation6], 67584  }
  0x23   :  { %14643 = vsyncadd [#allocation6], 4294899712 }
  0x24   :  { %14644 = dma.done.wait [#allocation8], 768  }
  0x25   :  { %14645 = vsyncadd [#allocation8], 4294966528  ;;  %v17017_v0 = vmov 0.0   ;;  %v51_v1 = vld [vmem:[#allocation5 + $0x8] sm:$0xff]  ;;  %v54_v2 = vld [vmem:[#allocation5 + $0x20] sm:$0xff]  ;;  %vm14652_vm0 = vmmov 0  }
  0x26   :  { %179 = vmatprep.mubr.f32.mxu0 %v17017_v0  ;;  %v50_v3 = vld [vmem:[#allocation5] sm:$0xff]  ;;  %v11671_v4 = vpack.c.bf16 %v54_v2, %v51_v1  ;;  %v53_v5 = vld [vmem:[#allocation5 + $0x18] sm:$0xff]  ;;  %v60_v7 = vld [vmem:[#allocation5 + $0x50] sm:$0xff] }
  0x27   :  { %v57_v6 = vld [vmem:[#allocation5 + $0x38] sm:$0xff]  ;;  %v11673_v8 = vpack.c.bf16 %v53_v5, %v50_v3  ;;  %v56_v10 = vld [vmem:[#allocation5 + $0x30] sm:$0xff]  ;;  %v59_v11 = vld [vmem:[#allocation5 + $0x48] sm:$0xff] }
  0x28   :  { %v11675_v9 = vpack.c.bf16 %v60_v7, %v57_v6  ;;  %v63_v12 = vld [vmem:[#allocation5 + $0x68] sm:$0xff]  ;;  %11672 = vmatprep.subr.bf16.mxu0 %v11671_v4  ;;  %v66_v13 = vld [vmem:[#allocation5 + $0x80] sm:$0xff]  ;;  %v11677_v14 = vpack.c.bf16 %v59_v11, %v56_v10  ;;  %v65_v17 = vld [vmem:[#allocation5 + $0x78] sm:$0xff] }
  0x29   :  { %11674 = vmatpush1.bf16.msra.mxu0 %v11673_v8  ;;  %v11679_v15 = vpack.c.bf16 %v66_v13, %v63_v12  ;;  %v62_v16 = vld [vmem:[#allocation5 + $0x60] sm:$0xff]  ;;  %v69_v18 = vld [vmem:[#allocation5 + $0x98] sm:$0xff]  ;;  %v72_v19 = vld [vmem:[#allocation5 + $0xb0] sm:$0xff] }
  0x2a   :  { %11676 = vmatprep.subr.bf16.mxu0 %v11675_v9  ;;  %v11681_v20 = vpack.c.bf16 %v65_v17, %v62_v16  ;;  %v68_v21 = vld [vmem:[#allocation5 + $0x90] sm:$0xff]  ;;  %v11683_v22 = vpack.c.bf16 %v72_v19, %v69_v18  ;;  %v71_v23 = vld [vmem:[#allocation5 + $0xa8] sm:$0xff]  ;;  %v78_v27 = vld [vmem:[#allocation5 + $0xe0] sm:$0xff] }
  0x2b   :  { %v52_v24 = vld [vmem:[#allocation5 + $0x10] sm:$0xff]  ;;  %v55_v25 = vld [vmem:[#allocation5 + $0x28] sm:$0xff]  ;;  %v58_v29 = vld [vmem:[#allocation5 + $0x40] sm:$0xff]  ;;  %v11685_v31 = vpack.c.bf16 %v71_v23, %v68_v21 }
  0x2c   :  { %v75_v26 = vld [vmem:[#allocation5 + $0xc8] sm:$0xff]  ;;  %v11703_v28 = vpack.c.bf16 %v55_v25, %v52_v24  ;;  %v61_v30 = vld [vmem:[#allocation5 + $0x58] sm:$0xff]  ;;  %v74_v32 = vld [vmem:[#allocation5 + $0xc0] sm:$0xff] }
  0x2d   :  { %11678 = vmatpush1.bf16.msra.mxu0 %v11677_v14  ;;  %v11707_v33 = vpack.c.bf16 %v61_v30, %v58_v29  ;;  %v11687_v34 = vpack.c.bf16 %v78_v27, %v75_v26  ;;  %v77_v35 = vld [vmem:[#allocation5 + $0xd8] sm:$0xff]  ;;  %v14701_v36 = vld [vmem:[%s17013_s0] sm:$0xff]  ;;  %v64_v37 = vld [vmem:[#allocation5 + $0x70] sm:$0xff] }
  0x2e   :  { %11680 = vmatprep.subr.bf16.mxu0 %v11679_v15  ;;  %11704 = vmatprep.subr.bf16.mxu1 %v11703_v28  ;;  %v81_v38 = vld [vmem:[#allocation5 + $0xf8] sm:$0xff]  ;;  %v84_v39 = vld [vmem:[#allocation5 + $0x110] sm:$0xff]  ;;  %v67_v40 = vld [vmem:[#allocation5 + $0x88] sm:$0xff]  ;;  %v11689_v42 = vpack.c.bf16 %v77_v35, %v74_v32 }
  0x2f   :  { %11706 = vmatpush3.bf16.msra.mxu1 %v11703_v28  ;;  %10145 = vmatprep.mubr.f32.mxu1 %v14701_v36  ;;  %v11711_v41 = vpack.c.bf16 %v67_v40, %v64_v37  ;;  %v70_v43 = vld [vmem:[#allocation5 + $0xa0] sm:$0xff]  ;;  %v73_v44 = vld [vmem:[#allocation5 + $0xb8] sm:$0xff]  ;;  %v11691_v45 = vpack.c.bf16 %v84_v39, %v81_v38  ;;  %v80_v46 = vld [vmem:[#allocation5 + $0xf0] sm:$0xff] }
  0x30   :  { %11708 = vmatprep.subr.bf16.mxu1 %v11707_v33  ;;  %v83_v47 = vld [vmem:[#allocation5 + $0x108] sm:$0xff]  ;;  %v90_v49 = vld [vmem:[#allocation5 + $0x140] sm:$0xff]  ;;  %v11715_v50 = vpack.c.bf16 %v73_v44, %v70_v43  ;;  %v76_v51 = vld [vmem:[#allocation5 + $0xd0] sm:$0xff] }
  0x31   :  { %11682 = vmatpush1.bf16.msra.mxu0 %v11681_v20  ;;  %v87_v48 = vld [vmem:[#allocation5 + $0x128] sm:$0xff]  ;;  %v11693_v53 = vpack.c.bf16 %v83_v47, %v80_v46  ;;  %v86_v55 = vld [vmem:[#allocation5 + $0x120] sm:$0xff]  ;;  %v89_v56 = vld [vmem:[#allocation5 + $0x138] sm:$0xff] }
  0x32   :  { %11684 = vmatprep.subr.bf16.mxu0 %v11683_v22  ;;  %v79_v52 = vld [vmem:[#allocation5 + $0xe8] sm:$0xff]  ;;  %v11695_v54 = vpack.c.bf16 %v90_v49, %v87_v48  ;;  %v93_v57 = vld [vmem:[#allocation5 + $0x158] sm:$0xff]  ;;  %v96_v58 = vld [vmem:[#allocation5 + $0x170] sm:$0xff]  ;;  %v11697_v62 = vpack.c.bf16 %v89_v56, %v86_v55 }
  0x33   :  { %11710 = vmatpush3.bf16.msra.mxu1 %v11707_v33  ;;  %v11719_v59 = vpack.c.bf16 %v79_v52, %v76_v51  ;;  %v82_v60 = vld [vmem:[#allocation5 + $0x100] sm:$0xff]  ;;  %v85_v61 = vld [vmem:[#allocation5 + $0x118] sm:$0xff]  ;;  %v11699_v63 = vpack.c.bf16 %v96_v58, %v93_v57  ;;  %v92_v1 = vld [vmem:[#allocation5 + $0x150] sm:$0xff] }
  0x34   :  { %11712 = vmatprep.subr.bf16.mxu1 %v11711_v41  ;;  %v95_v2 = vld [vmem:[#allocation5 + $0x168] sm:$0xff]  ;;  %v362_v4 = vld [vmem:[#allocation5 + $0x1a0] sm:$0xff]  ;;  %v11723_v5 = vpack.c.bf16 %v85_v61, %v82_v60  ;;  %v88_v6 = vld [vmem:[#allocation5 + $0x130] sm:$0xff] }
  0x35   :  { %11686 = vmatpush1.bf16.msra.mxu0 %v11685_v31  ;;  %v359_v3 = vld [vmem:[#allocation5 + $0x188] sm:$0xff]  ;;  %v11701_v8 = vpack.c.bf16 %v95_v2, %v92_v1  ;;  %v358_v10 = vld [vmem:[#allocation5 + $0x180] sm:$0xff]  ;;  %v361_v11 = vld [vmem:[#allocation5 + $0x198] sm:$0xff] }
  0x36   :  { %11688 = vmatprep.subr.bf16.mxu0 %v11687_v34  ;;  %v91_v7 = vld [vmem:[#allocation5 + $0x148] sm:$0xff]  ;;  %v11735_v9 = vpack.c.bf16 %v362_v4, %v359_v3  ;;  %v365_v12 = vld [vmem:[#allocation5 + $0x1b8] sm:$0xff]  ;;  %v368_v13 = vld [vmem:[#allocation5 + $0x1d0] sm:$0xff]  ;;  %v11737_v17 = vpack.c.bf16 %v361_v11, %v358_v10 }
  0x37   :  { %11714 = vmatpush3.bf16.msra.mxu1 %v11711_v41  ;;  %v11727_v14 = vpack.c.bf16 %v91_v7, %v88_v6  ;;  %v94_v15 = vld [vmem:[#allocation5 + $0x160] sm:$0xff]  ;;  %v97_v16 = vld [vmem:[#allocation5 + $0x178] sm:$0xff]  ;;  %v11739_v18 = vpack.c.bf16 %v368_v13, %v365_v12  ;;  %v364_v19 = vld [vmem:[#allocation5 + $0x1b0] sm:$0xff] }
  0x38   :  { %11716 = vmatprep.subr.bf16.mxu1 %v11715_v50  ;;  %v367_v20 = vld [vmem:[#allocation5 + $0x1c8] sm:$0xff]  ;;  %v374_v22 = vld [vmem:[#allocation5 + $0x200] sm:$0xff]  ;;  %v11731_v23 = vpack.c.bf16 %v97_v16, %v94_v15  ;;  %v360_v24 = vld [vmem:[#allocation5 + $0x190] sm:$0xff] }
  0x39   :  { %11690 = vmatpush1.bf16.msra.mxu0 %v11689_v42  ;;  %v371_v21 = vld [vmem:[#allocation5 + $0x1e8] sm:$0xff]  ;;  %v11741_v27 = vpack.c.bf16 %v367_v20, %v364_v19  ;;  %v370_v29 = vld [vmem:[#allocation5 + $0x1e0] sm:$0xff]  ;;  %v373_v30 = vld [vmem:[#allocation5 + $0x1f8] sm:$0xff] }
  0x3a   :  { %11692 = vmatprep.subr.bf16.mxu0 %v11691_v45  ;;  %v363_v25 = vld [vmem:[#allocation5 + $0x1a8] sm:$0xff]  ;;  %v11743_v28 = vpack.c.bf16 %v374_v22, %v371_v21  ;;  %v377_v31 = vld [vmem:[#allocation5 + $0x218] sm:$0xff]  ;;  %v380_v32 = vld [vmem:[#allocation5 + $0x230] sm:$0xff]  ;;  %v11745_v35 = vpack.c.bf16 %v373_v30, %v370_v29 }
  0x3b   :  { %11718 = vmatpush3.bf16.msra.mxu1 %v11715_v50  ;;  %v14709_v26 = vld [vmem:[%s17013_s0 + $0x8] sm:$0xff]  ;;  %v11767_v33 = vpack.c.bf16 %v363_v25, %v360_v24  ;;  %v14716_v34 = vld [vmem:[%s17013_s0 + $0x10] sm:$0xff]  ;;  %v366_v37 = vld [vmem:[#allocation5 + $0x1c0] sm:$0xff]  ;;  %v11747_v39 = vpack.c.bf16 %v380_v32, %v377_v31 }
  0x3c   :  { %11720 = vmatprep.subr.bf16.mxu1 %v11719_v59  ;;  %v369_v38 = vld [vmem:[#allocation5 + $0x1d8] sm:$0xff]  ;;  %v376_v40 = vld [vmem:[#allocation5 + $0x210] sm:$0xff]  ;;  %v379_v41 = vld [vmem:[#allocation5 + $0x228] sm:$0xff] }
  0x3d   :  { %11694 = vmatpush1.bf16.msra.mxu0 %v11693_v53  ;;  %v383_v42 = vld [vmem:[#allocation5 + $0x248] sm:$0xff]  ;;  %v386_v43 = vld [vmem:[#allocation5 + $0x260] sm:$0xff]  ;;  %v11771_v44 = vpack.c.bf16 %v369_v38, %v366_v37  ;;  %v14723_v45 = vld [vmem:[%s17013_s0 + $0x18] sm:$0xff]  ;;  %v11749_v46 = vpack.c.bf16 %v379_v41, %v376_v40 }
  0x3e   :  { %11696 = vmatprep.subr.bf16.mxu0 %v11695_v54  ;;  %v372_v47 = vld [vmem:[#allocation5 + $0x1f0] sm:$0xff]  ;;  %v375_v48 = vld [vmem:[#allocation5 + $0x208] sm:$0xff]  ;;  %v11751_v49 = vpack.c.bf16 %v386_v43, %v383_v42  ;;  %v382_v50 = vld [vmem:[#allocation5 + $0x240] sm:$0xff] }
  0x3f   :  { %11722 = vmatpush3.bf16.msra.mxu1 %v11719_v59  ;;  %v385_v51 = vld [vmem:[#allocation5 + $0x258] sm:$0xff]  ;;  %v392_v53 = vld [vmem:[#allocation5 + $0x290] sm:$0xff]  ;;  %v11775_v54 = vpack.c.bf16 %v375_v48, %v372_v47  ;;  %v14732_v55 = vld [vmem:[%s17013_s0 + $0x20] sm:$0xff] }
  0x40   :  { %11724 = vmatprep.subr.bf16.mxu1 %v11723_v5  ;;  %v389_v52 = vld [vmem:[#allocation5 + $0x278] sm:$0xff]  ;;  %v11753_v56 = vpack.c.bf16 %v385_v51, %v382_v50  ;;  %v378_v57 = vld [vmem:[#allocation5 + $0x220] sm:$0xff]  ;;  %v388_v60 = vld [vmem:[#allocation5 + $0x270] sm:$0xff] }
  0x41   :  { %11698 = vmatpush1.bf16.msra.mxu0 %v11697_v62  ;;  %v381_v58 = vld [vmem:[#allocation5 + $0x238] sm:$0xff]  ;;  %v11755_v59 = vpack.c.bf16 %v392_v53, %v389_v52  ;;  %v391_v61 = vld [vmem:[#allocation5 + $0x288] sm:$0xff]  ;;  %v384_v4 = vld [vmem:[#allocation5 + $0x250] sm:$0xff] }
  0x42   :  { %11700 = vmatprep.subr.bf16.mxu0 %v11699_v63  ;;  %v395_v62 = vld [vmem:[#allocation5 + $0x2a8] sm:$0xff]  ;;  %v398_v63 = vld [vmem:[#allocation5 + $0x2c0] sm:$0xff]  ;;  %v11779_v1 = vpack.c.bf16 %v381_v58, %v378_v57  ;;  %v11757_v3 = vpack.c.bf16 %v391_v61, %v388_v60  ;;  %v14746_v6 = vld [vmem:[%s17013_s0 + $0x30] sm:$0xff]  ;;  %v17028_v60 = vmov 0.0|0.0  }
  0x43   :  { %11726 = vmatpush3.bf16.msra.mxu1 %v11723_v5  ;;  %v14741_v2 = vld [vmem:[%s17013_s0 + $0x28] sm:$0xff]  ;;  %v11759_v7 = vpack.c.bf16 %v398_v63, %v395_v62  ;;  %v401_v10 = vld [vmem:[#allocation5 + $0x2d8] sm:$0xff]  ;;  %v404_v11 = vld [vmem:[#allocation5 + $0x2f0] sm:$0xff] }
  0x44   :  { %11728 = vmatprep.subr.bf16.mxu1 %v11727_v14  ;;  %v387_v5 = vld [vmem:[#allocation5 + $0x268] sm:$0xff]  ;;  %v390_v15 = vld [vmem:[#allocation5 + $0x280] sm:$0xff]  ;;  %v393_v16 = vld [vmem:[#allocation5 + $0x298] sm:$0xff] }
  0x45   :  { %11702 = vmatpush1.bf16.msra.mxu0 %v11701_v8  ;;  %v394_v8 = vld [vmem:[#allocation5 + $0x2a0] sm:$0xff]  ;;  %v11783_v12 = vpack.c.bf16 %v387_v5, %v384_v4  ;;  %v403_v19 = vld [vmem:[#allocation5 + $0x2e8] sm:$0xff]  ;;  %v11787_v22 = vpack.c.bf16 %v393_v16, %v390_v15  ;;  %v396_v24 = vld [vmem:[#allocation5 + $0x2b0] sm:$0xff] }
  0x46   :  { %11736 = vmatprep.subr.bf16.mxu0 %v11735_v9  ;;  %v397_v9 = vld [vmem:[#allocation5 + $0x2b8] sm:$0xff]  ;;  %v712_v20 = vld [vmem:[#allocation5 + $0x308] sm:$0xff]  ;;  %v715_v21 = vld [vmem:[#allocation5 + $0x320] sm:$0xff] }
  0x47   :  { %11730 = vmatpush3.bf16.msra.mxu1 %v11727_v14  ;;  %v11761_v13 = vpack.c.bf16 %v397_v9, %v394_v8  ;;  %v14755_v14 = vld [vmem:[%s17013_s0 + $0x38] sm:$0xff]  ;;  %v399_v25 = vld [vmem:[#allocation5 + $0x2c8] sm:$0xff]  ;;  %v721_v31 = vld [vmem:[#allocation5 + $0x350] sm:$0xff] }
  0x48   :  { %180 = vmatmul.mubr.f32.vlgmr.msra.gmra.mrb[0].mxu0 %v14701_v36  ;;  %11732 = vmatprep.subr.bf16.mxu1 %v11731_v23  ;;  %v714_v29 = vld [vmem:[#allocation5 + $0x318] sm:$0xff]  ;;  %v11791_v32 = vpack.c.bf16 %v399_v25, %v396_v24  ;;  %v720_v40 = vld [vmem:[#allocation5 + $0x348] sm:$0xff]  ;;  %v727_v42 = vld [vmem:[#allocation5 + $0x380] sm:$0xff] }
  0x49   :  { %11738 = vmatpush1.bf16.msra.mxu0 %v11737_v17  ;;  %185 = vmatprep.mubr.f32.mxu0 %v17017_v0  ;;  %v11763_v17 = vpack.c.bf16 %v404_v11, %v401_v10  ;;  %v718_v30 = vld [vmem:[#allocation5 + $0x338] sm:$0xff]  ;;  %v724_v41 = vld [vmem:[#allocation5 + $0x368] sm:$0xff]  ;;  %v723_v47 = vld [vmem:[#allocation5 + $0x360] sm:$0xff] }
  0x4a   :  { %11740 = vmatprep.subr.bf16.mxu0 %v11739_v18  ;;  %v400_v18 = vld [vmem:[#allocation5 + $0x2d0] sm:$0xff]  ;;  %v405_v37 = vld [vmem:[#allocation5 + $0x2f8] sm:$0xff]  ;;  %v11803_v38 = vpack.c.bf16 %v721_v31, %v718_v30  ;;  %v716_v52 = vld [vmem:[#allocation5 + $0x328] sm:$0xff] }
  0x4b   :  { %11734 = vmatpush3.bf16.msra.mxu1 %v11731_v23  ;;  %v11765_v23 = vpack.c.bf16 %v403_v19, %v400_v18  ;;  %v726_v48 = vld [vmem:[#allocation5 + $0x378] sm:$0xff]  ;;  %v733_v50 = vld [vmem:[#allocation5 + $0x3b0] sm:$0xff]  ;;  %v736_v57 = vld [vmem:[#allocation5 + $0x3c8] sm:$0xff] }
  0x4c   :  { %186 = vmatmul.mubr.f32.gmra.mrb[2].mxu0 %v14709_v26  ;;  %11768 = vmatprep.subr.bf16.mxu1 %v11767_v33  ;;  %v713_v51 = vld [vmem:[#allocation5 + $0x310] sm:$0xff]  ;;  %v739_v58 = vld [vmem:[#allocation5 + $0x3e0] sm:$0xff]  ;;  %v722_v62 = vld [vmem:[#allocation5 + $0x358] sm:$0xff] }
  0x4d   :  { %11742 = vmatpush1.bf16.msra.mxu0 %v11741_v27  ;;  %191 = vmatprep.mubr.f32.mxu0 %v17017_v0  ;;  %v11799_v27 = vpack.c.bf16 %v715_v21, %v712_v20  ;;  %v719_v61 = vld [vmem:[#allocation5 + $0x340] sm:$0xff]  ;;  %v738_v4 = vld [vmem:[#allocation5 + $0x3d8] sm:$0xff]  ;;  %v725_v9 = vld [vmem:[#allocation5 + $0x370] sm:$0xff] }
  0x4e   :  { %11744 = vmatprep.subr.bf16.mxu0 %v11743_v28  ;;  %10146 = vmatmul.mubr.f32.vlgmr.msra.gmra.mrb[0].mxu1 %v14709_v26  ;;  %v711_v28 = vld [vmem:[#allocation5 + $0x300] sm:$0xff]  ;;  %v742_v5 = vld [vmem:[#allocation5 + $0x3f8] sm:$0xff]  ;;  %v11835_v8 = vpack.c.bf16 %v722_v62, %v719_v61  ;;  %v728_v10 = vld [vmem:[#allocation5 + $0x388] sm:$0xff] }
  0x4f   :  { %11770 = vmatpush3.bf16.msra.mxu1 %v11767_v33  ;;  %10148 = vmatprep.mubr.f32.mxu1 %v14716_v34  ;;  %v11801_v33 = vpack.c.bf16 %v714_v29, %v711_v28  ;;  %v748_v15 = vld [vmem:[#allocation5 + $0x428] sm:$0xff]  ;;  %v751_v16 = vld [vmem:[#allocation5 + $0x440] sm:$0xff]  ;;  %v734_v18 = vld [vmem:[#allocation5 + $0x3b8] sm:$0xff] }
  0x50   :  { %192 = vmatmul.mubr.f32.gmra.mrb[4].mxu0 %v14716_v34  ;;  %11772 = vmatprep.subr.bf16.mxu1 %v11771_v44  ;;  %v11823_v20 = vpack.c.bf16 %v751_v16, %v748_v15  ;;  %v747_v21 = vld [vmem:[#allocation5 + $0x420] sm:$0xff]  ;;  %v740_v25 = vld [vmem:[#allocation5 + $0x3e8] sm:$0xff]  ;;  %v753_v29 = vld [vmem:[#allocation5 + $0x450] sm:$0xff] }
  0x51   :  { %11746 = vmatpush1.bf16.msra.mxu0 %v11745_v35  ;;  %197 = vmatprep.mubr.f32.mxu0 %v17017_v0  ;;  %v402_v35 = vld [vmem:[#allocation5 + $0x2e0] sm:$0xff]  ;;  %v756_v30 = vld [vmem:[#allocation5 + $0x468] sm:$0xff]  ;;  %v903_v62 = vld [vmem:[#allocation5 + $0x490] sm:$0xff] }
  0x52   :  { %11748 = vmatprep.subr.bf16.mxu0 %v11747_v39  ;;  %10149 = vmatmul.mubr.f32.gmra.mrb[2].mxu1 %v14723_v45  ;;  %v717_v39 = vld [vmem:[#allocation5 + $0x330] sm:$0xff]  ;;  %v11795_v43 = vpack.c.bf16 %v405_v37, %v402_v35  ;;  %v902_v31 = vld [vmem:[#allocation5 + $0x488] sm:$0xff]  ;;  %v746_v35 = vld [vmem:[#allocation5 + $0x418] sm:$0xff]  ;;  %v11829_v37 = vpack.c.bf16 %v756_v30, %v753_v29 }
  0x53   :  { %11774 = vmatpush3.bf16.msra.mxu1 %v11771_v44  ;;  %10151 = vmatprep.mubr.f32.mxu1 %v14732_v55  ;;  %v11805_v44 = vpack.c.bf16 %v720_v40, %v717_v39  ;;  %v901_v39 = vld [vmem:[#allocation5 + $0x480] sm:$0xff]  ;;  %v904_v40 = vld [vmem:[#allocation5 + $0x498] sm:$0xff] }
  0x54   :  { %198 = vmatmul.mubr.f32.gmra.mrb[6].mxu0 %v14723_v45  ;;  %11776 = vmatprep.subr.bf16.mxu1 %v11775_v54  ;;  %v928_v15 = vld [vmem:[#allocation5 + $0x558] sm:$0xff]  ;;  %v937_v30 = vld [vmem:[#allocation5 + $0x5a0] sm:$0xff] }
  0x55   :  { %11750 = vmatpush1.bf16.msra.mxu0 %v11749_v46  ;;  %203 = vmatprep.mubr.f32.mxu0 %v17017_v0  ;;  %v11807_v46 = vpack.c.bf16 %v727_v42, %v724_v41  ;;  %v908_v41 = vld [vmem:[#allocation5 + $0x4b8] sm:$0xff]  ;;  %v911_v42 = vld [vmem:[#allocation5 + $0x4d0] sm:$0xff] }
  0x56   :  { %11752 = vmatprep.subr.bf16.mxu0 %v11751_v49  ;;  %10152 = vmatmul.mubr.f32.gmra.mrb[4].mxu1 %v14741_v2  ;;  %v730_v49 = vld [vmem:[#allocation5 + $0x398] sm:$0xff] }
  0x57   :  { %11778 = vmatpush3.bf16.msra.mxu1 %v11775_v54  ;;  %10154 = vmatprep.mubr.f32.mxu1 %v14746_v6  ;;  %v11811_v53 = vpack.c.bf16 %v733_v50, %v730_v49  ;;  %v729_v54 = vld [vmem:[#allocation5 + $0x390] sm:$0xff]  ;;  %v910_v49 = vld [vmem:[#allocation5 + $0x4c8] sm:$0xff]  ;;  %v932_v16 = vld [vmem:[#allocation5 + $0x578] sm:$0xff] }
  0x58   :  { %204 = vmatmul.mubr.f32.gmra.mrb[8].mxu0 %v14732_v55  ;;  %11780 = vmatprep.subr.bf16.mxu1 %v11779_v1  ;;  %v914_v50 = vld [vmem:[#allocation5 + $0x4e8] sm:$0xff] }
  0x59   :  { %11754 = vmatpush1.bf16.msra.mxu0 %v11753_v56  ;;  %209 = vmatprep.mubr.f32.mxu0 %v17017_v0  ;;  %v732_v56 = vld [vmem:[#allocation5 + $0x3a8] sm:$0xff] }
  0x5a   :  { %11756 = vmatprep.subr.bf16.mxu0 %v11755_v59  ;;  %10155 = vmatmul.mubr.f32.gmra.mrb[6].mxu1 %v14755_v14  ;;  %v11832_v59 = vpack.c.bf16 %v716_v52, %v713_v51  ;;  %v11813_v63 = vpack.c.bf16 %v732_v56, %v729_v54  ;;  %v917_v51 = vld [vmem:[#allocation5 + $0x500] sm:$0xff] }
  0x5b   :  { %11782 = vmatpush3.bf16.msra.mxu1 %v11779_v1  ;;  %10189 = vmatprep.mubr.f32.mxu1 %v14701_v36  ;;  %v11815_v1 = vpack.c.bf16 %v739_v58, %v736_v57  ;;  %v11863_v54 = vpack.c.bf16 %v917_v51, %v914_v50  ;;  %v913_v56 = vld [vmem:[#allocation5 + $0x4e0] sm:$0xff]  ;;  %v916_v57 = vld [vmem:[#allocation5 + $0x4f8] sm:$0xff] }
  0x5c   :  { %210 = vmatmul.mubr.f32.gmra.mrb[10].mxu0 %v14741_v2  ;;  %11784 = vmatprep.subr.bf16.mxu1 %v11783_v12  ;;  %v920_v58 = vld [vmem:[#allocation5 + $0x518] sm:$0xff]  ;;  %v945_v50 = vld [vmem:[#allocation5 + $0x5e0] sm:$0xff] }
  0x5d   :  { %11758 = vmatpush1.bf16.msra.mxu0 %v11757_v3  ;;  %215 = vmatprep.mubr.f32.mxu0 %v17017_v0  ;;  %v735_v3 = vld [vmem:[#allocation5 + $0x3c0] sm:$0xff]  ;;  %v948_v51 = vld [vmem:[#allocation5 + $0x5f8] sm:$0xff] }
  0x5e   :  { %11760 = vmatprep.subr.bf16.mxu0 %v11759_v7  ;;  %v745_v7 = vld [vmem:[#allocation5 + $0x410] sm:$0xff]  ;;  %v11817_v11 = vpack.c.bf16 %v738_v4, %v735_v3 }
  0x5f   :  { %11786 = vmatpush3.bf16.msra.mxu1 %v11783_v12  ;;  %v11819_v12 = vpack.c.bf16 %v745_v7, %v742_v5  ;;  %v919_v4 = vld [vmem:[#allocation5 + $0x510] sm:$0xff]  ;;  %v922_v5 = vld [vmem:[#allocation5 + $0x528] sm:$0xff] }
  0x60   :  { %216 = vmatmul.mubr.f32.gmra.mrb[12].mxu0 %v14746_v6  ;;  %11788 = vmatprep.subr.bf16.mxu1 %v11787_v22  ;;  %v926_v7 = vld [vmem:[#allocation5 + $0x548] sm:$0xff] }
  0x61   :  { %11762 = vmatpush1.bf16.msra.mxu0 %v11761_v13  ;;  %221 = vmatprep.mubr.f32.mxu0 %v17017_v0  ;;  %v741_v13 = vld [vmem:[#allocation5 + $0x3f0] sm:$0xff] }
  0x62   :  { %11764 = vmatprep.subr.bf16.mxu0 %v11763_v17  ;;  %v731_v17 = vld [vmem:[#allocation5 + $0x3a0] sm:$0xff] }
  0x63   :  { %11790 = vmatpush3.bf16.msra.mxu1 %v11787_v22  ;;  %v754_v22 = vld [vmem:[#allocation5 + $0x458] sm:$0xff]  ;;  %v11841_v24 = vpack.c.bf16 %v734_v18, %v731_v17  ;;  %v915_v18 = vld [vmem:[#allocation5 + $0x4f0] sm:$0xff] }
  0x64   :  { %222 = vmatmul.mubr.f32.gmra.mrb[14].mxu0 %v14755_v14  ;;  %11792 = vmatprep.subr.bf16.mxu1 %v11791_v32 }
  0x65   :  { %11766 = vmatpush1.bf16.msra.mxu0 %v11765_v23  ;;  %488 = vmatprep.mubr.f32.mxu0 %v17017_v0  ;;  %v757_v23 = vld [vmem:[#allocation5 + $0x470] sm:$0xff] }
  0x66   :  { %11800 = vmatprep.subr.bf16.mxu0 %v11799_v27  ;;  %v11827_v28 = vpack.c.bf16 %v757_v23, %v754_v22  ;;  %v934_v22 = vld [vmem:[#allocation5 + $0x588] sm:$0xff] }
  0x67   :  { %11794 = vmatpush3.bf16.msra.mxu1 %v11791_v32  ;;  %v905_v32 = vld [vmem:[#allocation5 + $0x4a0] sm:$0xff]  ;;  %v938_v23 = vld [vmem:[#allocation5 + $0x5a8] sm:$0xff] }
  0x68   :  { %489 = vmatmul.mubr.f32.vlgmr.msra.gmra.mrb[16].mxu0 %v14701_v36  ;;  %11796 = vmatprep.subr.bf16.mxu1 %v11795_v43  ;;  %v11809_v36 = vpack.c.bf16 %v726_v48, %v723_v47  ;;  %v11859_v47 = vpack.c.bf16 %v911_v42, %v908_v41  ;;  %v907_v48 = vld [vmem:[#allocation5 + $0x4b0] sm:$0xff]  ;;  %v946_v41 = vld [vmem:[#allocation5 + $0x5e8] sm:$0xff] }
  0x69   :  { %11802 = vmatpush1.bf16.msra.mxu0 %v11801_v33  ;;  %494 = vmatprep.mubr.f32.mxu0 %v17017_v0 }
  0x6a   :  { %11804 = vmatprep.subr.bf16.mxu0 %v11803_v38  ;;  %v11855_v38 = vpack.c.bf16 %v905_v32, %v902_v31  ;;  %v940_v31 = vld [vmem:[#allocation5 + $0x5b8] sm:$0xff] }
  0x6b   :  { %11798 = vmatpush3.bf16.msra.mxu1 %v11795_v43  ;;  %v944_v32 = vld [vmem:[#allocation5 + $0x5d8] sm:$0xff] }
  0x6c   :  { %495 = vmatmul.mubr.f32.gmra.mrb[18].mxu0 %v14709_v26  ;;  %11831 = vmatprep.subr.bf16.mxu1 %v17028_v60 }
  0x6d   :  { %11806 = vmatpush1.bf16.msra.mxu0 %v11805_v44  ;;  %500 = vmatprep.mubr.f32.mxu0 %v17017_v0  ;;  %v752_v44 = vld [vmem:[#allocation5 + $0x448] sm:$0xff] }
  0x6e   :  { %11808 = vmatprep.subr.bf16.mxu0 %v11807_v46  ;;  %10190 = vmatmul.mubr.f32.vlgmr.msra.gmra.mrb[8].mxu1 %v14709_v26  ;;  %v744_v26 = vld [vmem:[#allocation5 + $0x408] sm:$0xff]  ;;  %v11857_v46 = vpack.c.bf16 %v904_v40, %v901_v39  ;;  %v943_v40 = vld [vmem:[#allocation5 + $0x5d0] sm:$0xff] }
  0x6f   :  { %11833 = vmatpush3.bf16.msra.mxu1 %v11832_v59  ;;  %10192 = vmatprep.mubr.f32.mxu1 %v14716_v34  ;;  %v11821_v19 = vpack.c.bf16 %v744_v26, %v741_v13  ;;  %v923_v59 = vld [vmem:[#allocation5 + $0x530] sm:$0xff]  ;;  %v925_v26 = vld [vmem:[#allocation5 + $0x540] sm:$0xff] }
  0x70   :  { %501 = vmatmul.mubr.f32.gmra.mrb[20].mxu0 %v14716_v34  ;;  %11834 = vmatprep.subr.bf16.mxu1 %v17028_v60  ;;  %v11838_v34 = vpack.c.bf16 %v728_v10, %v725_v9  ;;  %v11867_v3 = vpack.c.bf16 %v923_v59, %v920_v58  ;;  %v909_v10 = vld [vmem:[#allocation5 + $0x4c0] sm:$0xff]  ;;  %v1147_v59 = vld [vmem:[#allocation5 + $0x628] sm:$0xff] }
  0x71   :  { %11810 = vmatpush1.bf16.msra.mxu0 %v11809_v36  ;;  %506 = vmatprep.mubr.f32.mxu0 %v17017_v0  ;;  %v758_v36 = vld [vmem:[#allocation5 + $0x478] sm:$0xff] }
  0x72   :  { %11812 = vmatprep.subr.bf16.mxu0 %v11811_v53  ;;  %10193 = vmatmul.mubr.f32.gmra.mrb[10].mxu1 %v14723_v45  ;;  %v11861_v53 = vpack.c.bf16 %v910_v49, %v907_v48  ;;  %v942_v48 = vld [vmem:[#allocation5 + $0x5c8] sm:$0xff] }
  0x73   :  { %11836 = vmatpush3.bf16.msra.mxu1 %v11835_v8  ;;  %10195 = vmatprep.mubr.f32.mxu1 %v14732_v55  ;;  %v929_v8 = vld [vmem:[#allocation5 + $0x560] sm:$0xff] }
  0x74   :  { %507 = vmatmul.mubr.f32.gmra.mrb[22].mxu0 %v14723_v45  ;;  %11837 = vmatprep.subr.bf16.mxu1 %v17028_v60  ;;  %v750_v45 = vld [vmem:[#allocation5 + $0x438] sm:$0xff]  ;;  %v11871_v13 = vpack.c.bf16 %v929_v8, %v926_v7 }
  0x75   :  { %11814 = vmatpush1.bf16.msra.mxu0 %v11813_v63  ;;  %512 = vmatprep.mubr.f32.mxu0 %v17017_v0  ;;  %v11825_v27 = vpack.c.bf16 %v750_v45, %v747_v21  ;;  %v906_v63 = vld [vmem:[#allocation5 + $0x4a8] sm:$0xff]  ;;  %v931_v45 = vld [vmem:[#allocation5 + $0x570] sm:$0xff]  ;;  %v1153_v8 = vld [vmem:[#allocation5 + $0x658] sm:$0xff] }
  0x76   :  { %11816 = vmatprep.subr.bf16.mxu0 %v11815_v1  ;;  %10196 = vmatmul.mubr.f32.gmra.mrb[12].mxu1 %v14741_v2  ;;  %v11865_v1 = vpack.c.bf16 %v916_v57, %v913_v56  ;;  %v11888_v9 = vpack.c.bf16 %v906_v63, %v903_v62  ;;  %v1145_v56 = vld [vmem:[#allocation5 + $0x618] sm:$0xff]  ;;  %v1144_v57 = vld [vmem:[#allocation5 + $0x610] sm:$0xff] }
  0x77   :  { %11839 = vmatpush3.bf16.msra.mxu1 %v11838_v34  ;;  %10198 = vmatprep.mubr.f32.mxu1 %v14746_v6  ;;  %v935_v34 = vld [vmem:[#allocation5 + $0x590] sm:$0xff]  ;;  %v1149_v62 = vld [vmem:[#allocation5 + $0x638] sm:$0xff] }
  0x78   :  { %513 = vmatmul.mubr.f32.gmra.mrb[24].mxu0 %v14732_v55  ;;  %11840 = vmatprep.subr.bf16.mxu1 %v17028_v60  ;;  %v737_v55 = vld [vmem:[#allocation5 + $0x3d0] sm:$0xff]  ;;  %v11875_v21 = vpack.c.bf16 %v935_v34, %v932_v16  ;;  %v1159_v34 = vld [vmem:[#allocation5 + $0x688] sm:$0xff] }
  0x79   :  { %11818 = vmatpush1.bf16.msra.mxu0 %v11817_v11  ;;  %518 = vmatprep.mubr.f32.mxu0 %v17017_v0  ;;  %v11844_v33 = vpack.c.bf16 %v740_v25, %v737_v55  ;;  %v912_v11 = vld [vmem:[#allocation5 + $0x4d8] sm:$0xff]  ;;  %v921_v25 = vld [vmem:[#allocation5 + $0x520] sm:$0xff]  ;;  %v1152_v63 = vld [vmem:[#allocation5 + $0x650] sm:$0xff] }
  0x7a   :  { %11820 = vmatprep.subr.bf16.mxu0 %v11819_v12  ;;  %10199 = vmatmul.mubr.f32.gmra.mrb[14].mxu1 %v14755_v14  ;;  %v11869_v12 = vpack.c.bf16 %v922_v5, %v919_v4  ;;  %v11891_v17 = vpack.c.bf16 %v912_v11, %v909_v10  ;;  %v1151_v4 = vld [vmem:[#allocation5 + $0x648] sm:$0xff]  ;;  %v1150_v5 = vld [vmem:[#allocation5 + $0x640] sm:$0xff] }
  0x7b   :  { %11842 = vmatpush3.bf16.msra.mxu1 %v11841_v24  ;;  %10233 = vmatprep.mubr.msk.f32.mxu1 %vm14652_vm0, %v17017_v0  ;;  %v941_v24 = vld [vmem:[#allocation5 + $0x5c0] sm:$0xff]  ;;  %v11947_v11 = vpack.c.bf16 %v1153_v8, %v1150_v5 }
  0x7c   :  { %519 = vmatmul.mubr.f32.gmra.mrb[26].mxu0 %v14741_v2  ;;  %11843 = vmatprep.subr.bf16.mxu1 %v17028_v60  ;;  %v743_v2 = vld [vmem:[#allocation5 + $0x400] sm:$0xff]  ;;  %v11879_v29 = vpack.c.bf16 %v941_v24, %v938_v23  ;;  %v1165_v24 = vld [vmem:[#allocation5 + $0x6b8] sm:$0xff] }
  0x7d   :  { %11822 = vmatpush1.bf16.msra.mxu0 %v11821_v19  ;;  %524 = vmatprep.mubr.f32.mxu0 %v17017_v0  ;;  %v11847_v43 = vpack.c.bf16 %v746_v35, %v743_v2  ;;  %v918_v19 = vld [vmem:[#allocation5 + $0x508] sm:$0xff]  ;;  %v927_v35 = vld [vmem:[#allocation5 + $0x550] sm:$0xff]  ;;  %v1158_v10 = vld [vmem:[#allocation5 + $0x680] sm:$0xff] }
  0x7e   :  { %11824 = vmatprep.subr.bf16.mxu0 %v11823_v20  ;;  %v11873_v20 = vpack.c.bf16 %v928_v15, %v925_v26  ;;  %v11894_v55 = vpack.c.bf16 %v918_v19, %v915_v18  ;;  %v1157_v26 = vld [vmem:[#allocation5 + $0x678] sm:$0xff]  ;;  %v1156_v15 = vld [vmem:[#allocation5 + $0x670] sm:$0xff] }
  0x7f   :  { %11845 = vmatpush3.bf16.msra.mxu1 %v11844_v33  ;;  %v947_v33 = vld [vmem:[#allocation5 + $0x5f0] sm:$0xff]  ;;  %v1161_v18 = vld [vmem:[#allocation5 + $0x698] sm:$0xff] }
  0x80   :  { %525 = vmatmul.mubr.f32.gmra.mrb[28].mxu0 %v14746_v6  ;;  %11846 = vmatprep.subr.bf16.mxu1 %v17028_v60  ;;  %v749_v6 = vld [vmem:[#allocation5 + $0x430] sm:$0xff]  ;;  %v11883_v39 = vpack.c.bf16 %v947_v33, %v944_v32  ;;  %v1171_v33 = vld [vmem:[#allocation5 + $0x6e8] sm:$0xff] }
  0x81   :  { %11826 = vmatpush1.bf16.msra.mxu0 %v11825_v27  ;;  %530 = vmatprep.mubr.f32.mxu0 %v17017_v0  ;;  %v11850_v52 = vpack.c.bf16 %v752_v44, %v749_v6  ;;  %v924_v27 = vld [vmem:[#allocation5 + $0x538] sm:$0xff]  ;;  %v11885_v44 = vpack.c.bf16 %v946_v41, %v943_v40  ;;  %v1164_v19 = vld [vmem:[#allocation5 + $0x6b0] sm:$0xff]  ;;  %v1175_v40 = vld [vmem:[#allocation5 + $0x708] sm:$0xff] }
  0x82   :  { %11828 = vmatprep.subr.bf16.mxu0 %v11827_v28  ;;  %v11877_v28 = vpack.c.bf16 %v934_v22, %v931_v45  ;;  %v11897_v2 = vpack.c.bf16 %v924_v27, %v921_v25  ;;  %v936_v6 = vld [vmem:[#allocation5 + $0x598] sm:$0xff]  ;;  %v1163_v45 = vld [vmem:[#allocation5 + $0x6a8] sm:$0xff]  ;;  %v1162_v22 = vld [vmem:[#allocation5 + $0x6a0] sm:$0xff] }
  0x83   :  { %11848 = vmatpush3.bf16.msra.mxu1 %v11847_v43  ;;  %v933_v43 = vld [vmem:[#allocation5 + $0x580] sm:$0xff]  ;;  %v1167_v25 = vld [vmem:[#allocation5 + $0x6c8] sm:$0xff] }
  0x84   :  { %531 = vmatmul.mubr.f32.gmra.mrb[30].mxu0 %v14755_v14  ;;  %11849 = vmatprep.subr.bf16.mxu1 %v17028_v60  ;;  %v755_v14 = vld [vmem:[#allocation5 + $0x460] sm:$0xff] }
  0x85   :  { %11830 = vmatpush1.bf16.msra.mxu0 %v11829_v37  ;;  %823 = vmatprep.mubr.f32.mxu0 %v17017_v0  ;;  %v11853_v61 = vpack.c.bf16 %v758_v36, %v755_v14  ;;  %v930_v37 = vld [vmem:[#allocation5 + $0x568] sm:$0xff]  ;;  %v1146_v36 = vld [vmem:[#allocation5 + $0x620] sm:$0xff] }
  0x86   :  { %11856 = vmatprep.subr.bf16.mxu0 %v11855_v38  ;;  %v11881_v38 = vpack.c.bf16 %v940_v31, %v937_v30  ;;  %v11900_v42 = vpack.c.bf16 %v930_v37, %v927_v35  ;;  %v1143_v14 = vld [vmem:[#allocation5 + $0x608] sm:$0xff]  ;;  %v1170_v27 = vld [vmem:[#allocation5 + $0x6e0] sm:$0xff]  ;;  %v1169_v30 = vld [vmem:[#allocation5 + $0x6d8] sm:$0xff] }
  0x87   :  { %11851 = vmatpush3.bf16.msra.mxu1 %v11850_v52  ;;  %v11909_v52 = vpack.c.bf16 %v948_v51, %v945_v50  ;;  %v1168_v31 = vld [vmem:[#allocation5 + $0x6d0] sm:$0xff]  ;;  %v1173_v35 = vld [vmem:[#allocation5 + $0x6f8] sm:$0xff]  ;;  %v1174_v41 = vld [vmem:[#allocation5 + $0x700] sm:$0xff] }
  0x88   :  { %824 = vmatmul.mubr.f32.vlgmr.msra.gmra.mrb[0].mxu0 %v17017_v0  ;;  %11852 = vmatprep.subr.bf16.mxu1 %v17028_v60  ;;  %v1176_v37 = vld [vmem:[#allocation5 + $0x710] sm:$0xff] }
  0x89   :  { %11858 = vmatpush1.bf16.msra.mxu0 %v11857_v46  ;;  %1013 = vmatprep.mubr.f32.mxu0 %v17017_v0  ;;  %v11903_v46 = vpack.c.bf16 %v936_v6, %v933_v43  ;;  %v1177_v43 = vld [vmem:[#allocation5 + $0x718] sm:$0xff]  ;;  %v1180_v50 = vld [vmem:[#allocation5 + $0x730] sm:$0xff] }
  0x8a   :  { %11860 = vmatprep.subr.bf16.mxu0 %v11859_v47  ;;  %v939_v47 = vld [vmem:[#allocation5 + $0x5b0] sm:$0xff]  ;;  %v11959_v6 = vpack.c.bf16 %v1177_v43, %v1174_v41 }
  0x8b   :  { %11854 = vmatpush3.bf16.msra.mxu1 %v11853_v61  ;;  %v11906_v49 = vpack.c.bf16 %v942_v48, %v939_v47  ;;  %v11944_v61 = vpack.c.bf16 %v1147_v59, %v1144_v57  ;;  %v1178_v48 = vld [vmem:[#allocation5 + $0x720] sm:$0xff]  ;;  %v1187_v57 = vld [vmem:[#allocation5 + $0x768] sm:$0xff] }
  0x8c   :  { %11887 = vmatprep.subr.bf16.mxu1 %v17028_v60  ;;  %v98_v8 = vld [vmem:[#allocation7] ss:$8 sm:$0x7] }
  0x8d   :  { %11862 = vmatpush1.bf16.msra.mxu0 %v11861_v53  ;;  %v11911_v53 = vpack.c.bf16 %v1146_v36, %v1143_v14  ;;  %v1185_v36 = vld [vmem:[#allocation5 + $0x758] sm:$0xff] }
  0x8e   :  { %11864 = vmatprep.subr.bf16.mxu0 %v11863_v54  ;;  %10234 = vmatmul.mubr.f32.vlgmr.msra.gmra.mrb[16].mxu1 %v17017_v0  ;;  %v1142_v54 = vld [vmem:[#allocation5 + $0x600] sm:$0xff] }
  0x8f   :  { %11889 = vmatpush3.bf16.msra.mxu1 %v11888_v9  ;;  %10268 = vmatprep.mubr.msk.f32.mxu1 %vm14652_vm0, %v17017_v0  ;;  %v11913_v58 = vpack.c.bf16 %v1145_v56, %v1142_v54  ;;  %v1155_v9 = vld [vmem:[#allocation5 + $0x668] sm:$0xff]  ;;  %v1184_v56 = vld [vmem:[#allocation5 + $0x750] sm:$0xff] }
  0x90   :  { %11890 = vmatprep.subr.bf16.mxu1 %v17028_v60  ;;  %v11941_v59 = vpack.c.bf16 %v1187_v57, %v1184_v56 }
  0x91   :  { %11866 = vmatpush1.bf16.msra.mxu0 %v11865_v1  ;;  %v11915_v1 = vpack.c.bf16 %v1152_v63, %v1149_v62  ;;  %v1342_v63 = vld [vmem:[#allocation5 + $0x788] sm:$0xff] }
  0x92   :  { %11868 = vmatprep.subr.bf16.mxu0 %v11867_v3  ;;  %v1148_v3 = vld [vmem:[#allocation5 + $0x630] sm:$0xff] }
  0x93   :  { %11892 = vmatpush3.bf16.msra.mxu1 %v11891_v17  ;;  %v11917_v7 = vpack.c.bf16 %v1151_v4, %v1148_v3  ;;  %v11950_v17 = vpack.c.bf16 %v1159_v34, %v1156_v15  ;;  %v100_v4 = vlaneseq }
  0x94   :  { %11893 = vmatprep.subr.bf16.mxu1 %v17028_v60 }
  0x95   :  { %11870 = vmatpush1.bf16.msra.mxu0 %v11869_v12  ;;  %v11919_v12 = vpack.c.bf16 %v1158_v10, %v1155_v9  ;;  %v101_v5 = vshrl.u32 %v100_v4, 7 }
  0x96   :  { %11872 = vmatprep.subr.bf16.mxu0 %v11871_v13  ;;  %v1154_v13 = vld [vmem:[#allocation5 + $0x660] sm:$0xff] }
  0x97   :  { %11895 = vmatpush3.bf16.msra.mxu1 %v11894_v55  ;;  %v11921_v16 = vpack.c.bf16 %v1157_v26, %v1154_v13  ;;  %v11953_v55 = vpack.c.bf16 %v1165_v24, %v1162_v22  ;;  %v14866_v41 = vsub.s32 0, %v101_v5 }
  0x98   :  { %11896 = vmatprep.subr.bf16.mxu1 %v17028_v60 }
  0x99   :  { %11874 = vmatpush1.bf16.msra.mxu0 %v11873_v20  ;;  %v11923_v20 = vpack.c.bf16 %v1164_v19, %v1161_v18  ;;  %17202 = vst [vmem:[#allocation24_spill] sm:$0xff] %v14866_v41 }
  0x9a   :  { %11876 = vmatprep.subr.bf16.mxu0 %v11875_v21  ;;  %v1160_v21 = vld [vmem:[#allocation5 + $0x690] sm:$0xff] }
  0x9b   :  { %11898 = vmatpush3.bf16.msra.mxu1 %v11897_v2  ;;  %v11925_v23 = vpack.c.bf16 %v1163_v45, %v1160_v21  ;;  %v11956_v2 = vpack.c.bf16 %v1171_v33, %v1168_v31 }
  0x9c   :  { %11899 = vmatprep.subr.bf16.mxu1 %v17028_v60 }
  0x9d   :  { %11878 = vmatpush1.bf16.msra.mxu0 %v11877_v28  ;;  %v11927_v28 = vpack.c.bf16 %v1170_v27, %v1167_v25 }
  0x9e   :  { %11880 = vmatprep.subr.bf16.mxu0 %v11879_v29  ;;  %v1166_v29 = vld [vmem:[#allocation5 + $0x6c0] sm:$0xff] }
  0x9f   :  { %11901 = vmatpush3.bf16.msra.mxu1 %v11900_v42  ;;  %v11929_v32 = vpack.c.bf16 %v1169_v30, %v1166_v29 }
  0xa0   :  { %11902 = vmatprep.subr.bf16.mxu1 %v17028_v60 }
  0xa1   :  { %11882 = vmatpush1.bf16.msra.mxu0 %v11881_v38  ;;  %v11931_v38 = vpack.c.bf16 %v1176_v37, %v1173_v35 }
  0xa2   :  { %11884 = vmatprep.subr.bf16.mxu0 %v11883_v39  ;;  %v1172_v39 = vld [vmem:[#allocation5 + $0x6f0] sm:$0xff] }
  0xa3   :  { %11904 = vmatpush3.bf16.msra.mxu1 %v11903_v46  ;;  %v11933_v42 = vpack.c.bf16 %v1175_v40, %v1172_v39  ;;  %v1182_v46 = vld [vmem:[#allocation5 + $0x740] sm:$0xff] }
  0xa4   :  { %11905 = vmatprep.subr.bf16.mxu1 %v17028_v60 }
  0xa5   :  { %11886 = vmatpush1.bf16.msra.mxu0 %v11885_v44  ;;  %v1179_v44 = vld [vmem:[#allocation5 + $0x728] sm:$0xff] }
  0xa6   :  { %11912 = vmatprep.subr.bf16.mxu0 %v11911_v53  ;;  %v11935_v47 = vpack.c.bf16 %v1182_v46, %v1179_v44  ;;  %v1188_v53 = vld [vmem:[#allocation5 + $0x770] sm:$0xff]  ;;  %v14872_v44 = vsub.s32 1, %v101_v5 }
  0xa7   :  { %11907 = vmatpush3.bf16.msra.mxu1 %v11906_v49  ;;  %v1181_v49 = vld [vmem:[#allocation5 + $0x738] sm:$0xff]  ;;  %v11939_v54 = vpack.c.bf16 %v1188_v53, %v1185_v36  ;;  %v708_v53 = vld [vmem:[#allocation7 + $0x4] ss:$0 sm:$0xff] }
  0xa8   :  { %1014 = vmatmul.mubr.f32.vlgmr.msra.gmra.mrb[30].mxu0 %v17017_v0  ;;  %11908 = vmatprep.subr.bf16.mxu1 %v17028_v60  ;;  %v11937_v51 = vpack.c.bf16 %v1181_v49, %v1178_v48  ;;  %17204 = vst [vmem:[#allocation26_spill] sm:$0xff] %v14872_v44  ;;  %v14875_v48 = vrot.slane %v98_v8, %v14872_v44 }
  0xa9   :  { %1254 = vmatprep.mubr.f32.mxu0 %v17017_v0  ;;  %11914 = vmatpush1.bf16.msra.mxu0 %v11913_v58  ;;  %v1186_v58 = vld [vmem:[#allocation5 + $0x760] sm:$0xff] }
  0xaa   :  { %11916 = vmatprep.subr.bf16.mxu0 %v11915_v1  ;;  %v1345_v1 = vld [vmem:[#allocation5 + $0x7a0] sm:$0xff]  ;;  %17205 = vst [vmem:[#allocation27_spill] sm:$0xff] %v14875_v48 }
  0xab   :  { %11910 = vmatpush3.bf16.msra.mxu1 %v11909_v52  ;;  %v1183_v52 = vld [vmem:[#allocation5 + $0x748] sm:$0xff]  ;;  %v11967_v3 = vpack.c.bf16 %v1345_v1, %v1342_v63 }
  0xac   :  { %11943 = vmatprep.subr.bf16.mxu1 %v17028_v60  ;;  %v11962_v14 = vpack.c.bf16 %v1183_v52, %v1180_v50 }
  0xad   :  { %11918 = vmatpush1.bf16.msra.mxu0 %v11917_v7  ;;  %v14823_v7 = vsub.s32 2, %v101_v5 }
  0xae   :  { %10269 = vmatmul.mubr.f32.vlgmr.msra.gmra.mrb[18].mxu1 %v17017_v0  ;;  %11920 = vmatprep.subr.bf16.mxu0 %v11919_v12 }
  0xaf   :  { %10303 = vmatprep.mubr.msk.f32.mxu1 %vm14652_vm0, %v17017_v0  ;;  %11945 = vmatpush3.bf16.msra.mxu1 %v11944_v61  ;;  %v1189_v61 = vld [vmem:[#allocation5 + $0x778] sm:$0xff]  ;;  %17189 = vst [vmem:[#allocation11_spill] sm:$0xff] %v14823_v7  ;;  %v111_v9 = vrot.slane %v98_v8, %v14823_v7 }
  0xb0   :  { %11946 = vmatprep.subr.bf16.mxu1 %v17028_v60  ;;  %v11965_v62 = vpack.c.bf16 %v1189_v61, %v1186_v58 }
  0xb1   :  { %11922 = vmatpush1.bf16.msra.mxu0 %v11921_v16 }
  0xb2   :  { %11924 = vmatprep.subr.bf16.mxu0 %v11923_v20 }
  0xb3   :  { %11948 = vmatpush3.bf16.msra.mxu1 %v11947_v11 }
  0xb4   :  { %11949 = vmatprep.subr.bf16.mxu1 %v17028_v60 }
  0xb5   :  { %11926 = vmatpush1.bf16.msra.mxu0 %v11925_v23  ;;  %v407_v23 = vld [vmem:[#allocation7 + $0x1] ss:$8 sm:$0x7] }
  0xb6   :  { %11928 = vmatprep.subr.bf16.mxu0 %v11927_v28  ;;  %v14841_v24 = vrot.slane %v407_v23, %v14823_v7  ;;  %v14879_v61 = vrot.slane %v407_v23, %v14866_v41  ;;  %v1964_v7 = vld [vmem:[#allocation5 + $0x578] sm:$0xff] }
  0xb7   :  { %11951 = vmatpush3.bf16.msra.mxu1 %v11950_v17 }
  0xb8   :  { %11952 = vmatprep.subr.bf16.mxu1 %v17028_v60  ;;  %17206 = vst [vmem:[#allocation28_spill] sm:$0xff] %v14879_v61 }
  0xb9   :  { %11930 = vmatpush1.bf16.msra.mxu0 %v11929_v32 }
  0xba   :  { %11932 = vmatprep.subr.bf16.mxu0 %v11931_v38 }
  0xbb   :  { %11954 = vmatpush3.bf16.msra.mxu1 %v11953_v55 }
  0xbc   :  { %11955 = vmatprep.subr.bf16.mxu1 %v17028_v60 }
  0xbd   :  { %11934 = vmatpush1.bf16.msra.mxu0 %v11933_v42  ;;  %v14869_v42 = vrot.slane %v98_v8, %v14866_v41  ;;  %v14883_v8 = vrot.slane %v407_v23, %v14872_v44  ;;  %v1347_v23 = vld [vmem:[#allocation5 + $0x7b0] sm:$0xff]  ;;  %v1950_v44 = vld [vmem:[#allocation5 + $0x508] sm:$0xff]  ;;  %v1952_v41 = vld [vmem:[#allocation5 + $0x518] sm:$0xff] }
  0xbe   :  { %11936 = vmatprep.subr.bf16.mxu0 %v11935_v47 }
  0xbf   :  { %11957 = vmatpush3.bf16.msra.mxu1 %v11956_v2  ;;  %17203 = vst [vmem:[#allocation25_spill] sm:$0xff] %v14869_v42  ;;  %17207 = vst [vmem:[#allocation29_spill] sm:$0xff] %v14883_v8 }
  0xc0   :  { %11958 = vmatprep.subr.bf16.mxu1 %v17028_v60 }
  0xc1   :  { %11938 = vmatpush1.bf16.msra.mxu0 %v11937_v51 }
  0xc2   :  { %11940 = vmatprep.subr.bf16.mxu0 %v11939_v54 }
  0xc3   :  { %11960 = vmatpush3.bf16.msra.mxu1 %v11959_v6 }
  0xc4   :  { %11961 = vmatprep.subr.bf16.mxu1 %v17028_v60 }
  0xc5   :  { %11942 = vmatpush1.bf16.msra.mxu0 %v11941_v59 }
  0xc6   :  { %11968 = vmatprep.subr.bf16.mxu0 %v11967_v3 }
  0xc7   :  { %11963 = vmatpush3.bf16.msra.mxu1 %v11962_v14 }
  0xc8   :  { %11964 = vmatprep.subr.bf16.mxu1 %v17028_v60 }
  0xcb   :  { %11966 = vmatpush3.bf16.msra.mxu1 %v11965_v62 }
  0xcc   :  { %11999 = vmatprep.subr.bf16.mxu1 %v17028_v60 }
 0x121   :  { %v10147_v10 = vpop.f32.mrb[0].mxu1 }
 0x122   :  { %v14826_v11 = vadd.f32 %v10147_v10, %v111_v9  ;;  %v294_v12 = vpop.f32.mrb[1].mxu1 }
 0x123   :  { %v295_v58 = vadd.f32 %v294_v12, %v111_v9 }
 0x125   :  { %v10150_v13 = vpop.f32.mrb[2].mxu1 }
 0x126   :  { %v14828_v26 = vadd.f32 %v10150_v13, %v111_v9  ;;  %v304_v15 = vpop.f32.mrb[3].mxu1  ;;  %v1341_v13 = vld [vmem:[#allocation5 + $0x780] sm:$0xff] }
 0x127   :  { %v14830_v16 = vadd.f32 %v304_v15, %v111_v9 }
 0x128   :  { %17190 = vst [vmem:[#allocation12_spill] sm:$0xff] %v14828_v26  ;;  %v1973_v26 = vld [vmem:[#allocation5 + $0x5c0] sm:$0xff] }
 0x129   :  { %17191 = vst [vmem:[#allocation13_spill] sm:$0xff] %v14830_v16  ;;  %v10153_v34 = vpop.f32.mrb[4].mxu1  ;;  %v1976_v16 = vld [vmem:[#allocation5 + $0x5d8] sm:$0xff] }
 0x12a   :  { %v14832_v17 = vadd.f32 %v10153_v34, %v111_v9  ;;  %v314_v18 = vpop.f32.mrb[5].mxu1 }
 0x12b   :  { %v14834_v19 = vadd.f32 %v314_v18, %v111_v9  ;;  %v1344_v18 = vld [vmem:[#allocation5 + $0x798] sm:$0xff] }
 0x12c   :  { %17192 = vst [vmem:[#allocation14_spill] sm:$0xff] %v14832_v17  ;;  %v1962_v17 = vld [vmem:[#allocation5 + $0x568] sm:$0xff] }
 0x12d   :  { %17193 = vst [vmem:[#allocation15_spill] sm:$0xff] %v14834_v19  ;;  %v10156_v20 = vpop.f32.mrb[6].mxu1  ;;  %v1968_v19 = vld [vmem:[#allocation5 + $0x598] sm:$0xff] }
 0x12e   :  { %v14836_v21 = vadd.f32 %v10156_v20, %v111_v9  ;;  %v324_v45 = vpop.f32.mrb[7].mxu1  ;;  %v1343_v20 = vld [vmem:[#allocation5 + $0x790] sm:$0xff] }
 0x12f   :  { %v14838_v22 = vadd.f32 %v324_v45, %v111_v9  ;;  %v1346_v45 = vld [vmem:[#allocation5 + $0x7a8] sm:$0xff] }
 0x130   :  { %17194 = vst [vmem:[#allocation16_spill] sm:$0xff] %v14836_v21  ;;  %v17208_v21 = vmov 0.0  }
 0x131   :  { %17195 = vst [vmem:[#allocation17_spill] sm:$0xff] %v14838_v22  ;;  %v1958_v22 = vld [vmem:[#allocation5 + $0x548] sm:$0xff] }
 0x141   :  { %v10191_v55 = vpop.f32.mrb[8].mxu1 }
 0x142   :  { %v14844_v25 = vadd.f32 %v10191_v55, %v14841_v24  ;;  %v603_v27 = vpop.f32.mrb[9].mxu1 }
 0x143   :  { %v14847_v28 = vadd.f32 %v603_v27, %v14841_v24 }
 0x144   :  { %17196 = vst [vmem:[#allocation18_spill] sm:$0xff] %v14844_v25  ;;  %v1956_v25 = vld [vmem:[#allocation5 + $0x538] sm:$0xff] }
 0x145   :  { %17197 = vst [vmem:[#allocation19_spill] sm:$0xff] %v14847_v28  ;;  %v10194_v29 = vpop.f32.mrb[10].mxu1  ;;  %v1955_v28 = vld [vmem:[#allocation5 + $0x530] sm:$0xff] }
 0x146   :  { %v14850_v30 = vadd.f32 %v10194_v29, %v14841_v24  ;;  %v613_v31 = vpop.f32.mrb[11].mxu1  ;;  %v1348_v29 = vld [vmem:[#allocation5 + $0x7b8] sm:$0xff] }
 0x147   :  { %v14853_v32 = vadd.f32 %v613_v31, %v14841_v24  ;;  %v1351_v31 = vld [vmem:[#allocation5 + $0x7d0] sm:$0xff] }
 0x148   :  { %17198 = vst [vmem:[#allocation20_spill] sm:$0xff] %v14850_v30  ;;  %v1967_v30 = vld [vmem:[#allocation5 + $0x590] sm:$0xff] }
 0x149   :  { %17199 = vst [vmem:[#allocation21_spill] sm:$0xff] %v14853_v32  ;;  %v10197_v33 = vpop.f32.mrb[12].mxu1  ;;  %v1961_v32 = vld [vmem:[#allocation5 + $0x560] sm:$0xff] }
 0x14a   :  { %v14856_v2 = vadd.f32 %v10197_v33, %v14841_v24  ;;  %v623_v35 = vpop.f32.mrb[13].mxu1 }
 0x14b   :  { %v14859_v37 = vadd.f32 %v623_v35, %v14841_v24 }
 0x14c   :  { %17200 = vst [vmem:[#allocation22_spill] sm:$0xff] %v14856_v2  ;;  %v1974_v2 = vld [vmem:[#allocation5 + $0x5c8] sm:$0xff] }
 0x14d   :  { %17201 = vst [vmem:[#allocation23_spill] sm:$0xff] %v14859_v37  ;;  %v14861_v38 = vpop.f32.mrb[14].mxu1  ;;  %v1970_v37 = vld [vmem:[#allocation5 + $0x5a8] sm:$0xff] }
 0x14e   :  { %v633_v39 = vpop.f32.mrb[15].mxu1 }
 0x14f   :  { %v14864_v40 = vadd.f32 %v633_v39, %v14841_v24  ;;  %v11969_v39 = vpack.c.bf16 %v1344_v18, %v1341_v13  ;;  %v1361_v13 = vld [vmem:[#allocation5 + $0x820] sm:$0xff]  ;;  %v1366_v18 = vld [vmem:[#allocation5 + $0x848] sm:$0xff] }
 0x15b   :  { %v825_v43 = vpop.f32.mrb[0].mxu0 }
 0x15c   :  { %v14215_v6 = vadd.f32 %v825_v43, %v14869_v42  ;;  %v827_v46 = vpop.f32.mrb[1].mxu0  ;;  %v12000_v43 = vpack.c.bf16 %v1346_v45, %v1343_v20  ;;  %v1369_v20 = vld [vmem:[#allocation5 + $0x860] sm:$0xff] }
 0x15d   :  { %v14216_v49 = vadd.f32 %v827_v46, %v14875_v48 }
 0x15e   :  { %v9301_v47 = vmul.f32 -1.442695, %v14215_v6 }
 0x15f   :  { %v9302_v52 = vmul.f32 -1.442695, %v14216_v49  ;;  %v1350_v49 = vld [vmem:[#allocation5 + $0x7c8] sm:$0xff] }
 0x160   :  { %14338 = vpow2.f32 %v9301_v47  ;;  %v11971_v47 = vpack.c.bf16 %v1351_v31, %v1348_v29  ;;  %v1365_v29 = vld [vmem:[#allocation5 + $0x840] sm:$0xff] }
 0x161   :  { %v896_v50 = vpop.f32.mrb[16].mxu1  ;;  %14340 = vpow2.f32 %v9302_v52  ;;  %v1354_v52 = vld [vmem:[#allocation5 + $0x7e8] sm:$0xff] }
 0x162   :  { %v10235_v51 = vpop.f32.mrb[17].mxu1  ;;  %v1107_v54 = vadd.f32 %v896_v50, %v708_v53  ;;  %v1349_v50 = vld [vmem:[#allocation5 + $0x7c0] sm:$0xff] }
 0x163   :  { %v1352_v51 = vld [vmem:[#allocation5 + $0x7d8] sm:$0xff] }
 0x164   :  { %v12003_v53 = vpack.c.bf16 %v1352_v51, %v1349_v50 }
 0x16a   :  { %v14339_v14 = vpop.eup %14338 }
 0x16b   :  { %v1097_v36 = vadd.f32 1.0, %v14339_v14  ;;  %v14341_v56 = vpop.eup %14340  ;;  %v1357_v14 = vld [vmem:[#allocation5 + $0x800] sm:$0xff] }
 0x16c   :  { %v1104_v62 = vadd.f32 1.0, %v14341_v56  ;;  %v11975_v56 = vpack.c.bf16 %v1357_v14, %v1354_v52  ;;  %v1371_v14 = vld [vmem:[#allocation5 + $0x870] sm:$0xff] }
 0x16d   :  { %14342 = vrcp.f32 %v1097_v36  ;;  %v11973_v36 = vpack.c.bf16 %v1350_v49, %v1347_v23  ;;  %v639_v23 = vadd.f32 %v14861_v38, %v14841_v24  ;;  %v1381_v24 = vld [vmem:[#allocation5 + $0x8c0] sm:$0xff] }
 0x177   :  { %v14343_v57 = vpop.eup %14342 }
 0x178   :  { %v1108_v59 = vmul.f32 %v14343_v57, %v1107_v54  ;;  %v1353_v54 = vld [vmem:[#allocation5 + $0x7e0] sm:$0xff]  ;;  %v1356_v57 = vld [vmem:[#allocation5 + $0x7f8] sm:$0xff] }
 0x17a   :  { %v1109_v63 = vadd.f32 %v1108_v59, %v295_v58  ;;  %v1355_v58 = vld [vmem:[#allocation5 + $0x7f0] sm:$0xff]  ;;  %v1358_v59 = vld [vmem:[#allocation5 + $0x808] sm:$0xff] }
 0x17b   :  { %v1015_v1 = vpop.f32.mrb[30].mxu0 }
 0x17c   :  { %14344 = vtanh.f32 %v1109_v63  ;;  %v14245_v3 = vadd.f32 %v1015_v1, %v14879_v61  ;;  %v1017_v4 = vpop.f32.mrb[31].mxu0  ;;  %v1363_v63 = vld [vmem:[#allocation5 + $0x830] sm:$0xff]  ;;  %v709_v1 = vld [vmem:[#allocation7 + $0x5] ss:$0 sm:$0xff] }
 0x17d   :  { %14346 = vrcp.f32 %v1104_v62  ;;  %v14246_v10 = vadd.f32 %v1017_v4, %v14883_v8  ;;  %v1360_v62 = vld [vmem:[#allocation5 + $0x818] sm:$0xff]  ;;  %v12006_v4 = vpack.c.bf16 %v1358_v59, %v1355_v58  ;;  %v1377_v59 = vld [vmem:[#allocation5 + $0x8a0] sm:$0xff] }
 0x17e   :  { %v9303_v5 = vmul.f32 -1.442695, %v14245_v3  ;;  %v11977_v3 = vpack.c.bf16 %v1356_v57, %v1353_v54  ;;  %v1373_v54 = vld [vmem:[#allocation5 + $0x880] sm:$0xff]  ;;  %v1378_v57 = vld [vmem:[#allocation5 + $0x8a8] sm:$0xff] }
 0x17f   :  { %v9304_v27 = vmul.f32 -1.442695, %v14246_v10  ;;  %v11979_v10 = vpack.c.bf16 %v1363_v63, %v1360_v62  ;;  %v11991_v62 = vpack.c.bf16 %v1381_v24, %v1378_v57  ;;  %v1380_v63 = vld [vmem:[#allocation5 + $0x8b8] sm:$0xff]  ;;  %v1550_v24 = vld [vmem:[#allocation5 + $0xc68] sm:$0xff] }
 0x180   :  { %14348 = vpow2.f32 %v9303_v5  ;;  %v1359_v5 = vld [vmem:[#allocation5 + $0x810] sm:$0xff]  ;;  %v1548_v57 = vld [vmem:[#allocation5 + $0xc58] sm:$0xff] }
 0x181   :  { %v1086_v9 = vpop.f32.mrb[18].mxu1  ;;  %14350 = vpow2.f32 %v9304_v27 }
 0x182   :  { %v10270_v15 = vpop.f32.mrb[19].mxu1 }
 0x183   :  { %v1364_v15 = vld [vmem:[#allocation5 + $0x838] sm:$0xff] }
 0x184   :  { %v12009_v27 = vpack.c.bf16 %v1364_v15, %v1361_v13  ;;  %v1383_v13 = vld [vmem:[#allocation5 + $0x8d0] sm:$0xff] }
 0x186   :  { %v14345_v12 = vpop.eup %14344 }
 0x187   :  { %v1111_v34 = vsub.f32 0.0, %v14345_v12  ;;  %v14347_v55 = vpop.eup %14346 }
 0x189   :  { %v1112_v33 = vmul.f32 %v14347_v55, %v1111_v34  ;;  %v1131_v34 = vadd.f32 %v1086_v9, %v709_v1  ;;  %v1379_v1 = vld [vmem:[#allocation5 + $0x8b0] sm:$0xff] }
 0x18a   :  { %v14349_v35 = vpop.eup %14348 }
 0x18b   :  { %v1121_v6 = vadd.f32 1.0, %v14349_v35  ;;  %v14886_v46 = vadd.f32 %v14345_v12, %v1112_v33  ;;  %v1362_v12 = vld [vmem:[#allocation5 + $0x828] sm:$0xff]  ;;  %v14351_v45 = vpop.eup %14350  ;;  %v11983_v33 = vpack.c.bf16 %v1369_v20, %v1366_v18  ;;  %v1368_v35 = vld [vmem:[#allocation5 + $0x858] sm:$0xff]  ;;  %v1385_v18 = vld [vmem:[#allocation5 + $0x8e0] sm:$0xff] }
 0x18c   :  { %v11981_v55 = vpack.c.bf16 %v1362_v12, %v1359_v5  ;;  %v1128_v49 = vadd.f32 1.0, %v14351_v45  ;;  %v11985_v51 = vpack.c.bf16 %v1368_v35, %v1365_v29  ;;  %v1387_v5 = vld [vmem:[#allocation5 + $0x8f0] sm:$0xff]  ;;  %v1388_v20 = vld [vmem:[#allocation5 + $0x8f8] sm:$0xff]  ;;  %v1538_v45 = vld [vmem:[#allocation5 + $0xc08] sm:$0xff] }
 0x18d   :  { %14352 = vrcp.f32 %v1121_v6  ;;  %1255 = vmatmul.mubr.f32.vlgmr.msra.gmra.mrb[32].mxu0 %v14886_v46  ;;  %10304 = vmatmul.mubr.f32.vlgmr.msra.gmra.mrb[20].mxu1 %v14886_v46  ;;  %v1372_v6 = vld [vmem:[#allocation5 + $0x878] sm:$0xff] }
 0x18e   :  { %11970 = vmatpush1.bf16.msra.mxu0 %v11969_v39  ;;  %12001 = vmatpush3.bf16.msra.mxu1 %v12000_v43  ;;  %v1367_v39 = vld [vmem:[#allocation5 + $0x850] sm:$0xff]  ;;  %v1370_v43 = vld [vmem:[#allocation5 + $0x868] sm:$0xff] }
 0x18f   :  { %11972 = vmatprep.subr.bf16.mxu0 %v11971_v47  ;;  %12002 = vmatprep.subr.bf16.mxu1 %v17028_v60  ;;  %v1375_v47 = vld [vmem:[#allocation5 + $0x890] sm:$0xff]  ;;  %v12012_v52 = vpack.c.bf16 %v1370_v43, %v1367_v39  ;;  %v1540_v43 = vld [vmem:[#allocation5 + $0xc18] sm:$0xff] }
 0x190   :  { %1453 = vmatprep.mubr.f32.mxu0 %v17017_v0  ;;  %10338 = vmatprep.mubr.msk.f32.mxu1 %vm14652_vm0, %v17017_v0 }
 0x192   :  { %11974 = vmatpush1.bf16.msra.mxu0 %v11973_v36  ;;  %12004 = vmatpush3.bf16.msra.mxu1 %v12003_v53  ;;  %v11987_v36 = vpack.c.bf16 %v1375_v47, %v1372_v6  ;;  %v1374_v53 = vld [vmem:[#allocation5 + $0x888] sm:$0xff]  ;;  %v1544_v47 = vld [vmem:[#allocation5 + $0xc38] sm:$0xff] }
 0x193   :  { %11976 = vmatprep.subr.bf16.mxu0 %v11975_v56  ;;  %12005 = vmatprep.subr.bf16.mxu1 %v17028_v60  ;;  %v1376_v56 = vld [vmem:[#allocation5 + $0x898] sm:$0xff]  ;;  %v11989_v38 = vpack.c.bf16 %v1374_v53, %v1371_v14  ;;  %v1543_v14 = vld [vmem:[#allocation5 + $0xc30] sm:$0xff] }
 0x194   :  { %v12015_v58 = vpack.c.bf16 %v1376_v56, %v1373_v54  ;;  %v1546_v54 = vld [vmem:[#allocation5 + $0xc48] sm:$0xff]  ;;  %v1545_v56 = vld [vmem:[#allocation5 + $0xc40] sm:$0xff] }
 0x196   :  { %11978 = vmatpush1.bf16.msra.mxu0 %v11977_v3  ;;  %12007 = vmatpush3.bf16.msra.mxu1 %v12006_v4  ;;  %v1382_v3 = vld [vmem:[#allocation5 + $0x8c8] sm:$0xff]  ;;  %v1384_v4 = vld [vmem:[#allocation5 + $0x8d8] sm:$0xff] }
 0x197   :  { %v14353_v31 = vpop.eup %14352  ;;  %11980 = vmatprep.subr.bf16.mxu0 %v11979_v10  ;;  %12008 = vmatprep.subr.bf16.mxu1 %v17028_v60  ;;  %v11993_v10 = vpack.c.bf16 %v1380_v63, %v1377_v59  ;;  %v12018_v12 = vpack.c.bf16 %v1382_v3, %v1379_v1  ;;  %v11995_v15 = vpack.c.bf16 %v1387_v5, %v1384_v4  ;;  %v1552_v1 = vld [vmem:[#allocation5 + $0xc78] sm:$0xff]  ;;  %v1551_v3 = vld [vmem:[#allocation5 + $0xc70] sm:$0xff]  ;;  %v1554_v4 = vld [vmem:[#allocation5 + $0xc88] sm:$0xff] }
 0x198   :  { %v1132_v9 = vmul.f32 %v14353_v31, %v1131_v34  ;;  %v1386_v34 = vld [vmem:[#allocation5 + $0x8e8] sm:$0xff]  ;;  %v12021_v31 = vpack.c.bf16 %v1388_v20, %v1385_v18  ;;  %v12059_v59 = vpack.c.bf16 %v1548_v57, %v1545_v56  ;;  %v1556_v5 = vld [vmem:[#allocation5 + $0xc98] sm:$0xff]  ;;  %v1557_v20 = vld [vmem:[#allocation5 + $0xca0] sm:$0xff] }
 0x199   :  { %v11997_v29 = vpack.c.bf16 %v1386_v34, %v1383_v13  ;;  %v12062_v13 = vpack.c.bf16 %v1554_v4, %v1551_v3  ;;  %v1558_v18 = vld [vmem:[#allocation5 + $0xca8] sm:$0xff]  ;;  %v1577_v56 = vld [vmem:[#allocation5 + $0xd40] sm:$0xff]  ;;  %v1583_v3 = vld [vmem:[#allocation5 + $0xd70] sm:$0xff] }
 0x19a   :  { %v1133_v50 = vadd.f32 %v1132_v9, %v639_v23  ;;  %11982 = vmatpush1.bf16.msra.mxu0 %v11981_v55  ;;  %12010 = vmatpush3.bf16.msra.mxu1 %v12009_v27  ;;  %v1541_v55 = vld [vmem:[#allocation5 + $0xc20] sm:$0xff]  ;;  %v1539_v23 = vld [vmem:[#allocation5 + $0xc10] sm:$0xff]  ;;  %v1542_v9 = vld [vmem:[#allocation5 + $0xc28] sm:$0xff] }
 0x19b   :  { %11984 = vmatprep.subr.bf16.mxu0 %v11983_v33  ;;  %12011 = vmatprep.subr.bf16.mxu1 %v17028_v60  ;;  %v1537_v33 = vld [vmem:[#allocation5 + $0xc00] sm:$0xff]  ;;  %v12023_v39 = vpack.c.bf16 %v1541_v55, %v1538_v45  ;;  %v1560_v45 = vld [vmem:[#allocation5 + $0xcb8] sm:$0xff]  ;;  %v1562_v55 = vld [vmem:[#allocation5 + $0xcc8] sm:$0xff] }
 0x19c   :  { %14354 = vtanh.f32 %v1133_v50 }
 0x19d   :  { %14356 = vrcp.f32 %v1128_v49  ;;  %v1547_v49 = vld [vmem:[#allocation5 + $0xc50] sm:$0xff] }
 0x19e   :  { %11986 = vmatpush1.bf16.msra.mxu0 %v11985_v51  ;;  %12013 = vmatpush3.bf16.msra.mxu1 %v12012_v52  ;;  %v12025_v51 = vpack.c.bf16 %v1540_v43, %v1537_v33  ;;  %v12056_v52 = vpack.c.bf16 %v1542_v9, %v1539_v23  ;;  %v12027_v53 = vpack.c.bf16 %v1547_v49, %v1544_v47  ;;  %v1561_v33 = vld [vmem:[#allocation5 + $0xcc0] sm:$0xff]  ;;  %v1563_v43 = vld [vmem:[#allocation5 + $0xcd0] sm:$0xff]  ;;  %v1566_v23 = vld [vmem:[#allocation5 + $0xce8] sm:$0xff] }
 0x19f   :  { %11988 = vmatprep.subr.bf16.mxu0 %v11987_v36  ;;  %12014 = vmatprep.subr.bf16.mxu1 %v17028_v60  ;;  %v1568_v9 = vld [vmem:[#allocation5 + $0xcf8] sm:$0xff]  ;;  %v12068_v49 = vpack.c.bf16 %v1566_v23, %v1563_v43  ;;  %v1754_v43 = vld [vmem:[#allocation5 + $0x350] sm:$0xff] }
 0x1a2   :  { %11990 = vmatpush1.bf16.msra.mxu0 %v11989_v38  ;;  %12016 = vmatpush3.bf16.msra.mxu1 %v12015_v58  ;;  %v1553_v38 = vld [vmem:[#allocation5 + $0xc80] sm:$0xff]  ;;  %v12029_v58 = vpack.c.bf16 %v1546_v54, %v1543_v14  ;;  %v1574_v54 = vld [vmem:[#allocation5 + $0xd28] sm:$0xff] }
 0x1a3   :  { %11992 = vmatprep.subr.bf16.mxu0 %v11991_v62  ;;  %12017 = vmatprep.subr.bf16.mxu1 %v17028_v60  ;;  %v1549_v62 = vld [vmem:[#allocation5 + $0xc60] sm:$0xff]  ;;  %v12031_v63 = vpack.c.bf16 %v1553_v38, %v1550_v24 }
 0x1a4   :  { %v1569_v14 = vld [vmem:[#allocation5 + $0xd00] sm:$0xff] }
 0x1a5   :  { %v1573_v38 = vld [vmem:[#allocation5 + $0xd20] sm:$0xff] }
 0x1a6   :  { %v14355_v27 = vpop.eup %14354  ;;  %11994 = vmatpush1.bf16.msra.mxu0 %v11993_v10  ;;  %12019 = vmatpush3.bf16.msra.mxu1 %v12018_v12  ;;  %v1559_v10 = vld [vmem:[#allocation5 + $0xcb0] sm:$0xff]  ;;  %v12033_v12 = vpack.c.bf16 %v1552_v1, %v1549_v62  ;;  %v1580_v1 = vld [vmem:[#allocation5 + $0xd58] sm:$0xff] }
 0x1a7   :  { %v1135_v35 = vsub.f32 0.0, %v14355_v27  ;;  %11996 = vmatprep.subr.bf16.mxu0 %v11995_v15  ;;  %12020 = vmatprep.subr.bf16.mxu1 %v17028_v60  ;;  %v14357_v6 = vpop.eup %14356  ;;  %v1555_v15 = vld [vmem:[#allocation5 + $0xc90] sm:$0xff]  ;;  %v12035_v34 = vpack.c.bf16 %v1559_v10, %v1556_v5 }
 0x1a8   :  { %v1575_v62 = vld [vmem:[#allocation5 + $0xd30] sm:$0xff] }
 0x1a9   :  { %v1136_v50 = vmul.f32 %v14357_v6, %v1135_v35  ;;  %v1571_v6 = vld [vmem:[#allocation5 + $0xd10] sm:$0xff] }
 0x1aa   :  { %11998 = vmatpush1.bf16.msra.mxu0 %v11997_v29  ;;  %12022 = vmatpush3.bf16.msra.mxu1 %v12021_v31  ;;  %v12037_v29 = vpack.c.bf16 %v1558_v18, %v1555_v15  ;;  %v12065_v31 = vpack.c.bf16 %v1560_v45, %v1557_v20  ;;  %v1579_v10 = vld [vmem:[#allocation5 + $0xd50] sm:$0xff]  ;;  %v1581_v15 = vld [vmem:[#allocation5 + $0xd60] sm:$0xff]  ;;  %v1745_v18 = vld [vmem:[#allocation5 + $0x308] sm:$0xff] }
 0x1ab   :  { %v14902_v36 = vadd.f32 %v14355_v27, %v1136_v50  ;;  %12024 = vmatprep.subr.bf16.mxu0 %v12023_v39  ;;  %12055 = vmatprep.subr.bf16.mxu1 %v17028_v60  ;;  %v1565_v27 = vld [vmem:[#allocation5 + $0xce0] sm:$0xff]  ;;  %v1564_v39 = vld [vmem:[#allocation5 + $0xcd8] sm:$0xff]  ;;  %v1567_v50 = vld [vmem:[#allocation5 + $0xcf0] sm:$0xff] }
 0x1ac   :  { %v12039_v35 = vpack.c.bf16 %v1565_v27, %v1562_v55  ;;  %v12041_v47 = vpack.c.bf16 %v1564_v39, %v1561_v33  ;;  %v1748_v20 = vld [vmem:[#allocation5 + $0x320] sm:$0xff]  ;;  %v1746_v33 = vld [vmem:[#allocation5 + $0x310] sm:$0xff]  ;;  %v1751_v39 = vld [vmem:[#allocation5 + $0x338] sm:$0xff] }
 0x1ad   :  { %1454 = vmatmul.mubr.f32.vlgmr.msra.gmra.mrb[34].mxu0 %v14902_v36  ;;  %10339 = vmatmul.mubr.f32.vlgmr.msra.gmra.mrb[22].mxu1 %v14902_v36  ;;  %v1744_v27 = vld [vmem:[#allocation5 + $0x300] sm:$0xff] }
 0x1ae   :  { %12026 = vmatpush1.bf16.msra.mxu0 %v12025_v51  ;;  %12057 = vmatpush3.bf16.msra.mxu1 %v12056_v52  ;;  %v12043_v51 = vpack.c.bf16 %v1571_v6, %v1568_v9  ;;  %v1570_v52 = vld [vmem:[#allocation5 + $0xd08] sm:$0xff]  ;;  %v1750_v6 = vld [vmem:[#allocation5 + $0x330] sm:$0xff] }
 0x1af   :  { %12028 = vmatprep.subr.bf16.mxu0 %v12027_v53  ;;  %12058 = vmatprep.subr.bf16.mxu1 %v17028_v60  ;;  %v1572_v53 = vld [vmem:[#allocation5 + $0xd18] sm:$0xff]  ;;  %v12045_v57 = vpack.c.bf16 %v1570_v52, %v1567_v50  ;;  %v1752_v50 = vld [vmem:[#allocation5 + $0x340] sm:$0xff]  ;;  %v1757_v52 = vld [vmem:[#allocation5 + $0x368] sm:$0xff] }
 0x1b0   :  { %1667 = vmatprep.mubr.f32.mxu0 %v17017_v0  ;;  %10373 = vmatprep.mubr.msk.f32.mxu1 %vm14652_vm0, %v17017_v0  ;;  %v12071_v24 = vpack.c.bf16 %v1572_v53, %v1569_v14  ;;  %v1760_v14 = vld [vmem:[#allocation5 + $0x380] sm:$0xff] }
 0x1b2   :  { %12030 = vmatpush1.bf16.msra.mxu0 %v12029_v58  ;;  %12060 = vmatpush3.bf16.msra.mxu1 %v12059_v59  ;;  %v12047_v58 = vpack.c.bf16 %v1577_v56, %v1574_v54  ;;  %v1576_v59 = vld [vmem:[#allocation5 + $0xd38] sm:$0xff]  ;;  %v1756_v56 = vld [vmem:[#allocation5 + $0x360] sm:$0xff] }
 0x1b3   :  { %12032 = vmatprep.subr.bf16.mxu0 %v12031_v63  ;;  %12061 = vmatprep.subr.bf16.mxu1 %v17028_v60  ;;  %v1578_v63 = vld [vmem:[#allocation5 + $0xd48] sm:$0xff]  ;;  %v12049_v4 = vpack.c.bf16 %v1576_v59, %v1573_v38  ;;  %v1758_v38 = vld [vmem:[#allocation5 + $0x370] sm:$0xff]  ;;  %v1763_v59 = vld [vmem:[#allocation5 + $0x398] sm:$0xff] }
 0x1b4   :  { %v12074_v5 = vpack.c.bf16 %v1578_v63, %v1575_v62  ;;  %v1766_v62 = vld [vmem:[#allocation5 + $0x3b0] sm:$0xff] }
 0x1b6   :  { %12034 = vmatpush1.bf16.msra.mxu0 %v12033_v12  ;;  %12063 = vmatpush3.bf16.msra.mxu1 %v12062_v13  ;;  %v12051_v12 = vpack.c.bf16 %v1583_v3, %v1580_v1  ;;  %v1582_v13 = vld [vmem:[#allocation5 + $0xd68] sm:$0xff]  ;;  %v1762_v3 = vld [vmem:[#allocation5 + $0x390] sm:$0xff] }
 0x1b7   :  { %12036 = vmatprep.subr.bf16.mxu0 %v12035_v34  ;;  %12064 = vmatprep.subr.bf16.mxu1 %v17028_v60  ;;  %v1584_v34 = vld [vmem:[#allocation5 + $0xd78] sm:$0xff]  ;;  %v12053_v45 = vpack.c.bf16 %v1582_v13, %v1579_v10  ;;  %v1764_v10 = vld [vmem:[#allocation5 + $0x3a0] sm:$0xff]  ;;  %v1769_v13 = vld [vmem:[#allocation5 + $0x3c8] sm:$0xff] }
 0x1b8   :  { %v12077_v55 = vpack.c.bf16 %v1584_v34, %v1581_v15  ;;  %v1772_v15 = vld [vmem:[#allocation5 + $0x3e0] sm:$0xff] }
 0x1ba   :  { %12038 = vmatpush1.bf16.msra.mxu0 %v12037_v29  ;;  %12066 = vmatpush3.bf16.msra.mxu1 %v12065_v31  ;;  %v14917_v29 = vpack.c.bf16 %v1748_v20, %v1745_v18  ;;  %v1747_v31 = vld [vmem:[#allocation5 + $0x318] sm:$0xff]  ;;  %v1768_v20 = vld [vmem:[#allocation5 + $0x3c0] sm:$0xff] }
 0x1bb   :  { %12040 = vmatprep.subr.bf16.mxu0 %v12039_v35  ;;  %12067 = vmatprep.subr.bf16.mxu1 %v17028_v60  ;;  %v1749_v35 = vld [vmem:[#allocation5 + $0x328] sm:$0xff]  ;;  %v14919_v23 = vpack.c.bf16 %v1747_v31, %v1744_v27  ;;  %v1770_v27 = vld [vmem:[#allocation5 + $0x3d0] sm:$0xff] }
 0x1bc   :  { %v14921_v9 = vpack.c.bf16 %v1749_v35, %v1746_v33  ;;  %v1773_v31 = vld [vmem:[#allocation5 + $0x3e8] sm:$0xff]  ;;  %v1775_v33 = vld [vmem:[#allocation5 + $0x3f8] sm:$0xff]  ;;  %v1778_v35 = vld [vmem:[#allocation5 + $0x410] sm:$0xff] }
 0x1be   :  { %12042 = vmatpush1.bf16.msra.mxu0 %v12041_v47  ;;  %12069 = vmatpush3.bf16.msra.mxu1 %v12068_v49  ;;  %v14925_v47 = vpack.c.bf16 %v1754_v43, %v1751_v39  ;;  %v1753_v49 = vld [vmem:[#allocation5 + $0x348] sm:$0xff]  ;;  %v14966_v43 = vpack.c.bf16 %v1773_v31, %v1770_v27  ;;  %v1788_v31 = vld [vmem:[#allocation5 + $0x460] sm:$0xff] }
 0x1bf   :  { %12044 = vmatprep.subr.bf16.mxu0 %v12043_v51  ;;  %12070 = vmatprep.subr.bf16.mxu1 %v17028_v60  ;;  %v1755_v51 = vld [vmem:[#allocation5 + $0x358] sm:$0xff]  ;;  %v14931_v53 = vpack.c.bf16 %v1753_v49, %v1750_v6  ;;  %v1774_v6 = vld [vmem:[#allocation5 + $0x3f0] sm:$0xff]  ;;  %v14970_v49 = vpack.c.bf16 %v1778_v35, %v1775_v33  ;;  %v1789_v27 = vld [vmem:[#allocation5 + $0x468] sm:$0xff] }
 0x1c0   :  { %v14933_v54 = vpack.c.bf16 %v1755_v51, %v1752_v50  ;;  %v1777_v50 = vld [vmem:[#allocation5 + $0x408] sm:$0xff]  ;;  %v1776_v51 = vld [vmem:[#allocation5 + $0x400] sm:$0xff]  ;;  %v1791_v33 = vld [vmem:[#allocation5 + $0x478] sm:$0xff] }
 0x1c1   :  { %v1934_v35 = vld [vmem:[#allocation5 + $0x488] sm:$0xff] }
 0x1c2   :  { %12046 = vmatpush1.bf16.msra.mxu0 %v12045_v57  ;;  %12072 = vmatpush3.bf16.msra.mxu1 %v12071_v24  ;;  %v14937_v57 = vpack.c.bf16 %v1760_v14, %v1757_v52  ;;  %v1759_v24 = vld [vmem:[#allocation5 + $0x378] sm:$0xff]  ;;  %v1781_v14 = vld [vmem:[#allocation5 + $0x428] sm:$0xff] }
 0x1c3   :  { %12048 = vmatprep.subr.bf16.mxu0 %v12047_v58  ;;  %12073 = vmatprep.subr.bf16.mxu1 %v17028_v60  ;;  %v1761_v58 = vld [vmem:[#allocation5 + $0x388] sm:$0xff]  ;;  %v14944_v63 = vpack.c.bf16 %v1759_v24, %v1756_v56  ;;  %v1779_v52 = vld [vmem:[#allocation5 + $0x418] sm:$0xff]  ;;  %v1784_v56 = vld [vmem:[#allocation5 + $0x440] sm:$0xff]  ;;  %v14974_v24 = vpack.c.bf16 %v1777_v50, %v1774_v6 }
 0x1c4   :  { %v14946_v1 = vpack.c.bf16 %v1761_v58, %v1758_v38  ;;  %v14976_v38 = vpack.c.bf16 %v1779_v52, %v1776_v51  ;;  %v1780_v58 = vld [vmem:[#allocation5 + $0x420] sm:$0xff]  ;;  %v14996_v51 = vpack.c.bf16 %v1791_v33, %v1788_v31  ;;  %v1942_v31 = vld [vmem:[#allocation5 + $0x4c8] sm:$0xff] }
 0x1c5   :  { %v1937_v6 = vld [vmem:[#allocation5 + $0x4a0] sm:$0xff] }
 0x1c6   :  { %12050 = vmatpush1.bf16.msra.mxu0 %v12049_v4  ;;  %12075 = vmatpush3.bf16.msra.mxu1 %v12074_v5  ;;  %v14950_v4 = vpack.c.bf16 %v1766_v62, %v1763_v59  ;;  %v1765_v5 = vld [vmem:[#allocation5 + $0x3a8] sm:$0xff]  ;;  %v14980_v59 = vpack.c.bf16 %v1784_v56, %v1781_v14  ;;  %v1783_v62 = vld [vmem:[#allocation5 + $0x438] sm:$0xff]  ;;  %v1933_v52 = vld [vmem:[#allocation5 + $0x480] sm:$0xff]  ;;  %v15000_v14 = vpack.c.bf16 %v1937_v6, %v1934_v35 }
 0x1c7   :  { %12052 = vmatprep.subr.bf16.mxu0 %v12051_v12  ;;  %12076 = vmatprep.subr.bf16.mxu1 %v17028_v60  ;;  %v1767_v12 = vld [vmem:[#allocation5 + $0x3b8] sm:$0xff]  ;;  %v14954_v34 = vpack.c.bf16 %v1765_v5, %v1762_v3  ;;  %v1782_v3 = vld [vmem:[#allocation5 + $0x430] sm:$0xff]  ;;  %v1785_v5 = vld [vmem:[#allocation5 + $0x448] sm:$0xff] }
 0x1c8   :  { %v14956_v18 = vpack.c.bf16 %v1767_v12, %v1764_v10  ;;  %v1787_v10 = vld [vmem:[#allocation5 + $0x458] sm:$0xff]  ;;  %v1790_v12 = vld [vmem:[#allocation5 + $0x470] sm:$0xff]  ;;  %v1941_v33 = vld [vmem:[#allocation5 + $0x4c0] sm:$0xff] }
 0x1c9   :  { %v1936_v56 = vld [vmem:[#allocation5 + $0x498] sm:$0xff]  ;;  %v1946_v6 = vld [vmem:[#allocation5 + $0x4e8] sm:$0xff] }
 0x1ca   :  { %12054 = vmatpush1.bf16.msra.mxu0 %v12053_v45  ;;  %12078 = vmatpush3.bf16.msra.mxu1 %v12077_v55  ;;  %v14960_v45 = vpack.c.bf16 %v1772_v15, %v1769_v13  ;;  %v1771_v55 = vld [vmem:[#allocation5 + $0x3d8] sm:$0xff]  ;;  %v14984_v13 = vpack.c.bf16 %v1783_v62, %v1780_v58  ;;  %v14986_v15 = vpack.c.bf16 %v1785_v5, %v1782_v3  ;;  %v1935_v58 = vld [vmem:[#allocation5 + $0x490] sm:$0xff]  ;;  %v1938_v62 = vld [vmem:[#allocation5 + $0x4a8] sm:$0xff] }
 0x1cb   :  { %12080 = vmatprep.subr.bf16.mxu0 %v14917_v29  ;;  %12111 = vmatprep.subr.bf16.mxu1 %v17028_v60  ;;  %v14964_v39 = vpack.c.bf16 %v1771_v55, %v1768_v20  ;;  %v1786_v20 = vld [vmem:[#allocation5 + $0x450] sm:$0xff]  ;;  %v14990_v55 = vpack.c.bf16 %v1790_v12, %v1787_v10  ;;  %v1940_v3 = vld [vmem:[#allocation5 + $0x4b8] sm:$0xff]  ;;  %v15004_v10 = vpack.c.bf16 %v1936_v56, %v1933_v52 }
 0x1cc   :  { %v14994_v50 = vpack.c.bf16 %v1789_v27, %v1786_v20  ;;  %v1943_v5 = vld [vmem:[#allocation5 + $0x4d0] sm:$0xff]  ;;  %v15006_v12 = vpack.c.bf16 %v1938_v62, %v1935_v58  ;;  %v1944_v35 = vld [vmem:[#allocation5 + $0x4d8] sm:$0xff]  ;;  %v1945_v58 = vld [vmem:[#allocation5 + $0x4e0] sm:$0xff] }
 0x1cd   :  { %1668 = vmatmul.mubr.f32.vlgmr.msra.gmra.mrb[36].mxu0 %v14902_v36  ;;  %10374 = vmatmul.mubr.f32.vlgmr.msra.gmra.mrb[24].mxu1 %v14902_v36  ;;  %v1939_v20 = vld [vmem:[#allocation5 + $0x4b0] sm:$0xff]  ;;  %v15010_v27 = vpack.c.bf16 %v1943_v5, %v1940_v3  ;;  %v15018_v56 = vpack.c.bf16 %v1944_v35, %v1941_v33  ;;  %v1948_v3 = vld [vmem:[#allocation5 + $0x4f8] sm:$0xff]  ;;  %v15035_v33 = vpack.c.bf16 %v1955_v28, %v1952_v41  ;;  %v1954_v35 = vld [vmem:[#allocation5 + $0x528] sm:$0xff] }
 0x1ce   :  { %12082 = vmatpush1.bf16.msra.mxu0 %v14919_v23  ;;  %12113 = vmatpush3.bf16.msra.mxu1 %v14921_v9  ;;  %v15016_v52 = vpack.c.bf16 %v1942_v31, %v1939_v20  ;;  %v1947_v5 = vld [vmem:[#allocation5 + $0x4f0] sm:$0xff]  ;;  %v15029_v20 = vpack.c.bf16 %v1948_v3, %v1945_v58  ;;  %v1957_v3 = vld [vmem:[#allocation5 + $0x540] sm:$0xff]  ;;  %v15045_v28 = vpack.c.bf16 %v1961_v32, %v1958_v22  ;;  %v1960_v41 = vld [vmem:[#allocation5 + $0x558] sm:$0xff] }
 0x1cf   :  { %12084 = vmatprep.subr.bf16.mxu0 %v14925_v47  ;;  %12114 = vmatprep.subr.bf16.mxu1 %v17028_v60  ;;  %v15031_v31 = vpack.c.bf16 %v1950_v44, %v1947_v5  ;;  %v1959_v5 = vld [vmem:[#allocation5 + $0x550] sm:$0xff]  ;;  %v15055_v22 = vpack.c.bf16 %v1967_v30, %v1964_v7  ;;  %v1966_v32 = vld [vmem:[#allocation5 + $0x588] sm:$0xff]  ;;  %v15065_v7 = vpack.c.bf16 %v1973_v26, %v1970_v37  ;;  %v1972_v30 = vld [vmem:[#allocation5 + $0x5b8] sm:$0xff] }
 0x1d0   :  { %1856 = vmatprep.mubr.f32.mxu0 %v17017_v0  ;;  %10408 = vmatprep.mubr.msk.f32.mxu1 %vm14652_vm0, %v17017_v0  ;;  %v1949_v0 = vld [vmem:[#allocation5 + $0x500] sm:$0xff]  ;;  %17209 = vst [vmem:[#allocation30_spill] sm:$0xff] %v15045_v28  ;;  %v1978_v37 = vld [vmem:[#allocation5 + $0x5e8] sm:$0xff] }
 0x1d1   :  { %v15022_v62 = vpack.c.bf16 %v1949_v0, %v1946_v6  ;;  %v1951_v0 = vld [vmem:[#allocation5 + $0x510] sm:$0xff]  ;;  %v1953_v6 = vld [vmem:[#allocation5 + $0x520] sm:$0xff]  ;;  %17212 = vst [vmem:[#allocation33_spill] sm:$0xff] %v15055_v22  ;;  %17215 = vst [vmem:[#allocation36_spill] sm:$0xff] %v15065_v7 }
 0x1d2   :  { %12086 = vmatpush1.bf16.msra.mxu0 %v14931_v53  ;;  %12116 = vmatpush3.bf16.msra.mxu1 %v14933_v54  ;;  %v15039_v58 = vpack.c.bf16 %v1954_v35, %v1951_v0  ;;  %v15041_v44 = vpack.c.bf16 %v1956_v25, %v1953_v6  ;;  %v15049_v0 = vpack.c.bf16 %v1960_v41, %v1957_v3  ;;  %v1963_v35 = vld [vmem:[#allocation5 + $0x570] sm:$0xff]  ;;  %v1965_v6 = vld [vmem:[#allocation5 + $0x580] sm:$0xff] }
 0x1d3   :  { %12088 = vmatprep.subr.bf16.mxu0 %v14937_v57  ;;  %12117 = vmatprep.subr.bf16.mxu1 %v17028_v60  ;;  %v15051_v25 = vpack.c.bf16 %v1962_v17, %v1959_v5  ;;  %v15059_v3 = vpack.c.bf16 %v1966_v32, %v1963_v35  ;;  %v15061_v17 = vpack.c.bf16 %v1968_v19, %v1965_v6  ;;  %v1969_v41 = vld [vmem:[#allocation5 + $0x5a0] sm:$0xff]  ;;  %v1971_v5 = vld [vmem:[#allocation5 + $0x5b0] sm:$0xff] }
 0x1d4   :  { %17210 = vst [vmem:[#allocation31_spill] sm:$0xff] %v15049_v0  ;;  %v15069_v35 = vpack.c.bf16 %v1972_v30, %v1969_v41  ;;  %v15071_v19 = vpack.c.bf16 %v1974_v2, %v1971_v5  ;;  %v1975_v32 = vld [vmem:[#allocation5 + $0x5d0] sm:$0xff]  ;;  %v1977_v6 = vld [vmem:[#allocation5 + $0x5e0] sm:$0xff]  ;;  %v2176_v30 = vld [vmem:[#allocation5 + $0x618] sm:$0xff] }
 0x1d5   :  { %17211 = vst [vmem:[#allocation32_spill] sm:$0xff] %v15051_v25  ;;  %17213 = vst [vmem:[#allocation34_spill] sm:$0xff] %v15059_v3  ;;  %v2177_v2 = vld [vmem:[#allocation5 + $0x620] sm:$0xff]  ;;  %v2175_v5 = vld [vmem:[#allocation5 + $0x610] sm:$0xff] }
 0x1d6   :  { %12090 = vmatpush1.bf16.msra.mxu0 %v14944_v63  ;;  %12119 = vmatpush3.bf16.msra.mxu1 %v14946_v1  ;;  %17214 = vst [vmem:[#allocation35_spill] sm:$0xff] %v15061_v17  ;;  %17216 = vst [vmem:[#allocation37_spill] sm:$0xff] %v15069_v35 }
 0x1d7   :  { %12092 = vmatprep.subr.bf16.mxu0 %v14950_v4  ;;  %12120 = vmatprep.subr.bf16.mxu1 %v17028_v60  ;;  %17217 = vst [vmem:[#allocation38_spill] sm:$0xff] %v15071_v19 }
 0x1da   :  { %12094 = vmatpush1.bf16.msra.mxu0 %v14954_v34  ;;  %12122 = vmatpush3.bf16.msra.mxu1 %v14956_v18 }
 0x1db   :  { %12096 = vmatprep.subr.bf16.mxu0 %v14960_v45  ;;  %12123 = vmatprep.subr.bf16.mxu1 %v17028_v60 }
 0x1de   :  { %12098 = vmatpush1.bf16.msra.mxu0 %v14964_v39  ;;  %12125 = vmatpush3.bf16.msra.mxu1 %v14966_v43 }
 0x1df   :  { %12100 = vmatprep.subr.bf16.mxu0 %v14970_v49  ;;  %12126 = vmatprep.subr.bf16.mxu1 %v17028_v60 }
 0x1e2   :  { %12102 = vmatpush1.bf16.msra.mxu0 %v14974_v24  ;;  %12128 = vmatpush3.bf16.msra.mxu1 %v14976_v38 }
 0x1e3   :  { %12104 = vmatprep.subr.bf16.mxu0 %v14980_v59  ;;  %12129 = vmatprep.subr.bf16.mxu1 %v17028_v60 }
 0x1e6   :  { %12106 = vmatpush1.bf16.msra.mxu0 %v14984_v13  ;;  %12131 = vmatpush3.bf16.msra.mxu1 %v14986_v15 }
 0x1e7   :  { %12108 = vmatprep.subr.bf16.mxu0 %v14990_v55  ;;  %12132 = vmatprep.subr.bf16.mxu1 %v17028_v60 }
 0x1ea   :  { %12110 = vmatpush1.bf16.msra.mxu0 %v14994_v50  ;;  %12134 = vmatpush3.bf16.msra.mxu1 %v14996_v51 }
 0x1eb   :  { %12136 = vmatprep.subr.bf16.mxu0 %v15000_v14  ;;  %12167 = vmatprep.subr.bf16.mxu1 %v17028_v60 }
 0x1ed   :  { %1857 = vmatmul.mubr.f32.vlgmr.msra.gmra.mrb[2].mxu0 %v14886_v46  ;;  %10409 = vmatmul.mubr.f32.vlgmr.msra.gmra.mrb[26].mxu1 %v14886_v46 }
 0x1ee   :  { %12138 = vmatpush1.bf16.msra.mxu0 %v15004_v10  ;;  %12169 = vmatpush3.bf16.msra.mxu1 %v15006_v12 }
 0x1ef   :  { %12140 = vmatprep.subr.bf16.mxu0 %v15010_v27  ;;  %12170 = vmatprep.subr.bf16.mxu1 %v17028_v60 }
 0x1f0   :  { %2045 = vmatprep.mubr.f32.mxu0 %v17208_v21  ;;  %10443 = vmatprep.mubr.msk.f32.mxu1 %vm14652_vm0, %v17208_v21 }
 0x1f2   :  { %12142 = vmatpush1.bf16.msra.mxu0 %v15016_v52  ;;  %12172 = vmatpush3.bf16.msra.mxu1 %v15018_v56 }
 0x1f3   :  { %12144 = vmatprep.subr.bf16.mxu0 %v15022_v62  ;;  %12173 = vmatprep.subr.bf16.mxu1 %v17028_v60 }
 0x1f6   :  { %12146 = vmatpush1.bf16.msra.mxu0 %v15029_v20  ;;  %12175 = vmatpush3.bf16.msra.mxu1 %v15031_v31 }
 0x1f7   :  { %12148 = vmatprep.subr.bf16.mxu0 %v15035_v33  ;;  %12176 = vmatprep.subr.bf16.mxu1 %v17028_v60 }
 0x1fa   :  { %12150 = vmatpush1.bf16.msra.mxu0 %v15039_v58  ;;  %12178 = vmatpush3.bf16.msra.mxu1 %v15041_v44 }
 0x1fb   :  { %12152 = vmatprep.subr.bf16.mxu0 %v15045_v28  ;;  %12179 = vmatprep.subr.bf16.mxu1 %v17028_v60  ;;  %v1979_v28 = vld [vmem:[#allocation5 + $0x5f0] sm:$0xff] }
 0x1fc   :  { %v15075_v26 = vpack.c.bf16 %v1979_v28, %v1976_v16  ;;  %v2174_v16 = vld [vmem:[#allocation5 + $0x608] sm:$0xff] }
 0x1fd   :  { %v15093_v28 = vpack.c.bf16 %v2177_v2, %v2174_v16  ;;  %v2179_v16 = vld [vmem:[#allocation5 + $0x630] sm:$0xff]  ;;  %v2182_v2 = vld [vmem:[#allocation5 + $0x648] sm:$0xff] }
 0x1fe   :  { %12154 = vmatpush1.bf16.msra.mxu0 %v15049_v0  ;;  %12181 = vmatpush3.bf16.msra.mxu1 %v15051_v25  ;;  %17218 = vst [vmem:[#allocation39_spill] sm:$0xff] %v15075_v26  ;;  %v2382_v25 = vld [vmem:[#allocation5 + $0x7d8] sm:$0xff]  ;;  %v2384_v0 = vld [vmem:[#allocation5 + $0x7e8] sm:$0xff] }
 0x1ff   :  { %12156 = vmatprep.subr.bf16.mxu0 %v15055_v22  ;;  %12182 = vmatprep.subr.bf16.mxu1 %v17028_v60  ;;  %v1980_v22 = vld [vmem:[#allocation5 + $0x5f8] sm:$0xff]  ;;  %17221 = vst [vmem:[#allocation42_spill] sm:$0xff] %v15093_v28 }
 0x200   :  { %v15081_v41 = vpack.c.bf16 %v1980_v22, %v1977_v6  ;;  %v2173_v22 = vld [vmem:[#allocation5 + $0x600] sm:$0xff] }
 0x202   :  { %12158 = vmatpush1.bf16.msra.mxu0 %v15059_v3  ;;  %12184 = vmatpush3.bf16.msra.mxu1 %v15061_v17  ;;  %v15079_v3 = vpack.c.bf16 %v1978_v37, %v1975_v32  ;;  %17220 = vst [vmem:[#allocation41_spill] sm:$0xff] %v15081_v41  ;;  %v15095_v32 = vpack.c.bf16 %v2176_v30, %v2173_v22  ;;  %v2178_v37 = vld [vmem:[#allocation5 + $0x628] sm:$0xff]  ;;  %v2184_v30 = vld [vmem:[#allocation5 + $0x658] sm:$0xff] }
 0x203   :  { %12160 = vmatprep.subr.bf16.mxu0 %v15065_v7  ;;  %12185 = vmatprep.subr.bf16.mxu1 %v17028_v60  ;;  %v15098_v6 = vpack.c.bf16 %v2178_v37, %v2175_v5  ;;  %v15105_v22 = vpack.c.bf16 %v2182_v2, %v2179_v16  ;;  %v2186_v37 = vld [vmem:[#allocation5 + $0x668] sm:$0xff] }
 0x204   :  { %17219 = vst [vmem:[#allocation40_spill] sm:$0xff] %v15079_v3  ;;  %17222 = vst [vmem:[#allocation43_spill] sm:$0xff] %v15095_v32  ;;  %v2190_v2 = vld [vmem:[#allocation5 + $0x688] sm:$0xff] }
 0x205   :  { %17223 = vst [vmem:[#allocation44_spill] sm:$0xff] %v15098_v6  ;;  %17226 = vst [vmem:[#allocation46_spill] sm:$0xff] %v15105_v22 }
 0x206   :  { %12162 = vmatpush1.bf16.msra.mxu0 %v15069_v35  ;;  %12187 = vmatpush3.bf16.msra.mxu1 %v15071_v19  ;;  %v17225_v19 = vmov 0.0|0.0  }
 0x207   :  { %12164 = vmatprep.subr.bf16.mxu0 %v15075_v26  ;;  %12188 = vmatprep.subr.bf16.mxu1 %v17028_v60  ;;  %v2181_v26 = vld [vmem:[#allocation5 + $0x640] sm:$0xff] }
 0x208   :  { %v15108_v5 = vpack.c.bf16 %v2184_v30, %v2181_v26  ;;  %v2192_v30 = vld [vmem:[#allocation5 + $0x698] sm:$0xff] }
 0x20a   :  { %12166 = vmatpush1.bf16.msra.mxu0 %v15079_v3  ;;  %12190 = vmatpush3.bf16.msra.mxu1 %v15081_v41  ;;  %v2183_v41 = vld [vmem:[#allocation5 + $0x650] sm:$0xff]  ;;  %17227 = vst [vmem:[#allocation47_spill] sm:$0xff] %v15108_v5 }
 0x20b   :  { %12223 = vmatprep.subr.bf16.mxu1 %v17028_v60  ;;  %12192 = vmatprep.subr.bf16.mxu0 %v15093_v28  ;;  %v2180_v60 = vld [vmem:[#allocation5 + $0x638] sm:$0xff]  ;;  %v2187_v28 = vld [vmem:[#allocation5 + $0x670] sm:$0xff] }
 0x20c   :  { %v15102_v3 = vpack.c.bf16 %v2183_v41, %v2180_v60  ;;  %v2185_v41 = vld [vmem:[#allocation5 + $0x660] sm:$0xff]  ;;  %v15118_v26 = vpack.c.bf16 %v2190_v2, %v2187_v28  ;;  %v2198_v2 = vld [vmem:[#allocation5 + $0x6c8] sm:$0xff] }
 0x20d   :  { %2046 = vmatmul.mubr.f32.vlgmr.msra.gmra.mrb[28].mxu0 %v14902_v36  ;;  %10444 = vmatmul.mubr.f32.vlgmr.msra.gmra.mrb[28].mxu1 %v14902_v36 }
 0x20e   :  { %2285 = vmatprep.mubr.f32.mxu0 %v17208_v21  ;;  %10478 = vmatprep.mubr.msk.f32.mxu1 %vm14652_vm0, %v17208_v21  ;;  %17224 = vst [vmem:[#allocation45_spill] sm:$0xff] %v15102_v3  ;;  %17230 = vst [vmem:[#allocation50_spill] sm:$0xff] %v15118_v26 }
 0x20f   :  { %12194 = vmatpush1.bf16.msra.mxu0 %v15095_v32  ;;  %12225 = vmatpush3.bf16.msra.mxu1 %v15098_v6  ;;  %v2189_v32 = vld [vmem:[#allocation5 + $0x680] sm:$0xff]  ;;  %v2188_v6 = vld [vmem:[#allocation5 + $0x678] sm:$0xff] }
 0x210   :  { %12226 = vmatprep.subr.bf16.mxu1 %v17225_v19  ;;  %12196 = vmatprep.subr.bf16.mxu0 %v15102_v3  ;;  %v15112_v60 = vpack.c.bf16 %v2189_v32, %v2186_v37  ;;  %v15115_v16 = vpack.c.bf16 %v2188_v6, %v2185_v41  ;;  %v2191_v37 = vld [vmem:[#allocation5 + $0x690] sm:$0xff]  ;;  %v2193_v3 = vld [vmem:[#allocation5 + $0x6a0] sm:$0xff]  ;;  %v2196_v41 = vld [vmem:[#allocation5 + $0x6b8] sm:$0xff] }
 0x211   :  { %v15128_v28 = vpack.c.bf16 %v2196_v41, %v2193_v3 }
 0x212   :  { %17228 = vst [vmem:[#allocation48_spill] sm:$0xff] %v15112_v60  ;;  %17229 = vst [vmem:[#allocation49_spill] sm:$0xff] %v15115_v16 }
 0x213   :  { %12198 = vmatpush1.bf16.msra.mxu0 %v15105_v22  ;;  %12228 = vmatpush3.bf16.msra.mxu1 %v15108_v5  ;;  %v2195_v22 = vld [vmem:[#allocation5 + $0x6b0] sm:$0xff]  ;;  %v2194_v5 = vld [vmem:[#allocation5 + $0x6a8] sm:$0xff]  ;;  %17233 = vst [vmem:[#allocation53_spill] sm:$0xff] %v15128_v28 }
 0x214   :  { %12229 = vmatprep.subr.bf16.mxu1 %v17225_v19  ;;  %12200 = vmatprep.subr.bf16.mxu0 %v15112_v60  ;;  %v15122_v32 = vpack.c.bf16 %v2195_v22, %v2192_v30  ;;  %v15125_v6 = vpack.c.bf16 %v2194_v5, %v2191_v37  ;;  %v2197_v30 = vld [vmem:[#allocation5 + $0x6c0] sm:$0xff]  ;;  %v2199_v60 = vld [vmem:[#allocation5 + $0x6d0] sm:$0xff]  ;;  %v2202_v37 = vld [vmem:[#allocation5 + $0x6e8] sm:$0xff] }
 0x215   :  { %v15140_v41 = vpack.c.bf16 %v2202_v37, %v2199_v60  ;;  %v2210_v37 = vld [vmem:[#allocation5 + $0x728] sm:$0xff] }
 0x216   :  { %17231 = vst [vmem:[#allocation51_spill] sm:$0xff] %v15122_v32  ;;  %17232 = vst [vmem:[#allocation52_spill] sm:$0xff] %v15125_v6 }
 0x217   :  { %12202 = vmatpush1.bf16.msra.mxu0 %v15115_v16  ;;  %12231 = vmatpush3.bf16.msra.mxu1 %v15118_v26  ;;  %v2201_v16 = vld [vmem:[#allocation5 + $0x6e0] sm:$0xff]  ;;  %v2200_v26 = vld [vmem:[#allocation5 + $0x6d8] sm:$0xff]  ;;  %17237 = vst [vmem:[#allocation57_spill] sm:$0xff] %v15140_v41 }
 0x218   :  { %12232 = vmatprep.subr.bf16.mxu1 %v17225_v19  ;;  %12204 = vmatprep.subr.bf16.mxu0 %v15122_v32  ;;  %v15132_v22 = vpack.c.bf16 %v2201_v16, %v2198_v2  ;;  %v15137_v5 = vpack.c.bf16 %v2200_v26, %v2197_v30  ;;  %v2207_v16 = vld [vmem:[#allocation5 + $0x710] sm:$0xff]  ;;  %v2205_v32 = vld [vmem:[#allocation5 + $0x700] sm:$0xff]  ;;  %v2208_v30 = vld [vmem:[#allocation5 + $0x718] sm:$0xff] }
 0x219   :  { %v15150_v60 = vpack.c.bf16 %v2208_v30, %v2205_v32  ;;  %v2216_v30 = vld [vmem:[#allocation5 + $0x758] sm:$0xff] }
 0x21a   :  { %17234 = vst [vmem:[#allocation54_spill] sm:$0xff] %v15132_v22  ;;  %17236 = vst [vmem:[#allocation56_spill] sm:$0xff] %v15137_v5 }
 0x21b   :  { %12206 = vmatpush1.bf16.msra.mxu0 %v15125_v6  ;;  %12234 = vmatpush3.bf16.msra.mxu1 %v15128_v28  ;;  %v2204_v28 = vld [vmem:[#allocation5 + $0x6f8] sm:$0xff]  ;;  %v2203_v6 = vld [vmem:[#allocation5 + $0x6f0] sm:$0xff]  ;;  %17240 = vst [vmem:[#allocation60_spill] sm:$0xff] %v15150_v60 }
 0x21c   :  { %12235 = vmatprep.subr.bf16.mxu1 %v17225_v19  ;;  %12208 = vmatprep.subr.bf16.mxu0 %v15132_v22  ;;  %v15144_v2 = vpack.c.bf16 %v2207_v16, %v2204_v28  ;;  %v2209_v16 = vld [vmem:[#allocation5 + $0x720] sm:$0xff] }
 0x21e   :  { %17238 = vst [vmem:[#allocation58_spill] sm:$0xff] %v15144_v2 }
 0x21f   :  { %12210 = vmatpush1.bf16.msra.mxu0 %v15137_v5  ;;  %12237 = vmatpush3.bf16.msra.mxu1 %v15140_v41  ;;  %v2212_v41 = vld [vmem:[#allocation5 + $0x738] sm:$0xff]  ;;  %v2211_v5 = vld [vmem:[#allocation5 + $0x730] sm:$0xff] }
 0x220   :  { %12238 = vmatprep.subr.bf16.mxu1 %v17225_v19  ;;  %12212 = vmatprep.subr.bf16.mxu0 %v15144_v2  ;;  %v2217_v2 = vld [vmem:[#allocation5 + $0x760] sm:$0xff] }
 0x223   :  { %12240 = vmatpush3.bf16.msra.mxu1 %v15150_v60  ;;  %v2218_v60 = vld [vmem:[#allocation5 + $0x768] sm:$0xff] }
 0x224   :  { %12241 = vmatprep.subr.bf16.mxu1 %v17225_v19 }
 0x260   :  { %v15134_v35 = vpop.f32.mrb[20].mxu1 }
 0x261   :  { %17235 = vst [vmem:[#allocation55_spill] sm:$0xff] %v15134_v35  ;;  %v10305_v3 = vpop.f32.mrb[21].mxu1  ;;  %v2206_v35 = vld [vmem:[#allocation5 + $0x708] sm:$0xff] }
 0x262   :  { %v15147_v26 = vpack.c.bf16 %v2206_v35, %v2203_v6  ;;  %v2213_v3 = vld [vmem:[#allocation5 + $0x740] sm:$0xff]  ;;  %v15157_v35 = vpack.c.bf16 %v2212_v41, %v2209_v16  ;;  %v2214_v6 = vld [vmem:[#allocation5 + $0x748] sm:$0xff]  ;;  %v2220_v16 = vld [vmem:[#allocation5 + $0x778] sm:$0xff] }
 0x263   :  { %v15154_v28 = vpack.c.bf16 %v2213_v3, %v2210_v37  ;;  %v15160_v32 = vpack.c.bf16 %v2214_v6, %v2211_v5  ;;  %v2215_v3 = vld [vmem:[#allocation5 + $0x750] sm:$0xff]  ;;  %v15170_v5 = vpack.c.bf16 %v2220_v16, %v2217_v2  ;;  %v2372_v6 = vld [vmem:[#allocation5 + $0x788] sm:$0xff] }
 0x264   :  { %17239 = vst [vmem:[#allocation59_spill] sm:$0xff] %v15147_v26  ;;  %12214 = vmatpush1.bf16.msra.mxu0 %v15147_v26  ;;  %17242 = vst [vmem:[#allocation62_spill] sm:$0xff] %v15157_v35  ;;  %v2219_v26 = vld [vmem:[#allocation5 + $0x770] sm:$0xff]  ;;  %v15167_v41 = vpack.c.bf16 %v2218_v60, %v2215_v3 }
 0x265   :  { %17241 = vst [vmem:[#allocation61_spill] sm:$0xff] %v15154_v28  ;;  %12216 = vmatprep.subr.bf16.mxu0 %v15154_v28  ;;  %17243 = vst [vmem:[#allocation63_spill] sm:$0xff] %v15160_v32  ;;  %12243 = vmatpush3.bf16.msra.mxu1 %v15160_v32  ;;  %v15164_v37 = vpack.c.bf16 %v2219_v26, %v2216_v30 }
 0x266   :  { %12244 = vmatprep.subr.bf16.mxu1 %v17225_v19  ;;  %17245 = vst [vmem:[#allocation65_spill] sm:$0xff] %v15167_v41  ;;  %17246 = vst [vmem:[#allocation66_spill] sm:$0xff] %v15170_v5 }
 0x267   :  { %17244 = vst [vmem:[#allocation64_spill] sm:$0xff] %v15164_v37 }
 0x268   :  { %12218 = vmatpush1.bf16.msra.mxu0 %v15157_v35  ;;  %v2375_v35 = vld [vmem:[#allocation5 + $0x7a0] sm:$0xff] }
 0x269   :  { %12220 = vmatprep.subr.bf16.mxu0 %v15164_v37  ;;  %12246 = vmatpush3.bf16.msra.mxu1 %v15170_v5  ;;  %v15174_v26 = vpack.c.bf16 %v2375_v35, %v2372_v6 }
 0x26a   :  { %12279 = vmatprep.subr.bf16.mxu1 %v17225_v19 }
 0x26b   :  { %17247 = vst [vmem:[#allocation67_spill] sm:$0xff] %v15174_v26 }
 0x26c   :  { %12222 = vmatpush1.bf16.msra.mxu0 %v15167_v41 }
 0x26d   :  { %12248 = vmatprep.subr.bf16.mxu0 %v15174_v26 }
 0x280   :  { %v15178_v30 = vpop.f32.mrb[22].mxu1 }
 0x281   :  { %17248 = vst [vmem:[#allocation68_spill] sm:$0xff] %v15178_v30  ;;  %v10340_v60 = vpop.f32.mrb[23].mxu1 }
 0x282   :  { %v15184_v60 = vld [vmem:[#allocation7 + $0x4] ss:$0 sm:$0xff] }
 0x283   :  { %17250 = vst [vmem:[#allocation70_spill] sm:$0xff] %v15184_v60 }
 0x2a0   :  { %v15180_v3 = vpop.f32.mrb[24].mxu1 }
 0x2a1   :  { %17249 = vst [vmem:[#allocation69_spill] sm:$0xff] %v15180_v3  ;;  %v10375_v37 = vpop.f32.mrb[25].mxu1 }
 0x2c0   :  { %v1858_v2 = vpop.f32.mrb[2].mxu0  ;;  %v1929_v16 = vpop.f32.mrb[26].mxu1 }
 0x2c1   :  { %v14217_v41 = vadd.f32 %v1858_v2, %v14869_v42  ;;  %v1860_v32 = vpop.f32.mrb[3].mxu0  ;;  %v10410_v28 = vpop.f32.mrb[27].mxu1  ;;  %v2139_v37 = vadd.f32 %v15184_v60, %v1929_v16  ;;  %v2371_v16 = vld [vmem:[#allocation5 + $0x780] sm:$0xff] }
 0x2c2   :  { %v14218_v35 = vadd.f32 %v1860_v32, %v14875_v48  ;;  %v2378_v48 = vld [vmem:[#allocation5 + $0x7b8] sm:$0xff] }
 0x2c3   :  { %v9305_v22 = vmul.f32 -1.442695, %v14217_v41 }
 0x2c4   :  { %v9306_v6 = vmul.f32 -1.442695, %v14218_v35 }
 0x2c5   :  { %14358 = vpow2.f32 %v9305_v22 }
 0x2c6   :  { %14360 = vpow2.f32 %v9306_v6 }
 0x2cf   :  { %v14359_v5 = vpop.eup %14358 }
 0x2d0   :  { %v2129_v7 = vadd.f32 1.0, %v14359_v5  ;;  %v14361_v30 = vpop.eup %14360 }
 0x2d1   :  { %v2136_v42 = vadd.f32 1.0, %v14361_v30 }
 0x2d2   :  { %14362 = vrcp.f32 %v2129_v7 }
 0x2dc   :  { %v14363_v3 = vpop.eup %14362 }
 0x2dd   :  { %v2140_v26 = vmul.f32 %v14363_v3, %v2139_v37  ;;  %v2374_v37 = vld [vmem:[#allocation5 + $0x798] sm:$0xff] }
 0x2df   :  { %v2141_v2 = vadd.f32 %v2140_v26, %v14826_v11  ;;  %v2373_v11 = vld [vmem:[#allocation5 + $0x790] sm:$0xff]  ;;  %v2376_v26 = vld [vmem:[#allocation5 + $0x7a8] sm:$0xff] }
 0x2e0   :  { %v2047_v28 = vpop.f32.mrb[28].mxu0  ;;  %v15188_v41 = vpop.f32.mrb[28].mxu1 }
 0x2e1   :  { %14364 = vtanh.f32 %v2141_v2  ;;  %v14243_v22 = vadd.f32 %v2047_v28, %v14879_v61  ;;  %v2049_v32 = vpop.f32.mrb[29].mxu0  ;;  %v10445_v5 = vpop.f32.mrb[29].mxu1  ;;  %v2381_v2 = vld [vmem:[#allocation5 + $0x7d0] sm:$0xff]  ;;  %v15193_v61 = vpack.c.bf16 %v2374_v37, %v2371_v16  ;;  %v2388_v37 = vld [vmem:[#allocation5 + $0x808] sm:$0xff] }
 0x2e2   :  { %14366 = vrcp.f32 %v2136_v42  ;;  %v14244_v35 = vadd.f32 %v2049_v32, %v14883_v8  ;;  %v15195_v42 = vpack.c.bf16 %v2376_v26, %v2373_v11  ;;  %v2379_v8 = vld [vmem:[#allocation5 + $0x7c0] sm:$0xff]  ;;  %v2390_v11 = vld [vmem:[#allocation5 + $0x818] sm:$0xff]  ;;  %v2393_v26 = vld [vmem:[#allocation5 + $0x830] sm:$0xff] }
 0x2e3   :  { %v9307_v7 = vmul.f32 -1.442695, %v14243_v22  ;;  %v2377_v22 = vld [vmem:[#allocation5 + $0x7b0] sm:$0xff] }
 0x2e4   :  { %v9308_v60 = vmul.f32 -1.442695, %v14244_v35  ;;  %v2387_v35 = vld [vmem:[#allocation5 + $0x800] sm:$0xff] }
 0x2e5   :  { %14368 = vpow2.f32 %v9307_v7  ;;  %v15199_v7 = vpack.c.bf16 %v2381_v2, %v2378_v48  ;;  %v2383_v48 = vld [vmem:[#allocation5 + $0x7e0] sm:$0xff]  ;;  %v2392_v2 = vld [vmem:[#allocation5 + $0x828] sm:$0xff] }
 0x2e6   :  { %14370 = vpow2.f32 %v9308_v60  ;;  %v15211_v60 = vpack.c.bf16 %v2387_v35, %v2384_v0  ;;  %v2389_v0 = vld [vmem:[#allocation5 + $0x810] sm:$0xff] }
 0x2e7   :  { %17251 = vst [vmem:[#allocation71_spill] sm:$0xff] %v15199_v7 }
 0x2e8   :  { %17254 = vst [vmem:[#allocation74_spill] sm:$0xff] %v15211_v60 }
 0x2eb   :  { %v14365_v6 = vpop.eup %14364 }
 0x2ec   :  { %v2143_v3 = vsub.f32 %v14886_v46, %v14365_v6  ;;  %v14367_v30 = vpop.eup %14366  ;;  %v2380_v46 = vld [vmem:[#allocation5 + $0x7c8] sm:$0xff] }
 0x2ed   :  { %v15205_v16 = vpack.c.bf16 %v2380_v46, %v2377_v22  ;;  %v2394_v22 = vld [vmem:[#allocation5 + $0x838] sm:$0xff]  ;;  %v2399_v46 = vld [vmem:[#allocation5 + $0x860] sm:$0xff] }
 0x2ee   :  { %v2144_v17 = vmul.f32 %v14367_v30, %v2143_v3  ;;  %v2385_v3 = vld [vmem:[#allocation5 + $0x7f0] sm:$0xff]  ;;  %v15224_v30 = vpack.c.bf16 %v2393_v26, %v2390_v11 }
 0x2ef   :  { %v14369_v28 = vpop.eup %14368  ;;  %17252 = vst [vmem:[#allocation72_spill] sm:$0xff] %v15205_v16 }
 0x2f0   :  { %v2153_v5 = vadd.f32 1.0, %v14369_v28  ;;  %v15197_v32 = vadd.f32 %v14365_v6, %v2144_v17  ;;  %v15207_v17 = vpack.c.bf16 %v2382_v25, %v2379_v8  ;;  %v2386_v6 = vld [vmem:[#allocation5 + $0x7f8] sm:$0xff]  ;;  %v15220_v25 = vpack.c.bf16 %v2388_v37, %v2385_v3  ;;  %v2391_v28 = vld [vmem:[#allocation5 + $0x820] sm:$0xff]  ;;  %v14371_v35 = vpop.eup %14370 }
 0x2f1   :  { %v15218_v8 = vpack.c.bf16 %v2386_v6, %v2383_v48  ;;  %v15232_v6 = vpack.c.bf16 %v2392_v2, %v2389_v0  ;;  %v15234_v3 = vpack.c.bf16 %v2394_v22, %v2391_v28  ;;  %v2395_v37 = vld [vmem:[#allocation5 + $0x840] sm:$0xff]  ;;  %v2160_v0 = vadd.f32 1.0, %v14371_v35  ;;  %v2401_v22 = vld [vmem:[#allocation5 + $0x870] sm:$0xff] }
 0x2f2   :  { %14372 = vrcp.f32 %v2153_v5  ;;  %2286 = vmatmul.mubr.f32.vlgmr.msra.gmra.mrb[38].mxu0 %v15197_v32  ;;  %10479 = vmatmul.mubr.f32.vlgmr.msra.gmra.mrb[30].mxu1 %v15197_v32  ;;  %17253 = vst [vmem:[#allocation73_spill] sm:$0xff] %v15207_v17  ;;  %17256 = vst [vmem:[#allocation76_spill] sm:$0xff] %v15220_v25  ;;  %v2396_v5 = vld [vmem:[#allocation5 + $0x848] sm:$0xff]  ;;  %v2411_v35 = vld [vmem:[#allocation5 + $0x8c0] sm:$0xff] }
 0x2f3   :  { %12250 = vmatpush1.bf16.msra.mxu0 %v15193_v61  ;;  %12281 = vmatpush3.bf16.msra.mxu1 %v15195_v42  ;;  %17255 = vst [vmem:[#allocation75_spill] sm:$0xff] %v15218_v8  ;;  %v15238_v26 = vpack.c.bf16 %v2399_v46, %v2396_v5  ;;  %v2404_v46 = vld [vmem:[#allocation5 + $0x888] sm:$0xff] }
 0x2f4   :  { %12252 = vmatprep.subr.bf16.mxu0 %v15199_v7  ;;  %12282 = vmatprep.subr.bf16.mxu1 %v17225_v19  ;;  %v2400_v7 = vld [vmem:[#allocation5 + $0x868] sm:$0xff] }
 0x2f5   :  { %2483 = vmatprep.mubr.f32.mxu0 %v17208_v21  ;;  %10513 = vmatprep.mubr.msk.f32.mxu1 %vm14652_vm0, %v17208_v21 }
 0x2f7   :  { %12254 = vmatpush1.bf16.msra.mxu0 %v15205_v16  ;;  %12284 = vmatpush3.bf16.msra.mxu1 %v15207_v17  ;;  %v15226_v16 = vld [vmem:[#allocation7 + $0x5] ss:$0 sm:$0xff]  ;;  %v2397_v17 = vld [vmem:[#allocation5 + $0x850] sm:$0xff] }
 0x2f8   :  { %12256 = vmatprep.subr.bf16.mxu0 %v15211_v60  ;;  %12285 = vmatprep.subr.bf16.mxu1 %v17225_v19  ;;  %17257 = vst [vmem:[#allocation77_spill] sm:$0xff] %v15226_v16  ;;  %v2163_v48 = vadd.f32 %v15226_v16, %v15188_v41  ;;  %v2398_v60 = vld [vmem:[#allocation5 + $0x858] sm:$0xff]  ;;  %v15245_v28 = vpack.c.bf16 %v2400_v7, %v2397_v17 }
 0x2f9   :  { %v2402_v16 = vld [vmem:[#allocation5 + $0x878] sm:$0xff]  ;;  %v15243_v2 = vpack.c.bf16 %v2398_v60, %v2395_v37  ;;  %v15253_v7 = vpack.c.bf16 %v2404_v46, %v2401_v22  ;;  %v2407_v60 = vld [vmem:[#allocation5 + $0x8a0] sm:$0xff]  ;;  %v2412_v37 = vld [vmem:[#allocation5 + $0x8c8] sm:$0xff] }
 0x2fa   :  { %17258 = vst [vmem:[#allocation78_spill] sm:$0xff] %v15245_v28 }
 0x2fb   :  { %12258 = vmatpush1.bf16.msra.mxu0 %v15218_v8  ;;  %12287 = vmatpush3.bf16.msra.mxu1 %v15220_v25  ;;  %v2405_v8 = vld [vmem:[#allocation5 + $0x890] sm:$0xff] }
 0x2fc   :  { %v14373_v11 = vpop.eup %14372  ;;  %12260 = vmatprep.subr.bf16.mxu0 %v15224_v30  ;;  %12288 = vmatprep.subr.bf16.mxu1 %v17225_v19  ;;  %v15249_v5 = vpack.c.bf16 %v2405_v8, %v2402_v16  ;;  %v2410_v8 = vld [vmem:[#allocation5 + $0x8b8] sm:$0xff] }
 0x2fd   :  { %v2164_v41 = vmul.f32 %v14373_v11, %v2163_v48  ;;  %v2403_v48 = vld [vmem:[#allocation5 + $0x880] sm:$0xff]  ;;  %v2406_v11 = vld [vmem:[#allocation5 + $0x898] sm:$0xff]  ;;  %v15263_v22 = vpack.c.bf16 %v2410_v8, %v2407_v60 }
 0x2fe   :  { %17259 = vst [vmem:[#allocation79_spill] sm:$0xff] %v15249_v5  ;;  %v15255_v17 = vpack.c.bf16 %v2406_v11, %v2403_v48  ;;  %v2413_v48 = vld [vmem:[#allocation5 + $0x8d0] sm:$0xff] }
 0x2ff   :  { %v2165_v25 = vadd.f32 %v2164_v41, %v14864_v40  ;;  %12262 = vmatpush1.bf16.msra.mxu0 %v15232_v6  ;;  %12290 = vmatpush3.bf16.msra.mxu1 %v15234_v3  ;;  %v2408_v40 = vld [vmem:[#allocation5 + $0x8a8] sm:$0xff]  ;;  %v2414_v41 = vld [vmem:[#allocation5 + $0x8d8] sm:$0xff] }
 0x300   :  { %12264 = vmatprep.subr.bf16.mxu0 %v15238_v26  ;;  %12291 = vmatprep.subr.bf16.mxu1 %v17225_v19  ;;  %17260 = vst [vmem:[#allocation80_spill] sm:$0xff] %v15255_v17  ;;  %v15259_v16 = vpack.c.bf16 %v2411_v35, %v2408_v40  ;;  %v2416_v40 = vld [vmem:[#allocation5 + $0x8e8] sm:$0xff]  ;;  %v2415_v35 = vld [vmem:[#allocation5 + $0x8e0] sm:$0xff] }
 0x301   :  { %14374 = vtanh.f32 %v2165_v25  ;;  %v2409_v25 = vld [vmem:[#allocation5 + $0x8b0] sm:$0xff] }
 0x302   :  { %14376 = vrcp.f32 %v2160_v0  ;;  %v2417_v0 = vld [vmem:[#allocation5 + $0x8f0] sm:$0xff]  ;;  %v15265_v46 = vpack.c.bf16 %v2412_v37, %v2409_v25 }
 0x303   :  { %12266 = vmatpush1.bf16.msra.mxu0 %v15243_v2  ;;  %12293 = vmatpush3.bf16.msra.mxu1 %v15245_v28  ;;  %v15269_v11 = vpack.c.bf16 %v2417_v0, %v2414_v41 }
 0x304   :  { %12268 = vmatprep.subr.bf16.mxu0 %v15249_v5  ;;  %12294 = vmatprep.subr.bf16.mxu1 %v17225_v19  ;;  %v2418_v5 = vld [vmem:[#allocation5 + $0x8f8] sm:$0xff] }
 0x305   :  { %v15275_v60 = vpack.c.bf16 %v2418_v5, %v2415_v35 }
 0x307   :  { %12270 = vmatpush1.bf16.msra.mxu0 %v15253_v7  ;;  %12296 = vmatpush3.bf16.msra.mxu1 %v15255_v17  ;;  %v15273_v17 = vpack.c.bf16 %v2416_v40, %v2413_v48 }
 0x308   :  { %12272 = vmatprep.subr.bf16.mxu0 %v15259_v16  ;;  %12297 = vmatprep.subr.bf16.mxu1 %v17225_v19 }
 0x30b   :  { %v14375_v28 = vpop.eup %14374  ;;  %12274 = vmatpush1.bf16.msra.mxu0 %v15263_v22  ;;  %12299 = vmatpush3.bf16.msra.mxu1 %v15265_v46 }
 0x30c   :  { %12276 = vmatprep.subr.bf16.mxu0 %v15269_v11  ;;  %12300 = vmatprep.subr.bf16.mxu1 %v17225_v19  ;;  %v2167_v8 = vsub.f32 %v14902_v36, %v14375_v28  ;;  %v14377_v25 = vpop.eup %14376  ;;  %v17261_v36 = vld [vmem:[#allocation30_spill] sm:$0xff] }
 0x30e   :  { %v2168_v37 = vmul.f32 %v14377_v25, %v2167_v8  ;;  %v17300_v8 = vld [vmem:[#allocation25_spill] sm:$0xff] }
 0x30f   :  { %12278 = vmatpush1.bf16.msra.mxu0 %v15273_v17  ;;  %12302 = vmatpush3.bf16.msra.mxu1 %v15275_v60 }
 0x310   :  { %12304 = vmatprep.subr.bf16.mxu0 %v14917_v29  ;;  %12335 = vmatprep.subr.bf16.mxu1 %v17225_v19  ;;  %v15284_v41 = vadd.f32 %v14375_v28, %v2168_v37  ;;  %v17262_v29 = vld [vmem:[#allocation31_spill] sm:$0xff] }
 0x312   :  { %2484 = vmatmul.mubr.f32.vlgmr.msra.gmra.mrb[40].mxu0 %v15284_v41  ;;  %10514 = vmatmul.mubr.f32.vlgmr.msra.gmra.mrb[32].mxu1 %v15284_v41 }
 0x313   :  { %12306 = vmatpush1.bf16.msra.mxu0 %v14919_v23  ;;  %12337 = vmatpush3.bf16.msra.mxu1 %v14921_v9  ;;  %v17263_v23 = vld [vmem:[#allocation32_spill] sm:$0xff]  ;;  %v17264_v9 = vld [vmem:[#allocation33_spill] sm:$0xff] }
 0x314   :  { %12308 = vmatprep.subr.bf16.mxu0 %v14925_v47  ;;  %12338 = vmatprep.subr.bf16.mxu1 %v17225_v19  ;;  %v17265_v47 = vld [vmem:[#allocation34_spill] sm:$0xff] }
 0x315   :  { %2678 = vmatprep.mubr.f32.mxu0 %v17208_v21  ;;  %10548 = vmatprep.mubr.msk.f32.mxu1 %vm14652_vm0, %v17208_v21 }
 0x317   :  { %12310 = vmatpush1.bf16.msra.mxu0 %v14931_v53  ;;  %12340 = vmatpush3.bf16.msra.mxu1 %v14933_v54  ;;  %v17266_v53 = vld [vmem:[#allocation35_spill] sm:$0xff]  ;;  %v17267_v54 = vld [vmem:[#allocation36_spill] sm:$0xff] }
 0x318   :  { %12312 = vmatprep.subr.bf16.mxu0 %v14937_v57  ;;  %12341 = vmatprep.subr.bf16.mxu1 %v17225_v19  ;;  %v17268_v57 = vld [vmem:[#allocation37_spill] sm:$0xff] }
 0x31b   :  { %12314 = vmatpush1.bf16.msra.mxu0 %v14944_v63  ;;  %12343 = vmatpush3.bf16.msra.mxu1 %v14946_v1  ;;  %v17269_v63 = vld [vmem:[#allocation38_spill] sm:$0xff]  ;;  %v17270_v1 = vld [vmem:[#allocation39_spill] sm:$0xff] }
 0x31c   :  { %12316 = vmatprep.subr.bf16.mxu0 %v14950_v4  ;;  %12344 = vmatprep.subr.bf16.mxu1 %v17225_v19  ;;  %v17271_v4 = vld [vmem:[#allocation40_spill] sm:$0xff] }
 0x31f   :  { %12318 = vmatpush1.bf16.msra.mxu0 %v14954_v34  ;;  %12346 = vmatpush3.bf16.msra.mxu1 %v14956_v18  ;;  %v17272_v34 = vld [vmem:[#allocation41_spill] sm:$0xff]  ;;  %v17273_v18 = vld [vmem:[#allocation42_spill] sm:$0xff] }
 0x320   :  { %12320 = vmatprep.subr.bf16.mxu0 %v14960_v45  ;;  %12347 = vmatprep.subr.bf16.mxu1 %v17225_v19  ;;  %v17274_v45 = vld [vmem:[#allocation43_spill] sm:$0xff] }
 0x323   :  { %12322 = vmatpush1.bf16.msra.mxu0 %v14964_v39  ;;  %12349 = vmatpush3.bf16.msra.mxu1 %v14966_v43  ;;  %v17275_v39 = vld [vmem:[#allocation44_spill] sm:$0xff]  ;;  %v17276_v43 = vld [vmem:[#allocation45_spill] sm:$0xff] }
 0x324   :  { %12324 = vmatprep.subr.bf16.mxu0 %v14970_v49  ;;  %12350 = vmatprep.subr.bf16.mxu1 %v17225_v19  ;;  %v17277_v49 = vld [vmem:[#allocation46_spill] sm:$0xff] }
 0x327   :  { %12326 = vmatpush1.bf16.msra.mxu0 %v14974_v24  ;;  %12352 = vmatpush3.bf16.msra.mxu1 %v14976_v38  ;;  %v17278_v24 = vld [vmem:[#allocation47_spill] sm:$0xff]  ;;  %v17279_v38 = vld [vmem:[#allocation48_spill] sm:$0xff] }
 0x328   :  { %12328 = vmatprep.subr.bf16.mxu0 %v14980_v59  ;;  %12353 = vmatprep.subr.bf16.mxu1 %v17225_v19  ;;  %v17280_v59 = vld [vmem:[#allocation49_spill] sm:$0xff] }
 0x32b   :  { %12330 = vmatpush1.bf16.msra.mxu0 %v14984_v13  ;;  %12355 = vmatpush3.bf16.msra.mxu1 %v14986_v15  ;;  %v17281_v13 = vld [vmem:[#allocation50_spill] sm:$0xff]  ;;  %v17282_v15 = vld [vmem:[#allocation51_spill] sm:$0xff] }
 0x32c   :  { %12332 = vmatprep.subr.bf16.mxu0 %v14990_v55  ;;  %12356 = vmatprep.subr.bf16.mxu1 %v17225_v19  ;;  %v17283_v55 = vld [vmem:[#allocation52_spill] sm:$0xff] }
 0x32f   :  { %12334 = vmatpush1.bf16.msra.mxu0 %v14994_v50  ;;  %12358 = vmatpush3.bf16.msra.mxu1 %v14996_v51  ;;  %v17284_v50 = vld [vmem:[#allocation53_spill] sm:$0xff]  ;;  %v17285_v51 = vld [vmem:[#allocation54_spill] sm:$0xff] }
 0x330   :  { %12360 = vmatprep.subr.bf16.mxu0 %v15000_v14  ;;  %12391 = vmatprep.subr.bf16.mxu1 %v17225_v19  ;;  %v17286_v14 = vld [vmem:[#allocation56_spill] sm:$0xff] }
 0x332   :  { %2679 = vmatmul.mubr.f32.vlgmr.msra.gmra.mrb[4].mxu0 %v15197_v32  ;;  %10549 = vmatmul.mubr.f32.vlgmr.msra.gmra.mrb[34].mxu1 %v15197_v32 }
 0x333   :  { %12362 = vmatpush1.bf16.msra.mxu0 %v15004_v10  ;;  %12393 = vmatpush3.bf16.msra.mxu1 %v15006_v12  ;;  %v17287_v10 = vld [vmem:[#allocation57_spill] sm:$0xff]  ;;  %v17288_v12 = vld [vmem:[#allocation58_spill] sm:$0xff] }
 0x334   :  { %12364 = vmatprep.subr.bf16.mxu0 %v15010_v27  ;;  %12394 = vmatprep.subr.bf16.mxu1 %v17225_v19  ;;  %v17289_v27 = vld [vmem:[#allocation59_spill] sm:$0xff] }
 0x335   :  { %2867 = vmatprep.mubr.f32.mxu0 %v17208_v21  ;;  %10583 = vmatprep.mubr.msk.f32.mxu1 %vm14652_vm0, %v17208_v21 }
 0x337   :  { %12366 = vmatpush1.bf16.msra.mxu0 %v15016_v52  ;;  %12396 = vmatpush3.bf16.msra.mxu1 %v15018_v56  ;;  %v17290_v52 = vld [vmem:[#allocation60_spill] sm:$0xff]  ;;  %v17291_v56 = vld [vmem:[#allocation61_spill] sm:$0xff] }
 0x338   :  { %12368 = vmatprep.subr.bf16.mxu0 %v15022_v62  ;;  %12397 = vmatprep.subr.bf16.mxu1 %v17225_v19  ;;  %v17292_v62 = vld [vmem:[#allocation62_spill] sm:$0xff] }
 0x33b   :  { %12370 = vmatpush1.bf16.msra.mxu0 %v15029_v20  ;;  %12399 = vmatpush3.bf16.msra.mxu1 %v15031_v31  ;;  %v17293_v20 = vld [vmem:[#allocation63_spill] sm:$0xff]  ;;  %v17294_v31 = vld [vmem:[#allocation64_spill] sm:$0xff] }
 0x33c   :  { %12372 = vmatprep.subr.bf16.mxu0 %v15035_v33  ;;  %12400 = vmatprep.subr.bf16.mxu1 %v17225_v19  ;;  %v17295_v33 = vld [vmem:[#allocation65_spill] sm:$0xff] }
 0x33f   :  { %12374 = vmatpush1.bf16.msra.mxu0 %v15039_v58  ;;  %12402 = vmatpush3.bf16.msra.mxu1 %v15041_v44  ;;  %v17296_v58 = vld [vmem:[#allocation66_spill] sm:$0xff]  ;;  %v17297_v44 = vld [vmem:[#allocation67_spill] sm:$0xff] }
 0x340   :  { %12376 = vmatprep.subr.bf16.mxu0 %v17261_v36  ;;  %12403 = vmatprep.subr.bf16.mxu1 %v17225_v19 }
 0x343   :  { %12378 = vmatpush1.bf16.msra.mxu0 %v17262_v29  ;;  %12405 = vmatpush3.bf16.msra.mxu1 %v17263_v23  ;;  %v17301_v23 = vld [vmem:[#allocation27_spill] sm:$0xff] }
 0x344   :  { %12380 = vmatprep.subr.bf16.mxu0 %v17264_v9  ;;  %12406 = vmatprep.subr.bf16.mxu1 %v17225_v19 }
 0x347   :  { %12382 = vmatpush1.bf16.msra.mxu0 %v17265_v47  ;;  %12408 = vmatpush3.bf16.msra.mxu1 %v17266_v53 }
 0x348   :  { %12384 = vmatprep.subr.bf16.mxu0 %v17267_v54  ;;  %12409 = vmatprep.subr.bf16.mxu1 %v17225_v19 }
 0x34b   :  { %12386 = vmatpush1.bf16.msra.mxu0 %v17268_v57  ;;  %12411 = vmatpush3.bf16.msra.mxu1 %v17269_v63  ;;  %v17302_v63 = vld [vmem:[#allocation70_spill] sm:$0xff] }
 0x34c   :  { %12388 = vmatprep.subr.bf16.mxu0 %v17270_v1  ;;  %12412 = vmatprep.subr.bf16.mxu1 %v17225_v19 }
 0x34f   :  { %12390 = vmatpush1.bf16.msra.mxu0 %v17271_v4  ;;  %12414 = vmatpush3.bf16.msra.mxu1 %v17272_v34 }
 0x350   :  { %12416 = vmatprep.subr.bf16.mxu0 %v17273_v18  ;;  %12447 = vmatprep.subr.bf16.mxu1 %v17225_v19  ;;  %v17303_v18 = vld [vmem:[#allocation13_spill] sm:$0xff] }
 0x352   :  { %2868 = vmatmul.mubr.f32.vlgmr.msra.gmra.mrb[26].mxu0 %v15284_v41  ;;  %10584 = vmatmul.mubr.f32.vlgmr.msra.gmra.mrb[36].mxu1 %v15284_v41 }
 0x353   :  { %12418 = vmatpush1.bf16.msra.mxu0 %v17274_v45  ;;  %12449 = vmatpush3.bf16.msra.mxu1 %v17275_v39 }
 0x354   :  { %12420 = vmatprep.subr.bf16.mxu0 %v17276_v43  ;;  %12450 = vmatprep.subr.bf16.mxu1 %v17225_v19 }
 0x355   :  { %3107 = vmatprep.mubr.f32.mxu0 %v17208_v21  ;;  %10618 = vmatprep.mubr.msk.f32.mxu1 %vm14652_vm0, %v17208_v21 }
 0x357   :  { %12422 = vmatpush1.bf16.msra.mxu0 %v17277_v49  ;;  %12452 = vmatpush3.bf16.msra.mxu1 %v17278_v24  ;;  %v17304_v24 = vld [vmem:[#allocation28_spill] sm:$0xff] }
 0x358   :  { %12424 = vmatprep.subr.bf16.mxu0 %v17279_v38  ;;  %12453 = vmatprep.subr.bf16.mxu1 %v17225_v19 }
 0x35b   :  { %12426 = vmatpush1.bf16.msra.mxu0 %v17280_v59  ;;  %12455 = vmatpush3.bf16.msra.mxu1 %v17281_v13 }
 0x35c   :  { %12428 = vmatprep.subr.bf16.mxu0 %v17282_v15  ;;  %12456 = vmatprep.subr.bf16.mxu1 %v17225_v19 }
 0x35f   :  { %12430 = vmatpush1.bf16.msra.mxu0 %v17283_v55  ;;  %12458 = vmatpush3.bf16.msra.mxu1 %v17284_v50  ;;  %v17305_v55 = vld [vmem:[#allocation29_spill] sm:$0xff] }
 0x360   :  { %12432 = vmatprep.subr.bf16.mxu0 %v17285_v51  ;;  %12459 = vmatprep.subr.bf16.mxu1 %v17225_v19 }
 0x363   :  { %12434 = vmatpush1.bf16.msra.mxu0 %v17286_v14  ;;  %12461 = vmatpush3.bf16.msra.mxu1 %v17287_v10 }
 0x364   :  { %12436 = vmatprep.subr.bf16.mxu0 %v17288_v12  ;;  %12462 = vmatprep.subr.bf16.mxu1 %v17225_v19 }
 0x367   :  { %12438 = vmatpush1.bf16.msra.mxu0 %v17289_v27  ;;  %12464 = vmatpush3.bf16.msra.mxu1 %v17290_v52 }
 0x368   :  { %12440 = vmatprep.subr.bf16.mxu0 %v17291_v56  ;;  %12465 = vmatprep.subr.bf16.mxu1 %v17225_v19 }
 0x36b   :  { %12442 = vmatpush1.bf16.msra.mxu0 %v17292_v62  ;;  %12467 = vmatpush3.bf16.msra.mxu1 %v17293_v20  ;;  %v17306_v20 = vld [vmem:[#allocation71_spill] sm:$0xff] }
 0x36c   :  { %12444 = vmatprep.subr.bf16.mxu0 %v17294_v31  ;;  %12468 = vmatprep.subr.bf16.mxu1 %v17225_v19  ;;  %v17308_v31 = vld [vmem:[#allocation73_spill] sm:$0xff] }
 0x36f   :  { %12446 = vmatpush1.bf16.msra.mxu0 %v17295_v33  ;;  %12470 = vmatpush3.bf16.msra.mxu1 %v17296_v58  ;;  %v17309_v33 = vld [vmem:[#allocation74_spill] sm:$0xff]  ;;  %v17310_v58 = vld [vmem:[#allocation77_spill] sm:$0xff] }
 0x370   :  { %12472 = vmatprep.subr.bf16.mxu0 %v17297_v44  ;;  %12503 = vmatprep.subr.bf16.mxu1 %v17225_v19  ;;  %v17311_v44 = vld [vmem:[#allocation75_spill] sm:$0xff] }
 0x3c5   :  { %v15397_v28 = vpop.f32.mrb[30].mxu1 }
 0x3c6   :  { %17298 = vst [vmem:[#allocation30_spill] sm:$0xff] %v15397_v28  ;;  %v10480_v5 = vpop.f32.mrb[31].mxu1  ;;  %v3623_v28 = vld [vmem:[#allocation5 + $0x5f0] sm:$0xff] }
 0x3c7   :  { %v17312_v5 = vld [vmem:[#allocation76_spill] sm:$0xff] }
 0x3e5   :  { %v15399_v0 = vpop.f32.mrb[32].mxu1 }
 0x3e6   :  { %17299 = vst [vmem:[#allocation31_spill] sm:$0xff] %v15399_v0  ;;  %v10515_v48 = vpop.f32.mrb[33].mxu1  ;;  %v3624_v0 = vld [vmem:[#allocation5 + $0x5f8] sm:$0xff] }
 0x405   :  { %v2680_v40 = vpop.f32.mrb[4].mxu0  ;;  %v2751_v35 = vpop.f32.mrb[34].mxu1 }
 0x406   :  { %v14219_v25 = vadd.f32 %v2680_v40, %v17300_v8  ;;  %v2682_v37 = vpop.f32.mrb[5].mxu0  ;;  %v10550_v36 = vpop.f32.mrb[35].mxu1  ;;  %v2961_v1 = vadd.f32 %v17302_v63, %v2751_v35  ;;  %v17313_v35 = vld [vmem:[#allocation22_spill] sm:$0xff]  ;;  %v3398_v63 = vld [vmem:[#allocation5 + $0x350] sm:$0xff] }
 0x407   :  { %v14220_v9 = vadd.f32 %v2682_v37, %v17301_v23  ;;  %v17314_v36 = vld [vmem:[#allocation78_spill] sm:$0xff] }
 0x408   :  { %v9309_v29 = vmul.f32 -1.442695, %v14219_v25 }
 0x409   :  { %v9310_v47 = vmul.f32 -1.442695, %v14220_v9 }
 0x40a   :  { %14378 = vpow2.f32 %v9309_v29  ;;  %v17316_v29 = vld [vmem:[#allocation80_spill] sm:$0xff] }
 0x40b   :  { %14380 = vpow2.f32 %v9310_v47  ;;  %v3391_v47 = vld [vmem:[#allocation5 + $0x318] sm:$0xff] }
 0x414   :  { %v14379_v53 = vpop.eup %14378 }
 0x415   :  { %v2951_v54 = vadd.f32 1.0, %v14379_v53  ;;  %v14381_v57 = vpop.eup %14380  ;;  %v3393_v53 = vld [vmem:[#allocation5 + $0x328] sm:$0xff] }
 0x416   :  { %v2958_v39 = vadd.f32 1.0, %v14381_v57  ;;  %v3395_v57 = vld [vmem:[#allocation5 + $0x338] sm:$0xff] }
 0x417   :  { %14382 = vrcp.f32 %v2951_v54 }
 0x421   :  { %v14383_v4 = vpop.eup %14382 }
 0x422   :  { %v2962_v34 = vmul.f32 %v14383_v4, %v2961_v1  ;;  %v15458_v4 = vpack.c.bf16 %v3398_v63, %v3395_v57  ;;  %v3426_v57 = vld [vmem:[#allocation5 + $0x430] sm:$0xff]  ;;  %v3429_v63 = vld [vmem:[#allocation5 + $0x448] sm:$0xff] }
 0x424   :  { %v2963_v45 = vadd.f32 %v2962_v34, %v17303_v18  ;;  %v3397_v34 = vld [vmem:[#allocation5 + $0x348] sm:$0xff]  ;;  %v3396_v18 = vld [vmem:[#allocation5 + $0x340] sm:$0xff] }
 0x425   :  { %v2869_v43 = vpop.f32.mrb[26].mxu0  ;;  %v2940_v49 = vpop.f32.mrb[36].mxu1 }
 0x426   :  { %14384 = vtanh.f32 %v2963_v45  ;;  %v14241_v38 = vadd.f32 %v2869_v43, %v17304_v24  ;;  %v2871_v59 = vpop.f32.mrb[27].mxu0  ;;  %v10585_v13 = vpop.f32.mrb[37].mxu1  ;;  %v3399_v45 = vld [vmem:[#allocation5 + $0x358] sm:$0xff] }
 0x427   :  { %14386 = vrcp.f32 %v2958_v39  ;;  %v14242_v50 = vadd.f32 %v2871_v59, %v17305_v55  ;;  %v3401_v39 = vld [vmem:[#allocation5 + $0x368] sm:$0xff]  ;;  %v15466_v43 = vpack.c.bf16 %v3399_v45, %v3396_v18  ;;  %v3403_v59 = vld [vmem:[#allocation5 + $0x378] sm:$0xff]  ;;  %v3402_v13 = vld [vmem:[#allocation5 + $0x370] sm:$0xff]  ;;  %v15519_v18 = vpack.c.bf16 %v3429_v63, %v3426_v57 }
 0x428   :  { %v9311_v15 = vmul.f32 -1.442695, %v14241_v38  ;;  %v3430_v45 = vld [vmem:[#allocation5 + $0x450] sm:$0xff]  ;;  %v3592_v57 = vld [vmem:[#allocation5 + $0x4f8] sm:$0xff] }
 0x429   :  { %v9312_v12 = vmul.f32 -1.442695, %v14242_v50  ;;  %v3407_v50 = vld [vmem:[#allocation5 + $0x398] sm:$0xff]  ;;  %v3591_v63 = vld [vmem:[#allocation5 + $0x4f0] sm:$0xff] }
 0x42a   :  { %14388 = vpow2.f32 %v9311_v15  ;;  %v3405_v15 = vld [vmem:[#allocation5 + $0x388] sm:$0xff] }
 0x42b   :  { %14390 = vpow2.f32 %v9312_v12  ;;  %v3406_v12 = vld [vmem:[#allocation5 + $0x390] sm:$0xff] }
 0x430   :  { %v14385_v51 = vpop.eup %14384 }
 0x431   :  { %v2965_v14 = vsub.f32 %v15197_v32, %v14385_v51  ;;  %v14387_v10 = vpop.eup %14386  ;;  %v17307_v32 = vld [vmem:[#allocation72_spill] sm:$0xff] }
 0x433   :  { %v2966_v27 = vmul.f32 %v14387_v10, %v2965_v14  ;;  %v15479_v10 = vpack.c.bf16 %v3405_v15, %v3402_v13  ;;  %v3578_v13 = vld [vmem:[#allocation5 + $0x488] sm:$0xff]  ;;  %v3581_v15 = vld [vmem:[#allocation5 + $0x4a0] sm:$0xff] }
 0x434   :  { %v14389_v52 = vpop.eup %14388 }
 0x435   :  { %v2975_v56 = vadd.f32 1.0, %v14389_v52  ;;  %v15408_v62 = vadd.f32 %v14385_v51, %v2966_v27  ;;  %v3410_v51 = vld [vmem:[#allocation5 + $0x3b0] sm:$0xff]  ;;  %v3409_v52 = vld [vmem:[#allocation5 + $0x3a8] sm:$0xff] }
 0x436   :  { %v15483_v27 = vpack.c.bf16 %v3410_v51, %v3407_v50 }
 0x437   :  { %14392 = vrcp.f32 %v2975_v56  ;;  %3108 = vmatmul.mubr.f32.vlgmr.msra.gmra.mrb[42].mxu0 %v15408_v62  ;;  %10619 = vmatmul.mubr.f32.vlgmr.msra.gmra.mrb[38].mxu1 %v15408_v62  ;;  %v3408_v56 = vld [vmem:[#allocation5 + $0x3a0] sm:$0xff] }
 0x438   :  { %12474 = vmatpush1.bf16.msra.mxu0 %v15193_v61  ;;  %12505 = vmatpush3.bf16.msra.mxu1 %v15195_v42  ;;  %v14391_v61 = vpop.eup %14390  ;;  %v2985_v42 = vadd.f32 %v17310_v58, %v2940_v49  ;;  %v3400_v49 = vld [vmem:[#allocation5 + $0x360] sm:$0xff] }
 0x439   :  { %12476 = vmatprep.subr.bf16.mxu0 %v17306_v20  ;;  %12506 = vmatprep.subr.bf16.mxu1 %v17225_v19  ;;  %v2982_v37 = vadd.f32 1.0, %v14391_v61  ;;  %v15477_v14 = vpack.c.bf16 %v3403_v59, %v3400_v49  ;;  %v3411_v20 = vld [vmem:[#allocation5 + $0x3b8] sm:$0xff]  ;;  %v3412_v58 = vld [vmem:[#allocation5 + $0x3c0] sm:$0xff] }
 0x43a   :  { %3305 = vmatprep.mubr.f32.mxu0 %v17208_v21  ;;  %10653 = vmatprep.mubr.msk.f32.mxu1 %vm14652_vm0, %v17208_v21  ;;  %v15489_v61 = vpack.c.bf16 %v3411_v20, %v3408_v56  ;;  %v3432_v49 = vld [vmem:[#allocation5 + $0x460] sm:$0xff]  ;;  %v3435_v59 = vld [vmem:[#allocation5 + $0x478] sm:$0xff]  ;;  %v3579_v20 = vld [vmem:[#allocation5 + $0x490] sm:$0xff] }
 0x43b   :  { %v15529_v51 = vpack.c.bf16 %v3435_v59, %v3432_v49  ;;  %v3580_v56 = vld [vmem:[#allocation5 + $0x498] sm:$0xff]  ;;  %v3595_v59 = vld [vmem:[#allocation5 + $0x510] sm:$0xff] }
 0x43c   :  { %12478 = vmatpush1.bf16.msra.mxu0 %v17307_v32  ;;  %12508 = vmatpush3.bf16.msra.mxu1 %v17308_v31  ;;  %v3413_v32 = vld [vmem:[#allocation5 + $0x3c8] sm:$0xff]  ;;  %v3416_v31 = vld [vmem:[#allocation5 + $0x3e0] sm:$0xff] }
 0x43d   :  { %12480 = vmatprep.subr.bf16.mxu0 %v17309_v33  ;;  %12509 = vmatprep.subr.bf16.mxu1 %v17225_v19  ;;  %v15487_v33 = vpack.c.bf16 %v3409_v52, %v3406_v12  ;;  %v3577_v12 = vld [vmem:[#allocation5 + $0x480] sm:$0xff]  ;;  %v15533_v52 = vpack.c.bf16 %v3581_v15, %v3578_v13  ;;  %v3598_v15 = vld [vmem:[#allocation5 + $0x528] sm:$0xff] }
 0x440   :  { %12482 = vmatpush1.bf16.msra.mxu0 %v17311_v44  ;;  %12511 = vmatpush3.bf16.msra.mxu1 %v17312_v5  ;;  %v3415_v44 = vld [vmem:[#allocation5 + $0x3d8] sm:$0xff]  ;;  %v3414_v5 = vld [vmem:[#allocation5 + $0x3d0] sm:$0xff] }
 0x441   :  { %v14393_v48 = vpop.eup %14392  ;;  %12484 = vmatprep.subr.bf16.mxu0 %v15224_v30  ;;  %12512 = vmatprep.subr.bf16.mxu1 %v17225_v19  ;;  %v17315_v30 = vld [vmem:[#allocation79_spill] sm:$0xff] }
 0x442   :  { %v2986_v40 = vmul.f32 %v14393_v48, %v2985_v42  ;;  %v15493_v42 = vpack.c.bf16 %v3416_v31, %v3413_v32  ;;  %v3417_v48 = vld [vmem:[#allocation5 + $0x3e8] sm:$0xff]  ;;  %v3584_v31 = vld [vmem:[#allocation5 + $0x4b8] sm:$0xff] }
 0x443   :  { %v3582_v32 = vld [vmem:[#allocation5 + $0x4a8] sm:$0xff] }
 0x444   :  { %v2987_v25 = vadd.f32 %v2986_v40, %v17313_v35  ;;  %12486 = vmatpush1.bf16.msra.mxu0 %v15232_v6  ;;  %12514 = vmatpush3.bf16.msra.mxu1 %v15234_v3  ;;  %v3389_v6 = vld [vmem:[#allocation5 + $0x308] sm:$0xff]  ;;  %v3392_v3 = vld [vmem:[#allocation5 + $0x320] sm:$0xff]  ;;  %v3419_v40 = vld [vmem:[#allocation5 + $0x3f8] sm:$0xff] }
 0x445   :  { %12488 = vmatprep.subr.bf16.mxu0 %v15238_v26  ;;  %12515 = vmatprep.subr.bf16.mxu1 %v17225_v19  ;;  %v15445_v9 = vpack.c.bf16 %v3392_v3, %v3389_v6  ;;  %v3422_v35 = vld [vmem:[#allocation5 + $0x410] sm:$0xff]  ;;  %v3420_v6 = vld [vmem:[#allocation5 + $0x400] sm:$0xff]  ;;  %v3423_v3 = vld [vmem:[#allocation5 + $0x418] sm:$0xff] }
 0x446   :  { %14394 = vtanh.f32 %v2987_v25  ;;  %v15497_v25 = vpack.c.bf16 %v3415_v44, %v3412_v58  ;;  %v3587_v58 = vld [vmem:[#allocation5 + $0x4d0] sm:$0xff]  ;;  %v15537_v44 = vpack.c.bf16 %v3580_v56, %v3577_v12  ;;  %v3597_v12 = vld [vmem:[#allocation5 + $0x520] sm:$0xff]  ;;  %v3600_v56 = vld [vmem:[#allocation5 + $0x538] sm:$0xff] }
 0x447   :  { %14396 = vrcp.f32 %v2982_v37  ;;  %v15499_v37 = vpack.c.bf16 %v3417_v48, %v3414_v5  ;;  %v15539_v5 = vpack.c.bf16 %v3582_v32, %v3579_v20  ;;  %v3583_v48 = vld [vmem:[#allocation5 + $0x4b0] sm:$0xff]  ;;  %v3602_v20 = vld [vmem:[#allocation5 + $0x548] sm:$0xff]  ;;  %v3605_v32 = vld [vmem:[#allocation5 + $0x560] sm:$0xff] }
 0x448   :  { %12490 = vmatpush1.bf16.msra.mxu0 %v15243_v2  ;;  %12517 = vmatpush3.bf16.msra.mxu1 %v17314_v36  ;;  %v3388_v2 = vld [vmem:[#allocation5 + $0x300] sm:$0xff]  ;;  %v3418_v36 = vld [vmem:[#allocation5 + $0x3f0] sm:$0xff] }
 0x449   :  { %12492 = vmatprep.subr.bf16.mxu0 %v17315_v30  ;;  %12518 = vmatprep.subr.bf16.mxu1 %v17225_v19  ;;  %v15503_v30 = vpack.c.bf16 %v3422_v35, %v3419_v40  ;;  %v15543_v40 = vpack.c.bf16 %v3587_v58, %v3584_v31  ;;  %v3586_v35 = vld [vmem:[#allocation5 + $0x4c8] sm:$0xff]  ;;  %v15572_v31 = vpack.c.bf16 %v3598_v15, %v3595_v59  ;;  %v3609_v59 = vld [vmem:[#allocation5 + $0x580] sm:$0xff]  ;;  %v3612_v15 = vld [vmem:[#allocation5 + $0x598] sm:$0xff] }
 0x44a   :  { %v15574_v58 = vpack.c.bf16 %v3600_v56, %v3597_v12  ;;  %v3614_v12 = vld [vmem:[#allocation5 + $0x5a8] sm:$0xff]  ;;  %v3617_v56 = vld [vmem:[#allocation5 + $0x5c0] sm:$0xff] }
 0x44c   :  { %12494 = vmatpush1.bf16.msra.mxu0 %v15253_v7  ;;  %12520 = vmatpush3.bf16.msra.mxu1 %v17316_v29  ;;  %v3421_v29 = vld [vmem:[#allocation5 + $0x408] sm:$0xff] }
 0x44d   :  { %12496 = vmatprep.subr.bf16.mxu0 %v15259_v16  ;;  %12521 = vmatprep.subr.bf16.mxu1 %v17225_v19  ;;  %v3390_v16 = vld [vmem:[#allocation5 + $0x310] sm:$0xff] }
 0x450   :  { %v14395_v26 = vpop.eup %14394  ;;  %12498 = vmatpush1.bf16.msra.mxu0 %v15263_v22  ;;  %12523 = vmatpush3.bf16.msra.mxu1 %v15265_v46  ;;  %v15450_v22 = vpack.c.bf16 %v3391_v47, %v3388_v2  ;;  %v15452_v46 = vpack.c.bf16 %v3393_v53, %v3390_v16  ;;  %v3428_v2 = vld [vmem:[#allocation5 + $0x440] sm:$0xff]  ;;  %v15509_v47 = vpack.c.bf16 %v3423_v3, %v3420_v6  ;;  %v3590_v6 = vld [vmem:[#allocation5 + $0x4e8] sm:$0xff] }
 0x451   :  { %12500 = vmatprep.subr.bf16.mxu0 %v15269_v11  ;;  %12524 = vmatprep.subr.bf16.mxu1 %v17225_v19  ;;  %v2989_v7 = vsub.f32 %v15284_v41, %v14395_v26  ;;  %v14397_v54 = vpop.eup %14396  ;;  %v3394_v11 = vld [vmem:[#allocation5 + $0x330] sm:$0xff]  ;;  %v3424_v16 = vld [vmem:[#allocation5 + $0x420] sm:$0xff] }
 0x452   :  { %v3593_v3 = vld [vmem:[#allocation5 + $0x500] sm:$0xff] }
 0x453   :  { %v2990_v1 = vmul.f32 %v14397_v54, %v2989_v7  ;;  %v15507_v7 = vpack.c.bf16 %v3421_v29, %v3418_v36  ;;  %v3427_v54 = vld [vmem:[#allocation5 + $0x438] sm:$0xff]  ;;  %v3585_v36 = vld [vmem:[#allocation5 + $0x4c0] sm:$0xff] }
 0x454   :  { %12502 = vmatpush1.bf16.msra.mxu0 %v15273_v17  ;;  %12526 = vmatpush3.bf16.msra.mxu1 %v15275_v60  ;;  %v3404_v17 = vld [vmem:[#allocation5 + $0x380] sm:$0xff]  ;;  %v15464_v60 = vpack.c.bf16 %v3397_v34, %v3394_v11  ;;  %v3434_v11 = vld [vmem:[#allocation5 + $0x470] sm:$0xff]  ;;  %v15517_v34 = vpack.c.bf16 %v3427_v54, %v3424_v16  ;;  %v3588_v29 = vld [vmem:[#allocation5 + $0x4d8] sm:$0xff]  ;;  %v15555_v54 = vpack.c.bf16 %v3593_v3, %v3590_v6 }
 0x455   :  { %12528 = vmatprep.subr.bf16.mxu0 %v15445_v9  ;;  %12559 = vmatprep.subr.bf16.mxu1 %v17225_v19  ;;  %v15456_v41 = vadd.f32 %v14395_v26, %v2990_v1  ;;  %v15470_v38 = vpack.c.bf16 %v3404_v17, %v3401_v39  ;;  %v3425_v26 = vld [vmem:[#allocation5 + $0x428] sm:$0xff]  ;;  %v3431_v1 = vld [vmem:[#allocation5 + $0x458] sm:$0xff]  ;;  %v3589_v16 = vld [vmem:[#allocation5 + $0x4e0] sm:$0xff] }
 0x456   :  { %v15513_v53 = vpack.c.bf16 %v3428_v2, %v3425_v26  ;;  %v15523_v39 = vpack.c.bf16 %v3434_v11, %v3431_v1  ;;  %v3433_v17 = vld [vmem:[#allocation5 + $0x468] sm:$0xff]  ;;  %v15549_v26 = vpack.c.bf16 %v3586_v35, %v3583_v48  ;;  %v15551_v2 = vpack.c.bf16 %v3588_v29, %v3585_v36  ;;  %v3596_v11 = vld [vmem:[#allocation5 + $0x518] sm:$0xff]  ;;  %v3601_v48 = vld [vmem:[#allocation5 + $0x540] sm:$0xff] }
 0x457   :  { %3306 = vmatmul.mubr.f32.vlgmr.msra.gmra.mrb[44].mxu0 %v15456_v41  ;;  %10654 = vmatmul.mubr.f32.vlgmr.msra.gmra.mrb[40].mxu1 %v15456_v41  ;;  %v15527_v50 = vpack.c.bf16 %v3433_v17, %v3430_v45  ;;  %v3594_v1 = vld [vmem:[#allocation5 + $0x508] sm:$0xff]  ;;  %v3599_v45 = vld [vmem:[#allocation5 + $0x530] sm:$0xff]  ;;  %v15562_v17 = vpack.c.bf16 %v3592_v57, %v3589_v16  ;;  %v15578_v35 = vpack.c.bf16 %v3605_v32, %v3602_v20  ;;  %v3604_v36 = vld [vmem:[#allocation5 + $0x558] sm:$0xff] }
 0x458   :  { %12530 = vmatpush1.bf16.msra.mxu0 %v15450_v22  ;;  %12561 = vmatpush3.bf16.msra.mxu1 %v15452_v46  ;;  %v15564_v49 = vpack.c.bf16 %v3594_v1, %v3591_v63  ;;  %v15568_v13 = vpack.c.bf16 %v3599_v45, %v3596_v11  ;;  %v3603_v29 = vld [vmem:[#allocation5 + $0x550] sm:$0xff]  ;;  %v3606_v6 = vld [vmem:[#allocation5 + $0x568] sm:$0xff]  ;;  %v3608_v3 = vld [vmem:[#allocation5 + $0x578] sm:$0xff]  ;;  %v15582_v57 = vpack.c.bf16 %v3604_v36, %v3601_v48 }
 0x459   :  { %12532 = vmatprep.subr.bf16.mxu0 %v15458_v4  ;;  %12562 = vmatprep.subr.bf16.mxu1 %v17225_v19  ;;  %v3611_v16 = vld [vmem:[#allocation5 + $0x590] sm:$0xff]  ;;  %v15584_v63 = vpack.c.bf16 %v3606_v6, %v3603_v29  ;;  %v3610_v45 = vld [vmem:[#allocation5 + $0x588] sm:$0xff]  ;;  %v15594_v32 = vpack.c.bf16 %v3612_v15, %v3609_v59  ;;  %v3613_v48 = vld [vmem:[#allocation5 + $0x5a0] sm:$0xff]  ;;  %v15598_v36 = vpack.c.bf16 %v3617_v56, %v3614_v12 }
 0x45a   :  { %3500 = vmatprep.mubr.f32.mxu0 %v17208_v21  ;;  %10688 = vmatprep.mubr.msk.f32.mxu1 %vm14652_vm0, %v17208_v21  ;;  %17317 = vst [vmem:[#allocation32_spill] sm:$0xff] %v15582_v57  ;;  %v3607_v1 = vld [vmem:[#allocation5 + $0x570] sm:$0xff]  ;;  %v15588_v11 = vpack.c.bf16 %v3611_v16, %v3608_v3  ;;  %v3616_v29 = vld [vmem:[#allocation5 + $0x5b8] sm:$0xff]  ;;  %v3618_v3 = vld [vmem:[#allocation5 + $0x5c8] sm:$0xff] }
 0x45b   :  { %17318 = vst [vmem:[#allocation33_spill] sm:$0xff] %v15584_v63  ;;  %v15592_v20 = vpack.c.bf16 %v3610_v45, %v3607_v1  ;;  %17321 = vst [vmem:[#allocation36_spill] sm:$0xff] %v15594_v32  ;;  %v3615_v6 = vld [vmem:[#allocation5 + $0x5b0] sm:$0xff]  ;;  %v3620_v16 = vld [vmem:[#allocation5 + $0x5d8] sm:$0xff]  ;;  %v15602_v1 = vpack.c.bf16 %v3616_v29, %v3613_v48 }
 0x45c   :  { %12534 = vmatpush1.bf16.msra.mxu0 %v15464_v60  ;;  %12564 = vmatpush3.bf16.msra.mxu1 %v15466_v43  ;;  %17319 = vst [vmem:[#allocation34_spill] sm:$0xff] %v15588_v11  ;;  %17322 = vst [vmem:[#allocation37_spill] sm:$0xff] %v15598_v36  ;;  %v15604_v45 = vpack.c.bf16 %v3618_v3, %v3615_v6  ;;  %v3619_v59 = vld [vmem:[#allocation5 + $0x5d0] sm:$0xff]  ;;  %v15608_v15 = vpack.c.bf16 %v3623_v28, %v3620_v16  ;;  %v3622_v12 = vld [vmem:[#allocation5 + $0x5e8] sm:$0xff] }
 0x45d   :  { %12536 = vmatprep.subr.bf16.mxu0 %v15470_v38  ;;  %12565 = vmatprep.subr.bf16.mxu1 %v17225_v19  ;;  %17320 = vst [vmem:[#allocation35_spill] sm:$0xff] %v15592_v20  ;;  %17323 = vst [vmem:[#allocation38_spill] sm:$0xff] %v15602_v1  ;;  %v3621_v56 = vld [vmem:[#allocation5 + $0x5e0] sm:$0xff]  ;;  %v3818_v28 = vld [vmem:[#allocation5 + $0x608] sm:$0xff] }
 0x45e   :  { %17324 = vst [vmem:[#allocation39_spill] sm:$0xff] %v15604_v45  ;;  %17325 = vst [vmem:[#allocation40_spill] sm:$0xff] %v15608_v15  ;;  %v15614_v48 = vpack.c.bf16 %v3624_v0, %v3621_v56  ;;  %v3821_v0 = vld [vmem:[#allocation5 + $0x620] sm:$0xff]  ;;  %v3820_v3 = vld [vmem:[#allocation5 + $0x618] sm:$0xff] }
 0x45f   :  { %v15626_v29 = vpack.c.bf16 %v3821_v0, %v3818_v28  ;;  %v3817_v6 = vld [vmem:[#allocation5 + $0x600] sm:$0xff]  ;;  %v3819_v16 = vld [vmem:[#allocation5 + $0x610] sm:$0xff]  ;;  %v3826_v0 = vld [vmem:[#allocation5 + $0x648] sm:$0xff] }
 0x460   :  { %12538 = vmatpush1.bf16.msra.mxu0 %v15477_v14  ;;  %12567 = vmatpush3.bf16.msra.mxu1 %v15479_v10  ;;  %17327 = vst [vmem:[#allocation42_spill] sm:$0xff] %v15614_v48  ;;  %v3823_v28 = vld [vmem:[#allocation5 + $0x630] sm:$0xff] }
 0x461   :  { %12540 = vmatprep.subr.bf16.mxu0 %v15483_v27  ;;  %12568 = vmatprep.subr.bf16.mxu1 %v17225_v19  ;;  %17328 = vst [vmem:[#allocation43_spill] sm:$0xff] %v15626_v29 }
 0x464   :  { %12542 = vmatpush1.bf16.msra.mxu0 %v15487_v33  ;;  %12570 = vmatpush3.bf16.msra.mxu1 %v15489_v61 }
 0x465   :  { %12544 = vmatprep.subr.bf16.mxu0 %v15493_v42  ;;  %12571 = vmatprep.subr.bf16.mxu1 %v17225_v19 }
 0x468   :  { %12546 = vmatpush1.bf16.msra.mxu0 %v15497_v25  ;;  %12573 = vmatpush3.bf16.msra.mxu1 %v15499_v37 }
 0x469   :  { %12548 = vmatprep.subr.bf16.mxu0 %v15503_v30  ;;  %12574 = vmatprep.subr.bf16.mxu1 %v17225_v19 }
 0x46c   :  { %12550 = vmatpush1.bf16.msra.mxu0 %v15507_v7  ;;  %12576 = vmatpush3.bf16.msra.mxu1 %v15509_v47 }
 0x46d   :  { %12552 = vmatprep.subr.bf16.mxu0 %v15513_v53  ;;  %12577 = vmatprep.subr.bf16.mxu1 %v17225_v19 }
 0x470   :  { %12554 = vmatpush1.bf16.msra.mxu0 %v15517_v34  ;;  %12579 = vmatpush3.bf16.msra.mxu1 %v15519_v18 }
 0x471   :  { %12556 = vmatprep.subr.bf16.mxu0 %v15523_v39  ;;  %12580 = vmatprep.subr.bf16.mxu1 %v17225_v19 }
 0x474   :  { %12558 = vmatpush1.bf16.msra.mxu0 %v15527_v50  ;;  %12582 = vmatpush3.bf16.msra.mxu1 %v15529_v51 }
 0x475   :  { %12584 = vmatprep.subr.bf16.mxu0 %v15533_v52  ;;  %12615 = vmatprep.subr.bf16.mxu1 %v17225_v19 }
 0x477   :  { %3501 = vmatmul.mubr.f32.vlgmr.msra.gmra.mrb[6].mxu0 %v15408_v62  ;;  %10689 = vmatmul.mubr.f32.vlgmr.msra.gmra.mrb[42].mxu1 %v15408_v62 }
 0x478   :  { %12586 = vmatpush1.bf16.msra.mxu0 %v15537_v44  ;;  %12617 = vmatpush3.bf16.msra.mxu1 %v15539_v5 }
 0x479   :  { %12588 = vmatprep.subr.bf16.mxu0 %v15543_v40  ;;  %12618 = vmatprep.subr.bf16.mxu1 %v17225_v19 }
 0x47a   :  { %3689 = vmatprep.mubr.f32.mxu0 %v17208_v21  ;;  %10723 = vmatprep.mubr.msk.f32.mxu1 %vm14652_vm0, %v17208_v21 }
 0x47c   :  { %12590 = vmatpush1.bf16.msra.mxu0 %v15549_v26  ;;  %12620 = vmatpush3.bf16.msra.mxu1 %v15551_v2 }
 0x47d   :  { %12592 = vmatprep.subr.bf16.mxu0 %v15555_v54  ;;  %12621 = vmatprep.subr.bf16.mxu1 %v17225_v19 }
 0x480   :  { %12594 = vmatpush1.bf16.msra.mxu0 %v15562_v17  ;;  %12623 = vmatpush3.bf16.msra.mxu1 %v15564_v49 }
 0x481   :  { %12596 = vmatprep.subr.bf16.mxu0 %v15568_v13  ;;  %12624 = vmatprep.subr.bf16.mxu1 %v17225_v19 }
 0x484   :  { %12598 = vmatpush1.bf16.msra.mxu0 %v15572_v31  ;;  %12626 = vmatpush3.bf16.msra.mxu1 %v15574_v58 }
 0x485   :  { %12600 = vmatprep.subr.bf16.mxu0 %v15578_v35  ;;  %12627 = vmatprep.subr.bf16.mxu1 %v17225_v19 }
 0x488   :  { %12602 = vmatpush1.bf16.msra.mxu0 %v15582_v57  ;;  %12629 = vmatpush3.bf16.msra.mxu1 %v15584_v63  ;;  %v4026_v63 = vld [vmem:[#allocation5 + $0x7d8] sm:$0xff]  ;;  %v4028_v57 = vld [vmem:[#allocation5 + $0x7e8] sm:$0xff] }
 0x489   :  { %12604 = vmatprep.subr.bf16.mxu0 %v15588_v11  ;;  %12630 = vmatprep.subr.bf16.mxu1 %v17225_v19 }
 0x48c   :  { %12606 = vmatpush1.bf16.msra.mxu0 %v15592_v20  ;;  %12632 = vmatpush3.bf16.msra.mxu1 %v15594_v32  ;;  %v15612_v20 = vpack.c.bf16 %v3622_v12, %v3619_v59  ;;  %v15628_v59 = vpack.c.bf16 %v3820_v3, %v3817_v6  ;;  %v3822_v12 = vld [vmem:[#allocation5 + $0x628] sm:$0xff]  ;;  %v15638_v6 = vpack.c.bf16 %v3826_v0, %v3823_v28  ;;  %v3828_v3 = vld [vmem:[#allocation5 + $0x658] sm:$0xff] }
 0x48d   :  { %12608 = vmatprep.subr.bf16.mxu0 %v15598_v36  ;;  %12633 = vmatprep.subr.bf16.mxu1 %v17225_v19  ;;  %v15631_v56 = vpack.c.bf16 %v3822_v12, %v3819_v16  ;;  %v3830_v12 = vld [vmem:[#allocation5 + $0x668] sm:$0xff]  ;;  %v17356_v32 = vld [vmem:[#allocation12_spill] sm:$0xff] }
 0x48e   :  { %17326 = vst [vmem:[#allocation41_spill] sm:$0xff] %v15612_v20  ;;  %17329 = vst [vmem:[#allocation44_spill] sm:$0xff] %v15628_v59  ;;  %v3834_v0 = vld [vmem:[#allocation5 + $0x688] sm:$0xff] }
 0x48f   :  { %17330 = vst [vmem:[#allocation45_spill] sm:$0xff] %v15631_v56  ;;  %17332 = vst [vmem:[#allocation47_spill] sm:$0xff] %v15638_v6 }
 0x490   :  { %12610 = vmatpush1.bf16.msra.mxu0 %v15602_v1  ;;  %12635 = vmatpush3.bf16.msra.mxu1 %v15604_v45  ;;  %v3825_v45 = vld [vmem:[#allocation5 + $0x640] sm:$0xff] }
 0x491   :  { %12612 = vmatprep.subr.bf16.mxu0 %v15608_v15  ;;  %12636 = vmatprep.subr.bf16.mxu1 %v17225_v19  ;;  %v15641_v16 = vpack.c.bf16 %v3828_v3, %v3825_v45  ;;  %v3836_v3 = vld [vmem:[#allocation5 + $0x698] sm:$0xff] }
 0x493   :  { %17333 = vst [vmem:[#allocation48_spill] sm:$0xff] %v15641_v16 }
 0x494   :  { %12614 = vmatpush1.bf16.msra.mxu0 %v15612_v20  ;;  %12638 = vmatpush3.bf16.msra.mxu1 %v15614_v48  ;;  %v3824_v48 = vld [vmem:[#allocation5 + $0x638] sm:$0xff]  ;;  %v3827_v20 = vld [vmem:[#allocation5 + $0x650] sm:$0xff] }
 0x495   :  { %12671 = vmatprep.subr.bf16.mxu1 %v17225_v19  ;;  %12640 = vmatprep.subr.bf16.mxu0 %v15626_v29  ;;  %v15635_v15 = vpack.c.bf16 %v3827_v20, %v3824_v48  ;;  %v3829_v48 = vld [vmem:[#allocation5 + $0x660] sm:$0xff]  ;;  %v3831_v29 = vld [vmem:[#allocation5 + $0x670] sm:$0xff] }
 0x496   :  { %v15651_v45 = vpack.c.bf16 %v3834_v0, %v3831_v29  ;;  %v3842_v0 = vld [vmem:[#allocation5 + $0x6c8] sm:$0xff] }
 0x497   :  { %3690 = vmatmul.mubr.f32.vlgmr.msra.gmra.mrb[24].mxu0 %v15456_v41  ;;  %10724 = vmatmul.mubr.f32.vlgmr.msra.gmra.mrb[44].mxu1 %v15456_v41  ;;  %17331 = vst [vmem:[#allocation46_spill] sm:$0xff] %v15635_v15 }
 0x498   :  { %3929 = vmatprep.mubr.f32.mxu0 %v17208_v21  ;;  %10758 = vmatprep.mubr.msk.f32.mxu1 %vm14652_vm0, %v17208_v21  ;;  %17336 = vst [vmem:[#allocation51_spill] sm:$0xff] %v15651_v45 }
 0x499   :  { %12642 = vmatpush1.bf16.msra.mxu0 %v15628_v59  ;;  %12673 = vmatpush3.bf16.msra.mxu1 %v15631_v56  ;;  %v3833_v59 = vld [vmem:[#allocation5 + $0x680] sm:$0xff]  ;;  %v3832_v56 = vld [vmem:[#allocation5 + $0x678] sm:$0xff] }
 0x49a   :  { %12674 = vmatprep.subr.bf16.mxu1 %v17225_v19  ;;  %12644 = vmatprep.subr.bf16.mxu0 %v15635_v15  ;;  %v15645_v20 = vpack.c.bf16 %v3833_v59, %v3830_v12  ;;  %v15648_v28 = vpack.c.bf16 %v3832_v56, %v3829_v48  ;;  %v3835_v12 = vld [vmem:[#allocation5 + $0x690] sm:$0xff]  ;;  %v3837_v15 = vld [vmem:[#allocation5 + $0x6a0] sm:$0xff]  ;;  %v3840_v48 = vld [vmem:[#allocation5 + $0x6b8] sm:$0xff] }
 0x49b   :  { %v15661_v29 = vpack.c.bf16 %v3840_v48, %v3837_v15  ;;  %v3848_v48 = vld [vmem:[#allocation5 + $0x6f8] sm:$0xff] }
 0x49c   :  { %17334 = vst [vmem:[#allocation49_spill] sm:$0xff] %v15645_v20  ;;  %17335 = vst [vmem:[#allocation50_spill] sm:$0xff] %v15648_v28 }
 0x49d   :  { %12646 = vmatpush1.bf16.msra.mxu0 %v15638_v6  ;;  %12676 = vmatpush3.bf16.msra.mxu1 %v15641_v16  ;;  %v3839_v6 = vld [vmem:[#allocation5 + $0x6b0] sm:$0xff]  ;;  %v3838_v16 = vld [vmem:[#allocation5 + $0x6a8] sm:$0xff]  ;;  %17339 = vst [vmem:[#allocation54_spill] sm:$0xff] %v15661_v29 }
 0x49e   :  { %12677 = vmatprep.subr.bf16.mxu1 %v17225_v19  ;;  %12648 = vmatprep.subr.bf16.mxu0 %v15645_v20  ;;  %v15655_v59 = vpack.c.bf16 %v3839_v6, %v3836_v3  ;;  %v15658_v56 = vpack.c.bf16 %v3838_v16, %v3835_v12  ;;  %v3841_v3 = vld [vmem:[#allocation5 + $0x6c0] sm:$0xff]  ;;  %v3843_v20 = vld [vmem:[#allocation5 + $0x6d0] sm:$0xff]  ;;  %v3846_v12 = vld [vmem:[#allocation5 + $0x6e8] sm:$0xff] }
 0x49f   :  { %v15671_v15 = vpack.c.bf16 %v3846_v12, %v3843_v20  ;;  %v3854_v12 = vld [vmem:[#allocation5 + $0x728] sm:$0xff] }
 0x4a0   :  { %17337 = vst [vmem:[#allocation52_spill] sm:$0xff] %v15655_v59  ;;  %17338 = vst [vmem:[#allocation53_spill] sm:$0xff] %v15658_v56 }
 0x4a1   :  { %12650 = vmatpush1.bf16.msra.mxu0 %v15648_v28  ;;  %12679 = vmatpush3.bf16.msra.mxu1 %v15651_v45  ;;  %v3845_v28 = vld [vmem:[#allocation5 + $0x6e0] sm:$0xff]  ;;  %v3844_v45 = vld [vmem:[#allocation5 + $0x6d8] sm:$0xff]  ;;  %17342 = vst [vmem:[#allocation58_spill] sm:$0xff] %v15671_v15 }
 0x4a2   :  { %12680 = vmatprep.subr.bf16.mxu1 %v17225_v19  ;;  %12652 = vmatprep.subr.bf16.mxu0 %v15655_v59  ;;  %v15665_v6 = vpack.c.bf16 %v3845_v28, %v3842_v0  ;;  %v15668_v16 = vpack.c.bf16 %v3844_v45, %v3841_v3  ;;  %v3847_v0 = vld [vmem:[#allocation5 + $0x6f0] sm:$0xff]  ;;  %v3849_v59 = vld [vmem:[#allocation5 + $0x700] sm:$0xff]  ;;  %v3852_v3 = vld [vmem:[#allocation5 + $0x718] sm:$0xff] }
 0x4a3   :  { %v15681_v20 = vpack.c.bf16 %v3852_v3, %v3849_v59  ;;  %v3860_v3 = vld [vmem:[#allocation5 + $0x758] sm:$0xff] }
 0x4a4   :  { %17340 = vst [vmem:[#allocation56_spill] sm:$0xff] %v15665_v6  ;;  %17341 = vst [vmem:[#allocation57_spill] sm:$0xff] %v15668_v16 }
 0x4a5   :  { %12654 = vmatpush1.bf16.msra.mxu0 %v15658_v56  ;;  %12682 = vmatpush3.bf16.msra.mxu1 %v15661_v29  ;;  %v3851_v56 = vld [vmem:[#allocation5 + $0x710] sm:$0xff]  ;;  %v3850_v29 = vld [vmem:[#allocation5 + $0x708] sm:$0xff]  ;;  %17345 = vst [vmem:[#allocation61_spill] sm:$0xff] %v15681_v20 }
 0x4a6   :  { %12683 = vmatprep.subr.bf16.mxu1 %v17225_v19  ;;  %12656 = vmatprep.subr.bf16.mxu0 %v15665_v6  ;;  %v15675_v28 = vpack.c.bf16 %v3851_v56, %v3848_v48  ;;  %v15678_v45 = vpack.c.bf16 %v3850_v29, %v3847_v0  ;;  %v3853_v48 = vld [vmem:[#allocation5 + $0x720] sm:$0xff]  ;;  %v3855_v6 = vld [vmem:[#allocation5 + $0x730] sm:$0xff]  ;;  %v3858_v0 = vld [vmem:[#allocation5 + $0x748] sm:$0xff] }
 0x4a7   :  { %v15691_v59 = vpack.c.bf16 %v3858_v0, %v3855_v6  ;;  %v4016_v0 = vld [vmem:[#allocation5 + $0x788] sm:$0xff] }
 0x4a8   :  { %17343 = vst [vmem:[#allocation59_spill] sm:$0xff] %v15675_v28  ;;  %17344 = vst [vmem:[#allocation60_spill] sm:$0xff] %v15678_v45 }
 0x4a9   :  { %12658 = vmatpush1.bf16.msra.mxu0 %v15668_v16  ;;  %12685 = vmatpush3.bf16.msra.mxu1 %v15671_v15  ;;  %v3857_v16 = vld [vmem:[#allocation5 + $0x740] sm:$0xff]  ;;  %v3856_v15 = vld [vmem:[#allocation5 + $0x738] sm:$0xff]  ;;  %17348 = vst [vmem:[#allocation64_spill] sm:$0xff] %v15691_v59 }
 0x4aa   :  { %12686 = vmatprep.subr.bf16.mxu1 %v17225_v19  ;;  %12660 = vmatprep.subr.bf16.mxu0 %v15675_v28  ;;  %v15685_v56 = vpack.c.bf16 %v3857_v16, %v3854_v12  ;;  %v15688_v29 = vpack.c.bf16 %v3856_v15, %v3853_v48  ;;  %v3859_v12 = vld [vmem:[#allocation5 + $0x750] sm:$0xff]  ;;  %v3861_v28 = vld [vmem:[#allocation5 + $0x760] sm:$0xff]  ;;  %v3864_v48 = vld [vmem:[#allocation5 + $0x778] sm:$0xff] }
 0x4ab   :  { %v15701_v6 = vpack.c.bf16 %v3864_v48, %v3861_v28 }
 0x4ac   :  { %17346 = vst [vmem:[#allocation62_spill] sm:$0xff] %v15685_v56  ;;  %17347 = vst [vmem:[#allocation63_spill] sm:$0xff] %v15688_v29 }
 0x4ad   :  { %12662 = vmatpush1.bf16.msra.mxu0 %v15678_v45  ;;  %12688 = vmatpush3.bf16.msra.mxu1 %v15681_v20  ;;  %v3863_v45 = vld [vmem:[#allocation5 + $0x770] sm:$0xff]  ;;  %v3862_v20 = vld [vmem:[#allocation5 + $0x768] sm:$0xff]  ;;  %17351 = vst [vmem:[#allocation67_spill] sm:$0xff] %v15701_v6 }
 0x4ae   :  { %12689 = vmatprep.subr.bf16.mxu1 %v17225_v19  ;;  %12664 = vmatprep.subr.bf16.mxu0 %v15685_v56  ;;  %v15695_v16 = vpack.c.bf16 %v3863_v45, %v3860_v3  ;;  %v15698_v15 = vpack.c.bf16 %v3862_v20, %v3859_v12 }
 0x4b0   :  { %17349 = vst [vmem:[#allocation65_spill] sm:$0xff] %v15695_v16  ;;  %17350 = vst [vmem:[#allocation66_spill] sm:$0xff] %v15698_v15 }
 0x4b1   :  { %12666 = vmatpush1.bf16.msra.mxu0 %v15688_v29  ;;  %12691 = vmatpush3.bf16.msra.mxu1 %v15691_v59  ;;  %v4019_v29 = vld [vmem:[#allocation5 + $0x7a0] sm:$0xff] }
 0x4b2   :  { %12692 = vmatprep.subr.bf16.mxu1 %v17225_v19  ;;  %12668 = vmatprep.subr.bf16.mxu0 %v15695_v16  ;;  %v15705_v45 = vpack.c.bf16 %v4019_v29, %v4016_v0 }
 0x4b4   :  { %17352 = vst [vmem:[#allocation70_spill] sm:$0xff] %v15705_v45 }
 0x4b5   :  { %12670 = vmatpush1.bf16.msra.mxu0 %v15698_v15  ;;  %12694 = vmatpush3.bf16.msra.mxu1 %v15701_v6 }
 0x4b6   :  { %12727 = vmatprep.subr.bf16.mxu1 %v17225_v19  ;;  %12696 = vmatprep.subr.bf16.mxu0 %v15705_v45 }
 0x50a   :  { %v15709_v3 = vpop.f32.mrb[38].mxu1 }
 0x50b   :  { %17353 = vst [vmem:[#allocation13_spill] sm:$0xff] %v15709_v3  ;;  %v10620_v20 = vpop.f32.mrb[39].mxu1 }
 0x50c   :  { %v15715_v20 = vld [vmem:[#allocation7 + $0x4] ss:$0 sm:$0xff] }
 0x50d   :  { %17355 = vst [vmem:[#allocation72_spill] sm:$0xff] %v15715_v20 }
 0x52a   :  { %v15711_v12 = vpop.f32.mrb[40].mxu1 }
 0x52b   :  { %17354 = vst [vmem:[#allocation71_spill] sm:$0xff] %v15711_v12  ;;  %v10655_v16 = vpop.f32.mrb[41].mxu1 }
 0x54a   :  { %v3502_v28 = vpop.f32.mrb[6].mxu0  ;;  %v3573_v48 = vpop.f32.mrb[42].mxu1 }
 0x54b   :  { %v14221_v15 = vadd.f32 %v3502_v28, %v17300_v8  ;;  %v3504_v59 = vpop.f32.mrb[7].mxu0  ;;  %v10690_v56 = vpop.f32.mrb[43].mxu1  ;;  %v3783_v16 = vadd.f32 %v15715_v20, %v3573_v48  ;;  %v4015_v48 = vld [vmem:[#allocation5 + $0x780] sm:$0xff] }
 0x54c   :  { %v14222_v29 = vadd.f32 %v3504_v59, %v17301_v23  ;;  %v4022_v23 = vld [vmem:[#allocation5 + $0x7b8] sm:$0xff] }
 0x54d   :  { %v9313_v1 = vmul.f32 -1.442695, %v14221_v15 }
 0x54e   :  { %v9314_v0 = vmul.f32 -1.442695, %v14222_v29 }
 0x54f   :  { %14398 = vpow2.f32 %v9313_v1 }
 0x550   :  { %14400 = vpow2.f32 %v9314_v0 }
 0x559   :  { %v14399_v6 = vpop.eup %14398 }
 0x55a   :  { %v3773_v36 = vadd.f32 1.0, %v14399_v6  ;;  %v14401_v3 = vpop.eup %14400 }
 0x55b   :  { %v3780_v8 = vadd.f32 1.0, %v14401_v3 }
 0x55c   :  { %14402 = vrcp.f32 %v3773_v36 }
 0x566   :  { %v14403_v12 = vpop.eup %14402 }
 0x567   :  { %v3784_v45 = vmul.f32 %v14403_v12, %v3783_v16  ;;  %v4018_v16 = vld [vmem:[#allocation5 + $0x798] sm:$0xff] }
 0x569   :  { %v3785_v28 = vadd.f32 %v3784_v45, %v17356_v32  ;;  %v4017_v32 = vld [vmem:[#allocation5 + $0x790] sm:$0xff]  ;;  %v4020_v45 = vld [vmem:[#allocation5 + $0x7a8] sm:$0xff] }
 0x56a   :  { %v3691_v56 = vpop.f32.mrb[24].mxu0  ;;  %v15719_v15 = vpop.f32.mrb[44].mxu1 }
 0x56b   :  { %14404 = vtanh.f32 %v3785_v28  ;;  %v14239_v1 = vadd.f32 %v3691_v56, %v17304_v24  ;;  %v3693_v59 = vpop.f32.mrb[25].mxu0  ;;  %v10725_v6 = vpop.f32.mrb[45].mxu1  ;;  %v4025_v28 = vld [vmem:[#allocation5 + $0x7d0] sm:$0xff]  ;;  %v15724_v24 = vpack.c.bf16 %v4018_v16, %v4015_v48  ;;  %v4032_v16 = vld [vmem:[#allocation5 + $0x808] sm:$0xff] }
 0x56c   :  { %14406 = vrcp.f32 %v3780_v8  ;;  %v14240_v29 = vadd.f32 %v3693_v59, %v17305_v55  ;;  %v15726_v8 = vpack.c.bf16 %v4020_v45, %v4017_v32  ;;  %v4023_v55 = vld [vmem:[#allocation5 + $0x7c0] sm:$0xff]  ;;  %v4034_v32 = vld [vmem:[#allocation5 + $0x818] sm:$0xff]  ;;  %v4037_v45 = vld [vmem:[#allocation5 + $0x830] sm:$0xff] }
 0x56d   :  { %v9315_v36 = vmul.f32 -1.442695, %v14239_v1  ;;  %v4021_v1 = vld [vmem:[#allocation5 + $0x7b0] sm:$0xff] }
 0x56e   :  { %v9316_v20 = vmul.f32 -1.442695, %v14240_v29  ;;  %17357 = vst [vmem:[#allocation73_spill] sm:$0xff] %v15726_v8  ;;  %v4031_v29 = vld [vmem:[#allocation5 + $0x800] sm:$0xff] }
 0x56f   :  { %14408 = vpow2.f32 %v9315_v36  ;;  %v15730_v36 = vpack.c.bf16 %v4025_v28, %v4022_v23  ;;  %v4027_v23 = vld [vmem:[#allocation5 + $0x7e0] sm:$0xff]  ;;  %v4036_v28 = vld [vmem:[#allocation5 + $0x828] sm:$0xff] }
 0x570   :  { %14410 = vpow2.f32 %v9316_v20  ;;  %v15742_v20 = vpack.c.bf16 %v4031_v29, %v4028_v57  ;;  %v4033_v57 = vld [vmem:[#allocation5 + $0x810] sm:$0xff] }
 0x571   :  { %17358 = vst [vmem:[#allocation74_spill] sm:$0xff] %v15730_v36 }
 0x572   :  { %17361 = vst [vmem:[#allocation76_spill] sm:$0xff] %v15742_v20 }
 0x575   :  { %v14405_v0 = vpop.eup %14404 }
 0x576   :  { %v3787_v12 = vsub.f32 %v15408_v62, %v14405_v0  ;;  %v14407_v3 = vpop.eup %14406  ;;  %v4024_v62 = vld [vmem:[#allocation5 + $0x7c8] sm:$0xff] }
 0x577   :  { %v15736_v48 = vpack.c.bf16 %v4024_v62, %v4021_v1  ;;  %v4038_v1 = vld [vmem:[#allocation5 + $0x838] sm:$0xff]  ;;  %v4043_v62 = vld [vmem:[#allocation5 + $0x860] sm:$0xff] }
 0x578   :  { %v3788_v11 = vmul.f32 %v14407_v3, %v3787_v12  ;;  %v4029_v12 = vld [vmem:[#allocation5 + $0x7f0] sm:$0xff]  ;;  %v15755_v3 = vpack.c.bf16 %v4037_v45, %v4034_v32 }
 0x579   :  { %v14409_v56 = vpop.eup %14408  ;;  %17359 = vst [vmem:[#allocation77_spill] sm:$0xff] %v15736_v48 }
 0x57a   :  { %v3797_v6 = vadd.f32 1.0, %v14409_v56  ;;  %v15728_v59 = vadd.f32 %v14405_v0, %v3788_v11  ;;  %v15738_v11 = vpack.c.bf16 %v4026_v63, %v4023_v55  ;;  %v4030_v0 = vld [vmem:[#allocation5 + $0x7f8] sm:$0xff]  ;;  %v15751_v63 = vpack.c.bf16 %v4032_v16, %v4029_v12  ;;  %v4035_v56 = vld [vmem:[#allocation5 + $0x820] sm:$0xff]  ;;  %v14411_v29 = vpop.eup %14410 }
 0x57b   :  { %v15749_v55 = vpack.c.bf16 %v4030_v0, %v4027_v23  ;;  %v15763_v0 = vpack.c.bf16 %v4036_v28, %v4033_v57  ;;  %v15765_v12 = vpack.c.bf16 %v4038_v1, %v4035_v56  ;;  %v4039_v16 = vld [vmem:[#allocation5 + $0x840] sm:$0xff]  ;;  %v3804_v57 = vadd.f32 1.0, %v14411_v29  ;;  %v4045_v1 = vld [vmem:[#allocation5 + $0x870] sm:$0xff] }
 0x57c   :  { %14412 = vrcp.f32 %v3797_v6  ;;  %3930 = vmatmul.mubr.f32.vlgmr.msra.gmra.mrb[46].mxu0 %v15728_v59  ;;  %10759 = vmatmul.mubr.f32.vlgmr.msra.gmra.mrb[46].mxu1 %v15728_v59  ;;  %17360 = vst [vmem:[#allocation75_spill] sm:$0xff] %v15738_v11  ;;  %17363 = vst [vmem:[#allocation78_spill] sm:$0xff] %v15751_v63  ;;  %v4040_v6 = vld [vmem:[#allocation5 + $0x848] sm:$0xff]  ;;  %v4055_v29 = vld [vmem:[#allocation5 + $0x8c0] sm:$0xff] }
 0x57d   :  { %12698 = vmatpush1.bf16.msra.mxu0 %v15724_v24  ;;  %12729 = vmatpush3.bf16.msra.mxu1 %v15726_v8  ;;  %17362 = vst [vmem:[#allocation22_spill] sm:$0xff] %v15749_v55  ;;  %v15769_v45 = vpack.c.bf16 %v4043_v62, %v4040_v6  ;;  %v17365_v8 = vld [vmem:[#allocation23_spill] sm:$0xff]  ;;  %v4048_v62 = vld [vmem:[#allocation5 + $0x888] sm:$0xff] }
 0x57e   :  { %12700 = vmatprep.subr.bf16.mxu0 %v15730_v36  ;;  %12730 = vmatprep.subr.bf16.mxu1 %v17225_v19  ;;  %v4044_v36 = vld [vmem:[#allocation5 + $0x868] sm:$0xff] }
 0x57f   :  { %4127 = vmatprep.mubr.f32.mxu0 %v17208_v21  ;;  %10793 = vmatprep.mubr.msk.f32.mxu1 %vm14652_vm0, %v17208_v21 }
 0x581   :  { %12702 = vmatpush1.bf16.msra.mxu0 %v15736_v48  ;;  %12732 = vmatpush3.bf16.msra.mxu1 %v15738_v11  ;;  %v15757_v48 = vld [vmem:[#allocation7 + $0x5] ss:$0 sm:$0xff]  ;;  %v4041_v11 = vld [vmem:[#allocation5 + $0x850] sm:$0xff] }
 0x582   :  { %12704 = vmatprep.subr.bf16.mxu0 %v15742_v20  ;;  %12733 = vmatprep.subr.bf16.mxu1 %v17225_v19  ;;  %17364 = vst [vmem:[#allocation79_spill] sm:$0xff] %v15757_v48  ;;  %v3807_v23 = vadd.f32 %v15757_v48, %v15719_v15  ;;  %v4042_v20 = vld [vmem:[#allocation5 + $0x858] sm:$0xff]  ;;  %v15776_v56 = vpack.c.bf16 %v4044_v36, %v4041_v11 }
 0x583   :  { %v4046_v48 = vld [vmem:[#allocation5 + $0x878] sm:$0xff]  ;;  %v15774_v28 = vpack.c.bf16 %v4042_v20, %v4039_v16  ;;  %v15784_v36 = vpack.c.bf16 %v4048_v62, %v4045_v1  ;;  %v4051_v20 = vld [vmem:[#allocation5 + $0x8a0] sm:$0xff]  ;;  %v4056_v16 = vld [vmem:[#allocation5 + $0x8c8] sm:$0xff] }
 0x584   :  { %17366 = vst [vmem:[#allocation80_spill] sm:$0xff] %v15776_v56 }
 0x585   :  { %12706 = vmatpush1.bf16.msra.mxu0 %v15749_v55  ;;  %12735 = vmatpush3.bf16.msra.mxu1 %v15751_v63  ;;  %v4049_v55 = vld [vmem:[#allocation5 + $0x890] sm:$0xff] }
 0x586   :  { %v14413_v32 = vpop.eup %14412  ;;  %12708 = vmatprep.subr.bf16.mxu0 %v15755_v3  ;;  %12736 = vmatprep.subr.bf16.mxu1 %v17225_v19  ;;  %v15780_v6 = vpack.c.bf16 %v4049_v55, %v4046_v48  ;;  %v4054_v55 = vld [vmem:[#allocation5 + $0x8b8] sm:$0xff] }
 0x587   :  { %v3808_v15 = vmul.f32 %v14413_v32, %v3807_v23  ;;  %v4047_v23 = vld [vmem:[#allocation5 + $0x880] sm:$0xff]  ;;  %v4050_v32 = vld [vmem:[#allocation5 + $0x898] sm:$0xff]  ;;  %v15794_v1 = vpack.c.bf16 %v4054_v55, %v4051_v20 }
 0x588   :  { %17367 = vst [vmem:[#allocation12_spill] sm:$0xff] %v15780_v6  ;;  %v15786_v11 = vpack.c.bf16 %v4050_v32, %v4047_v23  ;;  %v4057_v23 = vld [vmem:[#allocation5 + $0x8d0] sm:$0xff] }
 0x589   :  { %v3809_v63 = vadd.f32 %v3808_v15, %v17365_v8  ;;  %12710 = vmatpush1.bf16.msra.mxu0 %v15763_v0  ;;  %12738 = vmatpush3.bf16.msra.mxu1 %v15765_v12  ;;  %v4052_v8 = vld [vmem:[#allocation5 + $0x8a8] sm:$0xff]  ;;  %v4058_v15 = vld [vmem:[#allocation5 + $0x8d8] sm:$0xff] }
 0x58a   :  { %12712 = vmatprep.subr.bf16.mxu0 %v15769_v45  ;;  %12739 = vmatprep.subr.bf16.mxu1 %v17225_v19  ;;  %17368 = vst [vmem:[#allocation23_spill] sm:$0xff] %v15786_v11  ;;  %v15790_v48 = vpack.c.bf16 %v4055_v29, %v4052_v8  ;;  %v4060_v8 = vld [vmem:[#allocation5 + $0x8e8] sm:$0xff]  ;;  %v4059_v29 = vld [vmem:[#allocation5 + $0x8e0] sm:$0xff] }
 0x58b   :  { %14414 = vtanh.f32 %v3809_v63  ;;  %v4053_v63 = vld [vmem:[#allocation5 + $0x8b0] sm:$0xff] }
 0x58c   :  { %14416 = vrcp.f32 %v3804_v57  ;;  %v4061_v57 = vld [vmem:[#allocation5 + $0x8f0] sm:$0xff]  ;;  %v15796_v62 = vpack.c.bf16 %v4056_v16, %v4053_v63 }
 0x58d   :  { %12714 = vmatpush1.bf16.msra.mxu0 %v15774_v28  ;;  %12741 = vmatpush3.bf16.msra.mxu1 %v15776_v56  ;;  %v15800_v32 = vpack.c.bf16 %v4061_v57, %v4058_v15 }
 0x58e   :  { %12716 = vmatprep.subr.bf16.mxu0 %v15780_v6  ;;  %12742 = vmatprep.subr.bf16.mxu1 %v17225_v19  ;;  %v4062_v6 = vld [vmem:[#allocation5 + $0x8f8] sm:$0xff] }
 0x58f   :  { %v15806_v20 = vpack.c.bf16 %v4062_v6, %v4059_v29 }
 0x591   :  { %12718 = vmatpush1.bf16.msra.mxu0 %v15784_v36  ;;  %12744 = vmatpush3.bf16.msra.mxu1 %v15786_v11  ;;  %v15804_v11 = vpack.c.bf16 %v4060_v8, %v4057_v23  ;;  %v17405_v8 = vld [vmem:[#allocation25_spill] sm:$0xff] }
 0x592   :  { %12720 = vmatprep.subr.bf16.mxu0 %v15790_v48  ;;  %12745 = vmatprep.subr.bf16.mxu1 %v17225_v19 }
 0x595   :  { %v14415_v56 = vpop.eup %14414  ;;  %12722 = vmatpush1.bf16.msra.mxu0 %v15794_v1  ;;  %12747 = vmatpush3.bf16.msra.mxu1 %v15796_v62 }
 0x596   :  { %12724 = vmatprep.subr.bf16.mxu0 %v15800_v32  ;;  %12748 = vmatprep.subr.bf16.mxu1 %v17225_v19  ;;  %v3811_v55 = vsub.f32 %v15456_v41, %v14415_v56  ;;  %v14417_v63 = vpop.eup %14416  ;;  %v17372_v41 = vld [vmem:[#allocation35_spill] sm:$0xff] }
 0x598   :  { %v3812_v16 = vmul.f32 %v14417_v63, %v3811_v55 }
 0x599   :  { %12726 = vmatpush1.bf16.msra.mxu0 %v15804_v11  ;;  %12750 = vmatpush3.bf16.msra.mxu1 %v15806_v20 }
 0x59a   :  { %12752 = vmatprep.subr.bf16.mxu0 %v15445_v9  ;;  %12783 = vmatprep.subr.bf16.mxu1 %v17225_v19  ;;  %v15815_v15 = vadd.f32 %v14415_v56, %v3812_v16  ;;  %v17369_v9 = vld [vmem:[#allocation32_spill] sm:$0xff] }
 0x59c   :  { %4128 = vmatmul.mubr.f32.vlgmr.msra.gmra.mrb[48].mxu0 %v15815_v15  ;;  %10794 = vmatmul.mubr.f32.vlgmr.msra.gmra.mrb[48].mxu1 %v15815_v15 }
 0x59d   :  { %12754 = vmatpush1.bf16.msra.mxu0 %v15450_v22  ;;  %12785 = vmatpush3.bf16.msra.mxu1 %v15452_v46  ;;  %v17370_v22 = vld [vmem:[#allocation33_spill] sm:$0xff]  ;;  %v17371_v46 = vld [vmem:[#allocation34_spill] sm:$0xff] }
 0x59e   :  { %12756 = vmatprep.subr.bf16.mxu0 %v15458_v4  ;;  %12786 = vmatprep.subr.bf16.mxu1 %v17225_v19  ;;  %v17373_v4 = vld [vmem:[#allocation36_spill] sm:$0xff] }
 0x59f   :  { %4322 = vmatprep.mubr.f32.mxu0 %v17208_v21  ;;  %10828 = vmatprep.mubr.msk.f32.mxu1 %vm14652_vm0, %v17208_v21 }
 0x5a1   :  { %12758 = vmatpush1.bf16.msra.mxu0 %v15464_v60  ;;  %12788 = vmatpush3.bf16.msra.mxu1 %v15466_v43  ;;  %v17374_v60 = vld [vmem:[#allocation37_spill] sm:$0xff]  ;;  %v17375_v43 = vld [vmem:[#allocation38_spill] sm:$0xff] }
 0x5a2   :  { %12760 = vmatprep.subr.bf16.mxu0 %v15470_v38  ;;  %12789 = vmatprep.subr.bf16.mxu1 %v17225_v19  ;;  %v17376_v38 = vld [vmem:[#allocation39_spill] sm:$0xff] }
 0x5a5   :  { %12762 = vmatpush1.bf16.msra.mxu0 %v15477_v14  ;;  %12791 = vmatpush3.bf16.msra.mxu1 %v15479_v10  ;;  %v17377_v14 = vld [vmem:[#allocation40_spill] sm:$0xff]  ;;  %v17378_v10 = vld [vmem:[#allocation41_spill] sm:$0xff] }
 0x5a6   :  { %12764 = vmatprep.subr.bf16.mxu0 %v15483_v27  ;;  %12792 = vmatprep.subr.bf16.mxu1 %v17225_v19  ;;  %v17379_v27 = vld [vmem:[#allocation42_spill] sm:$0xff] }
 0x5a9   :  { %12766 = vmatpush1.bf16.msra.mxu0 %v15487_v33  ;;  %12794 = vmatpush3.bf16.msra.mxu1 %v15489_v61  ;;  %v17380_v33 = vld [vmem:[#allocation43_spill] sm:$0xff]  ;;  %v17381_v61 = vld [vmem:[#allocation44_spill] sm:$0xff] }
 0x5aa   :  { %12768 = vmatprep.subr.bf16.mxu0 %v15493_v42  ;;  %12795 = vmatprep.subr.bf16.mxu1 %v17225_v19  ;;  %v17382_v42 = vld [vmem:[#allocation45_spill] sm:$0xff] }
 0x5ad   :  { %12770 = vmatpush1.bf16.msra.mxu0 %v15497_v25  ;;  %12797 = vmatpush3.bf16.msra.mxu1 %v15499_v37  ;;  %v17383_v25 = vld [vmem:[#allocation46_spill] sm:$0xff]  ;;  %v17384_v37 = vld [vmem:[#allocation47_spill] sm:$0xff] }
 0x5ae   :  { %12772 = vmatprep.subr.bf16.mxu0 %v15503_v30  ;;  %12798 = vmatprep.subr.bf16.mxu1 %v17225_v19  ;;  %v17385_v30 = vld [vmem:[#allocation48_spill] sm:$0xff] }
 0x5b1   :  { %12774 = vmatpush1.bf16.msra.mxu0 %v15507_v7  ;;  %12800 = vmatpush3.bf16.msra.mxu1 %v15509_v47  ;;  %v17386_v7 = vld [vmem:[#allocation49_spill] sm:$0xff]  ;;  %v17387_v47 = vld [vmem:[#allocation50_spill] sm:$0xff] }
 0x5b2   :  { %12776 = vmatprep.subr.bf16.mxu0 %v15513_v53  ;;  %12801 = vmatprep.subr.bf16.mxu1 %v17225_v19  ;;  %v17388_v53 = vld [vmem:[#allocation51_spill] sm:$0xff] }
 0x5b5   :  { %12778 = vmatpush1.bf16.msra.mxu0 %v15517_v34  ;;  %12803 = vmatpush3.bf16.msra.mxu1 %v15519_v18  ;;  %v17389_v34 = vld [vmem:[#allocation52_spill] sm:$0xff]  ;;  %v17390_v18 = vld [vmem:[#allocation53_spill] sm:$0xff] }
 0x5b6   :  { %12780 = vmatprep.subr.bf16.mxu0 %v15523_v39  ;;  %12804 = vmatprep.subr.bf16.mxu1 %v17225_v19  ;;  %v17391_v39 = vld [vmem:[#allocation54_spill] sm:$0xff] }
 0x5b9   :  { %12782 = vmatpush1.bf16.msra.mxu0 %v15527_v50  ;;  %12806 = vmatpush3.bf16.msra.mxu1 %v15529_v51  ;;  %v17392_v50 = vld [vmem:[#allocation56_spill] sm:$0xff]  ;;  %v17393_v51 = vld [vmem:[#allocation57_spill] sm:$0xff] }
 0x5ba   :  { %12808 = vmatprep.subr.bf16.mxu0 %v15533_v52  ;;  %12839 = vmatprep.subr.bf16.mxu1 %v17225_v19  ;;  %v17394_v52 = vld [vmem:[#allocation58_spill] sm:$0xff] }
 0x5bc   :  { %4323 = vmatmul.mubr.f32.vlgmr.msra.gmra.mrb[8].mxu0 %v15728_v59  ;;  %10829 = vmatmul.mubr.f32.vlgmr.msra.gmra.mrb[50].mxu1 %v15728_v59 }
 0x5bd   :  { %12810 = vmatpush1.bf16.msra.mxu0 %v15537_v44  ;;  %12841 = vmatpush3.bf16.msra.mxu1 %v15539_v5  ;;  %v17395_v44 = vld [vmem:[#allocation59_spill] sm:$0xff]  ;;  %v17396_v5 = vld [vmem:[#allocation60_spill] sm:$0xff] }
 0x5be   :  { %12812 = vmatprep.subr.bf16.mxu0 %v15543_v40  ;;  %12842 = vmatprep.subr.bf16.mxu1 %v17225_v19  ;;  %v17397_v40 = vld [vmem:[#allocation61_spill] sm:$0xff] }
 0x5bf   :  { %4511 = vmatprep.mubr.f32.mxu0 %v17208_v21  ;;  %10863 = vmatprep.mubr.msk.f32.mxu1 %vm14652_vm0, %v17208_v21 }
 0x5c1   :  { %12814 = vmatpush1.bf16.msra.mxu0 %v15549_v26  ;;  %12844 = vmatpush3.bf16.msra.mxu1 %v15551_v2  ;;  %v17398_v26 = vld [vmem:[#allocation62_spill] sm:$0xff]  ;;  %v17399_v2 = vld [vmem:[#allocation63_spill] sm:$0xff] }
 0x5c2   :  { %12816 = vmatprep.subr.bf16.mxu0 %v15555_v54  ;;  %12845 = vmatprep.subr.bf16.mxu1 %v17225_v19  ;;  %v17400_v54 = vld [vmem:[#allocation64_spill] sm:$0xff] }
 0x5c5   :  { %12818 = vmatpush1.bf16.msra.mxu0 %v15562_v17  ;;  %12847 = vmatpush3.bf16.msra.mxu1 %v15564_v49  ;;  %v17401_v17 = vld [vmem:[#allocation65_spill] sm:$0xff]  ;;  %v17402_v49 = vld [vmem:[#allocation66_spill] sm:$0xff] }
 0x5c6   :  { %12820 = vmatprep.subr.bf16.mxu0 %v15568_v13  ;;  %12848 = vmatprep.subr.bf16.mxu1 %v17225_v19  ;;  %v17403_v13 = vld [vmem:[#allocation67_spill] sm:$0xff] }
 0x5c9   :  { %12822 = vmatpush1.bf16.msra.mxu0 %v15572_v31  ;;  %12850 = vmatpush3.bf16.msra.mxu1 %v15574_v58  ;;  %v17404_v31 = vld [vmem:[#allocation70_spill] sm:$0xff] }
 0x5ca   :  { %12824 = vmatprep.subr.bf16.mxu0 %v15578_v35  ;;  %12851 = vmatprep.subr.bf16.mxu1 %v17225_v19 }
 0x5cd   :  { %12826 = vmatpush1.bf16.msra.mxu0 %v17369_v9  ;;  %12853 = vmatpush3.bf16.msra.mxu1 %v17370_v22  ;;  %v17406_v9 = vld [vmem:[#allocation27_spill] sm:$0xff] }
 0x5ce   :  { %12828 = vmatprep.subr.bf16.mxu0 %v17371_v46  ;;  %12854 = vmatprep.subr.bf16.mxu1 %v17225_v19 }
 0x5d1   :  { %12830 = vmatpush1.bf16.msra.mxu0 %v17372_v41  ;;  %12856 = vmatpush3.bf16.msra.mxu1 %v17373_v4 }
 0x5d2   :  { %12832 = vmatprep.subr.bf16.mxu0 %v17374_v60  ;;  %12857 = vmatprep.subr.bf16.mxu1 %v17225_v19 }
 0x5d5   :  { %12834 = vmatpush1.bf16.msra.mxu0 %v17375_v43  ;;  %12859 = vmatpush3.bf16.msra.mxu1 %v17376_v38  ;;  %v17407_v43 = vld [vmem:[#allocation72_spill] sm:$0xff] }
 0x5d6   :  { %12836 = vmatprep.subr.bf16.mxu0 %v17377_v14  ;;  %12860 = vmatprep.subr.bf16.mxu1 %v17225_v19 }
 0x5d9   :  { %12838 = vmatpush1.bf16.msra.mxu0 %v17378_v10  ;;  %12862 = vmatpush3.bf16.msra.mxu1 %v17379_v27  ;;  %v17408_v27 = vld [vmem:[#allocation15_spill] sm:$0xff] }
 0x5da   :  { %12864 = vmatprep.subr.bf16.mxu0 %v17380_v33  ;;  %12895 = vmatprep.subr.bf16.mxu1 %v17225_v19 }
 0x5dc   :  { %4512 = vmatmul.mubr.f32.vlgmr.msra.gmra.mrb[22].mxu0 %v15815_v15  ;;  %10864 = vmatmul.mubr.f32.vlgmr.msra.gmra.mrb[52].mxu1 %v15815_v15 }
 0x5dd   :  { %12866 = vmatpush1.bf16.msra.mxu0 %v17381_v61  ;;  %12897 = vmatpush3.bf16.msra.mxu1 %v17382_v42 }
 0x5de   :  { %12868 = vmatprep.subr.bf16.mxu0 %v17383_v25  ;;  %12898 = vmatprep.subr.bf16.mxu1 %v17225_v19 }
 0x5df   :  { %4751 = vmatprep.mubr.f32.mxu0 %v17208_v21  ;;  %10898 = vmatprep.mubr.msk.f32.mxu1 %vm14652_vm0, %v17208_v21 }
 0x5e1   :  { %12870 = vmatpush1.bf16.msra.mxu0 %v17384_v37  ;;  %12900 = vmatpush3.bf16.msra.mxu1 %v17385_v30  ;;  %v17409_v37 = vld [vmem:[#allocation28_spill] sm:$0xff] }
 0x5e2   :  { %12872 = vmatprep.subr.bf16.mxu0 %v17386_v7  ;;  %12901 = vmatprep.subr.bf16.mxu1 %v17225_v19 }
 0x5e5   :  { %12874 = vmatpush1.bf16.msra.mxu0 %v17387_v47  ;;  %12903 = vmatpush3.bf16.msra.mxu1 %v17388_v53 }
 0x5e6   :  { %12876 = vmatprep.subr.bf16.mxu0 %v17389_v34  ;;  %12904 = vmatprep.subr.bf16.mxu1 %v17225_v19  ;;  %v17410_v34 = vld [vmem:[#allocation29_spill] sm:$0xff] }
 0x5e9   :  { %12878 = vmatpush1.bf16.msra.mxu0 %v17390_v18  ;;  %12906 = vmatpush3.bf16.msra.mxu1 %v17391_v39 }
 0x5ea   :  { %12880 = vmatprep.subr.bf16.mxu0 %v17392_v50  ;;  %12907 = vmatprep.subr.bf16.mxu1 %v17225_v19 }
 0x5ed   :  { %12882 = vmatpush1.bf16.msra.mxu0 %v17393_v51  ;;  %12909 = vmatpush3.bf16.msra.mxu1 %v17394_v52 }
 0x5ee   :  { %12884 = vmatprep.subr.bf16.mxu0 %v17395_v44  ;;  %12910 = vmatprep.subr.bf16.mxu1 %v17225_v19 }
 0x5f1   :  { %12886 = vmatpush1.bf16.msra.mxu0 %v17396_v5  ;;  %12912 = vmatpush3.bf16.msra.mxu1 %v17397_v40 }
 0x5f2   :  { %12888 = vmatprep.subr.bf16.mxu0 %v17398_v26  ;;  %12913 = vmatprep.subr.bf16.mxu1 %v17225_v19 }
 0x5f5   :  { %12890 = vmatpush1.bf16.msra.mxu0 %v17399_v2  ;;  %12915 = vmatpush3.bf16.msra.mxu1 %v17400_v54  ;;  %v17411_v2 = vld [vmem:[#allocation73_spill] sm:$0xff]  ;;  %v17412_v54 = vld [vmem:[#allocation74_spill] sm:$0xff] }
 0x5f6   :  { %12892 = vmatprep.subr.bf16.mxu0 %v17401_v17  ;;  %12916 = vmatprep.subr.bf16.mxu1 %v17225_v19  ;;  %v17414_v17 = vld [vmem:[#allocation75_spill] sm:$0xff] }
 0x5f9   :  { %12894 = vmatpush1.bf16.msra.mxu0 %v17402_v49  ;;  %12918 = vmatpush3.bf16.msra.mxu1 %v17403_v13  ;;  %v17415_v49 = vld [vmem:[#allocation76_spill] sm:$0xff]  ;;  %v17416_v13 = vld [vmem:[#allocation79_spill] sm:$0xff] }
 0x5fa   :  { %12920 = vmatprep.subr.bf16.mxu0 %v17404_v31  ;;  %12951 = vmatprep.subr.bf16.mxu1 %v17225_v19 }
 0x64f   :  { %v15928_v58 = vpop.f32.mrb[46].mxu1 }
 0x650   :  { %v10760_v35 = vpop.f32.mrb[47].mxu1 }
 0x651   :  { %v17417_v35 = vld [vmem:[#allocation22_spill] sm:$0xff] }
 0x66f   :  { %v15930_v56 = vpop.f32.mrb[48].mxu1 }
 0x670   :  { %v10795_v6 = vpop.f32.mrb[49].mxu1 }
 0x671   :  { %v17418_v6 = vld [vmem:[#allocation78_spill] sm:$0xff] }
 0x68f   :  { %v4324_v57 = vpop.f32.mrb[8].mxu0  ;;  %v4395_v23 = vpop.f32.mrb[50].mxu1 }
 0x690   :  { %v14223_v29 = vadd.f32 %v4324_v57, %v17405_v8  ;;  %v4326_v55 = vpop.f32.mrb[9].mxu0  ;;  %v10830_v63 = vpop.f32.mrb[51].mxu1  ;;  %v4605_v38 = vadd.f32 %v17407_v43, %v4395_v23  ;;  %v5039_v43 = vld [vmem:[#allocation5 + $0x338] sm:$0xff] }
 0x691   :  { %v14224_v22 = vadd.f32 %v4326_v55, %v17406_v9 }
 0x692   :  { %v9317_v16 = vmul.f32 -1.442695, %v14223_v29  ;;  %v17419_v29 = vld [vmem:[#allocation20_spill] sm:$0xff] }
 0x693   :  { %v9318_v46 = vmul.f32 -1.442695, %v14224_v22  ;;  %v17422_v22 = vld [vmem:[#allocation23_spill] sm:$0xff] }
 0x694   :  { %14418 = vpow2.f32 %v9317_v16  ;;  %v17420_v16 = vld [vmem:[#allocation80_spill] sm:$0xff] }
 0x695   :  { %14420 = vpow2.f32 %v9318_v46 }
 0x69e   :  { %v14419_v41 = vpop.eup %14418 }
 0x69f   :  { %v4595_v4 = vadd.f32 1.0, %v14419_v41  ;;  %v14421_v60 = vpop.eup %14420  ;;  %v5035_v41 = vld [vmem:[#allocation5 + $0x318] sm:$0xff] }
 0x6a0   :  { %v4602_v61 = vadd.f32 1.0, %v14421_v60 }
 0x6a1   :  { %14422 = vrcp.f32 %v4595_v4  ;;  %v5037_v4 = vld [vmem:[#allocation5 + $0x328] sm:$0xff] }
 0x6ab   :  { %v14423_v14 = vpop.eup %14422 }
 0x6ac   :  { %v4606_v10 = vmul.f32 %v14423_v14, %v4605_v38  ;;  %v5042_v38 = vld [vmem:[#allocation5 + $0x350] sm:$0xff] }
 0x6ae   :  { %v4607_v33 = vadd.f32 %v4606_v10, %v17408_v27  ;;  %v15989_v10 = vpack.c.bf16 %v5042_v38, %v5039_v43  ;;  %v5041_v27 = vld [vmem:[#allocation5 + $0x348] sm:$0xff]  ;;  %v5070_v43 = vld [vmem:[#allocation5 + $0x430] sm:$0xff] }
 0x6af   :  { %v4513_v42 = vpop.f32.mrb[22].mxu0  ;;  %v4584_v25 = vpop.f32.mrb[52].mxu1  ;;  %v5073_v38 = vld [vmem:[#allocation5 + $0x448] sm:$0xff] }
 0x6b0   :  { %14424 = vtanh.f32 %v4607_v33  ;;  %v14237_v30 = vadd.f32 %v4513_v42, %v17409_v37  ;;  %v4515_v7 = vpop.f32.mrb[23].mxu0  ;;  %v10865_v47 = vpop.f32.mrb[53].mxu1  ;;  %v4629_v31 = vadd.f32 %v17416_v13, %v4584_v25  ;;  %v5040_v33 = vld [vmem:[#allocation5 + $0x340] sm:$0xff]  ;;  %v5045_v42 = vld [vmem:[#allocation5 + $0x368] sm:$0xff] }
 0x6b1   :  { %14426 = vrcp.f32 %v4602_v61  ;;  %v14238_v18 = vadd.f32 %v4515_v7, %v17410_v34  ;;  %v5043_v61 = vld [vmem:[#allocation5 + $0x358] sm:$0xff]  ;;  %v5056_v13 = vld [vmem:[#allocation5 + $0x3c0] sm:$0xff] }
 0x6b2   :  { %v9319_v53 = vmul.f32 -1.442695, %v14237_v30  ;;  %v15997_v25 = vpack.c.bf16 %v5043_v61, %v5040_v33  ;;  %v5044_v30 = vld [vmem:[#allocation5 + $0x360] sm:$0xff]  ;;  %v5047_v47 = vld [vmem:[#allocation5 + $0x378] sm:$0xff]  ;;  %v16050_v33 = vpack.c.bf16 %v5073_v38, %v5070_v43  ;;  %v5074_v61 = vld [vmem:[#allocation5 + $0x450] sm:$0xff] }
 0x6b3   :  { %v9320_v52 = vmul.f32 -1.442695, %v14238_v18  ;;  %v5049_v18 = vld [vmem:[#allocation5 + $0x388] sm:$0xff]  ;;  %v5236_v43 = vld [vmem:[#allocation5 + $0x4f8] sm:$0xff]  ;;  %v5235_v38 = vld [vmem:[#allocation5 + $0x4f0] sm:$0xff] }
 0x6b4   :  { %14428 = vpow2.f32 %v9319_v53  ;;  %v5046_v53 = vld [vmem:[#allocation5 + $0x370] sm:$0xff] }
 0x6b5   :  { %14430 = vpow2.f32 %v9320_v52  ;;  %v16010_v52 = vpack.c.bf16 %v5049_v18, %v5046_v53  ;;  %v5222_v53 = vld [vmem:[#allocation5 + $0x488] sm:$0xff]  ;;  %v5225_v18 = vld [vmem:[#allocation5 + $0x4a0] sm:$0xff] }
 0x6ba   :  { %v14425_v39 = vpop.eup %14424 }
 0x6bb   :  { %v4609_v50 = vsub.f32 %v15728_v59, %v14425_v39  ;;  %v14427_v51 = vpop.eup %14426  ;;  %v17413_v59 = vld [vmem:[#allocation77_spill] sm:$0xff] }
 0x6bd   :  { %v4610_v44 = vmul.f32 %v14427_v51, %v4609_v50  ;;  %v5054_v50 = vld [vmem:[#allocation5 + $0x3b0] sm:$0xff]  ;;  %v16008_v51 = vpack.c.bf16 %v5047_v47, %v5044_v30  ;;  %v5076_v30 = vld [vmem:[#allocation5 + $0x460] sm:$0xff]  ;;  %v5079_v47 = vld [vmem:[#allocation5 + $0x478] sm:$0xff] }
 0x6be   :  { %v14429_v5 = vpop.eup %14428 }
 0x6bf   :  { %v4619_v40 = vadd.f32 1.0, %v14429_v5  ;;  %v15939_v26 = vadd.f32 %v14425_v39, %v4610_v44  ;;  %v5051_v39 = vld [vmem:[#allocation5 + $0x398] sm:$0xff]  ;;  %v5050_v44 = vld [vmem:[#allocation5 + $0x390] sm:$0xff] }
 0x6c0   :  { %v16014_v5 = vpack.c.bf16 %v5054_v50, %v5051_v39  ;;  %v16060_v50 = vpack.c.bf16 %v5079_v47, %v5076_v30  ;;  %v5239_v47 = vld [vmem:[#allocation5 + $0x510] sm:$0xff] }
 0x6c1   :  { %14432 = vrcp.f32 %v4619_v40  ;;  %4752 = vmatmul.mubr.f32.vlgmr.msra.gmra.mrb[48].mxu0 %v15939_v26  ;;  %10899 = vmatmul.mubr.f32.vlgmr.msra.gmra.mrb[54].mxu1 %v15939_v26  ;;  %v5053_v40 = vld [vmem:[#allocation5 + $0x3a8] sm:$0xff] }
 0x6c2   :  { %12922 = vmatpush1.bf16.msra.mxu0 %v15724_v24  ;;  %12953 = vmatpush3.bf16.msra.mxu1 %v17411_v2  ;;  %v14431_v24 = vpop.eup %14430  ;;  %v5052_v2 = vld [vmem:[#allocation5 + $0x3a0] sm:$0xff] }
 0x6c3   :  { %12924 = vmatprep.subr.bf16.mxu0 %v17412_v54  ;;  %12954 = vmatprep.subr.bf16.mxu1 %v17225_v19  ;;  %v4626_v63 = vadd.f32 1.0, %v14431_v24  ;;  %v5055_v54 = vld [vmem:[#allocation5 + $0x3b8] sm:$0xff] }
 0x6c4   :  { %4949 = vmatprep.mubr.f32.mxu0 %v17208_v21  ;;  %10933 = vmatprep.mubr.msk.f32.mxu1 %vm14652_vm0, %v17208_v21  ;;  %v16020_v24 = vpack.c.bf16 %v5055_v54, %v5052_v2  ;;  %v5224_v2 = vld [vmem:[#allocation5 + $0x498] sm:$0xff]  ;;  %v5223_v54 = vld [vmem:[#allocation5 + $0x490] sm:$0xff] }
 0x6c6   :  { %12926 = vmatpush1.bf16.msra.mxu0 %v17413_v59  ;;  %12956 = vmatpush3.bf16.msra.mxu1 %v17414_v17  ;;  %v5057_v59 = vld [vmem:[#allocation5 + $0x3c8] sm:$0xff]  ;;  %v5060_v17 = vld [vmem:[#allocation5 + $0x3e0] sm:$0xff] }
 0x6c7   :  { %12928 = vmatprep.subr.bf16.mxu0 %v17415_v49  ;;  %12957 = vmatprep.subr.bf16.mxu1 %v17225_v19  ;;  %v16018_v49 = vpack.c.bf16 %v5053_v40, %v5050_v44  ;;  %v5221_v44 = vld [vmem:[#allocation5 + $0x480] sm:$0xff]  ;;  %v16064_v40 = vpack.c.bf16 %v5225_v18, %v5222_v53  ;;  %v5242_v18 = vld [vmem:[#allocation5 + $0x528] sm:$0xff] }
 0x6ca   :  { %12930 = vmatpush1.bf16.msra.mxu0 %v17417_v35  ;;  %12959 = vmatpush3.bf16.msra.mxu1 %v17418_v6  ;;  %v5059_v35 = vld [vmem:[#allocation5 + $0x3d8] sm:$0xff]  ;;  %v5058_v6 = vld [vmem:[#allocation5 + $0x3d0] sm:$0xff] }
 0x6cb   :  { %v14433_v57 = vpop.eup %14432  ;;  %12932 = vmatprep.subr.bf16.mxu0 %v15755_v3  ;;  %12960 = vmatprep.subr.bf16.mxu1 %v17225_v19  ;;  %v17421_v3 = vld [vmem:[#allocation12_spill] sm:$0xff] }
 0x6cc   :  { %v4630_v23 = vmul.f32 %v14433_v57, %v4629_v31  ;;  %v16024_v31 = vpack.c.bf16 %v5060_v17, %v5057_v59  ;;  %v5061_v57 = vld [vmem:[#allocation5 + $0x3e8] sm:$0xff]  ;;  %v5228_v17 = vld [vmem:[#allocation5 + $0x4b8] sm:$0xff] }
 0x6cd   :  { %v5226_v59 = vld [vmem:[#allocation5 + $0x4a8] sm:$0xff] }
 0x6ce   :  { %v4631_v55 = vadd.f32 %v4630_v23, %v17419_v29  ;;  %12934 = vmatpush1.bf16.msra.mxu0 %v15763_v0  ;;  %12962 = vmatpush3.bf16.msra.mxu1 %v15765_v12  ;;  %v5033_v0 = vld [vmem:[#allocation5 + $0x308] sm:$0xff]  ;;  %v5036_v12 = vld [vmem:[#allocation5 + $0x320] sm:$0xff]  ;;  %v5063_v23 = vld [vmem:[#allocation5 + $0x3f8] sm:$0xff] }
 0x6cf   :  { %12936 = vmatprep.subr.bf16.mxu0 %v15769_v45  ;;  %12963 = vmatprep.subr.bf16.mxu1 %v17225_v19  ;;  %v15976_v46 = vpack.c.bf16 %v5036_v12, %v5033_v0  ;;  %v5066_v29 = vld [vmem:[#allocation5 + $0x410] sm:$0xff]  ;;  %v5064_v0 = vld [vmem:[#allocation5 + $0x400] sm:$0xff]  ;;  %v5067_v12 = vld [vmem:[#allocation5 + $0x418] sm:$0xff] }
 0x6d0   :  { %14434 = vtanh.f32 %v4631_v55  ;;  %v16028_v55 = vpack.c.bf16 %v5059_v35, %v5056_v13  ;;  %v5231_v13 = vld [vmem:[#allocation5 + $0x4d0] sm:$0xff]  ;;  %v16068_v35 = vpack.c.bf16 %v5224_v2, %v5221_v44  ;;  %v5241_v44 = vld [vmem:[#allocation5 + $0x520] sm:$0xff]  ;;  %v5244_v2 = vld [vmem:[#allocation5 + $0x538] sm:$0xff] }
 0x6d1   :  { %14436 = vrcp.f32 %v4626_v63  ;;  %v16030_v63 = vpack.c.bf16 %v5061_v57, %v5058_v6  ;;  %v16070_v6 = vpack.c.bf16 %v5226_v59, %v5223_v54  ;;  %v5227_v57 = vld [vmem:[#allocation5 + $0x4b0] sm:$0xff]  ;;  %v5246_v54 = vld [vmem:[#allocation5 + $0x548] sm:$0xff]  ;;  %v5249_v59 = vld [vmem:[#allocation5 + $0x560] sm:$0xff] }
 0x6d2   :  { %12938 = vmatpush1.bf16.msra.mxu0 %v15774_v28  ;;  %12965 = vmatpush3.bf16.msra.mxu1 %v17420_v16  ;;  %v5032_v28 = vld [vmem:[#allocation5 + $0x300] sm:$0xff]  ;;  %v5062_v16 = vld [vmem:[#allocation5 + $0x3f0] sm:$0xff] }
 0x6d3   :  { %12940 = vmatprep.subr.bf16.mxu0 %v17421_v3  ;;  %12966 = vmatprep.subr.bf16.mxu1 %v17225_v19  ;;  %v16034_v3 = vpack.c.bf16 %v5066_v29, %v5063_v23  ;;  %v16074_v23 = vpack.c.bf16 %v5231_v13, %v5228_v17  ;;  %v5230_v29 = vld [vmem:[#allocation5 + $0x4c8] sm:$0xff]  ;;  %v16103_v17 = vpack.c.bf16 %v5242_v18, %v5239_v47  ;;  %v5253_v47 = vld [vmem:[#allocation5 + $0x580] sm:$0xff]  ;;  %v5256_v18 = vld [vmem:[#allocation5 + $0x598] sm:$0xff] }
 0x6d4   :  { %v16105_v13 = vpack.c.bf16 %v5244_v2, %v5241_v44  ;;  %v5258_v44 = vld [vmem:[#allocation5 + $0x5a8] sm:$0xff]  ;;  %v5261_v2 = vld [vmem:[#allocation5 + $0x5c0] sm:$0xff] }
 0x6d6   :  { %12942 = vmatpush1.bf16.msra.mxu0 %v15784_v36  ;;  %12968 = vmatpush3.bf16.msra.mxu1 %v17422_v22  ;;  %v5065_v22 = vld [vmem:[#allocation5 + $0x408] sm:$0xff] }
 0x6d7   :  { %12944 = vmatprep.subr.bf16.mxu0 %v15790_v48  ;;  %12969 = vmatprep.subr.bf16.mxu1 %v17225_v19  ;;  %v5034_v48 = vld [vmem:[#allocation5 + $0x310] sm:$0xff] }
 0x6da   :  { %v14435_v45 = vpop.eup %14434  ;;  %12946 = vmatpush1.bf16.msra.mxu0 %v15794_v1  ;;  %12971 = vmatpush3.bf16.msra.mxu1 %v15796_v62  ;;  %v15981_v1 = vpack.c.bf16 %v5035_v41, %v5032_v28  ;;  %v15983_v62 = vpack.c.bf16 %v5037_v4, %v5034_v48  ;;  %v5072_v28 = vld [vmem:[#allocation5 + $0x440] sm:$0xff]  ;;  %v16040_v41 = vpack.c.bf16 %v5067_v12, %v5064_v0  ;;  %v5234_v0 = vld [vmem:[#allocation5 + $0x4e8] sm:$0xff] }
 0x6db   :  { %12948 = vmatprep.subr.bf16.mxu0 %v15800_v32  ;;  %12972 = vmatprep.subr.bf16.mxu1 %v17225_v19  ;;  %v4633_v36 = vsub.f32 %v15815_v15, %v14435_v45  ;;  %v14437_v60 = vpop.eup %14436  ;;  %v5038_v32 = vld [vmem:[#allocation5 + $0x330] sm:$0xff]  ;;  %v5068_v48 = vld [vmem:[#allocation5 + $0x420] sm:$0xff] }
 0x6dc   :  { %v5237_v12 = vld [vmem:[#allocation5 + $0x500] sm:$0xff] }
 0x6dd   :  { %v4634_v14 = vmul.f32 %v14437_v60, %v4633_v36  ;;  %v16038_v36 = vpack.c.bf16 %v5065_v22, %v5062_v16  ;;  %v5071_v60 = vld [vmem:[#allocation5 + $0x438] sm:$0xff]  ;;  %v5229_v16 = vld [vmem:[#allocation5 + $0x4c0] sm:$0xff] }
 0x6de   :  { %12950 = vmatpush1.bf16.msra.mxu0 %v15804_v11  ;;  %12974 = vmatpush3.bf16.msra.mxu1 %v15806_v20  ;;  %v5048_v11 = vld [vmem:[#allocation5 + $0x380] sm:$0xff]  ;;  %v15995_v20 = vpack.c.bf16 %v5041_v27, %v5038_v32  ;;  %v5078_v32 = vld [vmem:[#allocation5 + $0x470] sm:$0xff]  ;;  %v16048_v27 = vpack.c.bf16 %v5071_v60, %v5068_v48  ;;  %v5232_v22 = vld [vmem:[#allocation5 + $0x4d8] sm:$0xff]  ;;  %v16086_v60 = vpack.c.bf16 %v5237_v12, %v5234_v0 }
 0x6df   :  { %12976 = vmatprep.subr.bf16.mxu0 %v15976_v46  ;;  %13007 = vmatprep.subr.bf16.mxu1 %v17225_v19  ;;  %v15987_v15 = vadd.f32 %v14435_v45, %v4634_v14  ;;  %v16001_v7 = vpack.c.bf16 %v5048_v11, %v5045_v42  ;;  %v5069_v45 = vld [vmem:[#allocation5 + $0x428] sm:$0xff]  ;;  %v5075_v14 = vld [vmem:[#allocation5 + $0x458] sm:$0xff]  ;;  %v5233_v48 = vld [vmem:[#allocation5 + $0x4e0] sm:$0xff] }
 0x6e0   :  { %v16044_v4 = vpack.c.bf16 %v5072_v28, %v5069_v45  ;;  %v16054_v42 = vpack.c.bf16 %v5078_v32, %v5075_v14  ;;  %v5077_v11 = vld [vmem:[#allocation5 + $0x468] sm:$0xff]  ;;  %v16080_v45 = vpack.c.bf16 %v5230_v29, %v5227_v57  ;;  %v16082_v28 = vpack.c.bf16 %v5232_v22, %v5229_v16  ;;  %v5240_v32 = vld [vmem:[#allocation5 + $0x518] sm:$0xff]  ;;  %v5245_v57 = vld [vmem:[#allocation5 + $0x540] sm:$0xff] }
 0x6e1   :  { %4950 = vmatmul.mubr.f32.vlgmr.msra.gmra.mrb[46].mxu0 %v15987_v15  ;;  %10934 = vmatmul.mubr.f32.vlgmr.msra.gmra.mrb[56].mxu1 %v15987_v15  ;;  %v16058_v39 = vpack.c.bf16 %v5077_v11, %v5074_v61  ;;  %v5238_v14 = vld [vmem:[#allocation5 + $0x508] sm:$0xff]  ;;  %v5243_v61 = vld [vmem:[#allocation5 + $0x530] sm:$0xff]  ;;  %v16093_v11 = vpack.c.bf16 %v5236_v43, %v5233_v48  ;;  %v16109_v29 = vpack.c.bf16 %v5249_v59, %v5246_v54  ;;  %v5248_v16 = vld [vmem:[#allocation5 + $0x558] sm:$0xff] }
 0x6e2   :  { %12978 = vmatpush1.bf16.msra.mxu0 %v15981_v1  ;;  %13009 = vmatpush3.bf16.msra.mxu1 %v15983_v62  ;;  %v16095_v30 = vpack.c.bf16 %v5238_v14, %v5235_v38  ;;  %v16099_v53 = vpack.c.bf16 %v5243_v61, %v5240_v32  ;;  %v5247_v22 = vld [vmem:[#allocation5 + $0x550] sm:$0xff]  ;;  %v5250_v0 = vld [vmem:[#allocation5 + $0x568] sm:$0xff]  ;;  %v5252_v12 = vld [vmem:[#allocation5 + $0x578] sm:$0xff]  ;;  %v16113_v43 = vpack.c.bf16 %v5248_v16, %v5245_v57 }
 0x6e3   :  { %12980 = vmatprep.subr.bf16.mxu0 %v15989_v10  ;;  %13010 = vmatprep.subr.bf16.mxu1 %v17225_v19  ;;  %17423 = vst [vmem:[#allocation32_spill] sm:$0xff] %v16109_v29  ;;  %v5255_v48 = vld [vmem:[#allocation5 + $0x590] sm:$0xff]  ;;  %v16115_v38 = vpack.c.bf16 %v5250_v0, %v5247_v22  ;;  %v5254_v61 = vld [vmem:[#allocation5 + $0x588] sm:$0xff]  ;;  %v16125_v59 = vpack.c.bf16 %v5256_v18, %v5253_v47  ;;  %v5257_v57 = vld [vmem:[#allocation5 + $0x5a0] sm:$0xff] }
 0x6e4   :  { %5144 = vmatprep.mubr.f32.mxu0 %v17208_v21  ;;  %10968 = vmatprep.mubr.msk.f32.mxu1 %vm14652_vm0, %v17208_v21  ;;  %v5251_v14 = vld [vmem:[#allocation5 + $0x570] sm:$0xff]  ;;  %v16119_v32 = vpack.c.bf16 %v5255_v48, %v5252_v12  ;;  %v16129_v16 = vpack.c.bf16 %v5261_v2, %v5258_v44  ;;  %v5260_v22 = vld [vmem:[#allocation5 + $0x5b8] sm:$0xff]  ;;  %v5262_v12 = vld [vmem:[#allocation5 + $0x5c8] sm:$0xff] }
 0x6e5   :  { %17424 = vst [vmem:[#allocation33_spill] sm:$0xff] %v16115_v38  ;;  %v16123_v54 = vpack.c.bf16 %v5254_v61, %v5251_v14  ;;  %17427 = vst [vmem:[#allocation36_spill] sm:$0xff] %v16125_v59  ;;  %v5259_v0 = vld [vmem:[#allocation5 + $0x5b0] sm:$0xff]  ;;  %v5264_v48 = vld [vmem:[#allocation5 + $0x5d8] sm:$0xff]  ;;  %v16133_v14 = vpack.c.bf16 %v5260_v22, %v5257_v57 }
 0x6e6   :  { %12982 = vmatpush1.bf16.msra.mxu0 %v15995_v20  ;;  %13012 = vmatpush3.bf16.msra.mxu1 %v15997_v25  ;;  %17425 = vst [vmem:[#allocation34_spill] sm:$0xff] %v16119_v32  ;;  %17428 = vst [vmem:[#allocation37_spill] sm:$0xff] %v16129_v16  ;;  %v16135_v61 = vpack.c.bf16 %v5262_v12, %v5259_v0  ;;  %v5263_v47 = vld [vmem:[#allocation5 + $0x5d0] sm:$0xff]  ;;  %v5266_v44 = vld [vmem:[#allocation5 + $0x5e8] sm:$0xff] }
 0x6e7   :  { %12984 = vmatprep.subr.bf16.mxu0 %v16001_v7  ;;  %13013 = vmatprep.subr.bf16.mxu1 %v17225_v19  ;;  %17426 = vst [vmem:[#allocation35_spill] sm:$0xff] %v16123_v54  ;;  %17429 = vst [vmem:[#allocation38_spill] sm:$0xff] %v16133_v14  ;;  %v5265_v2 = vld [vmem:[#allocation5 + $0x5e0] sm:$0xff]  ;;  %v5464_v12 = vld [vmem:[#allocation5 + $0x618] sm:$0xff] }
 0x6e8   :  { %17430 = vst [vmem:[#allocation39_spill] sm:$0xff] %v16135_v61  ;;  %v5461_v0 = vld [vmem:[#allocation5 + $0x600] sm:$0xff] }
 0x6ea   :  { %12986 = vmatpush1.bf16.msra.mxu0 %v16008_v51  ;;  %13015 = vmatpush3.bf16.msra.mxu1 %v16010_v52 }
 0x6eb   :  { %12988 = vmatprep.subr.bf16.mxu0 %v16014_v5  ;;  %13016 = vmatprep.subr.bf16.mxu1 %v17225_v19 }
 0x6ee   :  { %12990 = vmatpush1.bf16.msra.mxu0 %v16018_v49  ;;  %13018 = vmatpush3.bf16.msra.mxu1 %v16020_v24 }
 0x6ef   :  { %12992 = vmatprep.subr.bf16.mxu0 %v16024_v31  ;;  %13019 = vmatprep.subr.bf16.mxu1 %v17225_v19 }
 0x6f2   :  { %12994 = vmatpush1.bf16.msra.mxu0 %v16028_v55  ;;  %13021 = vmatpush3.bf16.msra.mxu1 %v16030_v63 }
 0x6f3   :  { %12996 = vmatprep.subr.bf16.mxu0 %v16034_v3  ;;  %13022 = vmatprep.subr.bf16.mxu1 %v17225_v19 }
 0x6f6   :  { %12998 = vmatpush1.bf16.msra.mxu0 %v16038_v36  ;;  %13024 = vmatpush3.bf16.msra.mxu1 %v16040_v41 }
 0x6f7   :  { %13000 = vmatprep.subr.bf16.mxu0 %v16044_v4  ;;  %13025 = vmatprep.subr.bf16.mxu1 %v17225_v19 }
 0x6fa   :  { %13002 = vmatpush1.bf16.msra.mxu0 %v16048_v27  ;;  %13027 = vmatpush3.bf16.msra.mxu1 %v16050_v33 }
 0x6fb   :  { %13004 = vmatprep.subr.bf16.mxu0 %v16054_v42  ;;  %13028 = vmatprep.subr.bf16.mxu1 %v17225_v19 }
 0x6fe   :  { %13006 = vmatpush1.bf16.msra.mxu0 %v16058_v39  ;;  %13030 = vmatpush3.bf16.msra.mxu1 %v16060_v50 }
 0x6ff   :  { %13032 = vmatprep.subr.bf16.mxu0 %v16064_v40  ;;  %13063 = vmatprep.subr.bf16.mxu1 %v17225_v19 }
 0x701   :  { %5145 = vmatmul.mubr.f32.vlgmr.msra.gmra.mrb[10].mxu0 %v15939_v26  ;;  %10969 = vmatmul.mubr.f32.vlgmr.msra.gmra.mrb[58].mxu1 %v15939_v26 }
 0x702   :  { %13034 = vmatpush1.bf16.msra.mxu0 %v16068_v35  ;;  %13065 = vmatpush3.bf16.msra.mxu1 %v16070_v6 }
 0x703   :  { %13036 = vmatprep.subr.bf16.mxu0 %v16074_v23  ;;  %13066 = vmatprep.subr.bf16.mxu1 %v17225_v19 }
 0x704   :  { %5333 = vmatprep.mubr.f32.mxu0 %v17208_v21  ;;  %11003 = vmatprep.mubr.msk.f32.mxu1 %vm14652_vm0, %v17208_v21 }
 0x706   :  { %13038 = vmatpush1.bf16.msra.mxu0 %v16080_v45  ;;  %13068 = vmatpush3.bf16.msra.mxu1 %v16082_v28 }
 0x707   :  { %13040 = vmatprep.subr.bf16.mxu0 %v16086_v60  ;;  %13069 = vmatprep.subr.bf16.mxu1 %v17225_v19 }
 0x70a   :  { %13042 = vmatpush1.bf16.msra.mxu0 %v16093_v11  ;;  %13071 = vmatpush3.bf16.msra.mxu1 %v16095_v30 }
 0x70b   :  { %13044 = vmatprep.subr.bf16.mxu0 %v16099_v53  ;;  %13072 = vmatprep.subr.bf16.mxu1 %v17225_v19 }
 0x70e   :  { %13046 = vmatpush1.bf16.msra.mxu0 %v16103_v17  ;;  %13074 = vmatpush3.bf16.msra.mxu1 %v16105_v13 }
 0x70f   :  { %13048 = vmatprep.subr.bf16.mxu0 %v16109_v29  ;;  %13075 = vmatprep.subr.bf16.mxu1 %v17225_v19  ;;  %v5267_v29 = vld [vmem:[#allocation5 + $0x5f0] sm:$0xff] }
 0x710   :  { %v16139_v18 = vpack.c.bf16 %v5267_v29, %v5264_v48  ;;  %v5462_v29 = vld [vmem:[#allocation5 + $0x608] sm:$0xff]  ;;  %v5463_v48 = vld [vmem:[#allocation5 + $0x610] sm:$0xff] }
 0x712   :  { %13050 = vmatpush1.bf16.msra.mxu0 %v16113_v43  ;;  %13077 = vmatpush3.bf16.msra.mxu1 %v16115_v38  ;;  %17431 = vst [vmem:[#allocation40_spill] sm:$0xff] %v16139_v18  ;;  %v5672_v38 = vld [vmem:[#allocation5 + $0x7e8] sm:$0xff] }
 0x713   :  { %13052 = vmatprep.subr.bf16.mxu0 %v16119_v32  ;;  %13078 = vmatprep.subr.bf16.mxu1 %v17225_v19  ;;  %v5268_v32 = vld [vmem:[#allocation5 + $0x5f8] sm:$0xff] }
 0x714   :  { %v16145_v57 = vpack.c.bf16 %v5268_v32, %v5265_v2  ;;  %v5465_v32 = vld [vmem:[#allocation5 + $0x620] sm:$0xff] }
 0x715   :  { %v16157_v22 = vpack.c.bf16 %v5465_v32, %v5462_v29  ;;  %v5467_v29 = vld [vmem:[#allocation5 + $0x630] sm:$0xff]  ;;  %v5470_v32 = vld [vmem:[#allocation5 + $0x648] sm:$0xff] }
 0x716   :  { %13054 = vmatpush1.bf16.msra.mxu0 %v16123_v54  ;;  %13080 = vmatpush3.bf16.msra.mxu1 %v16125_v59  ;;  %v16143_v54 = vpack.c.bf16 %v5266_v44, %v5263_v47  ;;  %17433 = vst [vmem:[#allocation42_spill] sm:$0xff] %v16145_v57  ;;  %v16159_v47 = vpack.c.bf16 %v5464_v12, %v5461_v0  ;;  %v5466_v44 = vld [vmem:[#allocation5 + $0x628] sm:$0xff]  ;;  %v5472_v12 = vld [vmem:[#allocation5 + $0x658] sm:$0xff] }
 0x717   :  { %13056 = vmatprep.subr.bf16.mxu0 %v16129_v16  ;;  %13081 = vmatprep.subr.bf16.mxu1 %v17225_v19  ;;  %17434 = vst [vmem:[#allocation43_spill] sm:$0xff] %v16157_v22  ;;  %v16162_v2 = vpack.c.bf16 %v5466_v44, %v5463_v48  ;;  %v16169_v0 = vpack.c.bf16 %v5470_v32, %v5467_v29  ;;  %v5474_v44 = vld [vmem:[#allocation5 + $0x668] sm:$0xff]  ;;  %v5670_v59 = vld [vmem:[#allocation5 + $0x7d8] sm:$0xff] }
 0x718   :  { %17432 = vst [vmem:[#allocation41_spill] sm:$0xff] %v16143_v54  ;;  %17435 = vst [vmem:[#allocation44_spill] sm:$0xff] %v16159_v47  ;;  %v5478_v32 = vld [vmem:[#allocation5 + $0x688] sm:$0xff] }
 0x719   :  { %17436 = vst [vmem:[#allocation45_spill] sm:$0xff] %v16162_v2  ;;  %17438 = vst [vmem:[#allocation47_spill] sm:$0xff] %v16169_v0 }
 0x71a   :  { %13058 = vmatpush1.bf16.msra.mxu0 %v16133_v14  ;;  %13083 = vmatpush3.bf16.msra.mxu1 %v16135_v61  ;;  %v5469_v61 = vld [vmem:[#allocation5 + $0x640] sm:$0xff] }
 0x71b   :  { %13060 = vmatprep.subr.bf16.mxu0 %v16139_v18  ;;  %13084 = vmatprep.subr.bf16.mxu1 %v17225_v19  ;;  %v16172_v48 = vpack.c.bf16 %v5472_v12, %v5469_v61  ;;  %v5480_v12 = vld [vmem:[#allocation5 + $0x698] sm:$0xff] }
 0x71d   :  { %17439 = vst [vmem:[#allocation48_spill] sm:$0xff] %v16172_v48 }
 0x71e   :  { %13062 = vmatpush1.bf16.msra.mxu0 %v16143_v54  ;;  %13086 = vmatpush3.bf16.msra.mxu1 %v16145_v57  ;;  %v5468_v57 = vld [vmem:[#allocation5 + $0x638] sm:$0xff]  ;;  %v5471_v54 = vld [vmem:[#allocation5 + $0x650] sm:$0xff] }
 0x71f   :  { %13119 = vmatprep.subr.bf16.mxu1 %v17225_v19  ;;  %13088 = vmatprep.subr.bf16.mxu0 %v16157_v22  ;;  %v16166_v18 = vpack.c.bf16 %v5471_v54, %v5468_v57  ;;  %v5473_v57 = vld [vmem:[#allocation5 + $0x660] sm:$0xff]  ;;  %v5475_v22 = vld [vmem:[#allocation5 + $0x670] sm:$0xff] }
 0x720   :  { %v16182_v61 = vpack.c.bf16 %v5478_v32, %v5475_v22  ;;  %v5486_v32 = vld [vmem:[#allocation5 + $0x6c8] sm:$0xff] }
 0x721   :  { %5334 = vmatmul.mubr.f32.vlgmr.msra.gmra.mrb[20].mxu0 %v15987_v15  ;;  %11004 = vmatmul.mubr.f32.vlgmr.msra.gmra.mrb[60].mxu1 %v15987_v15  ;;  %17437 = vst [vmem:[#allocation46_spill] sm:$0xff] %v16166_v18 }
 0x722   :  { %5573 = vmatprep.mubr.f32.mxu0 %v17208_v21  ;;  %11038 = vmatprep.mubr.msk.f32.mxu1 %vm14652_vm0, %v17208_v21  ;;  %17442 = vst [vmem:[#allocation51_spill] sm:$0xff] %v16182_v61 }
 0x723   :  { %13090 = vmatpush1.bf16.msra.mxu0 %v16159_v47  ;;  %13121 = vmatpush3.bf16.msra.mxu1 %v16162_v2  ;;  %v5477_v47 = vld [vmem:[#allocation5 + $0x680] sm:$0xff]  ;;  %v5476_v2 = vld [vmem:[#allocation5 + $0x678] sm:$0xff] }
 0x724   :  { %13122 = vmatprep.subr.bf16.mxu1 %v17225_v19  ;;  %13092 = vmatprep.subr.bf16.mxu0 %v16166_v18  ;;  %v16176_v54 = vpack.c.bf16 %v5477_v47, %v5474_v44  ;;  %v16179_v29 = vpack.c.bf16 %v5476_v2, %v5473_v57  ;;  %v5479_v44 = vld [vmem:[#allocation5 + $0x690] sm:$0xff]  ;;  %v5481_v18 = vld [vmem:[#allocation5 + $0x6a0] sm:$0xff]  ;;  %v5484_v57 = vld [vmem:[#allocation5 + $0x6b8] sm:$0xff] }
 0x725   :  { %v16192_v22 = vpack.c.bf16 %v5484_v57, %v5481_v18  ;;  %v5492_v57 = vld [vmem:[#allocation5 + $0x6f8] sm:$0xff] }
 0x726   :  { %17440 = vst [vmem:[#allocation49_spill] sm:$0xff] %v16176_v54  ;;  %17441 = vst [vmem:[#allocation50_spill] sm:$0xff] %v16179_v29 }
 0x727   :  { %13094 = vmatpush1.bf16.msra.mxu0 %v16169_v0  ;;  %13124 = vmatpush3.bf16.msra.mxu1 %v16172_v48  ;;  %v5483_v0 = vld [vmem:[#allocation5 + $0x6b0] sm:$0xff]  ;;  %v5482_v48 = vld [vmem:[#allocation5 + $0x6a8] sm:$0xff]  ;;  %17445 = vst [vmem:[#allocation54_spill] sm:$0xff] %v16192_v22 }
 0x728   :  { %13125 = vmatprep.subr.bf16.mxu1 %v17225_v19  ;;  %13096 = vmatprep.subr.bf16.mxu0 %v16176_v54  ;;  %v16186_v47 = vpack.c.bf16 %v5483_v0, %v5480_v12  ;;  %v16189_v2 = vpack.c.bf16 %v5482_v48, %v5479_v44  ;;  %v5485_v12 = vld [vmem:[#allocation5 + $0x6c0] sm:$0xff]  ;;  %v5487_v54 = vld [vmem:[#allocation5 + $0x6d0] sm:$0xff]  ;;  %v5490_v44 = vld [vmem:[#allocation5 + $0x6e8] sm:$0xff] }
 0x729   :  { %v16202_v18 = vpack.c.bf16 %v5490_v44, %v5487_v54  ;;  %v5498_v44 = vld [vmem:[#allocation5 + $0x728] sm:$0xff] }
 0x72a   :  { %17443 = vst [vmem:[#allocation52_spill] sm:$0xff] %v16186_v47  ;;  %17444 = vst [vmem:[#allocation53_spill] sm:$0xff] %v16189_v2 }
 0x72b   :  { %13098 = vmatpush1.bf16.msra.mxu0 %v16179_v29  ;;  %13127 = vmatpush3.bf16.msra.mxu1 %v16182_v61  ;;  %v5489_v29 = vld [vmem:[#allocation5 + $0x6e0] sm:$0xff]  ;;  %v5488_v61 = vld [vmem:[#allocation5 + $0x6d8] sm:$0xff]  ;;  %17448 = vst [vmem:[#allocation58_spill] sm:$0xff] %v16202_v18 }
 0x72c   :  { %13128 = vmatprep.subr.bf16.mxu1 %v17225_v19  ;;  %13100 = vmatprep.subr.bf16.mxu0 %v16186_v47  ;;  %v16196_v0 = vpack.c.bf16 %v5489_v29, %v5486_v32  ;;  %v16199_v48 = vpack.c.bf16 %v5488_v61, %v5485_v12  ;;  %v5491_v32 = vld [vmem:[#allocation5 + $0x6f0] sm:$0xff]  ;;  %v5493_v47 = vld [vmem:[#allocation5 + $0x700] sm:$0xff]  ;;  %v5496_v12 = vld [vmem:[#allocation5 + $0x718] sm:$0xff] }
 0x72d   :  { %v16212_v54 = vpack.c.bf16 %v5496_v12, %v5493_v47  ;;  %v5504_v12 = vld [vmem:[#allocation5 + $0x758] sm:$0xff] }
 0x72e   :  { %17446 = vst [vmem:[#allocation56_spill] sm:$0xff] %v16196_v0  ;;  %17447 = vst [vmem:[#allocation57_spill] sm:$0xff] %v16199_v48 }
 0x72f   :  { %13102 = vmatpush1.bf16.msra.mxu0 %v16189_v2  ;;  %13130 = vmatpush3.bf16.msra.mxu1 %v16192_v22  ;;  %v5495_v2 = vld [vmem:[#allocation5 + $0x710] sm:$0xff]  ;;  %v5494_v22 = vld [vmem:[#allocation5 + $0x708] sm:$0xff]  ;;  %17451 = vst [vmem:[#allocation61_spill] sm:$0xff] %v16212_v54 }
 0x730   :  { %13131 = vmatprep.subr.bf16.mxu1 %v17225_v19  ;;  %13104 = vmatprep.subr.bf16.mxu0 %v16196_v0  ;;  %v16206_v29 = vpack.c.bf16 %v5495_v2, %v5492_v57  ;;  %v16209_v61 = vpack.c.bf16 %v5494_v22, %v5491_v32  ;;  %v5497_v57 = vld [vmem:[#allocation5 + $0x720] sm:$0xff]  ;;  %v5499_v0 = vld [vmem:[#allocation5 + $0x730] sm:$0xff]  ;;  %v5502_v32 = vld [vmem:[#allocation5 + $0x748] sm:$0xff] }
 0x731   :  { %v16222_v47 = vpack.c.bf16 %v5502_v32, %v5499_v0  ;;  %v5660_v32 = vld [vmem:[#allocation5 + $0x788] sm:$0xff] }
 0x732   :  { %17449 = vst [vmem:[#allocation59_spill] sm:$0xff] %v16206_v29  ;;  %17450 = vst [vmem:[#allocation60_spill] sm:$0xff] %v16209_v61 }
 0x733   :  { %13106 = vmatpush1.bf16.msra.mxu0 %v16199_v48  ;;  %13133 = vmatpush3.bf16.msra.mxu1 %v16202_v18  ;;  %v5501_v48 = vld [vmem:[#allocation5 + $0x740] sm:$0xff]  ;;  %v5500_v18 = vld [vmem:[#allocation5 + $0x738] sm:$0xff]  ;;  %17454 = vst [vmem:[#allocation64_spill] sm:$0xff] %v16222_v47 }
 0x734   :  { %13134 = vmatprep.subr.bf16.mxu1 %v17225_v19  ;;  %13108 = vmatprep.subr.bf16.mxu0 %v16206_v29  ;;  %v16216_v2 = vpack.c.bf16 %v5501_v48, %v5498_v44  ;;  %v16219_v22 = vpack.c.bf16 %v5500_v18, %v5497_v57  ;;  %v5503_v44 = vld [vmem:[#allocation5 + $0x750] sm:$0xff]  ;;  %v5505_v29 = vld [vmem:[#allocation5 + $0x760] sm:$0xff]  ;;  %v5508_v57 = vld [vmem:[#allocation5 + $0x778] sm:$0xff] }
 0x735   :  { %v16232_v0 = vpack.c.bf16 %v5508_v57, %v5505_v29 }
 0x736   :  { %17452 = vst [vmem:[#allocation62_spill] sm:$0xff] %v16216_v2  ;;  %17453 = vst [vmem:[#allocation63_spill] sm:$0xff] %v16219_v22 }
 0x737   :  { %13110 = vmatpush1.bf16.msra.mxu0 %v16209_v61  ;;  %13136 = vmatpush3.bf16.msra.mxu1 %v16212_v54  ;;  %v5507_v61 = vld [vmem:[#allocation5 + $0x770] sm:$0xff]  ;;  %v5506_v54 = vld [vmem:[#allocation5 + $0x768] sm:$0xff]  ;;  %17457 = vst [vmem:[#allocation67_spill] sm:$0xff] %v16232_v0 }
 0x738   :  { %13137 = vmatprep.subr.bf16.mxu1 %v17225_v19  ;;  %13112 = vmatprep.subr.bf16.mxu0 %v16216_v2  ;;  %v16226_v48 = vpack.c.bf16 %v5507_v61, %v5504_v12  ;;  %v16229_v18 = vpack.c.bf16 %v5506_v54, %v5503_v44  ;;  %v667_v12 = vld [vmem:[#allocation7 + $0x2] ss:$8 sm:$0x7] }
 0x739   :  { %v17459_v54 = vld [vmem:[#allocation11_spill] sm:$0xff] }
 0x73a   :  { %17455 = vst [vmem:[#allocation65_spill] sm:$0xff] %v16226_v48  ;;  %17456 = vst [vmem:[#allocation66_spill] sm:$0xff] %v16229_v18  ;;  %v16241_v44 = vrot.slane %v667_v12, %v17459_v54 }
 0x73b   :  { %13114 = vmatpush1.bf16.msra.mxu0 %v16219_v22  ;;  %13139 = vmatpush3.bf16.msra.mxu1 %v16222_v47  ;;  %v5663_v22 = vld [vmem:[#allocation5 + $0x7a0] sm:$0xff] }
 0x73c   :  { %13140 = vmatprep.subr.bf16.mxu1 %v17225_v19  ;;  %13116 = vmatprep.subr.bf16.mxu0 %v16226_v48  ;;  %v16236_v61 = vpack.c.bf16 %v5663_v22, %v5660_v32  ;;  %17460 = vst [vmem:[#allocation72_spill] sm:$0xff] %v16241_v44  ;;  %v4206_v29 = vadd.f32 %v15930_v56, %v16241_v44 }
 0x73e   :  { %17458 = vst [vmem:[#allocation70_spill] sm:$0xff] %v16236_v61 }
 0x73f   :  { %13118 = vmatpush1.bf16.msra.mxu0 %v16229_v18  ;;  %13142 = vmatpush3.bf16.msra.mxu1 %v16232_v0  ;;  %v4008_v0 = vadd.f32 %v15928_v58, %v16241_v44 }
 0x740   :  { %13175 = vmatprep.subr.bf16.mxu1 %v17225_v19  ;;  %13144 = vmatprep.subr.bf16.mxu0 %v16236_v61 }
 0x794   :  { %v4824_v57 = vpop.f32.mrb[54].mxu1 }
 0x795   :  { %v16245_v48 = vadd.f32 %v4824_v57, %v4206_v29  ;;  %v10900_v18 = vpop.f32.mrb[55].mxu1 }
 0x797   :  { %17461 = vst [vmem:[#allocation15_spill] sm:$0xff] %v16245_v48  ;;  %v16253_v48 = vld [vmem:[#allocation7 + $0x4] ss:$0 sm:$0xff] }
 0x798   :  { %17463 = vst [vmem:[#allocation74_spill] sm:$0xff] %v16253_v48 }
 0x7b4   :  { %v5022_v22 = vpop.f32.mrb[56].mxu1 }
 0x7b5   :  { %v16249_v32 = vadd.f32 %v5022_v22, %v4008_v0  ;;  %v10935_v47 = vpop.f32.mrb[57].mxu1 }
 0x7b7   :  { %17462 = vst [vmem:[#allocation73_spill] sm:$0xff] %v16249_v32  ;;  %v17464_v32 = vld [vmem:[#allocation14_spill] sm:$0xff] }
 0x7d4   :  { %v5146_v2 = vpop.f32.mrb[10].mxu0  ;;  %v5217_v61 = vpop.f32.mrb[58].mxu1 }
 0x7d5   :  { %v14225_v14 = vadd.f32 %v5146_v2, %v17405_v8  ;;  %v5148_v12 = vpop.f32.mrb[11].mxu0  ;;  %v10970_v54 = vpop.f32.mrb[59].mxu1  ;;  %v5427_v47 = vadd.f32 %v16253_v48, %v5217_v61  ;;  %v5659_v61 = vld [vmem:[#allocation5 + $0x780] sm:$0xff] }
 0x7d6   :  { %v14226_v56 = vadd.f32 %v5148_v12, %v17406_v9  ;;  %v5666_v9 = vld [vmem:[#allocation5 + $0x7b8] sm:$0xff] }
 0x7d7   :  { %v9321_v16 = vmul.f32 -1.442695, %v14225_v14 }
 0x7d8   :  { %v9322_v29 = vmul.f32 -1.442695, %v14226_v56 }
 0x7d9   :  { %14438 = vpow2.f32 %v9321_v16 }
 0x7da   :  { %14440 = vpow2.f32 %v9322_v29 }
 0x7e3   :  { %v14439_v57 = vpop.eup %14438 }
 0x7e4   :  { %v5417_v18 = vadd.f32 1.0, %v14439_v57  ;;  %v14441_v58 = vpop.eup %14440 }
 0x7e5   :  { %v5424_v8 = vadd.f32 1.0, %v14441_v58  ;;  %v5664_v58 = vld [vmem:[#allocation5 + $0x7a8] sm:$0xff] }
 0x7e6   :  { %14442 = vrcp.f32 %v5417_v18 }
 0x7f0   :  { %v14443_v0 = vpop.eup %14442 }
 0x7f1   :  { %v5428_v22 = vmul.f32 %v14443_v0, %v5427_v47  ;;  %v5662_v0 = vld [vmem:[#allocation5 + $0x798] sm:$0xff] }
 0x7f3   :  { %v5429_v2 = vadd.f32 %v5428_v22, %v17464_v32  ;;  %v5661_v32 = vld [vmem:[#allocation5 + $0x790] sm:$0xff] }
 0x7f4   :  { %v5335_v54 = vpop.f32.mrb[20].mxu0  ;;  %v16257_v14 = vpop.f32.mrb[60].mxu1 }
 0x7f5   :  { %14444 = vtanh.f32 %v5429_v2  ;;  %v14235_v16 = vadd.f32 %v5335_v54, %v17409_v37  ;;  %v5337_v12 = vpop.f32.mrb[21].mxu0  ;;  %v11005_v56 = vpop.f32.mrb[61].mxu1  ;;  %v5669_v2 = vld [vmem:[#allocation5 + $0x7d0] sm:$0xff]  ;;  %v16262_v37 = vpack.c.bf16 %v5662_v0, %v5659_v61  ;;  %v5676_v0 = vld [vmem:[#allocation5 + $0x808] sm:$0xff] }
 0x7f6   :  { %14446 = vrcp.f32 %v5424_v8  ;;  %v14236_v57 = vadd.f32 %v5337_v12, %v17410_v34  ;;  %v16264_v8 = vpack.c.bf16 %v5664_v58, %v5661_v32  ;;  %v5667_v34 = vld [vmem:[#allocation5 + $0x7c0] sm:$0xff]  ;;  %v5678_v32 = vld [vmem:[#allocation5 + $0x818] sm:$0xff]  ;;  %v5681_v58 = vld [vmem:[#allocation5 + $0x830] sm:$0xff] }
 0x7f7   :  { %v9323_v29 = vmul.f32 -1.442695, %v14235_v16  ;;  %v5665_v16 = vld [vmem:[#allocation5 + $0x7b0] sm:$0xff] }
 0x7f8   :  { %v9324_v48 = vmul.f32 -1.442695, %v14236_v57  ;;  %17465 = vst [vmem:[#allocation77_spill] sm:$0xff] %v16264_v8  ;;  %v5675_v57 = vld [vmem:[#allocation5 + $0x800] sm:$0xff] }
 0x7f9   :  { %14448 = vpow2.f32 %v9323_v29  ;;  %v16268_v29 = vpack.c.bf16 %v5669_v2, %v5666_v9  ;;  %v5671_v9 = vld [vmem:[#allocation5 + $0x7e0] sm:$0xff]  ;;  %v5680_v2 = vld [vmem:[#allocation5 + $0x828] sm:$0xff] }
 0x7fa   :  { %14450 = vpow2.f32 %v9324_v48  ;;  %v16280_v48 = vpack.c.bf16 %v5675_v57, %v5672_v38  ;;  %v5677_v38 = vld [vmem:[#allocation5 + $0x810] sm:$0xff] }
 0x7fb   :  { %17466 = vst [vmem:[#allocation75_spill] sm:$0xff] %v16268_v29 }
 0x7fc   :  { %17469 = vst [vmem:[#allocation22_spill] sm:$0xff] %v16280_v48 }
 0x7ff   :  { %v14445_v18 = vpop.eup %14444 }
 0x800   :  { %v5431_v47 = vsub.f32 %v15939_v26, %v14445_v18  ;;  %v14447_v22 = vpop.eup %14446  ;;  %v5668_v26 = vld [vmem:[#allocation5 + $0x7c8] sm:$0xff] }
 0x801   :  { %v16274_v61 = vpack.c.bf16 %v5668_v26, %v5665_v16  ;;  %v5682_v16 = vld [vmem:[#allocation5 + $0x838] sm:$0xff]  ;;  %v5687_v26 = vld [vmem:[#allocation5 + $0x860] sm:$0xff] }
 0x802   :  { %v5432_v44 = vmul.f32 %v14447_v22, %v5431_v47  ;;  %v5673_v47 = vld [vmem:[#allocation5 + $0x7f0] sm:$0xff]  ;;  %v16293_v22 = vpack.c.bf16 %v5681_v58, %v5678_v32 }
 0x803   :  { %v14449_v54 = vpop.eup %14448  ;;  %17467 = vst [vmem:[#allocation76_spill] sm:$0xff] %v16274_v61 }
 0x804   :  { %v5441_v56 = vadd.f32 1.0, %v14449_v54  ;;  %v16266_v12 = vadd.f32 %v14445_v18, %v5432_v44  ;;  %v16276_v44 = vpack.c.bf16 %v5670_v59, %v5667_v34  ;;  %v5674_v18 = vld [vmem:[#allocation5 + $0x7f8] sm:$0xff]  ;;  %v16289_v59 = vpack.c.bf16 %v5676_v0, %v5673_v47  ;;  %v5679_v54 = vld [vmem:[#allocation5 + $0x820] sm:$0xff]  ;;  %v14451_v57 = vpop.eup %14450 }
 0x805   :  { %v16287_v34 = vpack.c.bf16 %v5674_v18, %v5671_v9  ;;  %v16301_v18 = vpack.c.bf16 %v5680_v2, %v5677_v38  ;;  %v16303_v47 = vpack.c.bf16 %v5682_v16, %v5679_v54  ;;  %v5683_v0 = vld [vmem:[#allocation5 + $0x840] sm:$0xff]  ;;  %v5448_v38 = vadd.f32 1.0, %v14451_v57  ;;  %v5689_v16 = vld [vmem:[#allocation5 + $0x870] sm:$0xff] }
 0x806   :  { %14452 = vrcp.f32 %v5441_v56  ;;  %5574 = vmatmul.mubr.f32.vlgmr.msra.gmra.mrb[44].mxu0 %v16266_v12  ;;  %11039 = vmatmul.mubr.f32.vlgmr.msra.gmra.mrb[62].mxu1 %v16266_v12  ;;  %17468 = vst [vmem:[#allocation79_spill] sm:$0xff] %v16276_v44  ;;  %17471 = vst [vmem:[#allocation20_spill] sm:$0xff] %v16289_v59  ;;  %v5684_v56 = vld [vmem:[#allocation5 + $0x848] sm:$0xff]  ;;  %v5699_v57 = vld [vmem:[#allocation5 + $0x8c0] sm:$0xff] }
 0x807   :  { %13146 = vmatpush1.bf16.msra.mxu0 %v16262_v37  ;;  %13177 = vmatpush3.bf16.msra.mxu1 %v16264_v8  ;;  %17470 = vst [vmem:[#allocation78_spill] sm:$0xff] %v16287_v34  ;;  %v16307_v58 = vpack.c.bf16 %v5687_v26, %v5684_v56  ;;  %v17473_v8 = vld [vmem:[#allocation21_spill] sm:$0xff]  ;;  %v5692_v26 = vld [vmem:[#allocation5 + $0x888] sm:$0xff] }
 0x808   :  { %13148 = vmatprep.subr.bf16.mxu0 %v16268_v29  ;;  %13178 = vmatprep.subr.bf16.mxu1 %v17225_v19  ;;  %v5688_v29 = vld [vmem:[#allocation5 + $0x868] sm:$0xff] }
 0x809   :  { %5771 = vmatprep.mubr.f32.mxu0 %v17208_v21  ;;  %11073 = vmatprep.mubr.msk.f32.mxu1 %vm14652_vm0, %v17208_v21 }
 0x80b   :  { %13150 = vmatpush1.bf16.msra.mxu0 %v16274_v61  ;;  %13180 = vmatpush3.bf16.msra.mxu1 %v16276_v44  ;;  %v16295_v61 = vld [vmem:[#allocation7 + $0x5] ss:$0 sm:$0xff]  ;;  %v5685_v44 = vld [vmem:[#allocation5 + $0x850] sm:$0xff] }
 0x80c   :  { %13152 = vmatprep.subr.bf16.mxu0 %v16280_v48  ;;  %13181 = vmatprep.subr.bf16.mxu1 %v17225_v19  ;;  %17472 = vst [vmem:[#allocation80_spill] sm:$0xff] %v16295_v61  ;;  %v5451_v9 = vadd.f32 %v16295_v61, %v16257_v14  ;;  %v5686_v48 = vld [vmem:[#allocation5 + $0x858] sm:$0xff]  ;;  %v16314_v54 = vpack.c.bf16 %v5688_v29, %v5685_v44 }
 0x80d   :  { %v5690_v61 = vld [vmem:[#allocation5 + $0x878] sm:$0xff]  ;;  %v16312_v2 = vpack.c.bf16 %v5686_v48, %v5683_v0  ;;  %v16322_v29 = vpack.c.bf16 %v5692_v26, %v5689_v16  ;;  %v5695_v48 = vld [vmem:[#allocation5 + $0x8a0] sm:$0xff]  ;;  %v5700_v0 = vld [vmem:[#allocation5 + $0x8c8] sm:$0xff] }
 0x80e   :  { %17474 = vst [vmem:[#allocation12_spill] sm:$0xff] %v16314_v54 }
 0x80f   :  { %13154 = vmatpush1.bf16.msra.mxu0 %v16287_v34  ;;  %13183 = vmatpush3.bf16.msra.mxu1 %v16289_v59  ;;  %v5693_v34 = vld [vmem:[#allocation5 + $0x890] sm:$0xff] }
 0x810   :  { %v14453_v32 = vpop.eup %14452  ;;  %13156 = vmatprep.subr.bf16.mxu0 %v16293_v22  ;;  %13184 = vmatprep.subr.bf16.mxu1 %v17225_v19  ;;  %v16318_v56 = vpack.c.bf16 %v5693_v34, %v5690_v61  ;;  %v5698_v34 = vld [vmem:[#allocation5 + $0x8b8] sm:$0xff] }
 0x811   :  { %v5452_v14 = vmul.f32 %v14453_v32, %v5451_v9  ;;  %v5691_v9 = vld [vmem:[#allocation5 + $0x880] sm:$0xff]  ;;  %v5694_v32 = vld [vmem:[#allocation5 + $0x898] sm:$0xff]  ;;  %v16332_v16 = vpack.c.bf16 %v5698_v34, %v5695_v48 }
 0x812   :  { %17475 = vst [vmem:[#allocation23_spill] sm:$0xff] %v16318_v56  ;;  %v16324_v44 = vpack.c.bf16 %v5694_v32, %v5691_v9  ;;  %v5701_v9 = vld [vmem:[#allocation5 + $0x8d0] sm:$0xff] }
 0x813   :  { %v5453_v59 = vadd.f32 %v5452_v14, %v17473_v8  ;;  %13158 = vmatpush1.bf16.msra.mxu0 %v16301_v18  ;;  %13186 = vmatpush3.bf16.msra.mxu1 %v16303_v47  ;;  %v5696_v8 = vld [vmem:[#allocation5 + $0x8a8] sm:$0xff]  ;;  %v5702_v14 = vld [vmem:[#allocation5 + $0x8d8] sm:$0xff] }
 0x814   :  { %13160 = vmatprep.subr.bf16.mxu0 %v16307_v58  ;;  %13187 = vmatprep.subr.bf16.mxu1 %v17225_v19  ;;  %17476 = vst [vmem:[#allocation14_spill] sm:$0xff] %v16324_v44  ;;  %v16328_v61 = vpack.c.bf16 %v5699_v57, %v5696_v8  ;;  %v5704_v8 = vld [vmem:[#allocation5 + $0x8e8] sm:$0xff]  ;;  %v5703_v57 = vld [vmem:[#allocation5 + $0x8e0] sm:$0xff] }
 0x815   :  { %14454 = vtanh.f32 %v5453_v59  ;;  %v5697_v59 = vld [vmem:[#allocation5 + $0x8b0] sm:$0xff] }
 0x816   :  { %14456 = vrcp.f32 %v5448_v38  ;;  %v5705_v38 = vld [vmem:[#allocation5 + $0x8f0] sm:$0xff]  ;;  %v16334_v26 = vpack.c.bf16 %v5700_v0, %v5697_v59 }
 0x817   :  { %13162 = vmatpush1.bf16.msra.mxu0 %v16312_v2  ;;  %13189 = vmatpush3.bf16.msra.mxu1 %v16314_v54  ;;  %v16338_v32 = vpack.c.bf16 %v5705_v38, %v5702_v14 }
 0x818   :  { %13164 = vmatprep.subr.bf16.mxu0 %v16318_v56  ;;  %13190 = vmatprep.subr.bf16.mxu1 %v17225_v19  ;;  %v5706_v56 = vld [vmem:[#allocation5 + $0x8f8] sm:$0xff] }
 0x819   :  { %v16344_v48 = vpack.c.bf16 %v5706_v56, %v5703_v57 }
 0x81b   :  { %13166 = vmatpush1.bf16.msra.mxu0 %v16322_v29  ;;  %13192 = vmatpush3.bf16.msra.mxu1 %v16324_v44  ;;  %v16342_v44 = vpack.c.bf16 %v5704_v8, %v5701_v9  ;;  %v17515_v8 = vld [vmem:[#allocation13_spill] sm:$0xff] }
 0x81c   :  { %13168 = vmatprep.subr.bf16.mxu0 %v16328_v61  ;;  %13193 = vmatprep.subr.bf16.mxu1 %v17225_v19 }
 0x81f   :  { %v14455_v54 = vpop.eup %14454  ;;  %13170 = vmatpush1.bf16.msra.mxu0 %v16332_v16  ;;  %13195 = vmatpush3.bf16.msra.mxu1 %v16334_v26 }
 0x820   :  { %13172 = vmatprep.subr.bf16.mxu0 %v16338_v32  ;;  %13196 = vmatprep.subr.bf16.mxu1 %v17225_v19  ;;  %v5455_v34 = vsub.f32 %v15987_v15, %v14455_v54  ;;  %v14457_v59 = vpop.eup %14456  ;;  %v17480_v15 = vld [vmem:[#allocation35_spill] sm:$0xff] }
 0x822   :  { %v5456_v0 = vmul.f32 %v14457_v59, %v5455_v34 }
 0x823   :  { %13174 = vmatpush1.bf16.msra.mxu0 %v16342_v44  ;;  %13198 = vmatpush3.bf16.msra.mxu1 %v16344_v48 }
 0x824   :  { %13200 = vmatprep.subr.bf16.mxu0 %v15976_v46  ;;  %13231 = vmatprep.subr.bf16.mxu1 %v17225_v19  ;;  %v16353_v14 = vadd.f32 %v14455_v54, %v5456_v0  ;;  %v17477_v46 = vld [vmem:[#allocation32_spill] sm:$0xff] }
 0x826   :  { %5772 = vmatmul.mubr.f32.vlgmr.msra.gmra.mrb[42].mxu0 %v16353_v14  ;;  %11074 = vmatmul.mubr.f32.vlgmr.msra.gmra.mrb[64].mxu1 %v16353_v14 }
 0x827   :  { %13202 = vmatpush1.bf16.msra.mxu0 %v15981_v1  ;;  %13233 = vmatpush3.bf16.msra.mxu1 %v15983_v62  ;;  %v17478_v1 = vld [vmem:[#allocation33_spill] sm:$0xff]  ;;  %v17479_v62 = vld [vmem:[#allocation34_spill] sm:$0xff] }
 0x828   :  { %13204 = vmatprep.subr.bf16.mxu0 %v15989_v10  ;;  %13234 = vmatprep.subr.bf16.mxu1 %v17225_v19  ;;  %v17481_v10 = vld [vmem:[#allocation36_spill] sm:$0xff] }
 0x829   :  { %5966 = vmatprep.mubr.f32.mxu0 %v17208_v21  ;;  %11108 = vmatprep.mubr.msk.f32.mxu1 %vm14652_vm0, %v17208_v21 }
 0x82b   :  { %13206 = vmatpush1.bf16.msra.mxu0 %v15995_v20  ;;  %13236 = vmatpush3.bf16.msra.mxu1 %v15997_v25  ;;  %v17482_v20 = vld [vmem:[#allocation37_spill] sm:$0xff]  ;;  %v17483_v25 = vld [vmem:[#allocation38_spill] sm:$0xff] }
 0x82c   :  { %13208 = vmatprep.subr.bf16.mxu0 %v16001_v7  ;;  %13237 = vmatprep.subr.bf16.mxu1 %v17225_v19  ;;  %v17484_v7 = vld [vmem:[#allocation39_spill] sm:$0xff] }
 0x82f   :  { %13210 = vmatpush1.bf16.msra.mxu0 %v16008_v51  ;;  %13239 = vmatpush3.bf16.msra.mxu1 %v16010_v52  ;;  %v17485_v51 = vld [vmem:[#allocation40_spill] sm:$0xff]  ;;  %v17486_v52 = vld [vmem:[#allocation41_spill] sm:$0xff] }
 0x830   :  { %13212 = vmatprep.subr.bf16.mxu0 %v16014_v5  ;;  %13240 = vmatprep.subr.bf16.mxu1 %v17225_v19  ;;  %v17487_v5 = vld [vmem:[#allocation42_spill] sm:$0xff] }
 0x833   :  { %13214 = vmatpush1.bf16.msra.mxu0 %v16018_v49  ;;  %13242 = vmatpush3.bf16.msra.mxu1 %v16020_v24  ;;  %v17488_v49 = vld [vmem:[#allocation43_spill] sm:$0xff]  ;;  %v17489_v24 = vld [vmem:[#allocation44_spill] sm:$0xff] }
 0x834   :  { %13216 = vmatprep.subr.bf16.mxu0 %v16024_v31  ;;  %13243 = vmatprep.subr.bf16.mxu1 %v17225_v19  ;;  %v17490_v31 = vld [vmem:[#allocation45_spill] sm:$0xff] }
 0x837   :  { %13218 = vmatpush1.bf16.msra.mxu0 %v16028_v55  ;;  %13245 = vmatpush3.bf16.msra.mxu1 %v16030_v63  ;;  %v17491_v55 = vld [vmem:[#allocation46_spill] sm:$0xff]  ;;  %v17492_v63 = vld [vmem:[#allocation47_spill] sm:$0xff] }
 0x838   :  { %13220 = vmatprep.subr.bf16.mxu0 %v16034_v3  ;;  %13246 = vmatprep.subr.bf16.mxu1 %v17225_v19  ;;  %v17493_v3 = vld [vmem:[#allocation48_spill] sm:$0xff] }
 0x83b   :  { %13222 = vmatpush1.bf16.msra.mxu0 %v16038_v36  ;;  %13248 = vmatpush3.bf16.msra.mxu1 %v16040_v41  ;;  %v17494_v36 = vld [vmem:[#allocation49_spill] sm:$0xff]  ;;  %v17495_v41 = vld [vmem:[#allocation50_spill] sm:$0xff] }
 0x83c   :  { %13224 = vmatprep.subr.bf16.mxu0 %v16044_v4  ;;  %13249 = vmatprep.subr.bf16.mxu1 %v17225_v19  ;;  %v17496_v4 = vld [vmem:[#allocation51_spill] sm:$0xff] }
 0x83f   :  { %13226 = vmatpush1.bf16.msra.mxu0 %v16048_v27  ;;  %13251 = vmatpush3.bf16.msra.mxu1 %v16050_v33  ;;  %v17497_v27 = vld [vmem:[#allocation52_spill] sm:$0xff]  ;;  %v17498_v33 = vld [vmem:[#allocation53_spill] sm:$0xff] }
 0x840   :  { %13228 = vmatprep.subr.bf16.mxu0 %v16054_v42  ;;  %13252 = vmatprep.subr.bf16.mxu1 %v17225_v19  ;;  %v17499_v42 = vld [vmem:[#allocation54_spill] sm:$0xff] }
 0x843   :  { %13230 = vmatpush1.bf16.msra.mxu0 %v16058_v39  ;;  %13254 = vmatpush3.bf16.msra.mxu1 %v16060_v50  ;;  %v17500_v39 = vld [vmem:[#allocation56_spill] sm:$0xff]  ;;  %v17501_v50 = vld [vmem:[#allocation57_spill] sm:$0xff] }
 0x844   :  { %13256 = vmatprep.subr.bf16.mxu0 %v16064_v40  ;;  %13287 = vmatprep.subr.bf16.mxu1 %v17225_v19  ;;  %v17502_v40 = vld [vmem:[#allocation58_spill] sm:$0xff] }
 0x846   :  { %5967 = vmatmul.mubr.f32.vlgmr.msra.gmra.mrb[12].mxu0 %v16266_v12  ;;  %11109 = vmatmul.mubr.f32.vlgmr.msra.gmra.mrb[66].mxu1 %v16266_v12 }
 0x847   :  { %13258 = vmatpush1.bf16.msra.mxu0 %v16068_v35  ;;  %13289 = vmatpush3.bf16.msra.mxu1 %v16070_v6  ;;  %v17503_v35 = vld [vmem:[#allocation59_spill] sm:$0xff]  ;;  %v17504_v6 = vld [vmem:[#allocation60_spill] sm:$0xff] }
 0x848   :  { %13260 = vmatprep.subr.bf16.mxu0 %v16074_v23  ;;  %13290 = vmatprep.subr.bf16.mxu1 %v17225_v19  ;;  %v17505_v23 = vld [vmem:[#allocation61_spill] sm:$0xff] }
 0x849   :  { %6155 = vmatprep.mubr.f32.mxu0 %v17208_v21  ;;  %11143 = vmatprep.mubr.msk.f32.mxu1 %vm14652_vm0, %v17208_v21 }
 0x84b   :  { %13262 = vmatpush1.bf16.msra.mxu0 %v16080_v45  ;;  %13292 = vmatpush3.bf16.msra.mxu1 %v16082_v28  ;;  %v17506_v45 = vld [vmem:[#allocation62_spill] sm:$0xff]  ;;  %v17507_v28 = vld [vmem:[#allocation63_spill] sm:$0xff] }
 0x84c   :  { %13264 = vmatprep.subr.bf16.mxu0 %v16086_v60  ;;  %13293 = vmatprep.subr.bf16.mxu1 %v17225_v19  ;;  %v17508_v60 = vld [vmem:[#allocation64_spill] sm:$0xff] }
 0x84f   :  { %13266 = vmatpush1.bf16.msra.mxu0 %v16093_v11  ;;  %13295 = vmatpush3.bf16.msra.mxu1 %v16095_v30  ;;  %v17509_v11 = vld [vmem:[#allocation65_spill] sm:$0xff]  ;;  %v17510_v30 = vld [vmem:[#allocation66_spill] sm:$0xff] }
 0x850   :  { %13268 = vmatprep.subr.bf16.mxu0 %v16099_v53  ;;  %13296 = vmatprep.subr.bf16.mxu1 %v17225_v19  ;;  %v17511_v53 = vld [vmem:[#allocation67_spill] sm:$0xff] }
 0x853   :  { %13270 = vmatpush1.bf16.msra.mxu0 %v16103_v17  ;;  %13298 = vmatpush3.bf16.msra.mxu1 %v16105_v13  ;;  %v17512_v17 = vld [vmem:[#allocation70_spill] sm:$0xff]  ;;  %v17513_v13 = vld [vmem:[#allocation72_spill] sm:$0xff] }
 0x854   :  { %13272 = vmatprep.subr.bf16.mxu0 %v17477_v46  ;;  %13299 = vmatprep.subr.bf16.mxu1 %v17225_v19  ;;  %v3186_v57 = vadd.f32 %v17515_v8, %v17513_v13  ;;  %v17526_v8 = vld [vmem:[#allocation22_spill] sm:$0xff] }
 0x857   :  { %13274 = vmatpush1.bf16.msra.mxu0 %v16113_v43  ;;  %13301 = vmatpush3.bf16.msra.mxu1 %v17478_v1  ;;  %v17514_v43 = vld [vmem:[#allocation71_spill] sm:$0xff] }
 0x858   :  { %13276 = vmatprep.subr.bf16.mxu0 %v17479_v62  ;;  %13302 = vmatprep.subr.bf16.mxu1 %v17225_v19  ;;  %v3384_v54 = vadd.f32 %v17514_v43, %v17513_v13  ;;  %v17516_v62 = vld [vmem:[#allocation25_spill] sm:$0xff] }
 0x85b   :  { %13278 = vmatpush1.bf16.msra.mxu0 %v17480_v15  ;;  %13304 = vmatpush3.bf16.msra.mxu1 %v17481_v10 }
 0x85c   :  { %13280 = vmatprep.subr.bf16.mxu0 %v17482_v20  ;;  %13305 = vmatprep.subr.bf16.mxu1 %v17225_v19 }
 0x85f   :  { %13282 = vmatpush1.bf16.msra.mxu0 %v17483_v25  ;;  %13307 = vmatpush3.bf16.msra.mxu1 %v17484_v7  ;;  %v17517_v7 = vld [vmem:[#allocation27_spill] sm:$0xff] }
 0x860   :  { %13284 = vmatprep.subr.bf16.mxu0 %v17485_v51  ;;  %13308 = vmatprep.subr.bf16.mxu1 %v17225_v19 }
 0x863   :  { %13286 = vmatpush1.bf16.msra.mxu0 %v17486_v52  ;;  %13310 = vmatpush3.bf16.msra.mxu1 %v17487_v5 }
 0x864   :  { %13312 = vmatprep.subr.bf16.mxu0 %v17488_v49  ;;  %13343 = vmatprep.subr.bf16.mxu1 %v17225_v19 }
 0x866   :  { %6156 = vmatmul.mubr.f32.vlgmr.msra.gmra.mrb[18].mxu0 %v16353_v14  ;;  %11144 = vmatmul.mubr.f32.vlgmr.msra.gmra.mrb[68].mxu1 %v16353_v14 }
 0x867   :  { %13314 = vmatpush1.bf16.msra.mxu0 %v17489_v24  ;;  %13345 = vmatpush3.bf16.msra.mxu1 %v17490_v31  ;;  %v17518_v31 = vld [vmem:[#allocation74_spill] sm:$0xff] }
 0x868   :  { %13316 = vmatprep.subr.bf16.mxu0 %v17491_v55  ;;  %13346 = vmatprep.subr.bf16.mxu1 %v17225_v19 }
 0x869   :  { %6395 = vmatprep.mubr.f32.mxu0 %v17208_v21  ;;  %11178 = vmatprep.mubr.msk.f32.mxu1 %vm14652_vm0, %v17208_v21 }
 0x86b   :  { %13318 = vmatpush1.bf16.msra.mxu0 %v17492_v63  ;;  %13348 = vmatpush3.bf16.msra.mxu1 %v17493_v3 }
 0x86c   :  { %13320 = vmatprep.subr.bf16.mxu0 %v17494_v36  ;;  %13349 = vmatprep.subr.bf16.mxu1 %v17225_v19  ;;  %v17519_v36 = vld [vmem:[#allocation17_spill] sm:$0xff] }
 0x86f   :  { %13322 = vmatpush1.bf16.msra.mxu0 %v17495_v41  ;;  %13351 = vmatpush3.bf16.msra.mxu1 %v17496_v4 }
 0x870   :  { %13324 = vmatprep.subr.bf16.mxu0 %v17497_v27  ;;  %13352 = vmatprep.subr.bf16.mxu1 %v17225_v19 }
 0x873   :  { %13326 = vmatpush1.bf16.msra.mxu0 %v17498_v33  ;;  %13354 = vmatpush3.bf16.msra.mxu1 %v17499_v42  ;;  %v17520_v42 = vld [vmem:[#allocation28_spill] sm:$0xff] }
 0x874   :  { %13328 = vmatprep.subr.bf16.mxu0 %v17500_v39  ;;  %13355 = vmatprep.subr.bf16.mxu1 %v17225_v19 }
 0x877   :  { %13330 = vmatpush1.bf16.msra.mxu0 %v17501_v50  ;;  %13357 = vmatpush3.bf16.msra.mxu1 %v17502_v40 }
 0x878   :  { %13332 = vmatprep.subr.bf16.mxu0 %v17503_v35  ;;  %13358 = vmatprep.subr.bf16.mxu1 %v17225_v19 }
 0x87b   :  { %13334 = vmatpush1.bf16.msra.mxu0 %v17504_v6  ;;  %13360 = vmatpush3.bf16.msra.mxu1 %v17505_v23  ;;  %v17521_v6 = vld [vmem:[#allocation29_spill] sm:$0xff] }
 0x87c   :  { %13336 = vmatprep.subr.bf16.mxu0 %v17506_v45  ;;  %13361 = vmatprep.subr.bf16.mxu1 %v17225_v19 }
 0x87f   :  { %13338 = vmatpush1.bf16.msra.mxu0 %v17507_v28  ;;  %13363 = vmatpush3.bf16.msra.mxu1 %v17508_v60 }
 0x880   :  { %13340 = vmatprep.subr.bf16.mxu0 %v17509_v11  ;;  %13364 = vmatprep.subr.bf16.mxu1 %v17225_v19 }
 0x883   :  { %13342 = vmatpush1.bf16.msra.mxu0 %v17510_v30  ;;  %13366 = vmatpush3.bf16.msra.mxu1 %v17511_v53 }
 0x884   :  { %13368 = vmatprep.subr.bf16.mxu0 %v17512_v17  ;;  %13399 = vmatprep.subr.bf16.mxu1 %v17225_v19 }
 0x8d9   :  { %v5646_v56 = vpop.f32.mrb[62].mxu1 }
 0x8da   :  { %v16468_v38 = vadd.f32 %v5646_v56, %v3384_v54  ;;  %v11040_v9 = vpop.f32.mrb[63].mxu1  ;;  %v17522_v54 = vld [vmem:[#allocation77_spill] sm:$0xff]  ;;  %v17523_v56 = vld [vmem:[#allocation75_spill] sm:$0xff] }
 0x8db   :  { %v17525_v9 = vld [vmem:[#allocation79_spill] sm:$0xff] }
 0x8f9   :  { %v5844_v34 = vpop.f32.mrb[64].mxu1 }
 0x8fa   :  { %v16472_v59 = vadd.f32 %v5844_v34, %v3186_v57  ;;  %v11075_v0 = vpop.f32.mrb[65].mxu1  ;;  %v17527_v57 = vld [vmem:[#allocation80_spill] sm:$0xff] }
 0x8fb   :  { %v17528_v0 = vld [vmem:[#allocation78_spill] sm:$0xff] }
 0x919   :  { %v5968_v46 = vpop.f32.mrb[12].mxu0  ;;  %v6039_v1 = vpop.f32.mrb[66].mxu1 }
 0x91a   :  { %v14227_v15 = vadd.f32 %v5968_v46, %v17516_v62  ;;  %v5970_v10 = vpop.f32.mrb[13].mxu0  ;;  %v11110_v20 = vpop.f32.mrb[67].mxu1  ;;  %v6249_v55 = vadd.f32 %v17518_v31, %v6039_v1  ;;  %v17529_v46 = vld [vmem:[#allocation20_spill] sm:$0xff] }
 0x91b   :  { %v14228_v51 = vadd.f32 %v5970_v10, %v17517_v7  ;;  %v17530_v10 = vld [vmem:[#allocation18_spill] sm:$0xff] }
 0x91c   :  { %v9325_v25 = vmul.f32 -1.442695, %v14227_v15 }
 0x91d   :  { %v9326_v52 = vmul.f32 -1.442695, %v14228_v51  ;;  %v17531_v51 = vld [vmem:[#allocation12_spill] sm:$0xff] }
 0x91e   :  { %14458 = vpow2.f32 %v9325_v25 }
 0x91f   :  { %14460 = vpow2.f32 %v9326_v52  ;;  %v17533_v52 = vld [vmem:[#allocation14_spill] sm:$0xff] }
 0x928   :  { %v14459_v5 = vpop.eup %14458 }
 0x929   :  { %v6239_v49 = vadd.f32 1.0, %v14459_v5  ;;  %v14461_v24 = vpop.eup %14460 }
 0x92a   :  { %v6246_v4 = vadd.f32 1.0, %v14461_v24  ;;  %v6678_v24 = vld [vmem:[#allocation5 + $0x310] sm:$0xff] }
 0x92b   :  { %14462 = vrcp.f32 %v6239_v49  ;;  %v6679_v49 = vld [vmem:[#allocation5 + $0x318] sm:$0xff] }
 0x935   :  { %v14463_v63 = vpop.eup %14462 }
 0x936   :  { %v6250_v3 = vmul.f32 %v14463_v63, %v6249_v55  ;;  %v6683_v55 = vld [vmem:[#allocation5 + $0x338] sm:$0xff]  ;;  %v6686_v63 = vld [vmem:[#allocation5 + $0x350] sm:$0xff] }
 0x938   :  { %v6251_v41 = vadd.f32 %v6250_v3, %v17519_v36  ;;  %v6682_v36 = vld [vmem:[#allocation5 + $0x330] sm:$0xff] }
 0x939   :  { %v6157_v27 = vpop.f32.mrb[18].mxu0  ;;  %v6228_v33 = vpop.f32.mrb[68].mxu1 }
 0x93a   :  { %14464 = vtanh.f32 %v6251_v41  ;;  %v14233_v39 = vadd.f32 %v6157_v27, %v17520_v42  ;;  %v6159_v50 = vpop.f32.mrb[19].mxu0  ;;  %v11145_v40 = vpop.f32.mrb[69].mxu1  ;;  %v6273_v34 = vadd.f32 %v17527_v57, %v6228_v33  ;;  %v6685_v41 = vld [vmem:[#allocation5 + $0x348] sm:$0xff]  ;;  %v6687_v27 = vld [vmem:[#allocation5 + $0x358] sm:$0xff] }
 0x93b   :  { %14466 = vrcp.f32 %v6246_v4  ;;  %v14234_v23 = vadd.f32 %v6159_v50, %v17521_v6  ;;  %v6684_v4 = vld [vmem:[#allocation5 + $0x340] sm:$0xff]  ;;  %v6689_v33 = vld [vmem:[#allocation5 + $0x368] sm:$0xff] }
 0x93c   :  { %v9327_v35 = vmul.f32 -1.442695, %v14233_v39  ;;  %v6692_v39 = vld [vmem:[#allocation5 + $0x380] sm:$0xff] }
 0x93d   :  { %v9328_v11 = vmul.f32 -1.442695, %v14234_v23  ;;  %v6688_v50 = vld [vmem:[#allocation5 + $0x360] sm:$0xff]  ;;  %v13431_v40 = vpack.c.bf16 %v6692_v39, %v6689_v33  ;;  %v6690_v23 = vld [vmem:[#allocation5 + $0x370] sm:$0xff]  ;;  %v6723_v33 = vld [vmem:[#allocation5 + $0x478] sm:$0xff] }
 0x93e   :  { %14468 = vpow2.f32 %v9327_v35  ;;  %v6691_v35 = vld [vmem:[#allocation5 + $0x378] sm:$0xff]  ;;  %v6866_v39 = vld [vmem:[#allocation5 + $0x488] sm:$0xff] }
 0x93f   :  { %14470 = vpow2.f32 %v9328_v11  ;;  %v13433_v11 = vpack.c.bf16 %v6691_v35, %v6688_v50 }
 0x944   :  { %v14465_v45 = vpop.eup %14464 }
 0x945   :  { %v6253_v28 = vsub.f32 %v16266_v12, %v14465_v45  ;;  %v14467_v60 = vpop.eup %14466  ;;  %v17524_v12 = vld [vmem:[#allocation76_spill] sm:$0xff] }
 0x947   :  { %v6254_v30 = vmul.f32 %v14467_v60, %v6253_v28  ;;  %v6695_v28 = vld [vmem:[#allocation5 + $0x398] sm:$0xff]  ;;  %v6698_v60 = vld [vmem:[#allocation5 + $0x3b0] sm:$0xff] }
 0x948   :  { %v14469_v53 = vpop.eup %14468 }
 0x949   :  { %v6263_v17 = vadd.f32 1.0, %v14469_v53  ;;  %v16481_v43 = vadd.f32 %v14465_v45, %v6254_v30  ;;  %v6693_v45 = vld [vmem:[#allocation5 + $0x388] sm:$0xff]  ;;  %v6694_v53 = vld [vmem:[#allocation5 + $0x390] sm:$0xff] }
 0x94a   :  { %v13462_v30 = vpack.c.bf16 %v6693_v45, %v6690_v23  ;;  %v6868_v23 = vld [vmem:[#allocation5 + $0x498] sm:$0xff]  ;;  %v6867_v45 = vld [vmem:[#allocation5 + $0x490] sm:$0xff] }
 0x94b   :  { %14472 = vrcp.f32 %v6263_v17  ;;  %6396 = vmatmul.mubr.f32.vlgmr.msra.gmra.mrb[40].mxu0 %v16481_v43  ;;  %11179 = vmatmul.mubr.f32.vlgmr.msra.gmra.mrb[70].mxu1 %v16481_v43  ;;  %v13435_v17 = vpack.c.bf16 %v6698_v60, %v6695_v28  ;;  %v6870_v28 = vld [vmem:[#allocation5 + $0x4a8] sm:$0xff]  ;;  %v6872_v60 = vld [vmem:[#allocation5 + $0x4b8] sm:$0xff] }
 0x94c   :  { %13370 = vmatpush1.bf16.msra.mxu0 %v16262_v37  ;;  %13401 = vmatpush3.bf16.msra.mxu1 %v17522_v54  ;;  %v14471_v37 = vpop.eup %14470  ;;  %v6697_v54 = vld [vmem:[#allocation5 + $0x3a8] sm:$0xff] }
 0x94d   :  { %13372 = vmatprep.subr.bf16.mxu0 %v17523_v56  ;;  %13402 = vmatprep.subr.bf16.mxu1 %v17225_v19  ;;  %v6270_v25 = vadd.f32 1.0, %v14471_v37  ;;  %v6696_v56 = vld [vmem:[#allocation5 + $0x3a0] sm:$0xff]  ;;  %v13437_v37 = vpack.c.bf16 %v6697_v54, %v6694_v53  ;;  %v13512_v53 = vpack.c.bf16 %v6870_v28, %v6867_v45  ;;  %v6904_v45 = vld [vmem:[#allocation5 + $0x5b8] sm:$0xff]  ;;  %v6903_v28 = vld [vmem:[#allocation5 + $0x5b0] sm:$0xff] }
 0x94e   :  { %6593 = vmatprep.mubr.f32.mxu0 %v17208_v21  ;;  %11213 = vmatprep.mubr.msk.f32.mxu1 %vm14652_vm0, %v17208_v21 }
 0x950   :  { %13374 = vmatpush1.bf16.msra.mxu0 %v17524_v12  ;;  %13404 = vmatpush3.bf16.msra.mxu1 %v17525_v9  ;;  %v6699_v12 = vld [vmem:[#allocation5 + $0x3b8] sm:$0xff]  ;;  %v6701_v9 = vld [vmem:[#allocation5 + $0x3c8] sm:$0xff] }
 0x951   :  { %13376 = vmatprep.subr.bf16.mxu0 %v17526_v8  ;;  %13405 = vmatprep.subr.bf16.mxu1 %v17225_v19  ;;  %v6704_v8 = vld [vmem:[#allocation5 + $0x3e0] sm:$0xff]  ;;  %v13465_v57 = vpack.c.bf16 %v6699_v12, %v6696_v56  ;;  %v6874_v56 = vld [vmem:[#allocation5 + $0x4c8] sm:$0xff] }
 0x952   :  { %v6873_v12 = vld [vmem:[#allocation5 + $0x4c0] sm:$0xff] }
 0x954   :  { %13378 = vmatpush1.bf16.msra.mxu0 %v17528_v0  ;;  %13407 = vmatpush3.bf16.msra.mxu1 %v17529_v46  ;;  %v13439_v0 = vpack.c.bf16 %v6704_v8, %v6701_v9  ;;  %v6703_v46 = vld [vmem:[#allocation5 + $0x3d8] sm:$0xff]  ;;  %v6878_v8 = vld [vmem:[#allocation5 + $0x4e8] sm:$0xff] }
 0x955   :  { %v14473_v1 = vpop.eup %14472  ;;  %13380 = vmatprep.subr.bf16.mxu0 %v16293_v22  ;;  %13408 = vmatprep.subr.bf16.mxu1 %v17225_v19  ;;  %v17532_v22 = vld [vmem:[#allocation23_spill] sm:$0xff]  ;;  %v6876_v9 = vld [vmem:[#allocation5 + $0x4d8] sm:$0xff] }
 0x956   :  { %v6274_v15 = vmul.f32 %v14473_v1, %v6273_v34  ;;  %v6700_v34 = vld [vmem:[#allocation5 + $0x3c0] sm:$0xff]  ;;  %v6702_v1 = vld [vmem:[#allocation5 + $0x3d0] sm:$0xff] }
 0x958   :  { %v6275_v20 = vadd.f32 %v6274_v15, %v17530_v10  ;;  %13382 = vmatpush1.bf16.msra.mxu0 %v16301_v18  ;;  %13410 = vmatpush3.bf16.msra.mxu1 %v16303_v47  ;;  %v6677_v18 = vld [vmem:[#allocation5 + $0x308] sm:$0xff]  ;;  %v6680_v47 = vld [vmem:[#allocation5 + $0x320] sm:$0xff]  ;;  %v6707_v10 = vld [vmem:[#allocation5 + $0x3f8] sm:$0xff] }
 0x959   :  { %13384 = vmatprep.subr.bf16.mxu0 %v16307_v58  ;;  %13411 = vmatprep.subr.bf16.mxu1 %v17225_v19  ;;  %v13423_v5 = vpack.c.bf16 %v6680_v47, %v6677_v18  ;;  %v6705_v15 = vld [vmem:[#allocation5 + $0x3e8] sm:$0xff]  ;;  %v6708_v47 = vld [vmem:[#allocation5 + $0x400] sm:$0xff] }
 0x95a   :  { %14474 = vtanh.f32 %v6275_v20  ;;  %v6710_v20 = vld [vmem:[#allocation5 + $0x410] sm:$0xff]  ;;  %v6709_v18 = vld [vmem:[#allocation5 + $0x408] sm:$0xff] }
 0x95b   :  { %14476 = vrcp.f32 %v6270_v25  ;;  %v13441_v25 = vpack.c.bf16 %v6703_v46, %v6700_v34  ;;  %v13515_v34 = vpack.c.bf16 %v6876_v9, %v6873_v12  ;;  %v6910_v12 = vld [vmem:[#allocation5 + $0x5e8] sm:$0xff]  ;;  %v6909_v9 = vld [vmem:[#allocation5 + $0x5e0] sm:$0xff] }
 0x95c   :  { %13386 = vmatpush1.bf16.msra.mxu0 %v16312_v2  ;;  %13413 = vmatpush3.bf16.msra.mxu1 %v17531_v51  ;;  %v6676_v2 = vld [vmem:[#allocation5 + $0x300] sm:$0xff]  ;;  %v13468_v51 = vpack.c.bf16 %v6705_v15, %v6702_v1  ;;  %v6880_v1 = vld [vmem:[#allocation5 + $0x4f8] sm:$0xff]  ;;  %v6879_v15 = vld [vmem:[#allocation5 + $0x4f0] sm:$0xff] }
 0x95d   :  { %13388 = vmatprep.subr.bf16.mxu0 %v17532_v22  ;;  %13414 = vmatprep.subr.bf16.mxu1 %v17225_v19  ;;  %v6706_v22 = vld [vmem:[#allocation5 + $0x3f0] sm:$0xff] }
 0x960   :  { %13390 = vmatpush1.bf16.msra.mxu0 %v16322_v29  ;;  %13416 = vmatpush3.bf16.msra.mxu1 %v17533_v52  ;;  %v13443_v52 = vpack.c.bf16 %v6710_v20, %v6707_v10  ;;  %v6882_v10 = vld [vmem:[#allocation5 + $0x508] sm:$0xff]  ;;  %v6884_v20 = vld [vmem:[#allocation5 + $0x518] sm:$0xff] }
 0x961   :  { %13392 = vmatprep.subr.bf16.mxu0 %v16328_v61  ;;  %13417 = vmatprep.subr.bf16.mxu1 %v17225_v19  ;;  %v6681_v61 = vld [vmem:[#allocation5 + $0x328] sm:$0xff] }
 0x964   :  { %v14475_v58 = vpop.eup %14474  ;;  %13394 = vmatpush1.bf16.msra.mxu0 %v16332_v16  ;;  %13419 = vmatpush3.bf16.msra.mxu1 %v16334_v26  ;;  %v13425_v16 = vpack.c.bf16 %v6679_v49, %v6676_v2  ;;  %v13456_v26 = vpack.c.bf16 %v6681_v61, %v6678_v24  ;;  %v6713_v2 = vld [vmem:[#allocation5 + $0x428] sm:$0xff]  ;;  %v6712_v24 = vld [vmem:[#allocation5 + $0x420] sm:$0xff] }
 0x965   :  { %13396 = vmatprep.subr.bf16.mxu0 %v16338_v32  ;;  %13420 = vmatprep.subr.bf16.mxu1 %v17225_v19  ;;  %v6277_v29 = vsub.f32 %v16353_v14, %v14475_v58  ;;  %v14477_v31 = vpop.eup %14476  ;;  %v13427_v14 = vpack.c.bf16 %v6686_v63, %v6683_v55  ;;  %v6714_v55 = vld [vmem:[#allocation5 + $0x430] sm:$0xff]  ;;  %v6717_v63 = vld [vmem:[#allocation5 + $0x448] sm:$0xff] }
 0x967   :  { %v6278_v3 = vmul.f32 %v14477_v31, %v6277_v29  ;;  %v13445_v29 = vpack.c.bf16 %v6709_v18, %v6706_v22  ;;  %v6715_v31 = vld [vmem:[#allocation5 + $0x438] sm:$0xff]  ;;  %v13518_v22 = vpack.c.bf16 %v6882_v10, %v6879_v15  ;;  %v7107_v10 = vld [vmem:[#allocation5 + $0x610] sm:$0xff] }
 0x968   :  { %13398 = vmatpush1.bf16.msra.mxu0 %v16342_v44  ;;  %13422 = vmatpush3.bf16.msra.mxu1 %v16344_v48  ;;  %v13429_v44 = vpack.c.bf16 %v6685_v41, %v6682_v36  ;;  %v13459_v48 = vpack.c.bf16 %v6687_v27, %v6684_v4  ;;  %v13474_v36 = vpack.c.bf16 %v6717_v63, %v6714_v55  ;;  %v6721_v4 = vld [vmem:[#allocation5 + $0x468] sm:$0xff]  ;;  %v6720_v27 = vld [vmem:[#allocation5 + $0x460] sm:$0xff]  ;;  %v6892_v55 = vld [vmem:[#allocation5 + $0x558] sm:$0xff] }
 0x969   :  { %13424 = vmatprep.subr.bf16.mxu0 %v13423_v5  ;;  %13455 = vmatprep.subr.bf16.mxu1 %v17225_v19  ;;  %v16522_v32 = vadd.f32 %v14475_v58, %v6278_v3  ;;  %v6711_v58 = vld [vmem:[#allocation5 + $0x418] sm:$0xff]  ;;  %v6716_v5 = vld [vmem:[#allocation5 + $0x440] sm:$0xff]  ;;  %v13477_v50 = vpack.c.bf16 %v6723_v33, %v6720_v27  ;;  %v6891_v63 = vld [vmem:[#allocation5 + $0x550] sm:$0xff] }
 0x96a   :  { %v13471_v49 = vpack.c.bf16 %v6711_v58, %v6708_v47  ;;  %v13447_v61 = vpack.c.bf16 %v6716_v5, %v6713_v2  ;;  %v6719_v3 = vld [vmem:[#allocation5 + $0x458] sm:$0xff]  ;;  %v6886_v47 = vld [vmem:[#allocation5 + $0x528] sm:$0xff]  ;;  %v6885_v58 = vld [vmem:[#allocation5 + $0x520] sm:$0xff] }
 0x96b   :  { %6594 = vmatmul.mubr.f32.vlgmr.msra.gmra.mrb[38].mxu0 %v16522_v32  ;;  %11214 = vmatmul.mubr.f32.vlgmr.msra.gmra.mrb[72].mxu1 %v16522_v32  ;;  %v6888_v2 = vld [vmem:[#allocation5 + $0x538] sm:$0xff]  ;;  %v6890_v5 = vld [vmem:[#allocation5 + $0x548] sm:$0xff]  ;;  %v6897_v33 = vld [vmem:[#allocation5 + $0x580] sm:$0xff] }
 0x96c   :  { %13426 = vmatpush1.bf16.msra.mxu0 %v13425_v16  ;;  %13457 = vmatpush3.bf16.msra.mxu1 %v13456_v26  ;;  %v6722_v16 = vld [vmem:[#allocation5 + $0x470] sm:$0xff]  ;;  %v13449_v26 = vpack.c.bf16 %v6715_v31, %v6712_v24  ;;  %v13521_v24 = vpack.c.bf16 %v6888_v2, %v6885_v58  ;;  %v6898_v27 = vld [vmem:[#allocation5 + $0x588] sm:$0xff]  ;;  %v7108_v15 = vld [vmem:[#allocation5 + $0x618] sm:$0xff] }
 0x96d   :  { %13428 = vmatprep.subr.bf16.mxu0 %v13427_v14  ;;  %13458 = vmatprep.subr.bf16.mxu1 %v17225_v19  ;;  %v6718_v14 = vld [vmem:[#allocation5 + $0x450] sm:$0xff]  ;;  %v13451_v41 = vpack.c.bf16 %v6722_v16, %v6719_v3  ;;  %v6894_v3 = vld [vmem:[#allocation5 + $0x568] sm:$0xff]  ;;  %v6896_v16 = vld [vmem:[#allocation5 + $0x578] sm:$0xff] }
 0x96e   :  { %6788 = vmatprep.mubr.f32.mxu0 %v17208_v21  ;;  %11248 = vmatprep.mubr.msk.f32.mxu1 %vm14652_vm0, %v17208_v21  ;;  %v7114_v58 = vld [vmem:[#allocation5 + $0x648] sm:$0xff]  ;;  %v7113_v2 = vld [vmem:[#allocation5 + $0x640] sm:$0xff] }
 0x970   :  { %13430 = vmatpush1.bf16.msra.mxu0 %v13429_v44  ;;  %13460 = vmatpush3.bf16.msra.mxu1 %v13459_v48  ;;  %v6869_v44 = vld [vmem:[#allocation5 + $0x4a0] sm:$0xff]  ;;  %v13453_v48 = vpack.c.bf16 %v6721_v4, %v6718_v14  ;;  %v13524_v14 = vpack.c.bf16 %v6894_v3, %v6891_v63  ;;  %v7120_v63 = vld [vmem:[#allocation5 + $0x678] sm:$0xff]  ;;  %v7119_v3 = vld [vmem:[#allocation5 + $0x670] sm:$0xff] }
 0x971   :  { %13432 = vmatprep.subr.bf16.mxu0 %v13431_v40  ;;  %13461 = vmatprep.subr.bf16.mxu1 %v17225_v19  ;;  %v6865_v40 = vld [vmem:[#allocation5 + $0x480] sm:$0xff]  ;;  %v13479_v35 = vpack.c.bf16 %v6869_v44, %v6866_v39  ;;  %v6900_v39 = vld [vmem:[#allocation5 + $0x598] sm:$0xff]  ;;  %v6902_v44 = vld [vmem:[#allocation5 + $0x5a8] sm:$0xff] }
 0x974   :  { %13434 = vmatpush1.bf16.msra.mxu0 %v13433_v11  ;;  %13463 = vmatpush3.bf16.msra.mxu1 %v13462_v30  ;;  %v6875_v11 = vld [vmem:[#allocation5 + $0x4d0] sm:$0xff]  ;;  %v13481_v30 = vpack.c.bf16 %v6868_v23, %v6865_v40  ;;  %v13527_v40 = vpack.c.bf16 %v6900_v39, %v6897_v33  ;;  %v7126_v33 = vld [vmem:[#allocation5 + $0x6a8] sm:$0xff]  ;;  %v7125_v39 = vld [vmem:[#allocation5 + $0x6a0] sm:$0xff] }
 0x975   :  { %13436 = vmatprep.subr.bf16.mxu0 %v13435_v17  ;;  %13464 = vmatprep.subr.bf16.mxu1 %v17225_v19  ;;  %v6871_v17 = vld [vmem:[#allocation5 + $0x4b0] sm:$0xff]  ;;  %v13483_v54 = vpack.c.bf16 %v6875_v11, %v6872_v60  ;;  %v6906_v60 = vld [vmem:[#allocation5 + $0x5c8] sm:$0xff]  ;;  %v6908_v11 = vld [vmem:[#allocation5 + $0x5d8] sm:$0xff] }
 0x978   :  { %13438 = vmatpush1.bf16.msra.mxu0 %v13437_v37  ;;  %13466 = vmatpush3.bf16.msra.mxu1 %v13465_v57  ;;  %v6881_v37 = vld [vmem:[#allocation5 + $0x500] sm:$0xff]  ;;  %v13485_v57 = vpack.c.bf16 %v6874_v56, %v6871_v17  ;;  %v13530_v17 = vpack.c.bf16 %v6906_v60, %v6903_v28  ;;  %v7132_v28 = vld [vmem:[#allocation5 + $0x6d8] sm:$0xff]  ;;  %v7131_v60 = vld [vmem:[#allocation5 + $0x6d0] sm:$0xff] }
 0x979   :  { %13440 = vmatprep.subr.bf16.mxu0 %v13439_v0  ;;  %13467 = vmatprep.subr.bf16.mxu1 %v17225_v19  ;;  %v6877_v0 = vld [vmem:[#allocation5 + $0x4e0] sm:$0xff]  ;;  %v13487_v46 = vpack.c.bf16 %v6881_v37, %v6878_v8  ;;  %v6912_v8 = vld [vmem:[#allocation5 + $0x5f8] sm:$0xff] }
 0x97c   :  { %13442 = vmatpush1.bf16.msra.mxu0 %v13441_v25  ;;  %13469 = vmatpush3.bf16.msra.mxu1 %v13468_v51  ;;  %v6887_v25 = vld [vmem:[#allocation5 + $0x530] sm:$0xff]  ;;  %v13489_v51 = vpack.c.bf16 %v6880_v1, %v6877_v0  ;;  %v7109_v0 = vld [vmem:[#allocation5 + $0x620] sm:$0xff] }
 0x97d   :  { %13444 = vmatprep.subr.bf16.mxu0 %v13443_v52  ;;  %13470 = vmatprep.subr.bf16.mxu1 %v17225_v19  ;;  %v6883_v52 = vld [vmem:[#allocation5 + $0x510] sm:$0xff]  ;;  %v13491_v18 = vpack.c.bf16 %v6887_v25, %v6884_v20  ;;  %v7105_v1 = vld [vmem:[#allocation5 + $0x600] sm:$0xff]  ;;  %v7110_v25 = vld [vmem:[#allocation5 + $0x628] sm:$0xff] }
 0x97e   :  { %v13537_v20 = vpack.c.bf16 %v7108_v15, %v7105_v1  ;;  %v7141_v15 = vld [vmem:[#allocation5 + $0x720] sm:$0xff] }
 0x980   :  { %13446 = vmatpush1.bf16.msra.mxu0 %v13445_v29  ;;  %13472 = vmatpush3.bf16.msra.mxu1 %v13471_v49  ;;  %v6893_v29 = vld [vmem:[#allocation5 + $0x560] sm:$0xff]  ;;  %v13493_v49 = vpack.c.bf16 %v6886_v47, %v6883_v52  ;;  %v7115_v52 = vld [vmem:[#allocation5 + $0x650] sm:$0xff] }
 0x981   :  { %13448 = vmatprep.subr.bf16.mxu0 %v13447_v61  ;;  %13473 = vmatprep.subr.bf16.mxu1 %v17225_v19  ;;  %v6889_v61 = vld [vmem:[#allocation5 + $0x540] sm:$0xff]  ;;  %v13495_v31 = vpack.c.bf16 %v6893_v29, %v6890_v5  ;;  %v7111_v47 = vld [vmem:[#allocation5 + $0x630] sm:$0xff]  ;;  %v7116_v29 = vld [vmem:[#allocation5 + $0x658] sm:$0xff] }
 0x982   :  { %v13541_v5 = vpack.c.bf16 %v7114_v58, %v7111_v47  ;;  %v7147_v58 = vld [vmem:[#allocation5 + $0x750] sm:$0xff] }
 0x984   :  { %13450 = vmatpush1.bf16.msra.mxu0 %v13449_v26  ;;  %13475 = vmatpush3.bf16.msra.mxu1 %v13474_v36  ;;  %v6899_v26 = vld [vmem:[#allocation5 + $0x590] sm:$0xff]  ;;  %v13497_v36 = vpack.c.bf16 %v6892_v55, %v6889_v61  ;;  %v7121_v61 = vld [vmem:[#allocation5 + $0x680] sm:$0xff] }
 0x985   :  { %13452 = vmatprep.subr.bf16.mxu0 %v13451_v41  ;;  %13476 = vmatprep.subr.bf16.mxu1 %v17225_v19  ;;  %v6895_v41 = vld [vmem:[#allocation5 + $0x570] sm:$0xff]  ;;  %v13499_v4 = vpack.c.bf16 %v6899_v26, %v6896_v16  ;;  %v7117_v55 = vld [vmem:[#allocation5 + $0x660] sm:$0xff]  ;;  %v7122_v26 = vld [vmem:[#allocation5 + $0x688] sm:$0xff] }
 0x986   :  { %v13545_v16 = vpack.c.bf16 %v7120_v63, %v7117_v55  ;;  %v17534_v63 = vld [vmem:[#allocation31_spill] sm:$0xff] }
 0x988   :  { %13454 = vmatpush1.bf16.msra.mxu0 %v13453_v48  ;;  %13478 = vmatpush3.bf16.msra.mxu1 %v13477_v50  ;;  %v6905_v48 = vld [vmem:[#allocation5 + $0x5c0] sm:$0xff]  ;;  %v13501_v50 = vpack.c.bf16 %v6898_v27, %v6895_v41  ;;  %v7127_v41 = vld [vmem:[#allocation5 + $0x6b0] sm:$0xff] }
 0x989   :  { %13480 = vmatprep.subr.bf16.mxu0 %v13479_v35  ;;  %13511 = vmatprep.subr.bf16.mxu1 %v17225_v19  ;;  %v6901_v35 = vld [vmem:[#allocation5 + $0x5a0] sm:$0xff]  ;;  %v13503_v23 = vpack.c.bf16 %v6905_v48, %v6902_v44  ;;  %v7123_v27 = vld [vmem:[#allocation5 + $0x690] sm:$0xff]  ;;  %v7128_v48 = vld [vmem:[#allocation5 + $0x6b8] sm:$0xff] }
 0x98a   :  { %v13549_v44 = vpack.c.bf16 %v7126_v33, %v7123_v27 }
 0x98b   :  { %6789 = vmatmul.mubr.f32.vlgmr.msra.gmra.mrb[14].mxu0 %v16481_v43  ;;  %11249 = vmatmul.mubr.f32.vlgmr.msra.gmra.mrb[74].mxu1 %v16481_v43 }
 0x98c   :  { %13482 = vmatpush1.bf16.msra.mxu0 %v13481_v30  ;;  %13513 = vmatpush3.bf16.msra.mxu1 %v13512_v53  ;;  %v6911_v30 = vld [vmem:[#allocation5 + $0x5f0] sm:$0xff]  ;;  %v13505_v53 = vpack.c.bf16 %v6904_v45, %v6901_v35  ;;  %v7133_v35 = vld [vmem:[#allocation5 + $0x6e0] sm:$0xff] }
 0x98d   :  { %13484 = vmatprep.subr.bf16.mxu0 %v13483_v54  ;;  %13514 = vmatprep.subr.bf16.mxu1 %v17225_v19  ;;  %v6907_v54 = vld [vmem:[#allocation5 + $0x5d0] sm:$0xff]  ;;  %v13507_v56 = vpack.c.bf16 %v6911_v30, %v6908_v11  ;;  %v7129_v45 = vld [vmem:[#allocation5 + $0x6c0] sm:$0xff]  ;;  %v7134_v30 = vld [vmem:[#allocation5 + $0x6e8] sm:$0xff] }
 0x98e   :  { %6977 = vmatprep.mubr.f32.mxu0 %v17208_v21  ;;  %11283 = vmatprep.mubr.msk.f32.mxu1 %vm14652_vm0, %v17208_v21  ;;  %v13509_v37 = vpack.c.bf16 %v6910_v12, %v6907_v54  ;;  %v13553_v11 = vpack.c.bf16 %v7132_v28, %v7129_v45  ;;  %v7139_v54 = vld [vmem:[#allocation5 + $0x710] sm:$0xff] }
 0x98f   :  { %v7135_v12 = vld [vmem:[#allocation5 + $0x6f0] sm:$0xff] }
 0x990   :  { %13486 = vmatpush1.bf16.msra.mxu0 %v13485_v57  ;;  %13516 = vmatpush3.bf16.msra.mxu1 %v13515_v34  ;;  %v13533_v57 = vpack.c.bf16 %v6912_v8, %v6909_v9  ;;  %v7106_v34 = vld [vmem:[#allocation5 + $0x608] sm:$0xff]  ;;  %v7137_v8 = vld [vmem:[#allocation5 + $0x700] sm:$0xff] }
 0x991   :  { %13488 = vmatprep.subr.bf16.mxu0 %v13487_v46  ;;  %13517 = vmatprep.subr.bf16.mxu1 %v17225_v19  ;;  %v13535_v46 = vpack.c.bf16 %v7109_v0, %v7106_v34  ;;  %v7138_v9 = vld [vmem:[#allocation5 + $0x708] sm:$0xff] }
 0x992   :  { %v7142_v0 = vld [vmem:[#allocation5 + $0x728] sm:$0xff] }
 0x994   :  { %13490 = vmatpush1.bf16.msra.mxu0 %v13489_v51  ;;  %13519 = vmatpush3.bf16.msra.mxu1 %v13518_v22  ;;  %v13568_v51 = vpack.c.bf16 %v7110_v25, %v7107_v10  ;;  %v7112_v22 = vld [vmem:[#allocation5 + $0x638] sm:$0xff] }
 0x995   :  { %13492 = vmatprep.subr.bf16.mxu0 %v13491_v18  ;;  %13520 = vmatprep.subr.bf16.mxu1 %v17225_v19  ;;  %v13539_v18 = vpack.c.bf16 %v7115_v52, %v7112_v22  ;;  %v7144_v10 = vld [vmem:[#allocation5 + $0x738] sm:$0xff] }
 0x996   :  { %v13561_v25 = vpack.c.bf16 %v7144_v10, %v7141_v15  ;;  %v7148_v52 = vld [vmem:[#allocation5 + $0x758] sm:$0xff] }
 0x997   :  { %v7306_v10 = vld [vmem:[#allocation5 + $0x798] sm:$0xff] }
 0x998   :  { %13494 = vmatpush1.bf16.msra.mxu0 %v13493_v49  ;;  %13522 = vmatpush3.bf16.msra.mxu1 %v13521_v24  ;;  %v13571_v49 = vpack.c.bf16 %v7116_v29, %v7113_v2  ;;  %v7118_v24 = vld [vmem:[#allocation5 + $0x668] sm:$0xff] }
 0x999   :  { %13496 = vmatprep.subr.bf16.mxu0 %v13495_v31  ;;  %13523 = vmatprep.subr.bf16.mxu1 %v17225_v19  ;;  %v13543_v31 = vpack.c.bf16 %v7121_v61, %v7118_v24  ;;  %v7150_v2 = vld [vmem:[#allocation5 + $0x768] sm:$0xff] }
 0x99a   :  { %v13565_v29 = vpack.c.bf16 %v7150_v2, %v7147_v58  ;;  %v7304_v61 = vld [vmem:[#allocation5 + $0x788] sm:$0xff] }
 0x99c   :  { %13498 = vmatpush1.bf16.msra.mxu0 %v13497_v36  ;;  %13525 = vmatpush3.bf16.msra.mxu1 %v13524_v14  ;;  %v13574_v36 = vpack.c.bf16 %v7122_v26, %v7119_v3  ;;  %v7124_v14 = vld [vmem:[#allocation5 + $0x698] sm:$0xff]  ;;  %v2562_v3 = vadd.f32 %v17534_v63, %v17513_v13 }
 0x99d   :  { %13500 = vmatprep.subr.bf16.mxu0 %v13499_v4  ;;  %13526 = vmatprep.subr.bf16.mxu1 %v17225_v19  ;;  %v13547_v4 = vpack.c.bf16 %v7127_v41, %v7124_v14  ;;  %v17535_v14 = vld [vmem:[#allocation30_spill] sm:$0xff] }
 0x99e   :  { %v2364_v41 = vadd.f32 %v17535_v14, %v17513_v13  ;;  %v7318_v14 = vld [vmem:[#allocation5 + $0x7f8] sm:$0xff] }
 0x9a0   :  { %13502 = vmatpush1.bf16.msra.mxu0 %v13501_v50  ;;  %13528 = vmatpush3.bf16.msra.mxu1 %v13527_v40  ;;  %v13577_v50 = vpack.c.bf16 %v7128_v48, %v7125_v39  ;;  %v7130_v40 = vld [vmem:[#allocation5 + $0x6c8] sm:$0xff] }
 0x9a1   :  { %13504 = vmatprep.subr.bf16.mxu0 %v13503_v23  ;;  %13529 = vmatprep.subr.bf16.mxu1 %v17225_v19  ;;  %v13551_v23 = vpack.c.bf16 %v7133_v35, %v7130_v40 }
 0x9a4   :  { %13506 = vmatpush1.bf16.msra.mxu0 %v13505_v53  ;;  %13531 = vmatpush3.bf16.msra.mxu1 %v13530_v17  ;;  %v13580_v53 = vpack.c.bf16 %v7134_v30, %v7131_v60  ;;  %v7136_v17 = vld [vmem:[#allocation5 + $0x6f8] sm:$0xff]  ;;  %v14594_v30 = vld [vmem:[#allocation7 + $0x4] ss:$0 sm:$0xff] }
 0x9a5   :  { %13508 = vmatprep.subr.bf16.mxu0 %v13507_v56  ;;  %13532 = vmatprep.subr.bf16.mxu1 %v17225_v19  ;;  %v13555_v56 = vpack.c.bf16 %v7139_v54, %v7136_v17 }
 0x9a8   :  { %13510 = vmatpush1.bf16.msra.mxu0 %v13509_v37  ;;  %13534 = vmatpush3.bf16.msra.mxu1 %v13533_v57  ;;  %v13557_v37 = vpack.c.bf16 %v7138_v9, %v7135_v12  ;;  %v7140_v57 = vld [vmem:[#allocation5 + $0x718] sm:$0xff] }
 0x9a9   :  { %13567 = vmatprep.subr.bf16.mxu1 %v17225_v19  ;;  %13536 = vmatprep.subr.bf16.mxu0 %v13535_v46  ;;  %v13583_v34 = vpack.c.bf16 %v7140_v57, %v7137_v8  ;;  %v7145_v46 = vld [vmem:[#allocation5 + $0x740] sm:$0xff] }
 0x9aa   :  { %v13559_v1 = vpack.c.bf16 %v7145_v46, %v7142_v0 }
 0x9ab   :  { %6978 = vmatmul.mubr.f32.vlgmr.msra.gmra.mrb[16].mxu0 %v16522_v32  ;;  %11284 = vmatmul.mubr.f32.vlgmr.msra.gmra.mrb[76].mxu1 %v16522_v32 }
 0x9ac   :  { %7217 = vmatprep.mubr.f32.mxu0 %v17208_v21  ;;  %11318 = vmatprep.mubr.msk.f32.mxu1 %vm14652_vm0, %v17208_v21 }
 0x9ad   :  { %13538 = vmatpush1.bf16.msra.mxu0 %v13537_v20  ;;  %13569 = vmatpush3.bf16.msra.mxu1 %v13568_v51  ;;  %v7143_v20 = vld [vmem:[#allocation5 + $0x730] sm:$0xff]  ;;  %v7146_v51 = vld [vmem:[#allocation5 + $0x748] sm:$0xff] }
 0x9ae   :  { %13570 = vmatprep.subr.bf16.mxu1 %v17225_v19  ;;  %13540 = vmatprep.subr.bf16.mxu0 %v13539_v18  ;;  %v13586_v22 = vpack.c.bf16 %v7146_v51, %v7143_v20  ;;  %v7151_v18 = vld [vmem:[#allocation5 + $0x770] sm:$0xff] }
 0x9af   :  { %v13563_v47 = vpack.c.bf16 %v7151_v18, %v7148_v52  ;;  %v7305_v20 = vld [vmem:[#allocation5 + $0x790] sm:$0xff]  ;;  %v7310_v52 = vld [vmem:[#allocation5 + $0x7b8] sm:$0xff] }
 0x9b0   :  { %v7313_v18 = vld [vmem:[#allocation5 + $0x7d0] sm:$0xff] }
 0x9b1   :  { %13542 = vmatpush1.bf16.msra.mxu0 %v13541_v5  ;;  %13572 = vmatpush3.bf16.msra.mxu1 %v13571_v49  ;;  %v7149_v5 = vld [vmem:[#allocation5 + $0x760] sm:$0xff]  ;;  %v7152_v49 = vld [vmem:[#allocation5 + $0x778] sm:$0xff] }
 0x9b2   :  { %13573 = vmatprep.subr.bf16.mxu1 %v17225_v19  ;;  %13544 = vmatprep.subr.bf16.mxu0 %v13543_v31  ;;  %v13589_v24 = vpack.c.bf16 %v7152_v49, %v7149_v5  ;;  %v7307_v31 = vld [vmem:[#allocation5 + $0x7a0] sm:$0xff]  ;;  %v7309_v5 = vld [vmem:[#allocation5 + $0x7b0] sm:$0xff] }
 0x9b3   :  { %v13591_v55 = vpack.c.bf16 %v7307_v31, %v7304_v61  ;;  %v7311_v61 = vld [vmem:[#allocation5 + $0x7c0] sm:$0xff]  ;;  %v7314_v31 = vld [vmem:[#allocation5 + $0x7d8] sm:$0xff] }
 0x9b5   :  { %13546 = vmatpush1.bf16.msra.mxu0 %v13545_v16  ;;  %13575 = vmatpush3.bf16.msra.mxu1 %v13574_v36 }
 0x9b6   :  { %13576 = vmatprep.subr.bf16.mxu1 %v17225_v19  ;;  %13548 = vmatprep.subr.bf16.mxu0 %v13547_v4 }
 0x9b9   :  { %13550 = vmatpush1.bf16.msra.mxu0 %v13549_v44  ;;  %13578 = vmatpush3.bf16.msra.mxu1 %v13577_v50 }
 0x9ba   :  { %13579 = vmatprep.subr.bf16.mxu1 %v17225_v19  ;;  %13552 = vmatprep.subr.bf16.mxu0 %v13551_v23 }
 0x9bd   :  { %13554 = vmatpush1.bf16.msra.mxu0 %v13553_v11  ;;  %13581 = vmatpush3.bf16.msra.mxu1 %v13580_v53 }
 0x9be   :  { %13582 = vmatprep.subr.bf16.mxu1 %v17225_v19  ;;  %13556 = vmatprep.subr.bf16.mxu0 %v13555_v56  ;;  %v17536_v56 = vld [vmem:[#allocation16_spill] sm:$0xff] }
 0x9c1   :  { %13558 = vmatpush1.bf16.msra.mxu0 %v13557_v37  ;;  %13584 = vmatpush3.bf16.msra.mxu1 %v13583_v34 }
 0x9c2   :  { %13585 = vmatprep.subr.bf16.mxu1 %v17225_v19  ;;  %13560 = vmatprep.subr.bf16.mxu0 %v13559_v1  ;;  %v7303_v1 = vld [vmem:[#allocation5 + $0x780] sm:$0xff] }
 0x9c3   :  { %v13593_v58 = vpack.c.bf16 %v7306_v10, %v7303_v1 }
 0x9c5   :  { %13562 = vmatpush1.bf16.msra.mxu0 %v13561_v25  ;;  %13587 = vmatpush3.bf16.msra.mxu1 %v13586_v22  ;;  %v7308_v25 = vld [vmem:[#allocation5 + $0x7a8] sm:$0xff] }
 0x9c6   :  { %13588 = vmatprep.subr.bf16.mxu1 %v17225_v19  ;;  %13564 = vmatprep.subr.bf16.mxu0 %v13563_v47  ;;  %v13624_v2 = vpack.c.bf16 %v7308_v25, %v7305_v20  ;;  %v7333_v20 = vld [vmem:[#allocation5 + $0x870] sm:$0xff] }
 0x9c9   :  { %13566 = vmatpush1.bf16.msra.mxu0 %v13565_v29  ;;  %13590 = vmatpush3.bf16.msra.mxu1 %v13589_v24  ;;  %v7312_v24 = vld [vmem:[#allocation5 + $0x7c8] sm:$0xff] }
 0x9ca   :  { %13623 = vmatprep.subr.bf16.mxu1 %v17225_v19  ;;  %13592 = vmatprep.subr.bf16.mxu0 %v13591_v55  ;;  %v7319_v55 = vld [vmem:[#allocation5 + $0x800] sm:$0xff]  ;;  %v13597_v63 = vpack.c.bf16 %v7312_v24, %v7309_v5  ;;  %v7344_v24 = vld [vmem:[#allocation5 + $0x8c8] sm:$0xff] }
 0xa1e   :  { %v6468_v16 = vpop.f32.mrb[70].mxu1 }
 0xa1f   :  { %v16565_v26 = vadd.f32 %v6468_v16, %v2562_v3  ;;  %v11180_v36 = vpop.f32.mrb[71].mxu1  ;;  %v13627_v3 = vpack.c.bf16 %v7314_v31, %v7311_v61  ;;  %v7315_v16 = vld [vmem:[#allocation5 + $0x7e0] sm:$0xff]  ;;  %v7346_v61 = vld [vmem:[#allocation5 + $0x8d8] sm:$0xff]  ;;  %v7349_v31 = vld [vmem:[#allocation5 + $0x8f0] sm:$0xff] }
 0xa3e   :  { %v6666_v4 = vpop.f32.mrb[72].mxu1 }
 0xa3f   :  { %v16569_v27 = vadd.f32 %v6666_v4, %v2364_v41  ;;  %v11215_v33 = vpop.f32.mrb[73].mxu1  ;;  %v7317_v41 = vld [vmem:[#allocation5 + $0x7f0] sm:$0xff]  ;;  %v7320_v4 = vld [vmem:[#allocation5 + $0x808] sm:$0xff] }
 0xa40   :  { %v7322_v33 = vld [vmem:[#allocation5 + $0x818] sm:$0xff] }
 0xa5e   :  { %v6790_v39 = vpop.f32.mrb[14].mxu0  ;;  %v6861_v44 = vpop.f32.mrb[74].mxu1 }
 0xa5f   :  { %v14229_v48 = vadd.f32 %v6790_v39, %v17516_v62  ;;  %v6792_v50 = vpop.f32.mrb[15].mxu0  ;;  %v11250_v40 = vpop.f32.mrb[75].mxu1  ;;  %v7071_v53 = vadd.f32 %v14594_v30, %v6861_v44  ;;  %v7325_v39 = vld [vmem:[#allocation5 + $0x830] sm:$0xff]  ;;  %v13601_v44 = vpack.c.bf16 %v7318_v14, %v7315_v16  ;;  %v14595_v30 = vld [vmem:[#allocation7 + $0x5] ss:$0 sm:$0xff]  ;;  %v7348_v16 = vld [vmem:[#allocation5 + $0x8e8] sm:$0xff] }
 0xa60   :  { %v14230_v23 = vadd.f32 %v6792_v50, %v17517_v7  ;;  %v7321_v50 = vld [vmem:[#allocation5 + $0x810] sm:$0xff]  ;;  %v13603_v40 = vpack.c.bf16 %v7325_v39, %v7322_v33  ;;  %v7350_v14 = vld [vmem:[#allocation5 + $0x8f8] sm:$0xff] }
 0xa61   :  { %v9329_v35 = vmul.f32 -1.442695, %v14229_v48  ;;  %v13630_v48 = vpack.c.bf16 %v7320_v4, %v7317_v41  ;;  %v7500_v41 = vld [vmem:[#allocation5 + $0xa88] sm:$0xff]  ;;  %v7503_v4 = vld [vmem:[#allocation5 + $0xaa0] sm:$0xff] }
 0xa62   :  { %v9330_v45 = vmul.f32 -1.442695, %v14230_v23  ;;  %v7323_v23 = vld [vmem:[#allocation5 + $0x820] sm:$0xff] }
 0xa63   :  { %14478 = vpow2.f32 %v9329_v35  ;;  %v7324_v35 = vld [vmem:[#allocation5 + $0x828] sm:$0xff] }
 0xa64   :  { %14480 = vpow2.f32 %v9330_v45  ;;  %v7326_v45 = vld [vmem:[#allocation5 + $0x838] sm:$0xff] }
 0xa6d   :  { %v14479_v28 = vpop.eup %14478 }
 0xa6e   :  { %v7061_v60 = vadd.f32 1.0, %v14479_v28  ;;  %v14481_v11 = vpop.eup %14480  ;;  %v7328_v28 = vld [vmem:[#allocation5 + $0x848] sm:$0xff] }
 0xa6f   :  { %v7068_v9 = vadd.f32 1.0, %v14481_v11 }
 0xa70   :  { %14482 = vrcp.f32 %v7061_v60  ;;  %v7331_v60 = vld [vmem:[#allocation5 + $0x860] sm:$0xff] }
 0xa7a   :  { %v14483_v17 = vpop.eup %14482 }
 0xa7b   :  { %v7072_v54 = vmul.f32 %v14483_v17, %v7071_v53  ;;  %v13605_v17 = vpack.c.bf16 %v7324_v35, %v7321_v50  ;;  %v13647_v50 = vpack.c.bf16 %v7503_v4, %v7500_v41  ;;  %v7502_v35 = vld [vmem:[#allocation5 + $0xa98] sm:$0xff]  ;;  %v7532_v41 = vld [vmem:[#allocation5 + $0xb88] sm:$0xff]  ;;  %v7531_v4 = vld [vmem:[#allocation5 + $0xb80] sm:$0xff] }
 0xa7d   :  { %v7073_v12 = vadd.f32 %v7072_v54, %v17536_v56  ;;  %v13633_v54 = vpack.c.bf16 %v7326_v45, %v7323_v23  ;;  %v7327_v56 = vld [vmem:[#allocation5 + $0x840] sm:$0xff]  ;;  %v7501_v23 = vld [vmem:[#allocation5 + $0xa90] sm:$0xff]  ;;  %v7504_v45 = vld [vmem:[#allocation5 + $0xaa8] sm:$0xff] }
 0xa7e   :  { %v6979_v62 = vpop.f32.mrb[16].mxu0  ;;  %v16574_v8 = vpop.f32.mrb[76].mxu1 }
 0xa7f   :  { %14484 = vtanh.f32 %v7073_v12  ;;  %v14231_v37 = vadd.f32 %v6979_v62, %v17520_v42  ;;  %v6981_v7 = vpop.f32.mrb[17].mxu0  ;;  %v11285_v57 = vpop.f32.mrb[77].mxu1  ;;  %v7095_v53 = vadd.f32 %v14595_v30, %v16574_v8  ;;  %v7330_v62 = vld [vmem:[#allocation5 + $0x858] sm:$0xff] }
 0xa80   :  { %14486 = vrcp.f32 %v7068_v9  ;;  %v14232_v0 = vadd.f32 %v6981_v7, %v17521_v6  ;;  %v13595_v6 = vpack.c.bf16 %v7313_v18, %v7310_v52  ;;  %v13607_v9 = vpack.c.bf16 %v7331_v60, %v7328_v28  ;;  %v7332_v7 = vld [vmem:[#allocation5 + $0x868] sm:$0xff]  ;;  %v7338_v52 = vld [vmem:[#allocation5 + $0x898] sm:$0xff] }
 0xa81   :  { %v9331_v34 = vmul.f32 -1.442695, %v14231_v37  ;;  %v7329_v37 = vld [vmem:[#allocation5 + $0x850] sm:$0xff]  ;;  %v13609_v8 = vpack.c.bf16 %v7330_v62, %v7327_v56  ;;  %v7340_v18 = vld [vmem:[#allocation5 + $0x8a8] sm:$0xff]  ;;  %v7506_v60 = vld [vmem:[#allocation5 + $0xab8] sm:$0xff] }
 0xa82   :  { %v9332_v22 = vmul.f32 -1.442695, %v14232_v0  ;;  %v7337_v0 = vld [vmem:[#allocation5 + $0x890] sm:$0xff]  ;;  %v13636_v10 = vpack.c.bf16 %v7332_v7, %v7329_v37  ;;  %v7507_v62 = vld [vmem:[#allocation5 + $0xac0] sm:$0xff]  ;;  %v7512_v37 = vld [vmem:[#allocation5 + $0xae8] sm:$0xff] }
 0xa83   :  { %14488 = vpow2.f32 %v9331_v34  ;;  %v7334_v34 = vld [vmem:[#allocation5 + $0x878] sm:$0xff]  ;;  %v7515_v7 = vld [vmem:[#allocation5 + $0xb00] sm:$0xff] }
 0xa84   :  { %14490 = vpow2.f32 %v9332_v22  ;;  %v13611_v25 = vpack.c.bf16 %v7337_v0, %v7334_v34  ;;  %v7335_v22 = vld [vmem:[#allocation5 + $0x880] sm:$0xff] }
 0xa85   :  { %v7511_v0 = vld [vmem:[#allocation5 + $0xae0] sm:$0xff] }
 0xa89   :  { %v14485_v46 = vpop.eup %14484 }
 0xa8a   :  { %v7075_v15 = vsub.f32 %v16481_v43, %v14485_v46  ;;  %v14487_v51 = vpop.eup %14486  ;;  %v7316_v43 = vld [vmem:[#allocation5 + $0x7e8] sm:$0xff] }
 0xa8b   :  { %v13599_v36 = vpack.c.bf16 %v7319_v55, %v7316_v43 }
 0xa8c   :  { %v7076_v47 = vmul.f32 %v14487_v51, %v7075_v15  ;;  %v7336_v51 = vld [vmem:[#allocation5 + $0x888] sm:$0xff] }
 0xa8d   :  { %v14489_v42 = vpop.eup %14488 }
 0xa8e   :  { %v7085_v29 = vadd.f32 1.0, %v14489_v42  ;;  %v16579_v49 = vadd.f32 %v14485_v46, %v7076_v47  ;;  %v14491_v11 = vpop.eup %14490  ;;  %v17537_v46 = vld [vmem:[#allocation19_spill] sm:$0xff]  ;;  %v7343_v47 = vld [vmem:[#allocation5 + $0x8c0] sm:$0xff]  ;;  %v13613_v42 = vpack.c.bf16 %v7336_v51, %v7333_v20 }
 0xa8f   :  { %v7092_v15 = vadd.f32 1.0, %v14491_v11  ;;  %v13615_v5 = vpack.c.bf16 %v7343_v47, %v7340_v18  ;;  %v7509_v11 = vld [vmem:[#allocation5 + $0xad0] sm:$0xff]  ;;  %v7520_v18 = vld [vmem:[#allocation5 + $0xb28] sm:$0xff]  ;;  %v7519_v47 = vld [vmem:[#allocation5 + $0xb20] sm:$0xff] }
 0xa90   :  { %14492 = vrcp.f32 %v7085_v29  ;;  %7218 = vmatmul.mubr.f32.vlgmr.msra.gmra.mrb[34].mxu0 %v16579_v49  ;;  %11319 = vmatmul.mubr.f32.vlgmr.msra.gmra.mrb[78].mxu1 %v16579_v49  ;;  %v7342_v29 = vld [vmem:[#allocation5 + $0x8b8] sm:$0xff]  ;;  %v7521_v20 = vld [vmem:[#allocation5 + $0xb30] sm:$0xff] }
 0xa91   :  { %13594 = vmatpush1.bf16.msra.mxu0 %v13593_v58  ;;  %13625 = vmatpush3.bf16.msra.mxu1 %v13624_v2  ;;  %v13639_v58 = vpack.c.bf16 %v7338_v52, %v7335_v22  ;;  %v7339_v2 = vld [vmem:[#allocation5 + $0x8a0] sm:$0xff]  ;;  %v7517_v22 = vld [vmem:[#allocation5 + $0xb10] sm:$0xff] }
 0xa92   :  { %13596 = vmatprep.subr.bf16.mxu0 %v13595_v6  ;;  %13626 = vmatprep.subr.bf16.mxu1 %v17225_v19  ;;  %v7341_v6 = vld [vmem:[#allocation5 + $0x8b0] sm:$0xff]  ;;  %v13617_v43 = vpack.c.bf16 %v7342_v29, %v7339_v2  ;;  %v7527_v2 = vld [vmem:[#allocation5 + $0xb60] sm:$0xff] }
 0xa93   :  { %7415 = vmatprep.mubr.f32.mxu0 %v17208_v21  ;;  %11353 = vmatprep.mubr.msk.f32.mxu1 %vm14652_vm0, %v17208_v21  ;;  %v13642_v55 = vpack.c.bf16 %v7344_v24, %v7341_v6  ;;  %v7523_v6 = vld [vmem:[#allocation5 + $0xb40] sm:$0xff] }
 0xa95   :  { %13598 = vmatpush1.bf16.msra.mxu0 %v13597_v63  ;;  %13628 = vmatpush3.bf16.msra.mxu1 %v13627_v3  ;;  %v7345_v63 = vld [vmem:[#allocation5 + $0x8d0] sm:$0xff]  ;;  %v13619_v3 = vpack.c.bf16 %v7349_v31, %v7346_v61  ;;  %v7526_v61 = vld [vmem:[#allocation5 + $0xb58] sm:$0xff] }
 0xa96   :  { %13600 = vmatprep.subr.bf16.mxu0 %v13599_v36  ;;  %13629 = vmatprep.subr.bf16.mxu1 %v17225_v19  ;;  %v7347_v36 = vld [vmem:[#allocation5 + $0x8e0] sm:$0xff]  ;;  %v13621_v39 = vpack.c.bf16 %v7348_v16, %v7345_v63  ;;  %v7525_v31 = vld [vmem:[#allocation5 + $0xb50] sm:$0xff] }
 0xa97   :  { %v7533_v63 = vld [vmem:[#allocation5 + $0xb90] sm:$0xff] }
 0xa99   :  { %13602 = vmatpush1.bf16.msra.mxu0 %v13601_v44  ;;  %13631 = vmatpush3.bf16.msra.mxu1 %v13630_v48  ;;  %v13645_v44 = vpack.c.bf16 %v7350_v14, %v7347_v36  ;;  %v7499_v48 = vld [vmem:[#allocation5 + $0xa80] sm:$0xff]  ;;  %v7529_v36 = vld [vmem:[#allocation5 + $0xb70] sm:$0xff] }
 0xa9a   :  { %v14493_v12 = vpop.eup %14492  ;;  %13604 = vmatprep.subr.bf16.mxu0 %v13603_v40  ;;  %13632 = vmatprep.subr.bf16.mxu1 %v17225_v19 }
 0xa9b   :  { %v7096_v57 = vmul.f32 %v14493_v12, %v7095_v53  ;;  %v13649_v53 = vpack.c.bf16 %v7502_v35, %v7499_v48  ;;  %v13651_v12 = vpack.c.bf16 %v7509_v11, %v7506_v60  ;;  %v13669_v48 = vpack.c.bf16 %v7532_v41, %v7529_v36  ;;  %v7542_v60 = vld [vmem:[#allocation5 + $0xbd8] sm:$0xff]  ;;  %v7545_v11 = vld [vmem:[#allocation5 + $0xbf0] sm:$0xff]  ;;  %v7731_v36 = vld [vmem:[#allocation5 + $0x9a0] sm:$0xff] }
 0xa9c   :  { %v7736_v41 = vld [vmem:[#allocation5 + $0x9c8] sm:$0xff] }
 0xa9d   :  { %v7097_v1 = vadd.f32 %v7096_v57, %v17537_v46  ;;  %13606 = vmatpush1.bf16.msra.mxu0 %v13605_v17  ;;  %13634 = vmatpush3.bf16.msra.mxu1 %v13633_v54  ;;  %v13680_v17 = vpack.c.bf16 %v7504_v45, %v7501_v23  ;;  %v7505_v54 = vld [vmem:[#allocation5 + $0xab0] sm:$0xff]  ;;  %v13655_v46 = vpack.c.bf16 %v7515_v7, %v7512_v37  ;;  %v7538_v23 = vld [vmem:[#allocation5 + $0xbb8] sm:$0xff] }
 0xa9e   :  { %13608 = vmatprep.subr.bf16.mxu0 %v13607_v9  ;;  %13635 = vmatprep.subr.bf16.mxu1 %v17225_v19  ;;  %v7508_v9 = vld [vmem:[#allocation5 + $0xac8] sm:$0xff]  ;;  %v7537_v45 = vld [vmem:[#allocation5 + $0xbb0] sm:$0xff] }
 0xa9f   :  { %14494 = vtanh.f32 %v7097_v1  ;;  %v13653_v57 = vpack.c.bf16 %v7508_v9, %v7505_v54  ;;  %v7514_v1 = vld [vmem:[#allocation5 + $0xaf8] sm:$0xff]  ;;  %v13675_v54 = vpack.c.bf16 %v7545_v11, %v7542_v60  ;;  %v7741_v60 = vld [vmem:[#allocation5 + $0x9f0] sm:$0xff] }
 0xaa0   :  { %14496 = vrcp.f32 %v7092_v15  ;;  %v7513_v15 = vld [vmem:[#allocation5 + $0xaf0] sm:$0xff]  ;;  %v7546_v9 = vld [vmem:[#allocation5 + $0xbf8] sm:$0xff] }
 0xaa1   :  { %13610 = vmatpush1.bf16.msra.mxu0 %v13609_v8  ;;  %13637 = vmatpush3.bf16.msra.mxu1 %v13636_v10  ;;  %v7516_v8 = vld [vmem:[#allocation5 + $0xb08] sm:$0xff]  ;;  %v7518_v10 = vld [vmem:[#allocation5 + $0xb18] sm:$0xff] }
 0xaa2   :  { %13612 = vmatprep.subr.bf16.mxu0 %v13611_v25  ;;  %13638 = vmatprep.subr.bf16.mxu1 %v17225_v19  ;;  %v13657_v25 = vpack.c.bf16 %v7514_v1, %v7511_v0  ;;  %v13686_v51 = vpack.c.bf16 %v7516_v8, %v7513_v15  ;;  %v13659_v52 = vpack.c.bf16 %v7521_v20, %v7518_v10  ;;  %v7714_v0 = vld [vmem:[#allocation5 + $0x918] sm:$0xff]  ;;  %v7716_v1 = vld [vmem:[#allocation5 + $0x928] sm:$0xff]  ;;  %v7721_v8 = vld [vmem:[#allocation5 + $0x950] sm:$0xff] }
 0xaa3   :  { %v7718_v15 = vld [vmem:[#allocation5 + $0x938] sm:$0xff]  ;;  %v7717_v20 = vld [vmem:[#allocation5 + $0x930] sm:$0xff] }
 0xaa5   :  { %13614 = vmatpush1.bf16.msra.mxu0 %v13613_v42  ;;  %13640 = vmatpush3.bf16.msra.mxu1 %v13639_v58  ;;  %v7522_v42 = vld [vmem:[#allocation5 + $0xb38] sm:$0xff]  ;;  %v7524_v58 = vld [vmem:[#allocation5 + $0xb48] sm:$0xff] }
 0xaa6   :  { %13616 = vmatprep.subr.bf16.mxu0 %v13615_v5  ;;  %13641 = vmatprep.subr.bf16.mxu1 %v17225_v19  ;;  %v13661_v5 = vpack.c.bf16 %v7520_v18, %v7517_v22  ;;  %v13689_v29 = vpack.c.bf16 %v7522_v42, %v7519_v47  ;;  %v13663_v24 = vpack.c.bf16 %v7527_v2, %v7524_v58  ;;  %v7720_v22 = vld [vmem:[#allocation5 + $0x948] sm:$0xff]  ;;  %v7722_v18 = vld [vmem:[#allocation5 + $0x958] sm:$0xff]  ;;  %v7727_v42 = vld [vmem:[#allocation5 + $0x980] sm:$0xff] }
 0xaa7   :  { %v7724_v47 = vld [vmem:[#allocation5 + $0x968] sm:$0xff]  ;;  %v16620_v58 = vpack.c.bf16 %v7720_v22, %v7717_v20  ;;  %v7723_v2 = vld [vmem:[#allocation5 + $0x960] sm:$0xff] }
 0xaa9   :  { %v14495_v33 = vpop.eup %14494  ;;  %13618 = vmatpush1.bf16.msra.mxu0 %v13617_v43  ;;  %13643 = vmatpush3.bf16.msra.mxu1 %v13642_v55  ;;  %v7528_v43 = vld [vmem:[#allocation5 + $0xb68] sm:$0xff]  ;;  %v7530_v55 = vld [vmem:[#allocation5 + $0xb78] sm:$0xff] }
 0xaaa   :  { %13620 = vmatprep.subr.bf16.mxu0 %v13619_v3  ;;  %13644 = vmatprep.subr.bf16.mxu1 %v17225_v19  ;;  %v7099_v40 = vsub.f32 %v16522_v32, %v14495_v33  ;;  %v14497_v28 = vpop.eup %14496  ;;  %v7510_v32 = vld [vmem:[#allocation5 + $0xad8] sm:$0xff]  ;;  %v13665_v3 = vpack.c.bf16 %v7526_v61, %v7523_v6  ;;  %v13692_v16 = vpack.c.bf16 %v7528_v43, %v7525_v31  ;;  %v7728_v61 = vld [vmem:[#allocation5 + $0x988] sm:$0xff] }
 0xaab   :  { %v13683_v34 = vpack.c.bf16 %v7510_v32, %v7507_v62  ;;  %v13667_v14 = vpack.c.bf16 %v7533_v63, %v7530_v55  ;;  %v7712_v62 = vld [vmem:[#allocation5 + $0x908] sm:$0xff]  ;;  %v7715_v32 = vld [vmem:[#allocation5 + $0x920] sm:$0xff]  ;;  %v7726_v6 = vld [vmem:[#allocation5 + $0x978] sm:$0xff] }
 0xaac   :  { %v7100_v30 = vmul.f32 %v14497_v28, %v7099_v40  ;;  %v7535_v40 = vld [vmem:[#allocation5 + $0xba0] sm:$0xff]  ;;  %v7540_v28 = vld [vmem:[#allocation5 + $0xbc8] sm:$0xff]  ;;  %v7730_v31 = vld [vmem:[#allocation5 + $0x998] sm:$0xff]  ;;  %v16633_v43 = vpack.c.bf16 %v7726_v6, %v7723_v2 }
 0xaad   :  { %13622 = vmatpush1.bf16.msra.mxu0 %v13621_v39  ;;  %13646 = vmatpush3.bf16.msra.mxu1 %v13645_v44  ;;  %v7536_v39 = vld [vmem:[#allocation5 + $0xba8] sm:$0xff]  ;;  %v7539_v44 = vld [vmem:[#allocation5 + $0xbc0] sm:$0xff]  ;;  %v7729_v55 = vld [vmem:[#allocation5 + $0x990] sm:$0xff] }
 0xaae   :  { %13648 = vmatprep.subr.bf16.mxu0 %v13647_v50  ;;  %13679 = vmatprep.subr.bf16.mxu1 %v17225_v19  ;;  %v7101_v56 = vadd.f32 %v14495_v33, %v7100_v30  ;;  %v7534_v33 = vld [vmem:[#allocation5 + $0xb98] sm:$0xff]  ;;  %v13671_v35 = vpack.c.bf16 %v7539_v44, %v7536_v39  ;;  %v13673_v30 = vpack.c.bf16 %v7538_v23, %v7535_v40  ;;  %v7735_v39 = vld [vmem:[#allocation5 + $0x9c0] sm:$0xff]  ;;  %v7737_v40 = vld [vmem:[#allocation5 + $0x9d0] sm:$0xff] }
 0xaaf   :  { %v13695_v50 = vpack.c.bf16 %v7534_v33, %v7531_v4  ;;  %v7739_v4 = vld [vmem:[#allocation5 + $0x9e0] sm:$0xff]  ;;  %v7742_v23 = vld [vmem:[#allocation5 + $0x9f8] sm:$0xff] }
 0xab0   :  { %7416 = vmatmul.mubr.f32.vlgmr.msra.gmra.mrb[32].mxu0 %v7101_v56  ;;  %11354 = vmatmul.mubr.f32.vlgmr.msra.gmra.mrb[80].mxu1 %v7101_v56  ;;  %v7544_v56 = vld [vmem:[#allocation5 + $0xbe8] sm:$0xff]  ;;  %v17538_v6 = vld [vmem:[#allocation68_spill] sm:$0xff] }
 0xab1   :  { %13650 = vmatpush1.bf16.msra.mxu0 %v13649_v53  ;;  %13681 = vmatpush3.bf16.msra.mxu1 %v13680_v17  ;;  %v13698_v53 = vpack.c.bf16 %v7540_v28, %v7537_v45  ;;  %v7541_v17 = vld [vmem:[#allocation5 + $0xbd0] sm:$0xff] }
 0xab2   :  { %13652 = vmatprep.subr.bf16.mxu0 %v13651_v12  ;;  %13682 = vmatprep.subr.bf16.mxu1 %v17225_v19  ;;  %v7543_v12 = vld [vmem:[#allocation5 + $0xbe0] sm:$0xff]  ;;  %v13677_v37 = vpack.c.bf16 %v7544_v56, %v7541_v17  ;;  %v7745_v45 = vld [vmem:[#allocation5 + $0xa10] sm:$0xff]  ;;  %v7748_v56 = vld [vmem:[#allocation5 + $0xa28] sm:$0xff] }
 0xab3   :  { %7611 = vmatprep.mubr.f32.mxu0 %v17208_v21  ;;  %11388 = vmatprep.mubr.msk.f32.mxu1 %vm14652_vm0, %v17208_v21  ;;  %v13701_v7 = vpack.c.bf16 %v7546_v9, %v7543_v12  ;;  %v7743_v17 = vld [vmem:[#allocation5 + $0xa00] sm:$0xff] }
 0xab4   :  { %v7751_v12 = vld [vmem:[#allocation5 + $0xa40] sm:$0xff] }
 0xab5   :  { %13654 = vmatpush1.bf16.msra.mxu0 %v13653_v57  ;;  %13684 = vmatpush3.bf16.msra.mxu1 %v13683_v34  ;;  %v7711_v57 = vld [vmem:[#allocation5 + $0x900] sm:$0xff]  ;;  %v16607_v34 = vpack.c.bf16 %v7715_v32, %v7712_v62 }
 0xab6   :  { %13656 = vmatprep.subr.bf16.mxu0 %v13655_v46  ;;  %13685 = vmatprep.subr.bf16.mxu1 %v17225_v19  ;;  %v7713_v46 = vld [vmem:[#allocation5 + $0x910] sm:$0xff]  ;;  %v16609_v10 = vpack.c.bf16 %v7714_v0, %v7711_v57  ;;  %v7747_v62 = vld [vmem:[#allocation5 + $0xa20] sm:$0xff]  ;;  %v7752_v0 = vld [vmem:[#allocation5 + $0xa48] sm:$0xff] }
 0xab7   :  { %v7749_v57 = vld [vmem:[#allocation5 + $0xa30] sm:$0xff] }
 0xab8   :  { %v16676_v20 = vpack.c.bf16 %v7752_v0, %v7749_v57 }
 0xab9   :  { %13658 = vmatpush1.bf16.msra.mxu0 %v13657_v25  ;;  %13687 = vmatpush3.bf16.msra.mxu1 %v13686_v51  ;;  %v16611_v25 = vpack.c.bf16 %v7716_v1, %v7713_v46  ;;  %v16614_v51 = vpack.c.bf16 %v7721_v8, %v7718_v15  ;;  %v7754_v46 = vld [vmem:[#allocation5 + $0xa58] sm:$0xff]  ;;  %v7757_v1 = vld [vmem:[#allocation5 + $0xa70] sm:$0xff] }
 0xaba   :  { %13660 = vmatprep.subr.bf16.mxu0 %v13659_v52  ;;  %13688 = vmatprep.subr.bf16.mxu1 %v17225_v19  ;;  %v7719_v52 = vld [vmem:[#allocation5 + $0x940] sm:$0xff]  ;;  %v7753_v8 = vld [vmem:[#allocation5 + $0xa50] sm:$0xff]  ;;  %v16679_v22 = vpack.c.bf16 %v7757_v1, %v7754_v46 }
 0xabd   :  { %13662 = vmatpush1.bf16.msra.mxu0 %v13661_v5  ;;  %13690 = vmatpush3.bf16.msra.mxu1 %v13689_v29  ;;  %v16623_v5 = vpack.c.bf16 %v7722_v18, %v7719_v52  ;;  %v16626_v29 = vpack.c.bf16 %v7727_v42, %v7724_v47  ;;  %v7756_v52 = vld [vmem:[#allocation5 + $0xa68] sm:$0xff]  ;;  %v7755_v18 = vld [vmem:[#allocation5 + $0xa60] sm:$0xff]  ;;  %v7758_v47 = vld [vmem:[#allocation5 + $0xa78] sm:$0xff] }
 0xabe   :  { %13664 = vmatprep.subr.bf16.mxu0 %v13663_v24  ;;  %13691 = vmatprep.subr.bf16.mxu1 %v17225_v19  ;;  %v7725_v24 = vld [vmem:[#allocation5 + $0x970] sm:$0xff]  ;;  %v16683_v42 = vpack.c.bf16 %v7756_v52, %v7753_v8  ;;  %v16686_v2 = vpack.c.bf16 %v7758_v47, %v7755_v18  ;;  %v7691_v52 = vld [vmem:[#allocation7 + $0x7] ss:$0 sm:$0xff] }
 0xabf   :  { %v16636_v63 = vpack.c.bf16 %v7728_v61, %v7725_v24  ;;  %v1532_v24 = vadd.f32 %v17538_v6, %v17513_v13 }
 0xac1   :  { %13666 = vmatpush1.bf16.msra.mxu0 %v13665_v3  ;;  %13693 = vmatpush3.bf16.msra.mxu1 %v13692_v16  ;;  %v7732_v16 = vld [vmem:[#allocation5 + $0x9a8] sm:$0xff] }
 0xac2   :  { %13668 = vmatprep.subr.bf16.mxu0 %v13667_v14  ;;  %13694 = vmatprep.subr.bf16.mxu1 %v17225_v19  ;;  %v7734_v14 = vld [vmem:[#allocation5 + $0x9b8] sm:$0xff]  ;;  %v16643_v33 = vpack.c.bf16 %v7732_v16, %v7729_v55  ;;  %v17539_v55 = vld [vmem:[#allocation55_spill] sm:$0xff] }
 0xac3   :  { %v16646_v44 = vpack.c.bf16 %v7734_v14, %v7731_v36  ;;  %v1333_v16 = vadd.f32 %v17539_v55, %v17513_v13 }
 0xac5   :  { %13670 = vmatpush1.bf16.msra.mxu0 %v13669_v48  ;;  %13696 = vmatpush3.bf16.msra.mxu1 %v13695_v50  ;;  %v16649_v48 = vpack.c.bf16 %v7739_v4, %v7736_v41  ;;  %v7738_v50 = vld [vmem:[#allocation5 + $0x9d8] sm:$0xff]  ;;  %v1586_v4 = vld [vmem:[#allocation7 + $0x3] ss:$8 sm:$0x7] }
 0xac6   :  { %13672 = vmatprep.subr.bf16.mxu0 %v13671_v35  ;;  %13697 = vmatprep.subr.bf16.mxu1 %v17225_v19  ;;  %v7740_v35 = vld [vmem:[#allocation5 + $0x9e8] sm:$0xff]  ;;  %v16653_v28 = vpack.c.bf16 %v7738_v50, %v7735_v39  ;;  %v17540_v39 = vld [vmem:[#allocation11_spill] sm:$0xff] }
 0xac7   :  { %v16656_v11 = vpack.c.bf16 %v7740_v35, %v7737_v40  ;;  %v1599_v50 = vrot.slane %v1586_v4, %v17540_v39  ;;  %v17541_v40 = vld [vmem:[#allocation24_spill] sm:$0xff] }
 0xac8   :  { %v1591_v35 = vrot.slane %v1586_v4, %v17541_v40 }
 0xac9   :  { %13674 = vmatpush1.bf16.msra.mxu0 %v13673_v30  ;;  %13699 = vmatpush3.bf16.msra.mxu1 %v13698_v53  ;;  %v16659_v30 = vpack.c.bf16 %v7745_v45, %v7742_v23  ;;  %v7744_v53 = vld [vmem:[#allocation5 + $0xa08] sm:$0xff]  ;;  %v17542_v23 = vld [vmem:[#allocation69_spill] sm:$0xff] }
 0xaca   :  { %13676 = vmatprep.subr.bf16.mxu0 %v13675_v54  ;;  %13700 = vmatprep.subr.bf16.mxu1 %v17225_v19  ;;  %v7746_v54 = vld [vmem:[#allocation5 + $0xa18] sm:$0xff]  ;;  %v16663_v9 = vpack.c.bf16 %v7744_v53, %v7741_v60  ;;  %v1741_v45 = vadd.f32 %v17542_v23, %v1599_v50 }
 0xacb   :  { %v16666_v32 = vpack.c.bf16 %v7746_v54, %v7743_v17 }
 0xacd   :  { %13678 = vmatpush1.bf16.msra.mxu0 %v13677_v37  ;;  %13702 = vmatpush3.bf16.msra.mxu1 %v13701_v7  ;;  %v16669_v37 = vpack.c.bf16 %v7751_v12, %v7748_v56  ;;  %v7750_v7 = vld [vmem:[#allocation5 + $0xa38] sm:$0xff] }
 0xace   :  { %13704 = vmatprep.subr.bf16.mxu0 %v16607_v34  ;;  %13735 = vmatprep.subr.bf16.mxu1 %v17225_v19  ;;  %v16673_v15 = vpack.c.bf16 %v7750_v7, %v7747_v62  ;;  %v17543_v7 = vld [vmem:[#allocation26_spill] sm:$0xff] }
 0xacf   :  { %v1595_v57 = vrot.slane %v1586_v4, %v17543_v7 }
 0xad0   :  { %7612 = vmatmul.mubr.f32.vlgmr.msra.gmra.mrb[36].mxu0 %v16579_v49  ;;  %11389 = vmatmul.mubr.f32.vlgmr.msra.gmra.mrb[82].mxu1 %v16579_v49  ;;  %v7733_v49 = vld [vmem:[#allocation5 + $0x9b0] sm:$0xff] }
 0xad1   :  { %13706 = vmatpush1.bf16.msra.mxu0 %v16609_v10  ;;  %13737 = vmatpush3.bf16.msra.mxu1 %v16611_v25  ;;  %v16639_v3 = vpack.c.bf16 %v7733_v49, %v7730_v31 }
 0xad2   :  { %13708 = vmatprep.subr.bf16.mxu0 %v16614_v51  ;;  %13738 = vmatprep.subr.bf16.mxu1 %v17225_v19 }
 0xad3   :  { %7823 = vmatprep.mubr.f32.mxu0 %v17208_v21  ;;  %11423 = vmatprep.mubr.msk.f32.mxu1 %vm14652_vm0, %v17208_v21 }
 0xad5   :  { %13710 = vmatpush1.bf16.msra.mxu0 %v16620_v58  ;;  %13740 = vmatpush3.bf16.msra.mxu1 %v16623_v5 }
 0xad6   :  { %13712 = vmatprep.subr.bf16.mxu0 %v16626_v29  ;;  %13741 = vmatprep.subr.bf16.mxu1 %v17225_v19 }
 0xad9   :  { %13714 = vmatpush1.bf16.msra.mxu0 %v16633_v43  ;;  %13743 = vmatpush3.bf16.msra.mxu1 %v16636_v63 }
 0xada   :  { %13716 = vmatprep.subr.bf16.mxu0 %v16639_v3  ;;  %13744 = vmatprep.subr.bf16.mxu1 %v17225_v19 }
 0xadd   :  { %13718 = vmatpush1.bf16.msra.mxu0 %v16643_v33  ;;  %13746 = vmatpush3.bf16.msra.mxu1 %v16646_v44 }
 0xade   :  { %13720 = vmatprep.subr.bf16.mxu0 %v16649_v48  ;;  %13747 = vmatprep.subr.bf16.mxu1 %v17225_v19 }
 0xae1   :  { %13722 = vmatpush1.bf16.msra.mxu0 %v16653_v28  ;;  %13749 = vmatpush3.bf16.msra.mxu1 %v16656_v11 }
 0xae2   :  { %13724 = vmatprep.subr.bf16.mxu0 %v16659_v30  ;;  %13750 = vmatprep.subr.bf16.mxu1 %v17225_v19 }
 0xae5   :  { %13726 = vmatpush1.bf16.msra.mxu0 %v16663_v9  ;;  %13752 = vmatpush3.bf16.msra.mxu1 %v16666_v32 }
 0xae6   :  { %13728 = vmatprep.subr.bf16.mxu0 %v16669_v37  ;;  %13753 = vmatprep.subr.bf16.mxu1 %v17225_v19 }
 0xae9   :  { %13730 = vmatpush1.bf16.msra.mxu0 %v16673_v15  ;;  %13755 = vmatpush3.bf16.msra.mxu1 %v16676_v20 }
 0xaea   :  { %13732 = vmatprep.subr.bf16.mxu0 %v16679_v22  ;;  %13756 = vmatprep.subr.bf16.mxu1 %v17225_v19 }
 0xaed   :  { %13734 = vmatpush1.bf16.msra.mxu0 %v16683_v42  ;;  %13758 = vmatpush3.bf16.msra.mxu1 %v16686_v2 }
 0xaee   :  { %13760 = vmatprep.subr.bf16.mxu0 %v16607_v34  ;;  %13791 = vmatprep.subr.bf16.mxu1 %v17225_v19 }
 0xaf0   :  { %7824 = vmatmul.mubr.f32.vlgmr.msra.gmra.mrb[32].mxu0 %v17208_v21  ;;  %11424 = vmatmul.mubr.f32.vlgmr.msra.gmra.mrb[84].mxu1 %v17208_v21 }
 0xaf1   :  { %13762 = vmatpush1.bf16.msra.mxu0 %v16609_v10  ;;  %13793 = vmatpush3.bf16.msra.mxu1 %v16611_v25 }
 0xaf2   :  { %13764 = vmatprep.subr.bf16.mxu0 %v16614_v51  ;;  %13794 = vmatprep.subr.bf16.mxu1 %v17225_v19 }
 0xaf3   :  { %7988 = vmatprep.mubr.f32.mxu0 %v17208_v21  ;;  %11458 = vmatprep.mubr.msk.f32.mxu1 %vm14652_vm0, %v17208_v21 }
 0xaf5   :  { %13766 = vmatpush1.bf16.msra.mxu0 %v16620_v58  ;;  %13796 = vmatpush3.bf16.msra.mxu1 %v16623_v5 }
 0xaf6   :  { %13768 = vmatprep.subr.bf16.mxu0 %v16626_v29  ;;  %13797 = vmatprep.subr.bf16.mxu1 %v17225_v19 }
 0xaf9   :  { %13770 = vmatpush1.bf16.msra.mxu0 %v16633_v43  ;;  %13799 = vmatpush3.bf16.msra.mxu1 %v16636_v63 }
 0xafa   :  { %13772 = vmatprep.subr.bf16.mxu0 %v16639_v3  ;;  %13800 = vmatprep.subr.bf16.mxu1 %v17225_v19 }
 0xafd   :  { %13774 = vmatpush1.bf16.msra.mxu0 %v16643_v33  ;;  %13802 = vmatpush3.bf16.msra.mxu1 %v16646_v44 }
 0xafe   :  { %13776 = vmatprep.subr.bf16.mxu0 %v16649_v48  ;;  %13803 = vmatprep.subr.bf16.mxu1 %v17225_v19 }
 0xb01   :  { %13778 = vmatpush1.bf16.msra.mxu0 %v16653_v28  ;;  %13805 = vmatpush3.bf16.msra.mxu1 %v16656_v11 }
 0xb02   :  { %13780 = vmatprep.subr.bf16.mxu0 %v16659_v30  ;;  %13806 = vmatprep.subr.bf16.mxu1 %v17225_v19 }
 0xb05   :  { %13782 = vmatpush1.bf16.msra.mxu0 %v16663_v9  ;;  %13808 = vmatpush3.bf16.msra.mxu1 %v16666_v32 }
 0xb06   :  { %13784 = vmatprep.subr.bf16.mxu0 %v16669_v37  ;;  %13809 = vmatprep.subr.bf16.mxu1 %v17225_v19 }
 0xb09   :  { %13786 = vmatpush1.bf16.msra.mxu0 %v16673_v15  ;;  %13811 = vmatpush3.bf16.msra.mxu1 %v16676_v20 }
 0xb0a   :  { %13788 = vmatprep.subr.bf16.mxu0 %v16679_v22  ;;  %13812 = vmatprep.subr.bf16.mxu1 %v17225_v19 }
 0xb0d   :  { %13790 = vmatpush1.bf16.msra.mxu0 %v16683_v42  ;;  %13814 = vmatpush3.bf16.msra.mxu1 %v16686_v2 }
 0xb0e   :  { %13816 = vmatprep.subr.bf16.mxu0 %v16607_v34  ;;  %13847 = vmatprep.subr.bf16.mxu1 %v17225_v19 }
 0xb63   :  { %v7290_v61 = vpop.f32.mrb[78].mxu1 }
 0xb64   :  { %v16733_v31 = vadd.f32 %v7290_v61, %v1532_v24  ;;  %v11320_v49 = vpop.f32.mrb[79].mxu1  ;;  %v14596_v24 = vld [vmem:[#allocation7 + $0x2] ss:$8 sm:$0x7] }
 0xb65   :  { %v16742_v61 = vrot.slane %v14596_v24, %v17541_v40  ;;  %v16746_v50 = vrot.slane %v14596_v24, %v17543_v7 }
 0xb83   :  { %v7488_v36 = vpop.f32.mrb[80].mxu1 }
 0xb84   :  { %v7494_v14 = vadd.f32 %v7488_v36, %v1333_v16  ;;  %v11355_v41 = vpop.f32.mrb[81].mxu1 }
 0xba3   :  { %v7613_v60 = vpop.f32.mrb[36].mxu0  ;;  %v7684_v53 = vpop.f32.mrb[82].mxu1 }
 0xba4   :  { %v14251_v17 = vadd.f32 %v7613_v60, %v1591_v35  ;;  %v7690_v54 = vadd.f32 %v7684_v53, %v1741_v45  ;;  %v7615_v56 = vpop.f32.mrb[37].mxu0  ;;  %v11390_v12 = vpop.f32.mrb[83].mxu1 }
 0xba5   :  { %v14252_v13 = vadd.f32 %v7615_v56, %v1595_v57  ;;  %v16756_v12 = vld [vmem:[#allocation7 + $0x6] ss:$0 sm:$0xff] }
 0xba6   :  { %v9333_v62 = vmul.f32 -1.442695, %v14251_v17 }
 0xba7   :  { %v9334_v0 = vmul.f32 -1.442695, %v14252_v13 }
 0xba8   :  { %14498 = vpow2.f32 %v9333_v62 }
 0xba9   :  { %14500 = vpow2.f32 %v9334_v0 }
 0xbb2   :  { %v14499_v46 = vpop.eup %14498 }
 0xbb3   :  { %v7695_v1 = vadd.f32 1.0, %v14499_v46  ;;  %v14501_v8 = vpop.eup %14500 }
 0xbb4   :  { %v7701_v47 = vadd.f32 1.0, %v14501_v8 }
 0xbb5   :  { %14502 = vrcp.f32 %v7695_v1 }
 0xbb6   :  { %14504 = vrcp.f32 %v7701_v47 }
 0xbbf   :  { %v14503_v18 = vpop.eup %14502 }
 0xbc0   :  { %v7704_v6 = vmul.f32 %v14503_v18, %v7691_v52  ;;  %v14505_v23 = vpop.eup %14504 }
 0xbc2   :  { %v7705_v49 = vadd.f32 %v7704_v6, %v7690_v54 }
 0xbc3   :  { %v7825_v55 = vpop.f32.mrb[32].mxu0  ;;  %v7896_v16 = vpop.f32.mrb[84].mxu1 }
 0xbc4   :  { %14506 = vtanh.f32 %v7705_v49  ;;  %v14247_v36 = vadd.f32 %v7825_v55, %v16742_v61  ;;  %v7827_v41 = vpop.f32.mrb[33].mxu0  ;;  %v11425_v4 = vpop.f32.mrb[85].mxu1  ;;  %v7917_v62 = vadd.f32 %v7896_v16, %v16756_v12 }
 0xbc5   :  { %v14248_v35 = vadd.f32 %v7827_v41, %v16746_v50 }
 0xbc6   :  { %v9335_v39 = vmul.f32 -1.442695, %v14247_v36 }
 0xbc7   :  { %v9336_v53 = vmul.f32 -1.442695, %v14248_v35 }
 0xbc8   :  { %14508 = vpow2.f32 %v9335_v39 }
 0xbc9   :  { %14510 = vpow2.f32 %v9336_v53 }
 0xbce   :  { %v16749_v45 = vpop.eup %14506 }
 0xbcf   :  { %v16752_v60 = vmul.f32 %v16749_v45, %v14505_v23 }
 0xbd1   :  { %v7708_v17 = vsub.f32 %v16749_v45, %v16752_v60  ;;  %v9088_v60 = vld [vmem:[#allocation5 + $0xde0] sm:$0xff] }
 0xbd2   :  { %v14509_v54 = vpop.eup %14508 }
 0xbd3   :  { %v7907_v56 = vadd.f32 1.0, %v14509_v54  ;;  %v14511_v7 = vpop.eup %14510 }
 0xbd4   :  { %v7914_v0 = vadd.f32 1.0, %v14511_v7 }
 0xbd5   :  { %14512 = vrcp.f32 %v7907_v56 }
 0xbdf   :  { %v14513_v57 = vpop.eup %14512 }
 0xbe0   :  { %v7918_v13 = vmul.f32 %v14513_v57, %v7917_v62 }
 0xbe2   :  { %v7919_v46 = vadd.f32 %v7918_v13, %v7494_v14 }
 0xbe4   :  { %14514 = vtanh.f32 %v7919_v46 }
 0xbe5   :  { %14516 = vrcp.f32 %v7914_v0 }
 0xbee   :  { %v14515_v1 = vpop.eup %14514 }
 0xbef   :  { %v7921_v8 = vsub.f32 0.0, %v14515_v1  ;;  %v14517_v52 = vpop.eup %14516 }
 0xbf1   :  { %v7922_v18 = vmul.f32 %v14517_v52, %v7921_v8 }
 0xbf3   :  { %v7923_v47 = vadd.f32 %v14515_v1, %v7922_v18 }
 0xbf5   :  { %7989 = vmatmul.mubr.f32.vlgmr.msra.gmra.mrb[38].mxu0 %v7923_v47  ;;  %11459 = vmatmul.mubr.f32.vlgmr.msra.gmra.mrb[86].mxu1 %v7923_v47 }
 0xbf6   :  { %13818 = vmatpush1.bf16.msra.mxu0 %v16609_v10  ;;  %13849 = vmatpush3.bf16.msra.mxu1 %v16611_v25 }
 0xbf7   :  { %13820 = vmatprep.subr.bf16.mxu0 %v16614_v51  ;;  %13850 = vmatprep.subr.bf16.mxu1 %v17225_v19 }
 0xbf8   :  { %8153 = vmatprep.mubr.f32.mxu0 %v17208_v21  ;;  %11493 = vmatprep.mubr.msk.f32.mxu1 %vm14652_vm0, %v17208_v21 }
 0xbfa   :  { %13822 = vmatpush1.bf16.msra.mxu0 %v16620_v58  ;;  %13852 = vmatpush3.bf16.msra.mxu1 %v16623_v5 }
 0xbfb   :  { %13824 = vmatprep.subr.bf16.mxu0 %v16626_v29  ;;  %13853 = vmatprep.subr.bf16.mxu1 %v17225_v19 }
 0xbfe   :  { %13826 = vmatpush1.bf16.msra.mxu0 %v16633_v43  ;;  %13855 = vmatpush3.bf16.msra.mxu1 %v16636_v63 }
 0xbff   :  { %13828 = vmatprep.subr.bf16.mxu0 %v16639_v3  ;;  %13856 = vmatprep.subr.bf16.mxu1 %v17225_v19 }
 0xc02   :  { %13830 = vmatpush1.bf16.msra.mxu0 %v16643_v33  ;;  %13858 = vmatpush3.bf16.msra.mxu1 %v16646_v44 }
 0xc03   :  { %13832 = vmatprep.subr.bf16.mxu0 %v16649_v48  ;;  %13859 = vmatprep.subr.bf16.mxu1 %v17225_v19 }
 0xc06   :  { %13834 = vmatpush1.bf16.msra.mxu0 %v16653_v28  ;;  %13861 = vmatpush3.bf16.msra.mxu1 %v16656_v11 }
 0xc07   :  { %13836 = vmatprep.subr.bf16.mxu0 %v16659_v30  ;;  %13862 = vmatprep.subr.bf16.mxu1 %v17225_v19 }
 0xc0a   :  { %13838 = vmatpush1.bf16.msra.mxu0 %v16663_v9  ;;  %13864 = vmatpush3.bf16.msra.mxu1 %v16666_v32 }
 0xc0b   :  { %13840 = vmatprep.subr.bf16.mxu0 %v16669_v37  ;;  %13865 = vmatprep.subr.bf16.mxu1 %v17225_v19 }
 0xc0e   :  { %13842 = vmatpush1.bf16.msra.mxu0 %v16673_v15  ;;  %13867 = vmatpush3.bf16.msra.mxu1 %v16676_v20 }
 0xc0f   :  { %13844 = vmatprep.subr.bf16.mxu0 %v16679_v22  ;;  %13868 = vmatprep.subr.bf16.mxu1 %v17225_v19 }
 0xc12   :  { %13846 = vmatpush1.bf16.msra.mxu0 %v16683_v42  ;;  %13870 = vmatpush3.bf16.msra.mxu1 %v16686_v2 }
 0xc13   :  { %13872 = vmatprep.subr.bf16.mxu0 %v16607_v34  ;;  %13903 = vmatprep.subr.bf16.mxu1 %v17225_v19 }
 0xcc8   :  { %v7990_v14 = vpop.f32.mrb[38].mxu0  ;;  %v8061_v6 = vpop.f32.mrb[86].mxu1 }
 0xcc9   :  { %v14253_v24 = vadd.f32 %v7990_v14, %v16742_v61  ;;  %v7992_v49 = vpop.f32.mrb[39].mxu0  ;;  %v11460_v55 = vpop.f32.mrb[87].mxu1  ;;  %v8082_v23 = vadd.f32 %v8061_v6, %v16756_v12 }
 0xcca   :  { %v14254_v36 = vadd.f32 %v7992_v49, %v16746_v50 }
 0xccb   :  { %v9337_v16 = vmul.f32 -1.442695, %v14253_v24 }
 0xccc   :  { %v9338_v41 = vmul.f32 -1.442695, %v14254_v36 }
 0xccd   :  { %14518 = vpow2.f32 %v9337_v16 }
 0xcce   :  { %14520 = vpow2.f32 %v9338_v41 }
 0xcd7   :  { %v14519_v4 = vpop.eup %14518 }
 0xcd8   :  { %v8072_v39 = vadd.f32 1.0, %v14519_v4  ;;  %v14521_v35 = vpop.eup %14520 }
 0xcd9   :  { %v8079_v62 = vadd.f32 1.0, %v14521_v35 }
 0xcda   :  { %14522 = vrcp.f32 %v8072_v39 }
 0xce4   :  { %v14523_v53 = vpop.eup %14522 }
 0xce5   :  { %v8083_v54 = vmul.f32 %v14523_v53, %v8082_v23 }
 0xce7   :  { %v8084_v56 = vadd.f32 %v8083_v54, %v16569_v27 }
 0xce9   :  { %14524 = vtanh.f32 %v8084_v56 }
 0xcea   :  { %14526 = vrcp.f32 %v8079_v62 }
 0xcf3   :  { %v14525_v7 = vpop.eup %14524 }
 0xcf4   :  { %v8086_v57 = vsub.f32 %v7923_v47, %v14525_v7  ;;  %v14527_v13 = vpop.eup %14526 }
 0xcf6   :  { %v8087_v0 = vmul.f32 %v14527_v13, %v8086_v57 }
 0xcf8   :  { %v8088_v46 = vadd.f32 %v14525_v7, %v8087_v0 }
 0xcfa   :  { %8154 = vmatmul.mubr.f32.vlgmr.msra.gmra.mrb[42].mxu0 %v8088_v46  ;;  %11494 = vmatmul.mubr.f32.vlgmr.msra.gmra.mrb[88].mxu1 %v8088_v46 }
 0xcfb   :  { %13874 = vmatpush1.bf16.msra.mxu0 %v16609_v10  ;;  %13905 = vmatpush3.bf16.msra.mxu1 %v16611_v25 }
 0xcfc   :  { %13876 = vmatprep.subr.bf16.mxu0 %v16614_v51  ;;  %13906 = vmatprep.subr.bf16.mxu1 %v17225_v19 }
 0xcfd   :  { %8318 = vmatprep.mubr.f32.mxu0 %v17208_v21  ;;  %11528 = vmatprep.mubr.msk.f32.mxu1 %vm14652_vm0, %v17208_v21 }
 0xcff   :  { %13878 = vmatpush1.bf16.msra.mxu0 %v16620_v58  ;;  %13908 = vmatpush3.bf16.msra.mxu1 %v16623_v5 }
 0xd00   :  { %13880 = vmatprep.subr.bf16.mxu0 %v16626_v29  ;;  %13909 = vmatprep.subr.bf16.mxu1 %v17225_v19 }
 0xd03   :  { %13882 = vmatpush1.bf16.msra.mxu0 %v16633_v43  ;;  %13911 = vmatpush3.bf16.msra.mxu1 %v16636_v63 }
 0xd04   :  { %13884 = vmatprep.subr.bf16.mxu0 %v16639_v3  ;;  %13912 = vmatprep.subr.bf16.mxu1 %v17225_v19 }
 0xd07   :  { %13886 = vmatpush1.bf16.msra.mxu0 %v16643_v33  ;;  %13914 = vmatpush3.bf16.msra.mxu1 %v16646_v44 }
 0xd08   :  { %13888 = vmatprep.subr.bf16.mxu0 %v16649_v48  ;;  %13915 = vmatprep.subr.bf16.mxu1 %v17225_v19 }
 0xd0b   :  { %13890 = vmatpush1.bf16.msra.mxu0 %v16653_v28  ;;  %13917 = vmatpush3.bf16.msra.mxu1 %v16656_v11 }
 0xd0c   :  { %13892 = vmatprep.subr.bf16.mxu0 %v16659_v30  ;;  %13918 = vmatprep.subr.bf16.mxu1 %v17225_v19 }
 0xd0f   :  { %13894 = vmatpush1.bf16.msra.mxu0 %v16663_v9  ;;  %13920 = vmatpush3.bf16.msra.mxu1 %v16666_v32 }
 0xd10   :  { %13896 = vmatprep.subr.bf16.mxu0 %v16669_v37  ;;  %13921 = vmatprep.subr.bf16.mxu1 %v17225_v19 }
 0xd13   :  { %13898 = vmatpush1.bf16.msra.mxu0 %v16673_v15  ;;  %13923 = vmatpush3.bf16.msra.mxu1 %v16676_v20 }
 0xd14   :  { %13900 = vmatprep.subr.bf16.mxu0 %v16679_v22  ;;  %13924 = vmatprep.subr.bf16.mxu1 %v17225_v19 }
 0xd17   :  { %13902 = vmatpush1.bf16.msra.mxu0 %v16683_v42  ;;  %13926 = vmatpush3.bf16.msra.mxu1 %v16686_v2 }
 0xd18   :  { %13928 = vmatprep.subr.bf16.mxu0 %v16607_v34  ;;  %13959 = vmatprep.subr.bf16.mxu1 %v17225_v19 }
 0xdcd   :  { %v8155_v27 = vpop.f32.mrb[42].mxu0  ;;  %v8226_v1 = vpop.f32.mrb[88].mxu1 }
 0xdce   :  { %v14257_v8 = vadd.f32 %v8155_v27, %v16742_v61  ;;  %v8157_v52 = vpop.f32.mrb[43].mxu0  ;;  %v11495_v18 = vpop.f32.mrb[89].mxu1  ;;  %v8247_v16 = vadd.f32 %v8226_v1, %v16756_v12 }
 0xdcf   :  { %v14258_v14 = vadd.f32 %v8157_v52, %v16746_v50 }
 0xdd0   :  { %v9339_v47 = vmul.f32 -1.442695, %v14257_v8 }
 0xdd1   :  { %v9340_v6 = vmul.f32 -1.442695, %v14258_v14 }
 0xdd2   :  { %14528 = vpow2.f32 %v9339_v47 }
 0xdd3   :  { %14530 = vpow2.f32 %v9340_v6  ;;  %v17544_v6 = vld [vmem:[#allocation73_spill] sm:$0xff] }
 0xddc   :  { %v14529_v24 = vpop.eup %14528 }
 0xddd   :  { %v8237_v49 = vadd.f32 1.0, %v14529_v24  ;;  %v14531_v55 = vpop.eup %14530 }
 0xdde   :  { %v8244_v39 = vadd.f32 1.0, %v14531_v55 }
 0xddf   :  { %14532 = vrcp.f32 %v8237_v49 }
 0xde9   :  { %v14533_v36 = vpop.eup %14532 }
 0xdea   :  { %v8248_v41 = vmul.f32 %v14533_v36, %v8247_v16 }
 0xdec   :  { %v8249_v4 = vadd.f32 %v8248_v41, %v16472_v59 }
 0xdee   :  { %14534 = vtanh.f32 %v8249_v4 }
 0xdef   :  { %14536 = vrcp.f32 %v8244_v39 }
 0xdf8   :  { %v14535_v35 = vpop.eup %14534 }
 0xdf9   :  { %v8251_v23 = vsub.f32 %v8088_v46, %v14535_v35  ;;  %v14537_v53 = vpop.eup %14536 }
 0xdfb   :  { %v8252_v54 = vmul.f32 %v14537_v53, %v8251_v23 }
 0xdfd   :  { %v8253_v56 = vadd.f32 %v14535_v35, %v8252_v54 }
 0xdff   :  { %8319 = vmatmul.mubr.f32.vlgmr.msra.gmra.mrb[46].mxu0 %v8253_v56  ;;  %11529 = vmatmul.mubr.f32.vlgmr.msra.gmra.mrb[90].mxu1 %v8253_v56 }
 0xe00   :  { %13930 = vmatpush1.bf16.msra.mxu0 %v16609_v10  ;;  %13961 = vmatpush3.bf16.msra.mxu1 %v16611_v25 }
 0xe01   :  { %13932 = vmatprep.subr.bf16.mxu0 %v16614_v51  ;;  %13962 = vmatprep.subr.bf16.mxu1 %v17225_v19 }
 0xe02   :  { %8483 = vmatprep.mubr.f32.mxu0 %v17208_v21  ;;  %11563 = vmatprep.mubr.msk.f32.mxu1 %vm14652_vm0, %v17208_v21 }
 0xe04   :  { %13934 = vmatpush1.bf16.msra.mxu0 %v16620_v58  ;;  %13964 = vmatpush3.bf16.msra.mxu1 %v16623_v5 }
 0xe05   :  { %13936 = vmatprep.subr.bf16.mxu0 %v16626_v29  ;;  %13965 = vmatprep.subr.bf16.mxu1 %v17225_v19 }
 0xe08   :  { %13938 = vmatpush1.bf16.msra.mxu0 %v16633_v43  ;;  %13967 = vmatpush3.bf16.msra.mxu1 %v16636_v63 }
 0xe09   :  { %13940 = vmatprep.subr.bf16.mxu0 %v16639_v3  ;;  %13968 = vmatprep.subr.bf16.mxu1 %v17225_v19 }
 0xe0c   :  { %13942 = vmatpush1.bf16.msra.mxu0 %v16643_v33  ;;  %13970 = vmatpush3.bf16.msra.mxu1 %v16646_v44 }
 0xe0d   :  { %13944 = vmatprep.subr.bf16.mxu0 %v16649_v48  ;;  %13971 = vmatprep.subr.bf16.mxu1 %v17225_v19 }
 0xe10   :  { %13946 = vmatpush1.bf16.msra.mxu0 %v16653_v28  ;;  %13973 = vmatpush3.bf16.msra.mxu1 %v16656_v11 }
 0xe11   :  { %13948 = vmatprep.subr.bf16.mxu0 %v16659_v30  ;;  %13974 = vmatprep.subr.bf16.mxu1 %v17225_v19 }
 0xe14   :  { %13950 = vmatpush1.bf16.msra.mxu0 %v16663_v9  ;;  %13976 = vmatpush3.bf16.msra.mxu1 %v16666_v32 }
 0xe15   :  { %13952 = vmatprep.subr.bf16.mxu0 %v16669_v37  ;;  %13977 = vmatprep.subr.bf16.mxu1 %v17225_v19 }
 0xe18   :  { %13954 = vmatpush1.bf16.msra.mxu0 %v16673_v15  ;;  %13979 = vmatpush3.bf16.msra.mxu1 %v16676_v20 }
 0xe19   :  { %13956 = vmatprep.subr.bf16.mxu0 %v16679_v22  ;;  %13980 = vmatprep.subr.bf16.mxu1 %v17225_v19 }
 0xe1c   :  { %13958 = vmatpush1.bf16.msra.mxu0 %v16683_v42  ;;  %13982 = vmatpush3.bf16.msra.mxu1 %v16686_v2 }
 0xe1d   :  { %13984 = vmatprep.subr.bf16.mxu0 %v16607_v34  ;;  %14015 = vmatprep.subr.bf16.mxu1 %v17225_v19 }
 0xed2   :  { %v8320_v59 = vpop.f32.mrb[46].mxu0  ;;  %v8391_v62 = vpop.f32.mrb[90].mxu1 }
 0xed3   :  { %v14261_v7 = vadd.f32 %v8320_v59, %v16742_v61  ;;  %v8322_v57 = vpop.f32.mrb[47].mxu0  ;;  %v11530_v13 = vpop.f32.mrb[91].mxu1  ;;  %v8412_v18 = vadd.f32 %v8391_v62, %v16756_v12 }
 0xed4   :  { %v14262_v46 = vadd.f32 %v8322_v57, %v16746_v50 }
 0xed5   :  { %v9341_v0 = vmul.f32 -1.442695, %v14261_v7 }
 0xed6   :  { %v9342_v27 = vmul.f32 -1.442695, %v14262_v46 }
 0xed7   :  { %14538 = vpow2.f32 %v9341_v0 }
 0xed8   :  { %14540 = vpow2.f32 %v9342_v27 }
 0xee1   :  { %v14539_v1 = vpop.eup %14538 }
 0xee2   :  { %v8402_v8 = vadd.f32 1.0, %v14539_v1  ;;  %v14541_v52 = vpop.eup %14540  ;;  %v17545_v1 = vld [vmem:[#allocation15_spill] sm:$0xff] }
 0xee3   :  { %v8409_v49 = vadd.f32 1.0, %v14541_v52 }
 0xee4   :  { %14542 = vrcp.f32 %v8402_v8 }
 0xeee   :  { %v14543_v47 = vpop.eup %14542 }
 0xeef   :  { %v8413_v14 = vmul.f32 %v14543_v47, %v8412_v18 }
 0xef1   :  { %v8414_v24 = vadd.f32 %v8413_v14, %v17544_v6 }
 0xef3   :  { %14544 = vtanh.f32 %v8414_v24 }
 0xef4   :  { %14546 = vrcp.f32 %v8409_v49 }
 0xefd   :  { %v14545_v55 = vpop.eup %14544 }
 0xefe   :  { %v8416_v16 = vsub.f32 %v8253_v56, %v14545_v55  ;;  %v14547_v36 = vpop.eup %14546 }
 0xf00   :  { %v8417_v41 = vmul.f32 %v14547_v36, %v8416_v16 }
 0xf02   :  { %v8418_v4 = vadd.f32 %v14545_v55, %v8417_v41 }
 0xf04   :  { %8484 = vmatmul.mubr.f32.vlgmr.msra.gmra.mrb[48].mxu0 %v8418_v4  ;;  %11564 = vmatmul.mubr.f32.vlgmr.msra.gmra.mrb[92].mxu1 %v8418_v4 }
 0xf05   :  { %13986 = vmatpush1.bf16.msra.mxu0 %v16609_v10  ;;  %14017 = vmatpush3.bf16.msra.mxu1 %v16611_v25 }
 0xf06   :  { %13988 = vmatprep.subr.bf16.mxu0 %v16614_v51  ;;  %14018 = vmatprep.subr.bf16.mxu1 %v17225_v19 }
 0xf07   :  { %8648 = vmatprep.mubr.f32.mxu0 %v17208_v21  ;;  %11598 = vmatprep.mubr.msk.f32.mxu1 %vm14652_vm0, %v17208_v21 }
 0xf09   :  { %13990 = vmatpush1.bf16.msra.mxu0 %v16620_v58  ;;  %14020 = vmatpush3.bf16.msra.mxu1 %v16623_v5 }
 0xf0a   :  { %13992 = vmatprep.subr.bf16.mxu0 %v16626_v29  ;;  %14021 = vmatprep.subr.bf16.mxu1 %v17225_v19 }
 0xf0d   :  { %13994 = vmatpush1.bf16.msra.mxu0 %v16633_v43  ;;  %14023 = vmatpush3.bf16.msra.mxu1 %v16636_v63 }
 0xf0e   :  { %13996 = vmatprep.subr.bf16.mxu0 %v16639_v3  ;;  %14024 = vmatprep.subr.bf16.mxu1 %v17225_v19 }
 0xf11   :  { %13998 = vmatpush1.bf16.msra.mxu0 %v16643_v33  ;;  %14026 = vmatpush3.bf16.msra.mxu1 %v16646_v44 }
 0xf12   :  { %14000 = vmatprep.subr.bf16.mxu0 %v16649_v48  ;;  %14027 = vmatprep.subr.bf16.mxu1 %v17225_v19 }
 0xf15   :  { %14002 = vmatpush1.bf16.msra.mxu0 %v16653_v28  ;;  %14029 = vmatpush3.bf16.msra.mxu1 %v16656_v11 }
 0xf16   :  { %14004 = vmatprep.subr.bf16.mxu0 %v16659_v30  ;;  %14030 = vmatprep.subr.bf16.mxu1 %v17225_v19 }
 0xf19   :  { %14006 = vmatpush1.bf16.msra.mxu0 %v16663_v9  ;;  %14032 = vmatpush3.bf16.msra.mxu1 %v16666_v32 }
 0xf1a   :  { %14008 = vmatprep.subr.bf16.mxu0 %v16669_v37  ;;  %14033 = vmatprep.subr.bf16.mxu1 %v17225_v19 }
 0xf1d   :  { %14010 = vmatpush1.bf16.msra.mxu0 %v16673_v15  ;;  %14035 = vmatpush3.bf16.msra.mxu1 %v16676_v20 }
 0xf1e   :  { %14012 = vmatprep.subr.bf16.mxu0 %v16679_v22  ;;  %14036 = vmatprep.subr.bf16.mxu1 %v17225_v19 }
 0xf21   :  { %14014 = vmatpush1.bf16.msra.mxu0 %v16683_v42  ;;  %14038 = vmatpush3.bf16.msra.mxu1 %v16686_v2 }
 0xf22   :  { %14040 = vmatprep.subr.bf16.mxu0 %v16607_v34  ;;  %14071 = vmatprep.subr.bf16.mxu1 %v17225_v19 }
 0xfd7   :  { %v8485_v39 = vpop.f32.mrb[48].mxu0  ;;  %v8556_v35 = vpop.f32.mrb[92].mxu1 }
 0xfd8   :  { %v14263_v23 = vadd.f32 %v8485_v39, %v16742_v61  ;;  %v8487_v53 = vpop.f32.mrb[49].mxu0  ;;  %v11565_v54 = vpop.f32.mrb[93].mxu1  ;;  %v8577_v0 = vadd.f32 %v8556_v35, %v16756_v12 }
 0xfd9   :  { %v14264_v59 = vadd.f32 %v8487_v53, %v16746_v50 }
 0xfda   :  { %v9343_v56 = vmul.f32 -1.442695, %v14263_v23 }
 0xfdb   :  { %v9344_v62 = vmul.f32 -1.442695, %v14264_v59 }
 0xfdc   :  { %14548 = vpow2.f32 %v9343_v56 }
 0xfdd   :  { %14550 = vpow2.f32 %v9344_v62 }
 0xfe6   :  { %v14549_v7 = vpop.eup %14548 }
 0xfe7   :  { %v8567_v57 = vadd.f32 1.0, %v14549_v7  ;;  %v14551_v13 = vpop.eup %14550 }
 0xfe8   :  { %v8574_v52 = vadd.f32 1.0, %v14551_v13 }
 0xfe9   :  { %14552 = vrcp.f32 %v8567_v57 }
 0xff3   :  { %v14553_v46 = vpop.eup %14552 }
 0xff4   :  { %v8578_v27 = vmul.f32 %v14553_v46, %v8577_v0 }
 0xff6   :  { %v8579_v8 = vadd.f32 %v8578_v27, %v17545_v1  ;;  %v9120_v1 = vld [vmem:[#allocation5 + $0xf50] sm:$0xff] }
 0xff8   :  { %14554 = vtanh.f32 %v8579_v8 }
 0xff9   :  { %14556 = vrcp.f32 %v8574_v52 }
0x1002   :  { %v14555_v18 = vpop.eup %14554 }
0x1003   :  { %v8581_v47 = vsub.f32 %v8418_v4, %v14555_v18  ;;  %v14557_v14 = vpop.eup %14556 }
0x1005   :  { %v8582_v6 = vmul.f32 %v14557_v14, %v8581_v47  ;;  %v9117_v47 = vld [vmem:[#allocation5 + $0xf30] sm:$0xff]  ;;  %v9119_v14 = vld [vmem:[#allocation5 + $0xf48] sm:$0xff] }
0x1007   :  { %v8583_v24 = vadd.f32 %v14555_v18, %v8582_v6  ;;  %v9122_v6 = vld [vmem:[#allocation5 + $0xf68] sm:$0xff] }
0x1009   :  { %8649 = vmatmul.mubr.f32.vlgmr.msra.gmra.mrb[44].mxu0 %v8583_v24  ;;  %11599 = vmatmul.mubr.f32.vlgmr.msra.gmra.mrb[94].mxu1 %v8583_v24 }
0x100a   :  { %14042 = vmatpush1.bf16.msra.mxu0 %v16609_v10  ;;  %14073 = vmatpush3.bf16.msra.mxu1 %v16611_v25 }
0x100b   :  { %14044 = vmatprep.subr.bf16.mxu0 %v16614_v51  ;;  %14074 = vmatprep.subr.bf16.mxu1 %v17225_v19 }
0x100c   :  { %8813 = vmatprep.mubr.f32.mxu0 %v17208_v21  ;;  %11633 = vmatprep.mubr.msk.f32.mxu1 %vm14652_vm0, %v17208_v21 }
0x100e   :  { %14046 = vmatpush1.bf16.msra.mxu0 %v16620_v58  ;;  %14076 = vmatpush3.bf16.msra.mxu1 %v16623_v5 }
0x100f   :  { %14048 = vmatprep.subr.bf16.mxu0 %v16626_v29  ;;  %14077 = vmatprep.subr.bf16.mxu1 %v17225_v19 }
0x1012   :  { %14050 = vmatpush1.bf16.msra.mxu0 %v16633_v43  ;;  %14079 = vmatpush3.bf16.msra.mxu1 %v16636_v63 }
0x1013   :  { %14052 = vmatprep.subr.bf16.mxu0 %v16639_v3  ;;  %14080 = vmatprep.subr.bf16.mxu1 %v17225_v19 }
0x1016   :  { %14054 = vmatpush1.bf16.msra.mxu0 %v16643_v33  ;;  %14082 = vmatpush3.bf16.msra.mxu1 %v16646_v44 }
0x1017   :  { %14056 = vmatprep.subr.bf16.mxu0 %v16649_v48  ;;  %14083 = vmatprep.subr.bf16.mxu1 %v17225_v19 }
0x101a   :  { %14058 = vmatpush1.bf16.msra.mxu0 %v16653_v28  ;;  %14085 = vmatpush3.bf16.msra.mxu1 %v16656_v11 }
0x101b   :  { %14060 = vmatprep.subr.bf16.mxu0 %v16659_v30  ;;  %14086 = vmatprep.subr.bf16.mxu1 %v17225_v19 }
0x101e   :  { %14062 = vmatpush1.bf16.msra.mxu0 %v16663_v9  ;;  %14088 = vmatpush3.bf16.msra.mxu1 %v16666_v32 }
0x101f   :  { %14064 = vmatprep.subr.bf16.mxu0 %v16669_v37  ;;  %14089 = vmatprep.subr.bf16.mxu1 %v17225_v19 }
0x1022   :  { %14066 = vmatpush1.bf16.msra.mxu0 %v16673_v15  ;;  %14091 = vmatpush3.bf16.msra.mxu1 %v16676_v20 }
0x1023   :  { %14068 = vmatprep.subr.bf16.mxu0 %v16679_v22  ;;  %14092 = vmatprep.subr.bf16.mxu1 %v17225_v19 }
0x1026   :  { %14070 = vmatpush1.bf16.msra.mxu0 %v16683_v42  ;;  %14094 = vmatpush3.bf16.msra.mxu1 %v16686_v2 }
0x1027   :  { %14096 = vmatprep.subr.bf16.mxu0 %v16607_v34  ;;  %14127 = vmatprep.subr.bf16.mxu1 %v17225_v19 }
0x10dc   :  { %v8650_v49 = vpop.f32.mrb[44].mxu0  ;;  %v8721_v55 = vpop.f32.mrb[94].mxu1 }
0x10dd   :  { %v14259_v16 = vadd.f32 %v8650_v49, %v16742_v61  ;;  %v8652_v36 = vpop.f32.mrb[45].mxu0  ;;  %v11600_v41 = vpop.f32.mrb[95].mxu1  ;;  %v8742_v34 = vadd.f32 %v8721_v55, %v16756_v12  ;;  %v9121_v55 = vld [vmem:[#allocation5 + $0xf60] sm:$0xff] }
0x10de   :  { %v14260_v39 = vadd.f32 %v8652_v36, %v16746_v50  ;;  %v9126_v36 = vld [vmem:[#allocation5 + $0xf98] sm:$0xff]  ;;  %v9128_v41 = vld [vmem:[#allocation5 + $0xfb0] sm:$0xff] }
0x10df   :  { %v9345_v4 = vmul.f32 -1.442695, %v14259_v16  ;;  %v9123_v16 = vld [vmem:[#allocation5 + $0xf78] sm:$0xff] }
0x10e0   :  { %v9346_v35 = vmul.f32 -1.442695, %v14260_v39  ;;  %v14163_v39 = vpack.c.bf16 %v9128_v41, %v9126_v36  ;;  %v9098_v36 = vld [vmem:[#allocation5 + $0xe58] sm:$0xff] }
0x10e1   :  { %14558 = vpow2.f32 %v9345_v4  ;;  %v14161_v4 = vpack.c.bf16 %v9123_v16, %v9121_v55  ;;  %v9096_v16 = vld [vmem:[#allocation5 + $0xe40] sm:$0xff]  ;;  %v9101_v41 = vld [vmem:[#allocation5 + $0xe78] sm:$0xff] }
0x10e2   :  { %14560 = vpow2.f32 %v9346_v35  ;;  %v9125_v35 = vld [vmem:[#allocation5 + $0xf90] sm:$0xff] }
0x10eb   :  { %v14559_v23 = vpop.eup %14558 }
0x10ec   :  { %v8732_v53 = vadd.f32 1.0, %v14559_v23  ;;  %v14561_v54 = vpop.eup %14560  ;;  %v9127_v23 = vld [vmem:[#allocation5 + $0xfa8] sm:$0xff] }
0x10ed   :  { %v8739_v7 = vadd.f32 1.0, %v14561_v54  ;;  %v9132_v54 = vld [vmem:[#allocation5 + $0xfe0] sm:$0xff] }
0x10ee   :  { %14562 = vrcp.f32 %v8732_v53  ;;  %v9130_v53 = vld [vmem:[#allocation5 + $0xfc8] sm:$0xff] }
0x10f8   :  { %v14563_v56 = vpop.eup %14562 }
0x10f9   :  { %v8743_v59 = vmul.f32 %v14563_v56, %v8742_v34  ;;  %v14165_v34 = vpack.c.bf16 %v9127_v23, %v9125_v35  ;;  %v14167_v56 = vpack.c.bf16 %v9132_v54, %v9130_v53  ;;  %v9100_v35 = vld [vmem:[#allocation5 + $0xe70] sm:$0xff]  ;;  %v9102_v23 = vld [vmem:[#allocation5 + $0xe88] sm:$0xff] }
0x10fa   :  { %v9105_v54 = vld [vmem:[#allocation5 + $0xea8] sm:$0xff] }
0x10fb   :  { %v8744_v62 = vadd.f32 %v8743_v59, %v16468_v38  ;;  %v9114_v38 = vld [vmem:[#allocation5 + $0xf08] sm:$0xff]  ;;  %v9129_v59 = vld [vmem:[#allocation5 + $0xfc0] sm:$0xff] }
0x10fd   :  { %14564 = vtanh.f32 %v8744_v62  ;;  %v9131_v62 = vld [vmem:[#allocation5 + $0xfd8] sm:$0xff] }
0x10fe   :  { %14566 = vrcp.f32 %v8739_v7  ;;  %v9134_v7 = vld [vmem:[#allocation5 + $0xff8] sm:$0xff] }
0x1107   :  { %v14565_v57 = vpop.eup %14564 }
0x1108   :  { %v8746_v13 = vsub.f32 %v8583_v24, %v14565_v57  ;;  %v14567_v0 = vpop.eup %14566  ;;  %v14157_v24 = vpack.c.bf16 %v9119_v14, %v9117_v47  ;;  %v9092_v14 = vld [vmem:[#allocation5 + $0xe10] sm:$0xff] }
0x110a   :  { %v8747_v46 = vmul.f32 %v14567_v0, %v8746_v13  ;;  %v9133_v0 = vld [vmem:[#allocation5 + $0xff0] sm:$0xff] }
0x110c   :  { %v16954_v27 = vadd.f32 %v14565_v57, %v8747_v46  ;;  %v9136_v57 = vld [vmem:[#allocation5 + $0x1010] sm:$0xff]  ;;  %v9135_v46 = vld [vmem:[#allocation5 + $0x1008] sm:$0xff] }
0x110d   :  { %v14171_v13 = vpack.c.bf16 %v9136_v57, %v9134_v7  ;;  %v9106_v7 = vld [vmem:[#allocation5 + $0xeb8] sm:$0xff] }
0x110e   :  { %8814 = vmatmul.mubr.f32.vlgmr.msra.gmra.mrb[40].mxu0 %v16954_v27  ;;  %11634 = vmatmul.mubr.f32.vlgmr.msra.gmra.mrb[96].mxu1 %v16954_v27  ;;  %v9109_v57 = vld [vmem:[#allocation5 + $0xed8] sm:$0xff] }
0x110f   :  { %14098 = vmatpush1.bf16.msra.mxu0 %v16609_v10  ;;  %14129 = vmatpush3.bf16.msra.mxu1 %v16611_v25  ;;  %v9116_v10 = vld [vmem:[#allocation5 + $0xf20] sm:$0xff] }
0x1110   :  { %14100 = vmatprep.subr.bf16.mxu0 %v16614_v51  ;;  %14130 = vmatprep.subr.bf16.mxu1 %v17225_v19  ;;  %v14151_v25 = vpack.c.bf16 %v9116_v10, %v9114_v38  ;;  %v9140_v38 = vld [vmem:[#allocation5 + $0x1040] sm:$0xff]  ;;  %v14173_v10 = vpack.c.bf16 %v9135_v46, %v9133_v0  ;;  %v9108_v46 = vld [vmem:[#allocation5 + $0xed0] sm:$0xff] }
0x1111   :  { %8978 = vmatprep.mubr.f32.mxu0 %v17208_v21  ;;  %11668 = vmatprep.mubr.msk.f32.mxu1 %vm14652_vm0, %v17208_v21 }
0x1113   :  { %14102 = vmatpush1.bf16.msra.mxu0 %v16620_v58  ;;  %14132 = vmatpush3.bf16.msra.mxu1 %v16623_v5 }
0x1114   :  { %14104 = vmatprep.subr.bf16.mxu0 %v16626_v29  ;;  %14133 = vmatprep.subr.bf16.mxu1 %v17225_v19 }
0x1117   :  { %14106 = vmatpush1.bf16.msra.mxu0 %v16633_v43  ;;  %14135 = vmatpush3.bf16.msra.mxu1 %v16636_v63 }
0x1118   :  { %14108 = vmatprep.subr.bf16.mxu0 %v16639_v3  ;;  %14136 = vmatprep.subr.bf16.mxu1 %v17225_v19 }
0x111b   :  { %14110 = vmatpush1.bf16.msra.mxu0 %v16643_v33  ;;  %14138 = vmatpush3.bf16.msra.mxu1 %v16646_v44 }
0x111c   :  { %14112 = vmatprep.subr.bf16.mxu0 %v16649_v48  ;;  %14139 = vmatprep.subr.bf16.mxu1 %v17225_v19 }
0x111f   :  { %14114 = vmatpush1.bf16.msra.mxu0 %v16653_v28  ;;  %14141 = vmatpush3.bf16.msra.mxu1 %v16656_v11 }
0x1120   :  { %14116 = vmatprep.subr.bf16.mxu0 %v16659_v30  ;;  %14142 = vmatprep.subr.bf16.mxu1 %v17225_v19 }
0x1123   :  { %14118 = vmatpush1.bf16.msra.mxu0 %v16663_v9  ;;  %14144 = vmatpush3.bf16.msra.mxu1 %v16666_v32 }
0x1124   :  { %14120 = vmatprep.subr.bf16.mxu0 %v16669_v37  ;;  %14145 = vmatprep.subr.bf16.mxu1 %v17225_v19 }
0x1127   :  { %14122 = vmatpush1.bf16.msra.mxu0 %v16673_v15  ;;  %14147 = vmatpush3.bf16.msra.mxu1 %v16676_v20  ;;  %v9113_v20 = vld [vmem:[#allocation5 + $0xf00] sm:$0xff] }
0x1128   :  { %14124 = vmatprep.subr.bf16.mxu0 %v16679_v22  ;;  %14148 = vmatprep.subr.bf16.mxu1 %v17225_v19  ;;  %v9115_v22 = vld [vmem:[#allocation5 + $0xf18] sm:$0xff] }
0x1129   :  { %v14153_v52 = vpack.c.bf16 %v9115_v22, %v9113_v20  ;;  %v9084_v20 = vld [vmem:[#allocation5 + $0xdb0] sm:$0xff]  ;;  %v9086_v22 = vld [vmem:[#allocation5 + $0xdc8] sm:$0xff] }
0x112b   :  { %14126 = vmatpush1.bf16.msra.mxu0 %v16683_v42  ;;  %14150 = vmatpush3.bf16.msra.mxu1 %v16686_v2  ;;  %v9118_v2 = vld [vmem:[#allocation5 + $0xf38] sm:$0xff] }
0x112c   :  { %14152 = vmatprep.subr.bf16.mxu0 %v14151_v25 }
0x11e1   :  { %v8815_v51 = vpop.f32.mrb[40].mxu0  ;;  %v8886_v58 = vpop.f32.mrb[96].mxu1 }
0x11e2   :  { %v14255_v5 = vadd.f32 %v8815_v51, %v16742_v61  ;;  %v8817_v29 = vpop.f32.mrb[41].mxu0  ;;  %v11635_v43 = vpop.f32.mrb[97].mxu1  ;;  %v8907_v28 = vadd.f32 %v8886_v58, %v16756_v12  ;;  %v14155_v12 = vpack.c.bf16 %v9120_v1, %v9118_v2  ;;  %v9137_v51 = vld [vmem:[#allocation5 + $0x1020] sm:$0xff]  ;;  %v9139_v58 = vld [vmem:[#allocation5 + $0x1038] sm:$0xff]  ;;  %v9089_v2 = vld [vmem:[#allocation5 + $0xde8] sm:$0xff] }
0x11e3   :  { %v14256_v3 = vadd.f32 %v8817_v29, %v16746_v50  ;;  %v9144_v29 = vld [vmem:[#allocation5 + $0x1070] sm:$0xff]  ;;  %v14177_v43 = vpack.c.bf16 %v9139_v58, %v9137_v51  ;;  %v9091_v1 = vld [vmem:[#allocation5 + $0xe00] sm:$0xff] }
0x11e4   :  { %v9347_v63 = vmul.f32 -1.442695, %v14255_v5  ;;  %v9142_v5 = vld [vmem:[#allocation5 + $0x1058] sm:$0xff]  ;;  %v14191_v45 = vpack.c.bf16 %v9091_v1, %v9089_v2 }
0x11e5   :  { %v9348_v33 = vmul.f32 -1.442695, %v14256_v3  ;;  %v9141_v3 = vld [vmem:[#allocation5 + $0x1050] sm:$0xff] }
0x11e6   :  { %14568 = vpow2.f32 %v9347_v63  ;;  %v14179_v63 = vpack.c.bf16 %v9144_v29, %v9142_v5 }
0x11e7   :  { %14570 = vpow2.f32 %v9348_v33  ;;  %v9143_v33 = vld [vmem:[#allocation5 + $0x1068] sm:$0xff] }
0x11f0   :  { %v14569_v19 = vpop.eup %14568 }
0x11f1   :  { %v8897_v44 = vadd.f32 1.0, %v14569_v19  ;;  %v14571_v48 = vpop.eup %14570  ;;  %v14181_v19 = vpack.c.bf16 %v9143_v33, %v9141_v3 }
0x11f2   :  { %v8904_v32 = vadd.f32 1.0, %v14571_v48  ;;  %v9083_v48 = vld [vmem:[#allocation5 + $0xda0] sm:$0xff] }
0x11f3   :  { %14572 = vrcp.f32 %v8897_v44  ;;  %v9081_v44 = vld [vmem:[#allocation5 + $0xd88] sm:$0xff] }
0x11fd   :  { %v14573_v11 = vpop.eup %14572 }
0x11fe   :  { %v8908_v30 = vmul.f32 %v14573_v11, %v8907_v28  ;;  %v14183_v28 = vpack.c.bf16 %v9083_v48, %v9081_v44  ;;  %v9080_v11 = vld [vmem:[#allocation5 + $0xd80] sm:$0xff] }
0x11ff   :  { %v14597_v44 = vld [vmem:[#allocation7 + $0x6] ss:$0 sm:$0xff] }
0x1200   :  { %v8909_v9 = vadd.f32 %v8908_v30, %v16565_v26  ;;  %v9124_v26 = vld [vmem:[#allocation5 + $0xf80] sm:$0xff]  ;;  %v9082_v30 = vld [vmem:[#allocation5 + $0xd98] sm:$0xff]  ;;  %14184 = vmatprep.subr.bf16.mxu1 %v14183_v28 }
0x1201   :  { %v14159_v49 = vpack.c.bf16 %v9124_v26, %v9122_v6  ;;  %v9094_v6 = vld [vmem:[#allocation5 + $0xe28] sm:$0xff] }
0x1202   :  { %14574 = vtanh.f32 %v8909_v9  ;;  %v14185_v9 = vpack.c.bf16 %v9082_v30, %v9080_v11  ;;  %v14197_v26 = vpack.c.bf16 %v9094_v6, %v9092_v14 }
0x1203   :  { %14576 = vrcp.f32 %v8904_v32  ;;  %v9085_v32 = vld [vmem:[#allocation5 + $0xdb8] sm:$0xff] }
0x120c   :  { %v14575_v37 = vpop.eup %14574 }
0x120d   :  { %v8911_v15 = vsub.f32 %v16954_v27, %v14575_v37  ;;  %v14577_v42 = vpop.eup %14576  ;;  %v9138_v27 = vld [vmem:[#allocation5 + $0x1028] sm:$0xff] }
0x120e   :  { %v14175_v25 = vpack.c.bf16 %v9140_v38, %v9138_v27  ;;  %v9110_v27 = vld [vmem:[#allocation5 + $0xee8] sm:$0xff] }
0x120f   :  { %v8912_v8 = vmul.f32 %v14577_v42, %v8911_v15  ;;  %v14189_v42 = vpack.c.bf16 %v9086_v22, %v9084_v20  ;;  %v14213_v38 = vpack.c.bf16 %v9110_v27, %v9108_v46 }
0x1211   :  { %v16996_v18 = vadd.f32 %v14575_v37, %v8912_v8  ;;  %v9087_v37 = vld [vmem:[#allocation5 + $0xdd0] sm:$0xff] }
0x1212   :  { %v14187_v15 = vpack.c.bf16 %v9087_v37, %v9085_v32 }
0x1213   :  { %8979 = vmatmul.mubr.f32.vlgmr.msra.gmra.mrb[34].mxu0 %v16996_v18  ;;  %11669 = vmatmul.mubr.f32.vlgmr.msra.gmra.mrb[98].mxu1 %v16996_v18 }
0x1214   :  { %14154 = vmatpush1.bf16.msra.mxu0 %v14153_v52  ;;  %9209 = vmatprep.mubr.f32.mxu0 %v17208_v21  ;;  %v9093_v52 = vld [vmem:[#allocation5 + $0xe18] sm:$0xff] }
0x1215   :  { %14156 = vmatprep.subr.bf16.mxu0 %v14155_v12  ;;  %9279 = vmatprep.mubr.f32.mxu1 %v17208_v21  ;;  %v14169_v21 = vpack.c.bf16 %v9131_v62, %v9129_v59  ;;  %v9095_v12 = vld [vmem:[#allocation5 + $0xe30] sm:$0xff]  ;;  %v9104_v62 = vld [vmem:[#allocation5 + $0xea0] sm:$0xff] }
0x1216   :  { %14186 = vmatpush1.bf16.msra.mxu1 %v14185_v9  ;;  %v14195_v47 = vpack.c.bf16 %v9095_v12, %v9093_v52 }
0x1217   :  { %14188 = vmatprep.subr.bf16.mxu1 %v14187_v15 }
0x1218   :  { %14158 = vmatpush1.bf16.msra.mxu0 %v14157_v24  ;;  %v9097_v24 = vld [vmem:[#allocation5 + $0xe48] sm:$0xff] }
0x1219   :  { %14160 = vmatprep.subr.bf16.mxu0 %v14159_v49  ;;  %v9099_v49 = vld [vmem:[#allocation5 + $0xe60] sm:$0xff] }
0x121a   :  { %14190 = vmatpush1.bf16.msra.mxu1 %v14189_v42  ;;  %v14199_v55 = vpack.c.bf16 %v9099_v49, %v9097_v24  ;;  %v9286_v42 = vld [vmem:[#allocation7 + $0x18] ss:$8 sm:$0x7] }
0x121b   :  { %14192 = vmatprep.subr.bf16.mxu1 %v14191_v45  ;;  %v9291_v2 = vrot.slane %v9286_v42, %v17541_v40 }
0x121c   :  { %14162 = vmatpush1.bf16.msra.mxu0 %v14161_v4  ;;  %v14201_v4 = vpack.c.bf16 %v9098_v36, %v9096_v16 }
0x121d   :  { %14164 = vmatprep.subr.bf16.mxu0 %v14163_v39  ;;  %v9103_v39 = vld [vmem:[#allocation5 + $0xe90] sm:$0xff] }
0x121e   :  { %v14203_v53 = vpack.c.bf16 %v9103_v39, %v9101_v41 }
0x1220   :  { %14166 = vmatpush1.bf16.msra.mxu0 %v14165_v34  ;;  %v9107_v34 = vld [vmem:[#allocation5 + $0xec0] sm:$0xff] }
0x1221   :  { %14168 = vmatprep.subr.bf16.mxu0 %v14167_v56  ;;  %v14205_v56 = vpack.c.bf16 %v9102_v23, %v9100_v35  ;;  %v14207_v59 = vpack.c.bf16 %v9107_v34, %v9105_v54 }
0x1224   :  { %14170 = vmatpush1.bf16.msra.mxu0 %v14169_v21  ;;  %v9111_v21 = vld [vmem:[#allocation5 + $0xef0] sm:$0xff] }
0x1225   :  { %14172 = vmatprep.subr.bf16.mxu0 %v14171_v13  ;;  %v14209_v13 = vpack.c.bf16 %v9106_v7, %v9104_v62  ;;  %v14211_v0 = vpack.c.bf16 %v9111_v21, %v9109_v57 }
0x1228   :  { %14174 = vmatpush1.bf16.msra.mxu0 %v14173_v10 }
0x1229   :  { %14176 = vmatprep.subr.bf16.mxu0 %v14175_v25 }
0x122c   :  { %14178 = vmatpush1.bf16.msra.mxu0 %v14177_v43 }
0x122d   :  { %14180 = vmatprep.subr.bf16.mxu0 %v14179_v63 }
0x1230   :  { %14182 = vmatpush1.bf16.msra.mxu0 %v14181_v19 }
0x1233   :  { %9210 = vmatmul.mubr.f32.vlgmr.msra.gmra.mrb[50].mxu0 %v7708_v17  ;;  %v9090_v17 = vld [vmem:[#allocation5 + $0xdf8] sm:$0xff] }
0x1234   :  { %v14193_v8 = vpack.c.bf16 %v9090_v17, %v9088_v60 }
0x1236   :  { %14194 = vmatpush1.bf16.msra.mxu1 %v14193_v8 }
0x1237   :  { %14196 = vmatprep.subr.bf16.mxu1 %v14195_v47 }
0x123a   :  { %14198 = vmatpush1.bf16.msra.mxu1 %v14197_v26 }
0x123b   :  { %14200 = vmatprep.subr.bf16.mxu1 %v14199_v55 }
0x123e   :  { %14202 = vmatpush1.bf16.msra.mxu1 %v14201_v4 }
0x123f   :  { %14204 = vmatprep.subr.bf16.mxu1 %v14203_v53 }
0x1242   :  { %14206 = vmatpush1.bf16.msra.mxu1 %v14205_v56 }
0x1243   :  { %14208 = vmatprep.subr.bf16.mxu1 %v14207_v59 }
0x1246   :  { %14210 = vmatpush1.bf16.msra.mxu1 %v14209_v13 }
0x1247   :  { %14212 = vmatprep.subr.bf16.mxu1 %v14211_v0 }
0x124a   :  { %14214 = vmatpush1.bf16.msra.mxu1 %v14213_v38 }
0x12e6   :  { %v8980_v10 = vpop.f32.mrb[34].mxu0  ;;  %v9051_v25 = vpop.f32.mrb[98].mxu1 }
0x12e7   :  { %v14249_v51 = vadd.f32 %v8980_v10, %v16742_v61  ;;  %v8982_v58 = vpop.f32.mrb[35].mxu0  ;;  %v11670_v5 = vpop.f32.mrb[99].mxu1  ;;  %v9072_v48 = vadd.f32 %v14597_v44, %v9051_v25 }
0x12e8   :  { %v14250_v43 = vadd.f32 %v8982_v58, %v16746_v50 }
0x12e9   :  { %v9349_v29 = vmul.f32 -1.442695, %v14249_v51 }
0x12ea   :  { %v9350_v63 = vmul.f32 -1.442695, %v14250_v43 }
0x12eb   :  { %14578 = vpow2.f32 %v9349_v29 }
0x12ec   :  { %14580 = vpow2.f32 %v9350_v63 }
0x12f5   :  { %v14579_v3 = vpop.eup %14578 }
0x12f6   :  { %v9062_v33 = vadd.f32 1.0, %v14579_v3  ;;  %v14581_v19 = vpop.eup %14580 }
0x12f7   :  { %v9069_v9 = vadd.f32 1.0, %v14581_v19 }
0x12f8   :  { %14582 = vrcp.f32 %v9062_v33 }
0x1302   :  { %v14583_v28 = vpop.eup %14582 }
0x1303   :  { %v9073_v11 = vmul.f32 %v14583_v28, %v9072_v48 }
0x1305   :  { %v9074_v30 = vadd.f32 %v9073_v11, %v16733_v31 }
0x1306   :  { %v9211_v61 = vpop.f32.mrb[50].mxu0 }
0x1307   :  { %14584 = vtanh.f32 %v9074_v30  ;;  %v9213_v32 = vpop.f32.mrb[51].mxu0 }
0x1308   :  { %14586 = vrcp.f32 %v9069_v9 }
0x1311   :  { %v14585_v37 = vpop.eup %14584 }
0x1312   :  { %v9076_v50 = vsub.f32 %v16996_v18, %v14585_v37  ;;  %v14587_v15 = vpop.eup %14586 }
0x1314   :  { %v9077_v20 = vmul.f32 %v14587_v15, %v9076_v50 }
0x1316   :  { %v9078_v22 = vadd.f32 %v14585_v37, %v9077_v20 }
0x1318   :  { %9280 = vmatmul.mubr.f32.vlgmr.msra.gmra.mrb[100].mxu1 %v9078_v22 }
0x13eb   :  { %v9281_v1 = vpop.f32.mrb[100].mxu1 }
0x13ec   :  { %v9282_v45 = vadd.f32 %v9281_v1, %v9211_v61  ;;  %v9283_v60 = vpop.f32.mrb[101].mxu1 }
0x13ee   :  { %v9293_v17 = vadd.f32 %v9291_v2, %v9282_v45 }
0x13f0   :  { %9294 = vst [vmem:[%s17016_s3] sm:$0xff] %v9293_v17 }
0x13f1   :  { %9299 = vsyncpa [#allocation6], 1 }
0x13f2   :  { %9300 = vsyncpa [#allocation8], 1 }

</bundles_post_ra>
